<compile_context>
chip_gen: v7x
topology: tpu7x:2x2x1
jax: 0.10.0
libtpu: 0.0.40
codegen_flags: <defaults>
</compile_context>

<pallas_src>
import numpy as np
import jax
import jax.numpy as jnp
from jax.experimental import pallas as pl
from jax.experimental.pallas import tpu as pltpu

_BN_EPS = 1e-5
_B = 8          # samples per grid step


# ----------------------------------------------------------------------------
# Fused kernel: one grid step == _B samples, everything stays in VMEM/vregs.
# Row pitch is 20 rows/sample throughout (pool1 output height).
# ----------------------------------------------------------------------------
def _simple_net_kernel(x_ref, w1_ref, b1_ref, w2_ref, b2_ref, w3_ref, b3_ref,
                       fc1w_ref, fc1b_ref, fc2w_ref, fc2b_ref, o_ref,
                       p1s_ref, y2s_ref, t2s_ref):
    f32, bf16 = jnp.float32, jnp.bfloat16
    B = o_ref.shape[0]
    R = 20 * B                                   # rows per step (pitch 20/sample)

    # --- Conv1(1->10,5x5) + BN1 folded; pool1 window folded into lanes -----
    # x_ref: (R, 448) bf16 im2row, w1: (448, 2304) bf16.
    # Output lane 768*u + 256*m + 10*j + c = conv1 raw output at
    # (h = 3i+u, w = 3j+m, channel c); u/m are the MaxPool(3,3) window phases.
    y1 = jnp.dot(x_ref[...], w1_ref[...], preferred_element_type=f32)   # (R, 2304)

    # MaxPool2d(3, stride 3): 8 element-wise maxima of 128-aligned lane blocks.
    p1 = y1[:, 0:200]
    for u in range(3):
        for m in range(3):
            if u == 0 and m == 0:
                continue
            off = 768 * u + 256 * m
            p1 = jnp.maximum(p1, y1[:, off:off + 200])
    # Per-channel bias (+BN shift) and ReLU commute with the max -> apply once.
    p1 = jnp.maximum(p1 + b1_ref[...], 0.0)      # (R, 200), lane = 10*j + c

    # TODO(synk): nn.Dropout(p=0.5) is identity here (eval-mode semantics);
    # training-mode random masking is not implemented.

    # --- Conv2(10->10,5x5) + BN2 + ReLU: 5 accumulating shift-and-matmuls ---
    p1s_ref[0:R, :] = p1
    p1s_ref[R:R + 8, :] = jnp.zeros((8, 200), f32)      # zero tail for the dh shifts
    acc = None
    for dh in range(5):
        slab = p1s_ref[dh:dh + R, :].astype(bf16)       # (R, 200)
        d = jnp.dot(slab, w2_ref[dh], preferred_element_type=f32)
        acc = d if acc is None else acc + d
    y2 = jnp.maximum(acc + b2_ref[...], 0.0)             # (R, 160): valid rows 0..15 / 20

    # --- Conv3(10->15,5x5) + ReLU; pool2 W-window phases folded into lanes --
    y2s_ref[0:R, :] = y2
    y2s_ref[R:R + 8, :] = jnp.zeros((8, 160), f32)
    acc = None
    for dh in range(5):
        slab = y2s_ref[dh:dh + R, :].astype(bf16)        # (R, 160)
        d = jnp.dot(slab, w3_ref[dh], preferred_element_type=f32)
        acc = d if acc is None else acc + d               # (R, 384)
    # MaxPool2d(3, stride 2), W direction: lane blocks at 0 / 128 / 256.
    t2 = jnp.maximum(jnp.maximum(acc[:, 0:75], acc[:, 128:203]), acc[:, 256:331])
    t2 = jnp.maximum(t2 + b3_ref[...], 0.0)               # (R, 75): valid rows 0..11 / 20
    t2s_ref[...] = t2

    # --- pool2 H direction (win 3, stride 2) + Linear(375,100)+ReLU ---------
    # fc1's per-row weight already carries the NCHW flatten permutation.
    h = None
    for r in range(5):
        win = t2s_ref[pl.ds(2 * r, B, 20), :]             # row 2r of every sample
        win = jnp.maximum(win, t2s_ref[pl.ds(2 * r + 1, B, 20), :])
        win = jnp.maximum(win, t2s_ref[pl.ds(2 * r + 2, B, 20), :])   # (B, 75)
        d = jnp.dot(win.astype(bf16), fc1w_ref[r], preferred_element_type=f32)
        h = d if h is None else h + d
    h = jnp.maximum(h + fc1b_ref[...], 0.0)               # (B, 100)

    # --- Linear(100,15) ------------------------------------------------------
    out = jnp.dot(h.astype(bf16), fc2w_ref[...], preferred_element_type=f32)
    o_ref[...] = out + fc2b_ref[...]                      # (B, 15)


# ----------------------------------------------------------------------------
# One-time host-side weight folding (NumPy; not in the hot path).
# ----------------------------------------------------------------------------
def prepare_params(p):
    k1 = np.asarray(p["w1"], np.float32)      # (kh, kw, cin, cout)
    k2 = np.asarray(p["w2"], np.float32)
    k3 = np.asarray(p["w3"], np.float32)
    b1 = np.asarray(p["b1"], np.float32)
    b2 = np.asarray(p["b2"], np.float32)
    b3 = np.asarray(p["b3"], np.float32)
    fc1w = np.asarray(p["fc1_w"], np.float32)

    def bn_fold(name):
        g = np.asarray(p[f"{name}_gamma"], np.float32)
        beta = np.asarray(p[f"{name}_beta"], np.float32)
        mu = np.asarray(p[f"{name}_mean"], np.float32)
        var = np.asarray(p[f"{name}_var"], np.float32)
        s = g / np.sqrt(var + _BN_EPS)
        return s, beta - mu * s

    s1, sh1 = bn_fold("bn1")
    s2, sh2 = bn_fold("bn2")

    # conv1 (+ pool1): rows e*64 + w_in (im2row, e = u + dh in 0..6),
    # cols 768*u + 256*m + 10*j + c  (output h = 3i+u, w = 3j+m).
    w1f = np.zeros((448, 2304), np.float32)
    for dh in range(5):
        for dw in range(5):
            for u in range(3):
                e = u + dh
                for m in range(3):
                    for j in range(20):
                        row = e * 64 + 3 * j + m + dw
                        col = 768 * u + 256 * m + 10 * j
                        w1f[row, col:col + 10] = k1[dh, dw, 0, :] * s1
    b1f = np.tile(b1 * s1 + sh1, 20).reshape(1, 200)

    # conv2: banded over the dense pooled layout (input lane = 10*j + ci).
    w2f = np.zeros((5, 200, 160), np.float32)
    for dh in range(5):
        for dw in range(5):
            for w2 in range(16):
                jw = w2 + dw
                w2f[dh, 10 * jw:10 * jw + 10, 10 * w2:10 * w2 + 10] = k2[dh, dw] * s2[None, :]
    b2f = np.tile(b2 * s2 + sh2, 16).reshape(1, 160)

    # conv3: output lane 128*m + 15*j2 + co = output at (w = 2*j2 + m, ch co);
    # m is MaxPool(3, stride 2)'s W-window phase.
    w3f = np.zeros((5, 160, 384), np.float32)
    for dh in range(5):
        for dw in range(5):
            for j2 in range(5):
                for m in range(3):
                    w_in = 2 * j2 + m + dw
                    col = 128 * m + 15 * j2
                    w3f[dh, 10 * w_in:10 * w_in + 10, col:col + 15] = k3[dh, dw]
    b3f = np.tile(b3, 5).reshape(1, 75)

    # fc1: reorder rows from torch NCHW flatten (c*25 + h*5 + w) to the
    # kernel's (matmul step r = h, lane = 15*w + c) layout.
    fc1f = np.zeros((5, 75, 100), np.float32)
    for r in range(5):
        for w in range(5):
            for c in range(15):
                fc1f[r, 15 * w + c, :] = fc1w[c * 25 + r * 5 + w, :]

    return {
        "w1": jnp.asarray(w1f, jnp.bfloat16), "b1": jnp.asarray(b1f),
        "w2": jnp.asarray(w2f, jnp.bfloat16), "b2": jnp.asarray(b2f),
        "w3": jnp.asarray(w3f, jnp.bfloat16), "b3": jnp.asarray(b3f),
        "fc1_w": jnp.asarray(fc1f, jnp.bfloat16),
        "fc1_b": jnp.asarray(np.asarray(p["fc1_b"], np.float32).reshape(1, 100)),
        "fc2_w": jnp.asarray(np.asarray(p["fc2_w"], np.float32), jnp.bfloat16),
        "fc2_b": jnp.asarray(np.asarray(p["fc2_b"], np.float32).reshape(1, 15)),
    }


def init_params(key):
    """Torch-style uniform(+-1/sqrt(fan_in)) init; fresh eval-mode BN stats."""
    def uniform(k, shape, fan_in):
        b = 1.0 / float(np.sqrt(fan_in))
        return jax.random.uniform(k, shape, jnp.float32, -b, b)

    keys = jax.random.split(key, 10)
    p = {
        "w1": uniform(keys[0], (5, 5, 1, 10), 25), "b1": uniform(keys[1], (10,), 25),
        "w2": uniform(keys[2], (5, 5, 10, 10), 250), "b2": uniform(keys[3], (10,), 250),
        "w3": uniform(keys[4], (5, 5, 10, 15), 250), "b3": uniform(keys[5], (15,), 250),
        "fc1_w": uniform(keys[6], (375, 100), 375), "fc1_b": uniform(keys[7], (100,), 375),
        "fc2_w": uniform(keys[8], (100, 15), 100), "fc2_b": uniform(keys[9], (15,), 100),
    }
    for i in (1, 2):  # nn.init.constant_(weight,1)/(bias,0); fresh running stats
        p[f"bn{i}_gamma"] = jnp.ones((10,), jnp.float32)
        p[f"bn{i}_beta"] = jnp.zeros((10,), jnp.float32)
        p[f"bn{i}_mean"] = jnp.zeros((10,), jnp.float32)
        p[f"bn{i}_var"] = jnp.ones((10,), jnp.float32)
    return p


# ----------------------------------------------------------------------------
# Forward pass: one pallas_call, B samples per grid step.
# ----------------------------------------------------------------------------
def simple_net_final_forward(fused, x_nchw, block_b=_B):
    n, c, hh, ww = x_nchw.shape
    assert (c, hh, ww) == (1, 64, 64), "the fc layers require 1x64x64 inputs"
    n_pad = ((n + block_b - 1) // block_b) * block_b
    x = x_nchw.reshape(n, 64, 64).astype(jnp.float32)
    if n_pad != n:
        x = jnp.concatenate([x, jnp.zeros((n_pad - n, 64, 64), jnp.float32)], axis=0)

    # H-direction im2row (folds conv1's kh loop AND pool1's H window into K):
    # per sample, row i (0..19) holds x[3*i + e, :] at cols e*64 .. e*64+63.
    xim = jnp.concatenate([x[:, e:e + 58:3, :] for e in range(7)], axis=-1)
    xim = xim.reshape(n_pad * 20, 448).astype(jnp.bfloat16)

    rows = 20 * block_b
    out = pl.pallas_call(
        _simple_net_kernel,
        out_shape=jax.ShapeDtypeStruct((n_pad, 15), jnp.float32),
        grid=(n_pad // block_b,),
        in_specs=[
            pl.BlockSpec((rows, 448), lambda i: (i, 0)),        # im2row input
            pl.BlockSpec((448, 2304), lambda i: (0, 0)),        # conv1 (+BN1, +pool1)
            pl.BlockSpec((1, 200), lambda i: (0, 0)),
            pl.BlockSpec((5, 200, 160), lambda i: (0, 0, 0)),   # conv2 (+BN2)
            pl.BlockSpec((1, 160), lambda i: (0, 0)),
            pl.BlockSpec((5, 160, 384), lambda i: (0, 0, 0)),   # conv3 (+pool2 W phases)
            pl.BlockSpec((1, 75), lambda i: (0, 0)),
            pl.BlockSpec((5, 75, 100), lambda i: (0, 0, 0)),    # fc1 (+flatten perm)
            pl.BlockSpec((1, 100), lambda i: (0, 0)),
            pl.BlockSpec((100, 15), lambda i: (0, 0)),          # fc2
            pl.BlockSpec((1, 15), lambda i: (0, 0)),
        ],
        out_specs=pl.BlockSpec((block_b, 15), lambda i: (i, 0)),
        scratch_shapes=[
            pltpu.VMEM((rows + 8, 200), jnp.float32),   # p1 (pool1 out) + shift tail
            pltpu.VMEM((rows + 8, 160), jnp.float32),   # y2 (conv2 out) + shift tail
            pltpu.VMEM((rows, 75), jnp.float32),        # conv3 out, W-pooled
        ],
        compiler_params=pltpu.CompilerParams(
            dimension_semantics=("parallel",),
            vmem_limit_bytes=32 * 1024 * 1024),
    )(xim, fused["w1"], fused["b1"], fused["w2"], fused["b2"],
      fused["w3"], fused["b3"], fused["fc1_w"], fused["fc1_b"],
      fused["fc2_w"], fused["fc2_b"])
    return out[:n]


# ----------------------------------------------------------------------------
# Pure-JAX reference (f32, XLA) for a correctness self-check.
# ----------------------------------------------------------------------------
def reference_forward(p, x):
    dn = ("NCHW", "HWIO", "NCHW")

    def conv(z, w, b):
        y = jax.lax.conv_general_dilated(z, w, (1, 1), "VALID", dimension_numbers=dn)
        return y + b.reshape(1, -1, 1, 1)

    def bn(z, name):
        s = p[f"{name}_gamma"] / jnp.sqrt(p[f"{name}_var"] + _BN_EPS)
        sh = p[f"{name}_beta"] - p[f"{name}_mean"] * s
        return z * s.reshape(1, -1, 1, 1) + sh.reshape(1, -1, 1, 1)

    def maxpool(z, k, s):
        return jax.lax.reduce_window(z, -jnp.inf, jax.lax.max,
                                     (1, 1, k, k), (1, 1, s, s), "VALID")

    y = jax.nn.relu(bn(conv(x, p["w1"], p["b1"]), "bn1"))
    y = maxpool(y, 3, 3)
    y = jax.nn.relu(bn(conv(y, p["w2"], p["b2"]), "bn2"))
    y = jax.nn.relu(conv(y, p["w3"], p["b3"]))
    y = maxpool(y, 3, 2)
    y = y.reshape(y.shape[0], -1)
    y = jax.nn.relu(y @ p["fc1_w"] + p["fc1_b"])
    return y @ p["fc2_w"] + p["fc2_b"]


if __name__ == "__main__":
    key = jax.random.PRNGKey(0)
    pkey, xkey = jax.random.split(key)
    params = init_params(pkey)
    fused = prepare_params(params)            # one-time folding, outside the hot path
    # Input must be (N, 1, 64, 64) so the conv stack yields 15*5*5 = 375
    # features; N=16 -> 2 grid steps of 8 samples each.
    x = jax.random.normal(xkey, (16, 1, 64, 64), jnp.float32)

    fwd = jax.jit(simple_net_final_forward)
    out = jax.block_until_ready(fwd(fused, x))
    assert out.shape == (16, 15) and out.dtype == jnp.float32

    ref = jax.block_until_ready(jax.jit(reference_forward)(params, x))
    np.testing.assert_allclose(np.asarray(out), np.asarray(ref), rtol=1e-1, atol=5e-2)
    print("KERNEL_OK")
</pallas_src>

<mosaic_0001>
module attributes {stable_mosaic.version = 11 : i64} {
  func.func @_simple_net_kernel(%arg0: i32, %arg1: memref<160x448xbf16, #tpu.memory_space<vmem>>, %arg2: memref<448x2304xbf16, #tpu.memory_space<vmem>>, %arg3: memref<1x200xf32, #tpu.memory_space<vmem>>, %arg4: memref<5x200x160xbf16, #tpu.memory_space<vmem>>, %arg5: memref<1x160xf32, #tpu.memory_space<vmem>>, %arg6: memref<5x160x384xbf16, #tpu.memory_space<vmem>>, %arg7: memref<1x75xf32, #tpu.memory_space<vmem>>, %arg8: memref<5x75x100xbf16, #tpu.memory_space<vmem>>, %arg9: memref<1x100xf32, #tpu.memory_space<vmem>>, %arg10: memref<100x15xbf16, #tpu.memory_space<vmem>>, %arg11: memref<1x15xf32, #tpu.memory_space<vmem>>, %arg12: memref<8x15xf32, #tpu.memory_space<vmem>>, %arg13: memref<168x200xf32, #tpu.memory_space<vmem>>, %arg14: memref<168x160xf32, #tpu.memory_space<vmem>>, %arg15: memref<160x75xf32, #tpu.memory_space<vmem>>) attributes {dimension_semantics = [#tpu.dimension_semantics<parallel>], iteration_bounds = array<i64: 2>, scalar_prefetch = 0 : i64, scratch_operands = 3 : i64, tpu.core_type = #tpu.core_type<tc>, window_params = [{transform_indices = @transform_0, window_bounds = array<i64: 160, 448>}, {pipeline_mode = #tpu.pipeline_mode<synchronous>, transform_indices = @transform_1, window_bounds = array<i64: 448, 2304>}, {pipeline_mode = #tpu.pipeline_mode<synchronous>, transform_indices = @transform_2, window_bounds = array<i64: 1, 200>}, {pipeline_mode = #tpu.pipeline_mode<synchronous>, transform_indices = @transform_3, window_bounds = array<i64: 5, 200, 160>}, {pipeline_mode = #tpu.pipeline_mode<synchronous>, transform_indices = @transform_4, window_bounds = array<i64: 1, 160>}, {pipeline_mode = #tpu.pipeline_mode<synchronous>, transform_indices = @transform_5, window_bounds = array<i64: 5, 160, 384>}, {pipeline_mode = #tpu.pipeline_mode<synchronous>, transform_indices = @transform_6, window_bounds = array<i64: 1, 75>}, {pipeline_mode = #tpu.pipeline_mode<synchronous>, transform_indices = @transform_7, window_bounds = array<i64: 5, 75, 100>}, {pipeline_mode = #tpu.pipeline_mode<synchronous>, transform_indices = @transform_8, window_bounds = array<i64: 1, 100>}, {pipeline_mode = #tpu.pipeline_mode<synchronous>, transform_indices = @transform_9, window_bounds = array<i64: 100, 15>}, {pipeline_mode = #tpu.pipeline_mode<synchronous>, transform_indices = @transform_10, window_bounds = array<i64: 1, 15>}, {transform_indices = @transform_11, window_bounds = array<i64: 8, 15>}]} {
    %c0 = arith.constant 0 : index
    %c0_0 = arith.constant 0 : index
    %0 = vector.load %arg1[%c0, %c0_0] : memref<160x448xbf16, #tpu.memory_space<vmem>>, vector<160x448xbf16>
    %c0_1 = arith.constant 0 : index
    %c0_2 = arith.constant 0 : index
    %1 = vector.load %arg2[%c0_1, %c0_2] : memref<448x2304xbf16, #tpu.memory_space<vmem>>, vector<448x2304xbf16>
    %cst = arith.constant dense<0.000000e+00> : vector<160x2304xf32>
    %2 = tpu.matmul %0, %1, %cst {dimension_numbers = #tpu.dot_dimension_numbers<[1], [0], [0], [1], [0, 0, 1, 1], [], []>} : vector<160x448xbf16>, vector<448x2304xbf16>, vector<160x2304xf32> -> vector<160x2304xf32>
    %3 = vector.extract_strided_slice %2 {offsets = [0, 0], sizes = [160, 200], strides = [1, 1]} : vector<160x2304xf32> to vector<160x200xf32>
    %4 = vector.extract_strided_slice %2 {offsets = [0, 256], sizes = [160, 200], strides = [1, 1]} : vector<160x2304xf32> to vector<160x200xf32>
    %5 = arith.maximumf %3, %4 : vector<160x200xf32>
    %6 = vector.extract_strided_slice %2 {offsets = [0, 512], sizes = [160, 200], strides = [1, 1]} : vector<160x2304xf32> to vector<160x200xf32>
    %7 = arith.maximumf %5, %6 : vector<160x200xf32>
    %8 = vector.extract_strided_slice %2 {offsets = [0, 768], sizes = [160, 200], strides = [1, 1]} : vector<160x2304xf32> to vector<160x200xf32>
    %9 = arith.maximumf %7, %8 : vector<160x200xf32>
    %10 = vector.extract_strided_slice %2 {offsets = [0, 1024], sizes = [160, 200], strides = [1, 1]} : vector<160x2304xf32> to vector<160x200xf32>
    %11 = arith.maximumf %9, %10 : vector<160x200xf32>
    %12 = vector.extract_strided_slice %2 {offsets = [0, 1280], sizes = [160, 200], strides = [1, 1]} : vector<160x2304xf32> to vector<160x200xf32>
    %13 = arith.maximumf %11, %12 : vector<160x200xf32>
    %14 = vector.extract_strided_slice %2 {offsets = [0, 1536], sizes = [160, 200], strides = [1, 1]} : vector<160x2304xf32> to vector<160x200xf32>
    %15 = arith.maximumf %13, %14 : vector<160x200xf32>
    %16 = vector.extract_strided_slice %2 {offsets = [0, 1792], sizes = [160, 200], strides = [1, 1]} : vector<160x2304xf32> to vector<160x200xf32>
    %17 = arith.maximumf %15, %16 : vector<160x200xf32>
    %18 = vector.extract_strided_slice %2 {offsets = [0, 2048], sizes = [160, 200], strides = [1, 1]} : vector<160x2304xf32> to vector<160x200xf32>
    %19 = arith.maximumf %17, %18 : vector<160x200xf32>
    %c0_3 = arith.constant 0 : index
    %c0_4 = arith.constant 0 : index
    %20 = vector.load %arg3[%c0_3, %c0_4] : memref<1x200xf32, #tpu.memory_space<vmem>>, vector<1x200xf32>
    %21 = vector.broadcast %20 : vector<1x200xf32> to vector<160x200xf32>
    %22 = arith.addf %19, %21 : vector<160x200xf32>
    %cst_5 = arith.constant 0.000000e+00 : f32
    %23 = vector.broadcast %cst_5 : f32 to vector<160x200xf32>
    %24 = arith.maximumf %22, %23 : vector<160x200xf32>
    %c0_6 = arith.constant 0 : index
    %c0_7 = arith.constant 0 : index
    %25 = vector.load %arg13[%c0_6, %c0_7] : memref<168x200xf32, #tpu.memory_space<vmem>>, vector<160x200xf32>
    tpu.vector_store %arg13[%c0_6, %c0_7], %24 {strides = array<i32>} : memref<168x200xf32, #tpu.memory_space<vmem>>, vector<160x200xf32>,
    %cst_8 = arith.constant 0.000000e+00 : f32
    %26 = vector.broadcast %cst_8 : f32 to vector<8x200xf32>
    %c160 = arith.constant 160 : index
    %c0_9 = arith.constant 0 : index
    %27 = vector.load %arg13[%c160, %c0_9] : memref<168x200xf32, #tpu.memory_space<vmem>>, vector<8x200xf32>
    tpu.vector_store %arg13[%c160, %c0_9], %26 {strides = array<i32>} : memref<168x200xf32, #tpu.memory_space<vmem>>, vector<8x200xf32>,
    %c0_10 = arith.constant 0 : index
    %c0_11 = arith.constant 0 : index
    %28 = vector.load %arg13[%c0_10, %c0_11] : memref<168x200xf32, #tpu.memory_space<vmem>>, vector<160x200xf32>
    %29 = arith.truncf %28 : vector<160x200xf32> to vector<160x200xbf16>
    %c0_12 = arith.constant 0 : index
    %c0_13 = arith.constant 0 : index
    %c0_14 = arith.constant 0 : index
    %30 = vector.load %arg4[%c0_12, %c0_13, %c0_14] : memref<5x200x160xbf16, #tpu.memory_space<vmem>>, vector<1x200x160xbf16>
    %31 = vector.shape_cast %30 : vector<1x200x160xbf16> to vector<200x160xbf16>
    %cst_15 = arith.constant dense<0.000000e+00> : vector<160x160xf32>
    %32 = tpu.matmul %29, %31, %cst_15 {dimension_numbers = #tpu.dot_dimension_numbers<[1], [0], [0], [1], [0, 0, 1, 1], [], []>} : vector<160x200xbf16>, vector<200x160xbf16>, vector<160x160xf32> -> vector<160x160xf32>
    %c1 = arith.constant 1 : index
    %c0_16 = arith.constant 0 : index
    %33 = vector.load %arg13[%c1, %c0_16] : memref<168x200xf32, #tpu.memory_space<vmem>>, vector<160x200xf32>
    %34 = arith.truncf %33 : vector<160x200xf32> to vector<160x200xbf16>
    %c1_17 = arith.constant 1 : index
    %c0_18 = arith.constant 0 : index
    %c0_19 = arith.constant 0 : index
    %35 = vector.load %arg4[%c1_17, %c0_18, %c0_19] : memref<5x200x160xbf16, #tpu.memory_space<vmem>>, vector<1x200x160xbf16>
    %36 = vector.shape_cast %35 : vector<1x200x160xbf16> to vector<200x160xbf16>
    %cst_20 = arith.constant dense<0.000000e+00> : vector<160x160xf32>
    %37 = tpu.matmul %34, %36, %cst_20 {dimension_numbers = #tpu.dot_dimension_numbers<[1], [0], [0], [1], [0, 0, 1, 1], [], []>} : vector<160x200xbf16>, vector<200x160xbf16>, vector<160x160xf32> -> vector<160x160xf32>
    %38 = arith.addf %32, %37 : vector<160x160xf32>
    %c2 = arith.constant 2 : index
    %c0_21 = arith.constant 0 : index
    %39 = vector.load %arg13[%c2, %c0_21] : memref<168x200xf32, #tpu.memory_space<vmem>>, vector<160x200xf32>
    %40 = arith.truncf %39 : vector<160x200xf32> to vector<160x200xbf16>
    %c2_22 = arith.constant 2 : index
    %c0_23 = arith.constant 0 : index
    %c0_24 = arith.constant 0 : index
    %41 = vector.load %arg4[%c2_22, %c0_23, %c0_24] : memref<5x200x160xbf16, #tpu.memory_space<vmem>>, vector<1x200x160xbf16>
    %42 = vector.shape_cast %41 : vector<1x200x160xbf16> to vector<200x160xbf16>
    %cst_25 = arith.constant dense<0.000000e+00> : vector<160x160xf32>
    %43 = tpu.matmul %40, %42, %cst_25 {dimension_numbers = #tpu.dot_dimension_numbers<[1], [0], [0], [1], [0, 0, 1, 1], [], []>} : vector<160x200xbf16>, vector<200x160xbf16>, vector<160x160xf32> -> vector<160x160xf32>
    %44 = arith.addf %38, %43 : vector<160x160xf32>
    %c3 = arith.constant 3 : index
    %c0_26 = arith.constant 0 : index
    %45 = vector.load %arg13[%c3, %c0_26] : memref<168x200xf32, #tpu.memory_space<vmem>>, vector<160x200xf32>
    %46 = arith.truncf %45 : vector<160x200xf32> to vector<160x200xbf16>
    %c3_27 = arith.constant 3 : index
    %c0_28 = arith.constant 0 : index
    %c0_29 = arith.constant 0 : index
    %47 = vector.load %arg4[%c3_27, %c0_28, %c0_29] : memref<5x200x160xbf16, #tpu.memory_space<vmem>>, vector<1x200x160xbf16>
    %48 = vector.shape_cast %47 : vector<1x200x160xbf16> to vector<200x160xbf16>
    %cst_30 = arith.constant dense<0.000000e+00> : vector<160x160xf32>
    %49 = tpu.matmul %46, %48, %cst_30 {dimension_numbers = #tpu.dot_dimension_numbers<[1], [0], [0], [1], [0, 0, 1, 1], [], []>} : vector<160x200xbf16>, vector<200x160xbf16>, vector<160x160xf32> -> vector<160x160xf32>
    %50 = arith.addf %44, %49 : vector<160x160xf32>
    %c4 = arith.constant 4 : index
    %c0_31 = arith.constant 0 : index
    %51 = vector.load %arg13[%c4, %c0_31] : memref<168x200xf32, #tpu.memory_space<vmem>>, vector<160x200xf32>
    %52 = arith.truncf %51 : vector<160x200xf32> to vector<160x200xbf16>
    %c4_32 = arith.constant 4 : index
    %c0_33 = arith.constant 0 : index
    %c0_34 = arith.constant 0 : index
    %53 = vector.load %arg4[%c4_32, %c0_33, %c0_34] : memref<5x200x160xbf16, #tpu.memory_space<vmem>>, vector<1x200x160xbf16>
    %54 = vector.shape_cast %53 : vector<1x200x160xbf16> to vector<200x160xbf16>
    %cst_35 = arith.constant dense<0.000000e+00> : vector<160x160xf32>
    %55 = tpu.matmul %52, %54, %cst_35 {dimension_numbers = #tpu.dot_dimension_numbers<[1], [0], [0], [1], [0, 0, 1, 1], [], []>} : vector<160x200xbf16>, vector<200x160xbf16>, vector<160x160xf32> -> vector<160x160xf32>
    %56 = arith.addf %50, %55 : vector<160x160xf32>
    %c0_36 = arith.constant 0 : index
    %c0_37 = arith.constant 0 : index
    %57 = vector.load %arg5[%c0_36, %c0_37] : memref<1x160xf32, #tpu.memory_space<vmem>>, vector<1x160xf32>
    %58 = vector.broadcast %57 : vector<1x160xf32> to vector<160x160xf32>
    %59 = arith.addf %56, %58 : vector<160x160xf32>
    %cst_38 = arith.constant 0.000000e+00 : f32
    %60 = vector.broadcast %cst_38 : f32 to vector<160x160xf32>
    %61 = arith.maximumf %59, %60 : vector<160x160xf32>
    %c0_39 = arith.constant 0 : index
    %c0_40 = arith.constant 0 : index
    %62 = vector.load %arg14[%c0_39, %c0_40] : memref<168x160xf32, #tpu.memory_space<vmem>>, vector<160x160xf32>
    tpu.vector_store %arg14[%c0_39, %c0_40], %61 {strides = array<i32>} : memref<168x160xf32, #tpu.memory_space<vmem>>, vector<160x160xf32>,
    %cst_41 = arith.constant 0.000000e+00 : f32
    %63 = vector.broadcast %cst_41 : f32 to vector<8x160xf32>
    %c160_42 = arith.constant 160 : index
    %c0_43 = arith.constant 0 : index
    %64 = vector.load %arg14[%c160_42, %c0_43] : memref<168x160xf32, #tpu.memory_space<vmem>>, vector<8x160xf32>
    tpu.vector_store %arg14[%c160_42, %c0_43], %63 {strides = array<i32>} : memref<168x160xf32, #tpu.memory_space<vmem>>, vector<8x160xf32>,
    %c0_44 = arith.constant 0 : index
    %c0_45 = arith.constant 0 : index
    %65 = vector.load %arg14[%c0_44, %c0_45] : memref<168x160xf32, #tpu.memory_space<vmem>>, vector<160x160xf32>
    %66 = arith.truncf %65 : vector<160x160xf32> to vector<160x160xbf16>
    %c0_46 = arith.constant 0 : index
    %c0_47 = arith.constant 0 : index
    %c0_48 = arith.constant 0 : index
    %67 = vector.load %arg6[%c0_46, %c0_47, %c0_48] : memref<5x160x384xbf16, #tpu.memory_space<vmem>>, vector<1x160x384xbf16>
    %68 = vector.shape_cast %67 : vector<1x160x384xbf16> to vector<160x384xbf16>
    %cst_49 = arith.constant dense<0.000000e+00> : vector<160x384xf32>
    %69 = tpu.matmul %66, %68, %cst_49 {dimension_numbers = #tpu.dot_dimension_numbers<[1], [0], [0], [1], [0, 0, 1, 1], [], []>} : vector<160x160xbf16>, vector<160x384xbf16>, vector<160x384xf32> -> vector<160x384xf32>
    %c1_50 = arith.constant 1 : index
    %c0_51 = arith.constant 0 : index
    %70 = vector.load %arg14[%c1_50, %c0_51] : memref<168x160xf32, #tpu.memory_space<vmem>>, vector<160x160xf32>
    %71 = arith.truncf %70 : vector<160x160xf32> to vector<160x160xbf16>
    %c1_52 = arith.constant 1 : index
    %c0_53 = arith.constant 0 : index
    %c0_54 = arith.constant 0 : index
    %72 = vector.load %arg6[%c1_52, %c0_53, %c0_54] : memref<5x160x384xbf16, #tpu.memory_space<vmem>>, vector<1x160x384xbf16>
    %73 = vector.shape_cast %72 : vector<1x160x384xbf16> to vector<160x384xbf16>
    %cst_55 = arith.constant dense<0.000000e+00> : vector<160x384xf32>
    %74 = tpu.matmul %71, %73, %cst_55 {dimension_numbers = #tpu.dot_dimension_numbers<[1], [0], [0], [1], [0, 0, 1, 1], [], []>} : vector<160x160xbf16>, vector<160x384xbf16>, vector<160x384xf32> -> vector<160x384xf32>
    %75 = arith.addf %69, %74 : vector<160x384xf32>
    %c2_56 = arith.constant 2 : index
    %c0_57 = arith.constant 0 : index
    %76 = vector.load %arg14[%c2_56, %c0_57] : memref<168x160xf32, #tpu.memory_space<vmem>>, vector<160x160xf32>
    %77 = arith.truncf %76 : vector<160x160xf32> to vector<160x160xbf16>
    %c2_58 = arith.constant 2 : index
    %c0_59 = arith.constant 0 : index
    %c0_60 = arith.constant 0 : index
    %78 = vector.load %arg6[%c2_58, %c0_59, %c0_60] : memref<5x160x384xbf16, #tpu.memory_space<vmem>>, vector<1x160x384xbf16>
    %79 = vector.shape_cast %78 : vector<1x160x384xbf16> to vector<160x384xbf16>
    %cst_61 = arith.constant dense<0.000000e+00> : vector<160x384xf32>
    %80 = tpu.matmul %77, %79, %cst_61 {dimension_numbers = #tpu.dot_dimension_numbers<[1], [0], [0], [1], [0, 0, 1, 1], [], []>} : vector<160x160xbf16>, vector<160x384xbf16>, vector<160x384xf32> -> vector<160x384xf32>
    %81 = arith.addf %75, %80 : vector<160x384xf32>
    %c3_62 = arith.constant 3 : index
    %c0_63 = arith.constant 0 : index
    %82 = vector.load %arg14[%c3_62, %c0_63] : memref<168x160xf32, #tpu.memory_space<vmem>>, vector<160x160xf32>
    %83 = arith.truncf %82 : vector<160x160xf32> to vector<160x160xbf16>
    %c3_64 = arith.constant 3 : index
    %c0_65 = arith.constant 0 : index
    %c0_66 = arith.constant 0 : index
    %84 = vector.load %arg6[%c3_64, %c0_65, %c0_66] : memref<5x160x384xbf16, #tpu.memory_space<vmem>>, vector<1x160x384xbf16>
    %85 = vector.shape_cast %84 : vector<1x160x384xbf16> to vector<160x384xbf16>
    %cst_67 = arith.constant dense<0.000000e+00> : vector<160x384xf32>
    %86 = tpu.matmul %83, %85, %cst_67 {dimension_numbers = #tpu.dot_dimension_numbers<[1], [0], [0], [1], [0, 0, 1, 1], [], []>} : vector<160x160xbf16>, vector<160x384xbf16>, vector<160x384xf32> -> vector<160x384xf32>
    %87 = arith.addf %81, %86 : vector<160x384xf32>
    %c4_68 = arith.constant 4 : index
    %c0_69 = arith.constant 0 : index
    %88 = vector.load %arg14[%c4_68, %c0_69] : memref<168x160xf32, #tpu.memory_space<vmem>>, vector<160x160xf32>
    %89 = arith.truncf %88 : vector<160x160xf32> to vector<160x160xbf16>
    %c4_70 = arith.constant 4 : index
    %c0_71 = arith.constant 0 : index
    %c0_72 = arith.constant 0 : index
    %90 = vector.load %arg6[%c4_70, %c0_71, %c0_72] : memref<5x160x384xbf16, #tpu.memory_space<vmem>>, vector<1x160x384xbf16>
    %91 = vector.shape_cast %90 : vector<1x160x384xbf16> to vector<160x384xbf16>
    %cst_73 = arith.constant dense<0.000000e+00> : vector<160x384xf32>
    %92 = tpu.matmul %89, %91, %cst_73 {dimension_numbers = #tpu.dot_dimension_numbers<[1], [0], [0], [1], [0, 0, 1, 1], [], []>} : vector<160x160xbf16>, vector<160x384xbf16>, vector<160x384xf32> -> vector<160x384xf32>
    %93 = arith.addf %87, %92 : vector<160x384xf32>
    %94 = vector.extract_strided_slice %93 {offsets = [0, 0], sizes = [160, 75], strides = [1, 1]} : vector<160x384xf32> to vector<160x75xf32>
    %95 = vector.extract_strided_slice %93 {offsets = [0, 128], sizes = [160, 75], strides = [1, 1]} : vector<160x384xf32> to vector<160x75xf32>
    %96 = arith.maximumf %94, %95 : vector<160x75xf32>
    %97 = vector.extract_strided_slice %93 {offsets = [0, 256], sizes = [160, 75], strides = [1, 1]} : vector<160x384xf32> to vector<160x75xf32>
    %98 = arith.maximumf %96, %97 : vector<160x75xf32>
    %c0_74 = arith.constant 0 : index
    %c0_75 = arith.constant 0 : index
    %99 = vector.load %arg7[%c0_74, %c0_75] : memref<1x75xf32, #tpu.memory_space<vmem>>, vector<1x75xf32>
    %100 = vector.broadcast %99 : vector<1x75xf32> to vector<160x75xf32>
    %101 = arith.addf %98, %100 : vector<160x75xf32>
    %cst_76 = arith.constant 0.000000e+00 : f32
    %102 = vector.broadcast %cst_76 : f32 to vector<160x75xf32>
    %103 = arith.maximumf %101, %102 : vector<160x75xf32>
    %c0_77 = arith.constant 0 : index
    %c0_78 = arith.constant 0 : index
    %104 = vector.load %arg15[%c0_77, %c0_78] : memref<160x75xf32, #tpu.memory_space<vmem>>, vector<160x75xf32>
    tpu.vector_store %arg15[%c0_77, %c0_78], %103 {strides = array<i32>} : memref<160x75xf32, #tpu.memory_space<vmem>>, vector<160x75xf32>,
    %c0_79 = arith.constant 0 : index
    %c0_80 = arith.constant 0 : index
    %105 = tpu.strided_load %arg15[%c0_79, %c0_80] {strides = array<i32: 20, 1>} : memref<160x75xf32, #tpu.memory_space<vmem>>, vector<8x75xf32>
    %c1_81 = arith.constant 1 : index
    %c0_82 = arith.constant 0 : index
    %106 = tpu.strided_load %arg15[%c1_81, %c0_82] {strides = array<i32: 20, 1>} : memref<160x75xf32, #tpu.memory_space<vmem>>, vector<8x75xf32>
    %107 = arith.maximumf %105, %106 : vector<8x75xf32>
    %c2_83 = arith.constant 2 : index
    %c0_84 = arith.constant 0 : index
    %108 = tpu.strided_load %arg15[%c2_83, %c0_84] {strides = array<i32: 20, 1>} : memref<160x75xf32, #tpu.memory_space<vmem>>, vector<8x75xf32>
    %109 = arith.maximumf %107, %108 : vector<8x75xf32>
    %110 = arith.truncf %109 : vector<8x75xf32> to vector<8x75xbf16>
    %c0_85 = arith.constant 0 : index
    %c0_86 = arith.constant 0 : index
    %c0_87 = arith.constant 0 : index
    %111 = vector.load %arg8[%c0_85, %c0_86, %c0_87] : memref<5x75x100xbf16, #tpu.memory_space<vmem>>, vector<1x75x100xbf16>
    %112 = vector.shape_cast %111 : vector<1x75x100xbf16> to vector<75x100xbf16>
    %cst_88 = arith.constant dense<0.000000e+00> : vector<8x100xf32>
    %113 = tpu.matmul %110, %112, %cst_88 {dimension_numbers = #tpu.dot_dimension_numbers<[1], [0], [0], [1], [0, 0, 1, 1], [], []>} : vector<8x75xbf16>, vector<75x100xbf16>, vector<8x100xf32> -> vector<8x100xf32>
    %c2_89 = arith.constant 2 : index
    %c0_90 = arith.constant 0 : index
    %114 = tpu.strided_load %arg15[%c2_89, %c0_90] {strides = array<i32: 20, 1>} : memref<160x75xf32, #tpu.memory_space<vmem>>, vector<8x75xf32>
    %c3_91 = arith.constant 3 : index
    %c0_92 = arith.constant 0 : index
    %115 = tpu.strided_load %arg15[%c3_91, %c0_92] {strides = array<i32: 20, 1>} : memref<160x75xf32, #tpu.memory_space<vmem>>, vector<8x75xf32>
    %116 = arith.maximumf %114, %115 : vector<8x75xf32>
    %c4_93 = arith.constant 4 : index
    %c0_94 = arith.constant 0 : index
    %117 = tpu.strided_load %arg15[%c4_93, %c0_94] {strides = array<i32: 20, 1>} : memref<160x75xf32, #tpu.memory_space<vmem>>, vector<8x75xf32>
    %118 = arith.maximumf %116, %117 : vector<8x75xf32>
    %119 = arith.truncf %118 : vector<8x75xf32> to vector<8x75xbf16>
    %c1_95 = arith.constant 1 : index
    %c0_96 = arith.constant 0 : index
    %c0_97 = arith.constant 0 : index
    %120 = vector.load %arg8[%c1_95, %c0_96, %c0_97] : memref<5x75x100xbf16, #tpu.memory_space<vmem>>, vector<1x75x100xbf16>
    %121 = vector.shape_cast %120 : vector<1x75x100xbf16> to vector<75x100xbf16>
    %cst_98 = arith.constant dense<0.000000e+00> : vector<8x100xf32>
    %122 = tpu.matmul %119, %121, %cst_98 {dimension_numbers = #tpu.dot_dimension_numbers<[1], [0], [0], [1], [0, 0, 1, 1], [], []>} : vector<8x75xbf16>, vector<75x100xbf16>, vector<8x100xf32> -> vector<8x100xf32>
    %123 = arith.addf %113, %122 : vector<8x100xf32>
    %c4_99 = arith.constant 4 : index
    %c0_100 = arith.constant 0 : index
    %124 = tpu.strided_load %arg15[%c4_99, %c0_100] {strides = array<i32: 20, 1>} : memref<160x75xf32, #tpu.memory_space<vmem>>, vector<8x75xf32>
    %c5 = arith.constant 5 : index
    %c0_101 = arith.constant 0 : index
    %125 = tpu.strided_load %arg15[%c5, %c0_101] {strides = array<i32: 20, 1>} : memref<160x75xf32, #tpu.memory_space<vmem>>, vector<8x75xf32>
    %126 = arith.maximumf %124, %125 : vector<8x75xf32>
    %c6 = arith.constant 6 : index
    %c0_102 = arith.constant 0 : index
    %127 = tpu.strided_load %arg15[%c6, %c0_102] {strides = array<i32: 20, 1>} : memref<160x75xf32, #tpu.memory_space<vmem>>, vector<8x75xf32>
    %128 = arith.maximumf %126, %127 : vector<8x75xf32>
    %129 = arith.truncf %128 : vector<8x75xf32> to vector<8x75xbf16>
    %c2_103 = arith.constant 2 : index
    %c0_104 = arith.constant 0 : index
    %c0_105 = arith.constant 0 : index
    %130 = vector.load %arg8[%c2_103, %c0_104, %c0_105] : memref<5x75x100xbf16, #tpu.memory_space<vmem>>, vector<1x75x100xbf16>
    %131 = vector.shape_cast %130 : vector<1x75x100xbf16> to vector<75x100xbf16>
    %cst_106 = arith.constant dense<0.000000e+00> : vector<8x100xf32>
    %132 = tpu.matmul %129, %131, %cst_106 {dimension_numbers = #tpu.dot_dimension_numbers<[1], [0], [0], [1], [0, 0, 1, 1], [], []>} : vector<8x75xbf16>, vector<75x100xbf16>, vector<8x100xf32> -> vector<8x100xf32>
    %133 = arith.addf %123, %132 : vector<8x100xf32>
    %c6_107 = arith.constant 6 : index
    %c0_108 = arith.constant 0 : index
    %134 = tpu.strided_load %arg15[%c6_107, %c0_108] {strides = array<i32: 20, 1>} : memref<160x75xf32, #tpu.memory_space<vmem>>, vector<8x75xf32>
    %c7 = arith.constant 7 : index
    %c0_109 = arith.constant 0 : index
    %135 = tpu.strided_load %arg15[%c7, %c0_109] {strides = array<i32: 20, 1>} : memref<160x75xf32, #tpu.memory_space<vmem>>, vector<8x75xf32>
    %136 = arith.maximumf %134, %135 : vector<8x75xf32>
    %c8 = arith.constant 8 : index
    %c0_110 = arith.constant 0 : index
    %137 = tpu.strided_load %arg15[%c8, %c0_110] {strides = array<i32: 20, 1>} : memref<160x75xf32, #tpu.memory_space<vmem>>, vector<8x75xf32>
    %138 = arith.maximumf %136, %137 : vector<8x75xf32>
    %139 = arith.truncf %138 : vector<8x75xf32> to vector<8x75xbf16>
    %c3_111 = arith.constant 3 : index
    %c0_112 = arith.constant 0 : index
    %c0_113 = arith.constant 0 : index
    %140 = vector.load %arg8[%c3_111, %c0_112, %c0_113] : memref<5x75x100xbf16, #tpu.memory_space<vmem>>, vector<1x75x100xbf16>
    %141 = vector.shape_cast %140 : vector<1x75x100xbf16> to vector<75x100xbf16>
    %cst_114 = arith.constant dense<0.000000e+00> : vector<8x100xf32>
    %142 = tpu.matmul %139, %141, %cst_114 {dimension_numbers = #tpu.dot_dimension_numbers<[1], [0], [0], [1], [0, 0, 1, 1], [], []>} : vector<8x75xbf16>, vector<75x100xbf16>, vector<8x100xf32> -> vector<8x100xf32>
    %143 = arith.addf %133, %142 : vector<8x100xf32>
    %c8_115 = arith.constant 8 : index
    %c0_116 = arith.constant 0 : index
    %144 = tpu.strided_load %arg15[%c8_115, %c0_116] {strides = array<i32: 20, 1>} : memref<160x75xf32, #tpu.memory_space<vmem>>, vector<8x75xf32>
    %c9 = arith.constant 9 : index
    %c0_117 = arith.constant 0 : index
    %145 = tpu.strided_load %arg15[%c9, %c0_117] {strides = array<i32: 20, 1>} : memref<160x75xf32, #tpu.memory_space<vmem>>, vector<8x75xf32>
    %146 = arith.maximumf %144, %145 : vector<8x75xf32>
    %c10 = arith.constant 10 : index
    %c0_118 = arith.constant 0 : index
    %147 = tpu.strided_load %arg15[%c10, %c0_118] {strides = array<i32: 20, 1>} : memref<160x75xf32, #tpu.memory_space<vmem>>, vector<8x75xf32>
    %148 = arith.maximumf %146, %147 : vector<8x75xf32>
    %149 = arith.truncf %148 : vector<8x75xf32> to vector<8x75xbf16>
    %c4_119 = arith.constant 4 : index
    %c0_120 = arith.constant 0 : index
    %c0_121 = arith.constant 0 : index
    %150 = vector.load %arg8[%c4_119, %c0_120, %c0_121] : memref<5x75x100xbf16, #tpu.memory_space<vmem>>, vector<1x75x100xbf16>
    %151 = vector.shape_cast %150 : vector<1x75x100xbf16> to vector<75x100xbf16>
    %cst_122 = arith.constant dense<0.000000e+00> : vector<8x100xf32>
    %152 = tpu.matmul %149, %151, %cst_122 {dimension_numbers = #tpu.dot_dimension_numbers<[1], [0], [0], [1], [0, 0, 1, 1], [], []>} : vector<8x75xbf16>, vector<75x100xbf16>, vector<8x100xf32> -> vector<8x100xf32>
    %153 = arith.addf %143, %152 : vector<8x100xf32>
    %c0_123 = arith.constant 0 : index
    %c0_124 = arith.constant 0 : index
    %154 = vector.load %arg9[%c0_123, %c0_124] : memref<1x100xf32, #tpu.memory_space<vmem>>, vector<1x100xf32>
    %155 = vector.broadcast %154 : vector<1x100xf32> to vector<8x100xf32>
    %156 = arith.addf %153, %155 : vector<8x100xf32>
    %cst_125 = arith.constant 0.000000e+00 : f32
    %157 = vector.broadcast %cst_125 : f32 to vector<8x100xf32>
    %158 = arith.maximumf %156, %157 : vector<8x100xf32>
    %159 = arith.truncf %158 : vector<8x100xf32> to vector<8x100xbf16>
    %c0_126 = arith.constant 0 : index
    %c0_127 = arith.constant 0 : index
    %160 = vector.load %arg10[%c0_126, %c0_127] : memref<100x15xbf16, #tpu.memory_space<vmem>>, vector<100x15xbf16>
    %cst_128 = arith.constant dense<0.000000e+00> : vector<8x15xf32>
    %161 = tpu.matmul %159, %160, %cst_128 {dimension_numbers = #tpu.dot_dimension_numbers<[1], [0], [0], [1], [0, 0, 1, 1], [], []>} : vector<8x100xbf16>, vector<100x15xbf16>, vector<8x15xf32> -> vector<8x15xf32>
    %c0_129 = arith.constant 0 : index
    %c0_130 = arith.constant 0 : index
    %162 = vector.load %arg11[%c0_129, %c0_130] : memref<1x15xf32, #tpu.memory_space<vmem>>, vector<1x15xf32>
    %163 = vector.broadcast %162 : vector<1x15xf32> to vector<8x15xf32>
    %164 = arith.addf %161, %163 : vector<8x15xf32>
    %c0_131 = arith.constant 0 : index
    %c0_132 = arith.constant 0 : index
    %165 = vector.load %arg12[%c0_131, %c0_132] : memref<8x15xf32, #tpu.memory_space<vmem>>, vector<8x15xf32>
    tpu.vector_store %arg12[%c0_131, %c0_132], %164 {strides = array<i32>} : memref<8x15xf32, #tpu.memory_space<vmem>>, vector<8x15xf32>,
    return
  }
  func.func @transform_0(%arg0: i32) -> (i32, i32) {
    %c0_i32 = arith.constant 0 : i32
    %c0_i32_0 = arith.constant 0 : i32
    return %arg0, %c0_i32 : i32, i32
  }
  func.func @transform_1(%arg0: i32) -> (i32, i32) {
    %c0_i32 = arith.constant 0 : i32
    %c0_i32_0 = arith.constant 0 : i32
    %c0_i32_1 = arith.constant 0 : i32
    return %c0_i32, %c0_i32_0 : i32, i32
  }
  func.func @transform_2(%arg0: i32) -> (i32, i32) {
    %c0_i32 = arith.constant 0 : i32
    %c0_i32_0 = arith.constant 0 : i32
    %c0_i32_1 = arith.constant 0 : i32
    return %c0_i32, %c0_i32_0 : i32, i32
  }
  func.func @transform_3(%arg0: i32) -> (i32, i32, i32) {
    %c0_i32 = arith.constant 0 : i32
    %c0_i32_0 = arith.constant 0 : i32
    %c0_i32_1 = arith.constant 0 : i32
    %c0_i32_2 = arith.constant 0 : i32
    return %c0_i32, %c0_i32_0, %c0_i32_1 : i32, i32, i32
  }
  func.func @transform_4(%arg0: i32) -> (i32, i32) {
    %c0_i32 = arith.constant 0 : i32
    %c0_i32_0 = arith.constant 0 : i32
    %c0_i32_1 = arith.constant 0 : i32
    return %c0_i32, %c0_i32_0 : i32, i32
  }
  func.func @transform_5(%arg0: i32) -> (i32, i32, i32) {
    %c0_i32 = arith.constant 0 : i32
    %c0_i32_0 = arith.constant 0 : i32
    %c0_i32_1 = arith.constant 0 : i32
    %c0_i32_2 = arith.constant 0 : i32
    return %c0_i32, %c0_i32_0, %c0_i32_1 : i32, i32, i32
  }
  func.func @transform_6(%arg0: i32) -> (i32, i32) {
    %c0_i32 = arith.constant 0 : i32
    %c0_i32_0 = arith.constant 0 : i32
    %c0_i32_1 = arith.constant 0 : i32
    return %c0_i32, %c0_i32_0 : i32, i32
  }
  func.func @transform_7(%arg0: i32) -> (i32, i32, i32) {
    %c0_i32 = arith.constant 0 : i32
    %c0_i32_0 = arith.constant 0 : i32
    %c0_i32_1 = arith.constant 0 : i32
    %c0_i32_2 = arith.constant 0 : i32
    return %c0_i32, %c0_i32_0, %c0_i32_1 : i32, i32, i32
  }
  func.func @transform_8(%arg0: i32) -> (i32, i32) {
    %c0_i32 = arith.constant 0 : i32
    %c0_i32_0 = arith.constant 0 : i32
    %c0_i32_1 = arith.constant 0 : i32
    return %c0_i32, %c0_i32_0 : i32, i32
  }
  func.func @transform_9(%arg0: i32) -> (i32, i32) {
    %c0_i32 = arith.constant 0 : i32
    %c0_i32_0 = arith.constant 0 : i32
    %c0_i32_1 = arith.constant 0 : i32
    return %c0_i32, %c0_i32_0 : i32, i32
  }
  func.func @transform_10(%arg0: i32) -> (i32, i32) {
    %c0_i32 = arith.constant 0 : i32
    %c0_i32_0 = arith.constant 0 : i32
    %c0_i32_1 = arith.constant 0 : i32
    return %c0_i32, %c0_i32_0 : i32, i32
  }
  func.func @transform_11(%arg0: i32) -> (i32, i32) {
    %c0_i32 = arith.constant 0 : i32
    %c0_i32_0 = arith.constant 0 : i32
    return %arg0, %c0_i32 : i32, i32
  }
}

</mosaic_0001>

<bundles_post_ra>
// kernel: simple_net_final_forward.1
= control target key start
LH: loop header
LB: loop body
LE: loop exit
PB: predicated region body
PF: predicated region fallthrough
CT: control target
= control target key end

     0   :  { %16 = vsyncpa [#allocation6], 0  ;;  %s22944_s0 = inlined_call_operand.vmem [shape: bf16[320,448], index: 0, kind: input, shape index: {}]   ;;  %s22945_s1 = inlined_call_operand.vmem [shape: bf16[448,2304], index: 1, kind: input, shape index: {}]   ;;  %s22946_s2 = inlined_call_operand.vmem [shape: f32[1,200], index: 2, kind: input, shape index: {}]   ;;  %s22947_s3 = inlined_call_operand.vmem [shape: bf16[5,200,160], index: 3, kind: input, shape index: {}]   ;;  %s22948_s4 = inlined_call_operand.vmem [shape: f32[1,160], index: 4, kind: input, shape index: {}]   ;;  %s22949_s5 = inlined_call_operand.vmem [shape: bf16[5,160,384], index: 5, kind: input, shape index: {}]   ;;  %s22950_s6 = inlined_call_operand.vmem [shape: f32[1,75], index: 6, kind: input, shape index: {}]   ;;  %s22951_s7 = inlined_call_operand.vmem [shape: bf16[5,75,100], index: 7, kind: input, shape index: {}]   ;;  %s22952_s8 = inlined_call_operand.vmem [shape: f32[1,100], index: 8, kind: input, shape index: {}]   ;;  %s22953_s9 = inlined_call_operand.vmem [shape: bf16[100,15], index: 9, kind: input, shape index: {}]   ;;  %s22954_s10 = inlined_call_operand.vmem [shape: f32[1,15], index: 10, kind: input, shape index: {}]   ;;  %s22955_s11 = inlined_call_operand.hbm [shape: f32[16,15], index: 11, kind: output, shape index: {}]  }
   0x1   :  { %18 = vsyncpa [#allocation6 + $0x1], 0  ;;  %s16676_s17 = smov 0   ;;  %s16678_s18 = smov 0  }
   0x2   :  { %s16680_s19 = smov 0   ;;  %s16682_s20 = smov 0  }
   0x3 LB: > { %23100 = sst [smem:[#allocation8_spill]] %s16605_s19  ;;  %s16697_s21 = sadd.s32 4294967295, %s16609_s20   ;;  %s16609_s20 = sphi %s16682_s20, %s23654_s20   ;;  %s16605_s19 = sphi %s16680_s19, %s23651_s19   ;;  %s16601_s18 = sphi %s16678_s18, %s23653_s18   ;;  %s16597_s17 = sphi %s16676_s17, %s23652_s17  }
   0x4   : > { %s12734_s22 = sadd.s32 4294967294, %s16609_s20   ;;  %s16701_s23 = sadd.s32 1, %s16609_s20  }
   0x5   : > { %s267_s24 = sadd.s32 1, %s16605_s19  ;;  %s264_s25 = ssub.s32 %s16609_s20, %s16701_s23 }
   0x6   : > { %p277_p0 = scmp.ne.s32.totalorder %s16605_s19, %s16601_s18  ;;  %p265_p1 = scmp.eq.s32.totalorder %s264_s25, 0 }
   0x7   : > { %p278_p2 = scmp.eq.s32.totalorder %s16697_s21, 1  ;;  %p283_p3 = scmp.ne.s32.totalorder %s16601_s18, %s16597_s17 }
   0x8   : > { %p284_p4 = scmp.eq.s32.totalorder %s12734_s22, 1  ;;  %p12737_p7 = scmp.ge.s32.totalorder %s16609_s20, 1 }
   0x9   : > { %s16712_s26 = scalar_select %p265_p1, %s16605_s19, %s267_s24  }
   0xa   : > { %p16714_p5 = por %p278_p2, %p277_p0  ;;  %p16718_p6 = por %p284_p4, %p283_p3 }
   0xb   : > { %23101 = sst [smem:[#allocation9_spill]] %s16712_s26  ;;  %p342_p8 = scmp.lt.s32.totalorder %s16609_s20, 3 }
   0xd   : > { %p343_p9 = pnand %p12737_p7, %p342_p8 }
   0xf   : > { %346 = sbr.rel (%p343_p9) target bundleno = 3129 (0xc39), region = 64 }
  0x16   : > { %v15173_v0 = vld [vmem:[%s22945_s1 + $0x4] ss:$72 sps:$4 sm:$0xff]   ;;  %v15175_v1 = vld [vmem:[%s22945_s1] ss:$72 sps:$4 sm:$0xff]   ;;  %v15176_v2 = vld [vmem:[%s22945_s1 + $0x94] ss:$72 sps:$4 sm:$0xff]  }
  0x17   : > { %3676 = vmatprep.subr.bf16.mxu1 %v15173_v0  ;;  %v15178_v3 = vld [vmem:[%s22945_s1 + $0x90] ss:$72 sps:$4 sm:$0xff]   ;;  %v15179_v4 = vld [vmem:[%s22945_s1 + $0x124] ss:$72 sps:$4 sm:$0xff]   ;;  %v15181_v5 = vld [vmem:[%s22945_s1 + $0x120] ss:$72 sps:$4 sm:$0xff]  }
  0x18   : > { %3677 = vmatpush1.bf16.msra.mxu1 %v15175_v1  ;;  %v15187_v6 = vld [vmem:[%s22945_s1 + $0x904] ss:$72 sps:$4 sm:$0xff]   ;;  %v15190_v7 = vld [vmem:[%s22945_s1 + $0x900] ss:$72 sps:$4 sm:$0xff]   ;;  %v15182_v8 = vld [vmem:[%s22945_s1 + $0x1b4] ss:$72 sps:$4 sm:$0xff]  }
  0x19   : > { %3678 = vmatprep.subr.bf16.mxu1 %v15176_v2  ;;  %3809 = vmatprep.subr.bf16.mxu0 %v15187_v6  ;;  %v15193_v9 = vld [vmem:[%s22945_s1 + $0x994] ss:$72 sps:$4 sm:$0xff]   ;;  %v15196_v10 = vld [vmem:[%s22945_s1 + $0x990] ss:$72 sps:$4 sm:$0xff]   ;;  %v15185_v12 = vld [vmem:[%s22945_s1 + $0x244] ss:$72 sps:$4 sm:$0xff]  }
  0x1a   : > { %3810 = vmatpush1.bf16.msra.mxu0 %v15190_v7  ;;  %v15184_v11 = vld [vmem:[%s22945_s1 + $0x1b0] ss:$72 sps:$4 sm:$0xff]   ;;  %v15199_v13 = vld [vmem:[%s22945_s1 + $0xa24] ss:$72 sps:$4 sm:$0xff]   ;;  %v15202_v14 = vld [vmem:[%s22945_s1 + $0xa20] ss:$72 sps:$4 sm:$0xff]  }
  0x1b   : > { %3811 = vmatprep.subr.bf16.mxu0 %v15193_v9  ;;  %v15189_v15 = vld [vmem:[%s22945_s1 + $0x240] ss:$72 sps:$4 sm:$0xff]   ;;  %v15205_v16 = vld [vmem:[%s22945_s1 + $0xab4] ss:$72 sps:$4 sm:$0xff]   ;;  %v15195_v18 = vld [vmem:[%s22945_s1 + $0x2d0] ss:$72 sps:$4 sm:$0xff]  }
  0x1c   : > { %3679 = vmatpush1.bf16.msra.mxu1 %v15178_v3  ;;  %v15191_v17 = vld [vmem:[%s22945_s1 + $0x2d4] ss:$72 sps:$4 sm:$0xff]   ;;  %v15208_v19 = vld [vmem:[%s22945_s1 + $0xab0] ss:$72 sps:$4 sm:$0xff]   ;;  %v15211_v20 = vld [vmem:[%s22945_s1 + $0xb44] ss:$72 sps:$4 sm:$0xff]  }
  0x1d   : > { %3680 = vmatprep.subr.bf16.mxu1 %v15179_v4  ;;  %v15197_v21 = vld [vmem:[%s22945_s1 + $0x364] ss:$72 sps:$4 sm:$0xff]   ;;  %s383_s14 = smul.u32 20, %s16697_s21  ;;  %v15214_v22 = vld [vmem:[%s22945_s1 + $0xb40] ss:$72 sps:$4 sm:$0xff]   ;;  %vm3645_vm0 = vcmask 523264  }
  0x1e   : > { %3812 = vmatpush1.bf16.msra.mxu0 %v15196_v10  ;;  %v15201_v23 = vld [vmem:[%s22945_s1 + $0x360] ss:$72 sps:$4 sm:$0xff]   ;;  %v15217_v24 = vld [vmem:[%s22945_s1 + $0xbd4] ss:$72 sps:$4 sm:$0xff]   ;;  %v15207_v26 = vld [vmem:[%s22945_s1 + $0x3f0] ss:$72 sps:$4 sm:$0xff]  }
  0x1f   : > { %3813 = vmatprep.subr.bf16.mxu0 %v15199_v13  ;;  %v15203_v25 = vld [vmem:[%s22945_s1 + $0x3f4] ss:$72 sps:$4 sm:$0xff]   ;;  %p384_p10 = scmp.lt.s32.totalorder %s383_s14, 39  ;;  %v15220_v27 = vld [vmem:[%s22945_s1 + $0xbd0] ss:$72 sps:$4 sm:$0xff]   ;;  %vm6978_vm1 = vcmask 1043456  }
  0x20   : > { %3681 = vmatpush1.bf16.msra.mxu1 %v15181_v5  ;;  %v15223_v28 = vld [vmem:[%s22945_s1 + $0xc64] ss:$72 sps:$4 sm:$0xff]   ;;  %v15226_v30 = vld [vmem:[%s22945_s1 + $0xc60] ss:$72 sps:$4 sm:$0xff]   ;;  %v15229_v32 = vld [vmem:[%s22945_s1 + $0xcf4] ss:$72 sps:$4 sm:$0xff]  }
  0x21   : > { %3682 = vmatprep.subr.bf16.mxu1 %v15182_v8  ;;  %v15209_v29 = vld [vmem:[%s22945_s1 + $0x484] ss:$72 sps:$4 sm:$0xff]   ;;  %s23656_s14 = smov (!%p384_p10, %s383_s14), 39  ;;  %v15213_v31 = vld [vmem:[%s22945_s1 + $0x480] ss:$72 sps:$4 sm:$0xff]   ;;  %vm6483_vm2 = vcmask 588800  }
  0x22   : > { %3814 = vmatpush1.bf16.msra.mxu0 %v15202_v14  ;;  %v15215_v33 = vld [vmem:[%s22945_s1 + $0x514] ss:$72 sps:$4 sm:$0xff]   ;;  %s14155_s25 = sshll.u32 %s23656_s14, 4  ;;  %v15219_v34 = vld [vmem:[%s22945_s1 + $0x510] ss:$72 sps:$4 sm:$0xff]   ;;  %vm7459_vm5 = vcmask 1046528  }
  0x23   : > { %3815 = vmatprep.subr.bf16.mxu0 %v15205_v16  ;;  %v15232_v35 = vld [vmem:[%s22945_s1 + $0xcf0] ss:$72 sps:$4 sm:$0xff]   ;;  %v15235_v36 = vld [vmem:[%s22945_s1 + $0xd84] ss:$72 sps:$4 sm:$0xff]   ;;  %s16839_s22 = scalar_lea.vmem %s22944_s0, %s14155_s25  ;;  %v15238_v38 = vld [vmem:[%s22945_s1 + $0xd80] ss:$72 sps:$4 sm:$0xff]  }
  0x24   : > { %3683 = vmatpush1.bf16.msra.mxu1 %v15184_v11  ;;  %v15221_v37 = vld [vmem:[%s22945_s1 + $0x5a4] ss:$72 sps:$4 sm:$0xff]   ;;  %v15225_v40 = vld [vmem:[%s22945_s1 + $0x5a0] ss:$72 sps:$4 sm:$0xff]   ;;  %v15241_v41 = vld [vmem:[%s22945_s1 + $0xe14] ss:$72 sps:$4 sm:$0xff]  }
  0x25   : > { %3684 = vmatprep.subr.bf16.mxu1 %v15185_v12  ;;  %v16848_v39 = vld [vmem:[%s16839_s22 + $0x4] ss:$16 sps:$4 sm:$0xff]   ;;  %v16857_v42 = vld [vmem:[%s16839_s22 + $0xc] ss:$16 sps:$4 sm:$0xff]   ;;  %v15231_v44 = vld [vmem:[%s22945_s1 + $0x630] ss:$72 sps:$4 sm:$0xff]  }
  0x26   : > { %3816 = vmatpush1.bf16.msra.mxu0 %v15208_v19  ;;  %v15227_v43 = vld [vmem:[%s22945_s1 + $0x634] ss:$72 sps:$4 sm:$0xff]   ;;  %3708 = vmatprep.mubr.bf16.mxu1 %v16848_v39  ;;  %v15244_v45 = vld [vmem:[%s22945_s1 + $0xe10] ss:$72 sps:$4 sm:$0xff]   ;;  %v15247_v46 = vld [vmem:[%s22945_s1 + $0xea4] ss:$72 sps:$4 sm:$0xff]  }
  0x27   : > { %3817 = vmatprep.subr.bf16.mxu0 %v15211_v20  ;;  %13285 = vmatprep.mubr.msk.bf16.mxu0 %vm3645_vm0, %v16857_v42  ;;  %v15233_v47 = vld [vmem:[%s22945_s1 + $0x6c4] ss:$72 sps:$4 sm:$0xff]   ;;  %v15237_v48 = vld [vmem:[%s22945_s1 + $0x6c0] ss:$72 sps:$4 sm:$0xff]   ;;  %v15253_v50 = vld [vmem:[%s22945_s1 + $0xf34] ss:$72 sps:$4 sm:$0xff]  }
  0x28   : > { %3685 = vmatpush1.bf16.msra.mxu1 %v15189_v15  ;;  %v15250_v49 = vld [vmem:[%s22945_s1 + $0xea0] ss:$72 sps:$4 sm:$0xff]   ;;  %v15239_v51 = vld [vmem:[%s22945_s1 + $0x754] ss:$72 sps:$4 sm:$0xff]   ;;  %v15256_v52 = vld [vmem:[%s22945_s1 + $0xf30] ss:$72 sps:$4 sm:$0xff]  }
  0x29   : > { %3686 = vmatprep.subr.bf16.mxu1 %v15191_v17  ;;  %v15243_v53 = vld [vmem:[%s22945_s1 + $0x750] ss:$72 sps:$4 sm:$0xff]   ;;  %v15245_v54 = vld [vmem:[%s22945_s1 + $0x7e4] ss:$72 sps:$4 sm:$0xff]   ;;  %v15249_v57 = vld [vmem:[%s22945_s1 + $0x7e0] ss:$72 sps:$4 sm:$0xff]  }
  0x2a   : > { %3818 = vmatpush1.bf16.msra.mxu0 %v15214_v22  ;;  %v16899_v55 = vld [vmem:[%s16839_s22 + $0x8] ss:$16 sps:$4 sm:$0xff]   ;;  %v16902_v56 = vld [vmem:[%s16839_s22 + $0x2c] ss:$16 sps:$4 sm:$0xff]   ;;  %v16917_v60 = vld [vmem:[%s16839_s22] ss:$16 sps:$4 sm:$0xff]  }
  0x2b   : > { %3819 = vmatprep.subr.bf16.mxu0 %v15217_v24  ;;  %v15251_v58 = vld [vmem:[%s22945_s1 + $0x874] ss:$72 sps:$4 sm:$0xff]   ;;  %v15255_v59 = vld [vmem:[%s22945_s1 + $0x870] ss:$72 sps:$4 sm:$0xff]   ;;  %vm6644_vm3 = vsmask.f32 7424 }
  0x2c   : > { %3687 = vmatpush1.bf16.msra.mxu1 %v15195_v18  ;;  %v15265_v61 = vld [vmem:[%s22945_s1 + $0xc] ss:$72 sps:$4 sm:$0xff]   ;;  %v16923_v62 = vld [vmem:[%s16839_s22 + $0x28] ss:$16 sps:$4 sm:$0xff]   ;;  %v15268_v2 = vld [vmem:[%s22945_s1 + $0x9c] ss:$72 sps:$4 sm:$0xff]  }
  0x2d   : > { %3688 = vmatprep.subr.bf16.mxu1 %v15197_v21  ;;  %v16926_v63 = vld [vmem:[%s16839_s22 + $0x4c] ss:$16 sps:$4 sm:$0xff]   ;;  %v15263_v0 = vld [vmem:[%s22945_s1 + $0x8] ss:$72 sps:$4 sm:$0xff]   ;;  %v16932_v1 = vld [vmem:[%s16839_s22 + $0x24] ss:$16 sps:$4 sm:$0xff]  }
  0x2e   : > { %3820 = vmatpush1.bf16.msra.mxu0 %v15220_v27  ;;  %v15266_v3 = vld [vmem:[%s22945_s1 + $0x98] ss:$72 sps:$4 sm:$0xff]   ;;  %v15277_v5 = vld [vmem:[%s22945_s1 + $0x12c] ss:$72 sps:$4 sm:$0xff]   ;;  %v15275_v7 = vld [vmem:[%s22945_s1 + $0x128] ss:$72 sps:$4 sm:$0xff]  }
  0x2f   : > { %3821 = vmatprep.subr.bf16.mxu0 %v15223_v28  ;;  %v16946_v4 = vld [vmem:[%s16839_s22 + $0x20] ss:$16 sps:$4 sm:$0xff]   ;;  %v16952_v6 = vld [vmem:[%s16839_s22 + $0x48] ss:$16 sps:$4 sm:$0xff]   ;;  %v16958_v8 = vld [vmem:[%s16839_s22 + $0x6c] ss:$16 sps:$4 sm:$0xff]  }
  0x30   : > { %3689 = vmatpush1.bf16.msra.mxu1 %v15201_v23  ;;  %v16961_v9 = vld [vmem:[%s16839_s22 + $0x44] ss:$16 sps:$4 sm:$0xff]   ;;  %v15282_v11 = vld [vmem:[%s22945_s1 + $0x1b8] ss:$72 sps:$4 sm:$0xff]   ;;  %v16984_v15 = vld [vmem:[%s16839_s22 + $0x8c] ss:$16 sps:$4 sm:$0xff]  }
  0x31   : > { %3690 = vmatprep.subr.bf16.mxu1 %v15203_v25  ;;  %v15284_v10 = vld [vmem:[%s22945_s1 + $0x1bc] ss:$72 sps:$4 sm:$0xff]   ;;  %v15289_v12 = vld [vmem:[%s22945_s1 + $0x24c] ss:$72 sps:$4 sm:$0xff]   ;;  %v16978_v13 = vld [vmem:[%s16839_s22 + $0x68] ss:$16 sps:$4 sm:$0xff]  }
  0x32   : > { %3822 = vmatpush1.bf16.msra.mxu0 %v15226_v30  ;;  %v16981_v14 = vld [vmem:[%s16839_s22 + $0x40] ss:$16 sps:$4 sm:$0xff]   ;;  %v16990_v17 = vld [vmem:[%s16839_s22 + $0x64] ss:$16 sps:$4 sm:$0xff]   ;;  %v17007_v21 = vld [vmem:[%s16839_s22 + $0x88] ss:$16 sps:$4 sm:$0xff]  }
  0x33   : > { %3823 = vmatprep.subr.bf16.mxu0 %v15229_v32  ;;  %v15287_v16 = vld [vmem:[%s22945_s1 + $0x248] ss:$72 sps:$4 sm:$0xff]   ;;  %v15298_v18 = vld [vmem:[%s22945_s1 + $0x2dc] ss:$72 sps:$4 sm:$0xff]   ;;  %v15296_v19 = vld [vmem:[%s22945_s1 + $0x2d8] ss:$72 sps:$4 sm:$0xff]  }
  0x34   : > { %3691 = vmatpush1.bf16.msra.mxu1 %v15207_v26  ;;  %v15301_v20 = vld [vmem:[%s22945_s1 + $0x36c] ss:$72 sps:$4 sm:$0xff]   ;;  %v17010_v22 = vld [vmem:[%s16839_s22 + $0x60] ss:$16 sps:$4 sm:$0xff]   ;;  %v15310_v26 = vld [vmem:[%s22945_s1 + $0x3fc] ss:$72 sps:$4 sm:$0xff]  }
  0x35   : > { %3692 = vmatprep.subr.bf16.mxu1 %v15209_v29  ;;  %v17013_v23 = vld [vmem:[%s16839_s22 + $0xac] ss:$16 sps:$4 sm:$0xff]   ;;  %v15299_v24 = vld [vmem:[%s22945_s1 + $0x368] ss:$72 sps:$4 sm:$0xff]   ;;  %v17019_v25 = vld [vmem:[%s16839_s22 + $0x84] ss:$16 sps:$4 sm:$0xff]  }
  0x36   : > { %3824 = vmatpush1.bf16.msra.mxu0 %v15232_v35  ;;  %v15308_v27 = vld [vmem:[%s22945_s1 + $0x3f8] ss:$72 sps:$4 sm:$0xff]   ;;  %v15319_v29 = vld [vmem:[%s22945_s1 + $0x48c] ss:$72 sps:$4 sm:$0xff]   ;;  %vm7880_vm4 = vsmask.f32 6400 }
  0x37   : > { %3825 = vmatprep.subr.bf16.mxu0 %v15235_v36  ;;  %v17033_v28 = vld [vmem:[%s16839_s22 + $0xa8] ss:$16 sps:$4 sm:$0xff]   ;;  %v17039_v30 = vld [vmem:[%s16839_s22 + $0x80] ss:$16 sps:$4 sm:$0xff]   ;;  %v17045_v32 = vld [vmem:[%s16839_s22 + $0xa4] ss:$16 sps:$4 sm:$0xff]  }
  0x38   : > { %3693 = vmatpush1.bf16.msra.mxu1 %v15213_v31  ;;  %v15380_v31 = vld [vmem:[%s22945_s1 + $0x910] ss:$72 sps:$4 sm:$0xff]   ;;  %v17054_v35 = vld [vmem:[%s16839_s22 + $0xcc] ss:$16 sps:$4 sm:$0xff]   ;;  %vm8369_vm6 = vcmask 1045504   ;;  %vm8849_vm7 = vcmask 261120  }
  0x39   : > { %3694 = vmatprep.subr.bf16.mxu1 %v15215_v33  ;;  %v15382_v33 = vld [vmem:[%s22945_s1 + $0x914] ss:$72 sps:$4 sm:$0xff]   ;;  %vm12138_vm8 = vcmask 1044480   ;;  %vm16614_vm9 = vmmov 0   ;;  %vm12049_vm10 = vcmask 613376   ;;  %vm12615_vm11 = vcmask 1041408  }
  0x3a   : > { %3826 = vmatpush1.bf16.msra.mxu0 %v15238_v38  ;;  %v15322_v36 = vld [vmem:[%s22945_s1 + $0x51c] ss:$72 sps:$4 sm:$0xff]   ;;  %v15386_v38 = vld [vmem:[%s22945_s1 + $0x9a0] ss:$72 sps:$4 sm:$0xff]   ;;  %vm12611_vm12 = vcmask 818176   ;;  %s380_s25 = sand.u32 1, %s16601_s18  }
  0x3b   : > { %3827 = vmatprep.subr.bf16.mxu0 %v15241_v41  ;;  %v15394_v41 = vld [vmem:[%s22945_s1 + $0xa34] ss:$72 sps:$4 sm:$0xff]   ;;  %s12738_s12 = sshll.u32 %s380_s25, 3  ;;  %s14152_s16 = sshll.u32 %s16697_s21, 7  ;;  %vm12659_vm13 = vcmask 121856  }
  0x3c   : > { %3695 = vmatpush1.bf16.msra.mxu1 %v15219_v34  ;;  %v15317_v34 = vld [vmem:[%s22945_s1 + $0x488] ss:$72 sps:$4 sm:$0xff]   ;;  %s382_s19 = scalar_lea.vmem [#allocation5], %s12738_s12  ;;  %s22902_s26 = scalar_lea.hbm %s22955_s11, %s14152_s16 }
  0x3d   : > { %3696 = vmatprep.subr.bf16.mxu1 %v15221_v37  ;;  %v15388_v37 = vld [vmem:[%s22945_s1 + $0x9a4] ss:$72 sps:$4 sm:$0xff]   ;;  %s12675_s14 = sshll.u32 %s382_s19, 4  ;;  %s12662_s21 = scalar_lea.sflag [#allocation6], %s380_s25  ;;  %s22904_s14 = int_to_ptr.vmem [resolvable:$true] %s12675_s14 }
  0x3e   : > { %3828 = vmatpush1.bf16.msra.mxu0 %v15244_v45  ;;  %v17083_v45 = vld [vmem:[%s16839_s22 + $0xa0] ss:$16 sps:$4 sm:$0xff]   ;;  %s16615_s30 = smov [#allocation5]  }
  0x3f   : > { %3829 = vmatprep.subr.bf16.mxu0 %v15247_v46  ;;  %v15392_v46 = vld [vmem:[%s22945_s1 + $0xa30] ss:$72 sps:$4 sm:$0xff]   ;;  %s16551_s12 = sshll.u32 %s16615_s30, 4  ;;  %s16552_s12 = int_to_ptr.vmem [resolvable:$false] %s16551_s12 }
  0x40   : > { %3697 = vmatpush1.bf16.msra.mxu1 %v15225_v40  ;;  %v15320_v40 = vld [vmem:[%s22945_s1 + $0x518] ss:$72 sps:$4 sm:$0xff]   ;;  %s16553_s13 = scalar_lea.vmem %s16552_s12, 256  ;;  %p16554_p0 = scmp.lt.s32.totalorder %s22904_s14, %s16552_s12 }
  0x41   : > { %3698 = vmatprep.subr.bf16.mxu1 %v15227_v43  ;;  %v17077_v43 = vld [vmem:[%s16839_s22 + $0xc8] ss:$16 sps:$4 sm:$0xff]  }
  0x42   : > { %3830 = vmatpush1.bf16.msra.mxu0 %v15250_v49  ;;  %v17095_v49 = vld [vmem:[%s16839_s22 + $0xec] ss:$16 sps:$4 sm:$0xff]  }
  0x43   : > { %3831 = vmatprep.subr.bf16.mxu0 %v15253_v50  ;;  %v15329_v50 = vld [vmem:[%s22945_s1 + $0x5a8] ss:$72 sps:$4 sm:$0xff]  }
  0x44   : > { %3699 = vmatpush1.bf16.msra.mxu1 %v15231_v44  ;;  %v15331_v44 = vld [vmem:[%s22945_s1 + $0x5ac] ss:$72 sps:$4 sm:$0xff]  }
  0x45   : > { %3700 = vmatprep.subr.bf16.mxu1 %v15233_v47  ;;  %v15397_v47 = vld [vmem:[%s22945_s1 + $0xac4] ss:$72 sps:$4 sm:$0xff]  }
  0x46   : > { %3832 = vmatpush1.bf16.msra.mxu0 %v15256_v52  ;;  %v15395_v52 = vld [vmem:[%s22945_s1 + $0xac0] ss:$72 sps:$4 sm:$0xff]  }
  0x47   : > { %4341 = vmatprep.subr.bf16.mxu0 %v15382_v33  ;;  %v15416_v33 = vld [vmem:[%s22945_s1 + $0xd00] ss:$72 sps:$4 sm:$0xff]  }
  0x48   : > { %3701 = vmatpush1.bf16.msra.mxu1 %v15237_v48  ;;  %v17092_v48 = vld [vmem:[%s16839_s22 + $0xc4] ss:$16 sps:$4 sm:$0xff]  }
  0x49   : > { %3702 = vmatprep.subr.bf16.mxu1 %v15239_v51  ;;  %3842 = vmatmul.mubr.bf16.vlgmr.msra.gmra.mrb[0].mxu0 %v16899_v55  ;;  %v15338_v51 = vld [vmem:[%s22945_s1 + $0x63c] ss:$72 sps:$4 sm:$0xff]  }
  0x4a   : > { %13286 = vmatprep.mubr.msk.bf16.mxu0 %vm3645_vm0, %v16902_v56  ;;  %4342 = vmatpush1.bf16.msra.mxu0 %v15380_v31  ;;  %v15364_v31 = vld [vmem:[%s22945_s1 + $0x87c] ss:$72 sps:$4 sm:$0xff]  }
  0x4b   : > { %4343 = vmatprep.subr.bf16.mxu0 %v15388_v37  ;;  %v15362_v37 = vld [vmem:[%s22945_s1 + $0x878] ss:$72 sps:$4 sm:$0xff]  }
  0x4c   : > { %3703 = vmatpush1.bf16.msra.mxu1 %v15243_v53  ;;  %v15403_v53 = vld [vmem:[%s22945_s1 + $0xb54] ss:$72 sps:$4 sm:$0xff]  }
  0x4d   : > { %3704 = vmatprep.subr.bf16.mxu1 %v15245_v54  ;;  %v15336_v54 = vld [vmem:[%s22945_s1 + $0x638] ss:$72 sps:$4 sm:$0xff]  }
  0x4e   : > { %4344 = vmatpush1.bf16.msra.mxu0 %v15386_v38  ;;  %v15367_v38 = vld [vmem:[%s22945_s1 + $0x90c] ss:$72 sps:$4 sm:$0xff]  }
  0x4f   : > { %4345 = vmatprep.subr.bf16.mxu0 %v15394_v41  ;;  %v15427_v41 = vld [vmem:[%s22945_s1 + $0xe24] ss:$72 sps:$4 sm:$0xff]  }
  0x50   : > { %3705 = vmatpush1.bf16.msra.mxu1 %v15249_v57  ;;  %v17118_v57 = vld [vmem:[%s16839_s22 + $0xe8] ss:$16 sps:$4 sm:$0xff]  }
  0x51   : > { %3706 = vmatprep.subr.bf16.mxu1 %v15251_v58  ;;  %3852 = vmatmul.mubr.bf16.gmra.mrb[4].mxu0 %v16923_v62  ;;  %v15343_v58 = vld [vmem:[%s22945_s1 + $0x6cc] ss:$72 sps:$4 sm:$0xff]  }
  0x52   : > { %13287 = vmatprep.mubr.msk.bf16.mxu0 %vm3645_vm0, %v16926_v63  ;;  %4346 = vmatpush1.bf16.msra.mxu0 %v15392_v46  ;;  %v17215_v46 = vld [vmem:[%s16839_s22 + $0x124] ss:$16 sps:$4 sm:$0xff]  }
  0x53   : > { %4347 = vmatprep.subr.bf16.mxu0 %v15397_v47  ;;  %v15425_v47 = vld [vmem:[%s22945_s1 + $0xe20] ss:$72 sps:$4 sm:$0xff]  }
  0x54   : > { %3707 = vmatpush1.bf16.msra.mxu1 %v15255_v59  ;;  %v17124_v59 = vld [vmem:[%s16839_s22 + $0xc0] ss:$16 sps:$4 sm:$0xff]  }
  0x55   : > { %3942 = vmatprep.subr.bf16.mxu1 %v15265_v61  ;;  %v15401_v61 = vld [vmem:[%s22945_s1 + $0xb50] ss:$72 sps:$4 sm:$0xff]  }
  0x56   : > { %4348 = vmatpush1.bf16.msra.mxu0 %v15395_v52  ;;  %v15436_v52 = vld [vmem:[%s22945_s1 + $0xf44] ss:$72 sps:$4 sm:$0xff]  }
  0x57   : > { %3709 = vmatmul.mubr.bf16.vlgmr.msra.gmra.mrb[0].mxu1 %v16917_v60  ;;  %4349 = vmatprep.subr.bf16.mxu0 %v15403_v53  ;;  %v17235_v53 = vld [vmem:[%s16839_s22 + $0x120] ss:$16 sps:$4 sm:$0xff]  }
  0x58   : > { %3943 = vmatpush1.bf16.msra.mxu1 %v15263_v0  ;;  %3718 = vmatprep.mubr.bf16.mxu1 %v16932_v1  ;;  %v15406_v0 = vld [vmem:[%s22945_s1 + $0xbe4] ss:$72 sps:$4 sm:$0xff]  }
  0x59   : > { %3944 = vmatprep.subr.bf16.mxu1 %v15268_v2  ;;  %3862 = vmatmul.mubr.bf16.gmra.mrb[8].mxu0 %v16952_v6  ;;  %v17133_v2 = vld [vmem:[%s16839_s22 + $0xe4] ss:$16 sps:$4 sm:$0xff]  }
  0x5a   : > { %13288 = vmatprep.mubr.msk.bf16.mxu0 %vm3645_vm0, %v16958_v8  ;;  %4350 = vmatpush1.bf16.msra.mxu0 %v15401_v61  ;;  %v15365_v61 = vld [vmem:[%s22945_s1 + $0x908] ss:$72 sps:$4 sm:$0xff]  }
  0x5b   : > { %4351 = vmatprep.subr.bf16.mxu0 %v15406_v0  ;;  %v15457_v0 = vld [vmem:[%s22945_s1 + $0xb4] ss:$72 sps:$4 sm:$0xff]  }
  0x5c   : > { %3945 = vmatpush1.bf16.msra.mxu1 %v15266_v3  ;;  %v17136_v3 = vld [vmem:[%s16839_s22 + $0x10c] ss:$16 sps:$4 sm:$0xff]  }
  0x5d   : > { %3946 = vmatprep.subr.bf16.mxu1 %v15277_v5  ;;  %v15341_v5 = vld [vmem:[%s22945_s1 + $0x6c8] ss:$72 sps:$4 sm:$0xff]  }
  0x5f   : > { %3719 = vmatmul.mubr.bf16.gmra.mrb[4].mxu1 %v16946_v4 }
  0x60   : > { %3947 = vmatpush1.bf16.msra.mxu1 %v15275_v7  ;;  %3728 = vmatprep.mubr.bf16.mxu1 %v16961_v9  ;;  %v15352_v7 = vld [vmem:[%s22945_s1 + $0x75c] ss:$72 sps:$4 sm:$0xff]  }
  0x61   : > { %3948 = vmatprep.subr.bf16.mxu1 %v15284_v10  ;;  %3872 = vmatmul.mubr.bf16.gmra.mrb[12].mxu0 %v16978_v13  ;;  %v15404_v10 = vld [vmem:[%s22945_s1 + $0xbe0] ss:$72 sps:$4 sm:$0xff]  }
  0x62   : > { %13289 = vmatprep.mubr.msk.bf16.mxu0 %vm3645_vm0, %v16984_v15  ;;  %4352 = vmatpush1.bf16.msra.mxu0 %v15404_v10  ;;  %v15368_v10 = vld [vmem:[%s22945_s1 + $0x998] ss:$72 sps:$4 sm:$0xff]  }
  0x64   : > { %3949 = vmatpush1.bf16.msra.mxu1 %v15282_v11  ;;  %v15412_v11 = vld [vmem:[%s22945_s1 + $0xc74] ss:$72 sps:$4 sm:$0xff]  }
  0x65   : > { %3950 = vmatprep.subr.bf16.mxu1 %v15289_v12  ;;  %v17156_v12 = vld [vmem:[%s16839_s22 + $0x108] ss:$16 sps:$4 sm:$0xff]   ;;  %4353 = vmatprep.subr.bf16.mxu0 %v15412_v11 }
  0x66   : > { %v15371_v11 = vld [vmem:[%s22945_s1 + $0xa28] ss:$72 sps:$4 sm:$0xff]  }
  0x67   : > { %3729 = vmatmul.mubr.bf16.gmra.mrb[8].mxu1 %v16981_v14 }
  0x68   : > { %3951 = vmatpush1.bf16.msra.mxu1 %v15287_v16  ;;  %3738 = vmatprep.mubr.bf16.mxu1 %v16990_v17  ;;  %v15350_v16 = vld [vmem:[%s22945_s1 + $0x758] ss:$72 sps:$4 sm:$0xff]  }
  0x69   : > { %3952 = vmatprep.subr.bf16.mxu1 %v15298_v18  ;;  %3882 = vmatmul.mubr.bf16.gmra.mrb[16].mxu0 %v17007_v21  ;;  %v15355_v18 = vld [vmem:[%s22945_s1 + $0x7ec] ss:$72 sps:$4 sm:$0xff]  }
  0x6a   : > { %13290 = vmatprep.mubr.msk.bf16.mxu0 %vm3645_vm0, %v17013_v23 }
  0x6c   : > { %3953 = vmatpush1.bf16.msra.mxu1 %v15296_v19  ;;  %v17165_v19 = vld [vmem:[%s16839_s22 + $0xe0] ss:$16 sps:$4 sm:$0xff]  }
  0x6d   : > { %3954 = vmatprep.subr.bf16.mxu1 %v15301_v20  ;;  %v15410_v20 = vld [vmem:[%s22945_s1 + $0xc70] ss:$72 sps:$4 sm:$0xff]  }
  0x6e   : > { %4354 = vmatpush1.bf16.msra.mxu0 %v15410_v20  ;;  %v15470_v20 = vld [vmem:[%s22945_s1 + $0x260] ss:$72 sps:$4 sm:$0xff]  }
  0x6f   : > { %3739 = vmatmul.mubr.bf16.gmra.mrb[12].mxu1 %v17010_v22 }
  0x70   : > { %3748 = vmatprep.mubr.bf16.mxu1 %v17019_v25  ;;  %3955 = vmatpush1.bf16.msra.mxu1 %v15299_v24  ;;  %v15418_v24 = vld [vmem:[%s22945_s1 + $0xd04] ss:$72 sps:$4 sm:$0xff]  }
  0x71   : > { %3956 = vmatprep.subr.bf16.mxu1 %v15310_v26  ;;  %3892 = vmatmul.mubr.bf16.gmra.mrb[20].mxu0 %v17033_v28  ;;  %v17174_v26 = vld [vmem:[%s16839_s22 + $0x104] ss:$16 sps:$4 sm:$0xff]  }
  0x72   : > { %13291 = vmatprep.mubr.msk.bf16.mxu0 %vm3645_vm0, %v17054_v35  ;;  %4355 = vmatprep.subr.bf16.mxu0 %v15418_v24  ;;  %v15377_v24 = vld [vmem:[%s22945_s1 + $0xb48] ss:$72 sps:$4 sm:$0xff]  }
  0x73   : > { %4356 = vmatpush1.bf16.msra.mxu0 %v15416_v33  ;;  %v15391_v33 = vld [vmem:[%s22945_s1 + $0xc6c] ss:$72 sps:$4 sm:$0xff]  }
  0x74   : > { %3957 = vmatpush1.bf16.msra.mxu1 %v15308_v27  ;;  %v17177_v27 = vld [vmem:[%s16839_s22 + $0x12c] ss:$16 sps:$4 sm:$0xff]  }
  0x75   : > { %3958 = vmatprep.subr.bf16.mxu1 %v15319_v29  ;;  %v15353_v29 = vld [vmem:[%s22945_s1 + $0x7e8] ss:$72 sps:$4 sm:$0xff]  }
  0x77   : > { %3749 = vmatmul.mubr.bf16.gmra.mrb[16].mxu1 %v17039_v30 }
  0x78   : > { %3758 = vmatprep.mubr.bf16.mxu1 %v17045_v32  ;;  %3959 = vmatpush1.bf16.msra.mxu1 %v15317_v34  ;;  %v15421_v34 = vld [vmem:[%s22945_s1 + $0xd94] ss:$72 sps:$4 sm:$0xff]  }
  0x79   : > { %3960 = vmatprep.subr.bf16.mxu1 %v15322_v36  ;;  %3902 = vmatmul.mubr.bf16.gmra.mrb[24].mxu0 %v17077_v43  ;;  %v17197_v36 = vld [vmem:[%s16839_s22 + $0x128] ss:$16 sps:$4 sm:$0xff]  }
  0x7a   : > { %13292 = vmatprep.mubr.msk.bf16.mxu0 %vm3645_vm0, %v17095_v49  ;;  %4357 = vmatprep.subr.bf16.mxu0 %v15421_v34  ;;  %v15389_v34 = vld [vmem:[%s22945_s1 + $0xc68] ss:$72 sps:$4 sm:$0xff]  }
  0x7c   : > { %3961 = vmatpush1.bf16.msra.mxu1 %v15320_v40  ;;  %v15419_v40 = vld [vmem:[%s22945_s1 + $0xd90] ss:$72 sps:$4 sm:$0xff]  }
  0x7d   : > { %3962 = vmatprep.subr.bf16.mxu1 %v15331_v44  ;;  %v17212_v44 = vld [vmem:[%s16839_s22 + $0x100] ss:$16 sps:$4 sm:$0xff]   ;;  %4358 = vmatpush1.bf16.msra.mxu0 %v15419_v40 }
  0x7e   : > { %4359 = vmatprep.subr.bf16.mxu0 %v15427_v41  ;;  %v15491_v40 = vld [vmem:[%s22945_s1 + $0x4a0] ss:$72 sps:$4 sm:$0xff]   ;;  %v15415_v41 = vld [vmem:[%s22945_s1 + $0xe1c] ss:$72 sps:$4 sm:$0xff]  }
  0x7f   : > { %3759 = vmatmul.mubr.bf16.gmra.mrb[20].mxu1 %v17083_v45 }
  0x80   : > { %3768 = vmatprep.mubr.bf16.mxu1 %v17092_v48  ;;  %3963 = vmatpush1.bf16.msra.mxu1 %v15329_v50  ;;  %v15430_v50 = vld [vmem:[%s22945_s1 + $0xeb4] ss:$72 sps:$4 sm:$0xff]  }
  0x81   : > { %3964 = vmatprep.subr.bf16.mxu1 %v15338_v51  ;;  %3912 = vmatmul.mubr.bf16.gmra.mrb[28].mxu0 %v17118_v57  ;;  %v15428_v51 = vld [vmem:[%s22945_s1 + $0xeb0] ss:$72 sps:$4 sm:$0xff]  }
  0x82   : > { %13293 = vmatprep.mubr.msk.bf16.mxu0 %vm3645_vm0, %v17136_v3  ;;  %4360 = vmatpush1.bf16.msra.mxu0 %v15425_v47  ;;  %v15497_v47 = vld [vmem:[%s22945_s1 + $0x530] ss:$72 sps:$4 sm:$0xff]  }
  0x83   : > { %4361 = vmatprep.subr.bf16.mxu0 %v15430_v50  ;;  %v15413_v50 = vld [vmem:[%s22945_s1 + $0xe18] ss:$72 sps:$4 sm:$0xff]  }
  0x84   : > { %3965 = vmatpush1.bf16.msra.mxu1 %v15336_v54  ;;  %v15434_v54 = vld [vmem:[%s22945_s1 + $0xf40] ss:$72 sps:$4 sm:$0xff]  }
  0x85   : > { %3966 = vmatprep.subr.bf16.mxu1 %v15343_v58  ;;  %v15449_v58 = vld [vmem:[%s22945_s1 + $0x20] ss:$72 sps:$4 sm:$0xff]  }
  0x86   : > { %4362 = vmatpush1.bf16.msra.mxu0 %v15428_v51  ;;  %v15424_v51 = vld [vmem:[%s22945_s1 + $0xeac] ss:$72 sps:$4 sm:$0xff]  }
  0x87   : > { %3769 = vmatmul.mubr.bf16.gmra.mrb[24].mxu1 %v17124_v59  ;;  %4363 = vmatprep.subr.bf16.mxu0 %v15436_v52  ;;  %v15422_v52 = vld [vmem:[%s22945_s1 + $0xea8] ss:$72 sps:$4 sm:$0xff]  }
  0x88   : > { %3778 = vmatprep.mubr.bf16.mxu1 %v17133_v2  ;;  %3967 = vmatpush1.bf16.msra.mxu1 %v15341_v5  ;;  %v15370_v5 = vld [vmem:[%s22945_s1 + $0x99c] ss:$72 sps:$4 sm:$0xff]  }
  0x89   : > { %3968 = vmatprep.subr.bf16.mxu1 %v15352_v7  ;;  %3922 = vmatmul.mubr.bf16.gmra.mrb[32].mxu0 %v17156_v12  ;;  %v15460_v7 = vld [vmem:[%s22945_s1 + $0x144] ss:$72 sps:$4 sm:$0xff]  }
  0x8a   : > { %13294 = vmatprep.mubr.msk.bf16.mxu0 %vm3645_vm0, %v17177_v27  ;;  %4364 = vmatpush1.bf16.msra.mxu0 %v15434_v54  ;;  %v15509_v54 = vld [vmem:[%s22945_s1 + $0x650] ss:$72 sps:$4 sm:$0xff]  }
  0x8c   : > { %3969 = vmatpush1.bf16.msra.mxu1 %v15350_v16  ;;  %v15464_v16 = vld [vmem:[%s22945_s1 + $0x1d0] ss:$72 sps:$4 sm:$0xff]  }
  0x8d   : > { %3970 = vmatprep.subr.bf16.mxu1 %v15355_v18  ;;  %v15472_v18 = vld [vmem:[%s22945_s1 + $0x264] ss:$72 sps:$4 sm:$0xff]  }
  0x8f   : > { %3779 = vmatmul.mubr.bf16.gmra.mrb[28].mxu1 %v17165_v19 }
  0x90   : > { %3788 = vmatprep.mubr.bf16.mxu1 %v17174_v26  ;;  %3971 = vmatpush1.bf16.msra.mxu1 %v15353_v29  ;;  %v15476_v29 = vld [vmem:[%s22945_s1 + $0x2f0] ss:$72 sps:$4 sm:$0xff]  }
  0x91   : > { %3972 = vmatprep.subr.bf16.mxu1 %v15364_v31  ;;  %3932 = vmatmul.mubr.bf16.gmra.mrb[36].mxu0 %v17197_v36  ;;  %v15383_v31 = vld [vmem:[%s22945_s1 + $0xbd8] ss:$72 sps:$4 sm:$0xff]  }
  0x92   : > { %13305 = vmatprep.mubr.msk.bf16.mxu0 %vm3645_vm0, %v16857_v42  ;;  %v15451_v42 = vld [vmem:[%s22945_s1 + $0x24] ss:$72 sps:$4 sm:$0xff]  }
  0x93   : > { %4740 = vmatprep.subr.bf16.mxu0 %v15451_v42  ;;  %v15431_v42 = vld [vmem:[%s22945_s1 + $0xf38] ss:$72 sps:$4 sm:$0xff]  }
  0x94   : > { %3973 = vmatpush1.bf16.msra.mxu1 %v15362_v37  ;;  %v15485_v37 = vld [vmem:[%s22945_s1 + $0x410] ss:$72 sps:$4 sm:$0xff]  }
  0x95   : > { %4075 = vmatprep.subr.bf16.mxu1 %v15367_v38  ;;  %v15493_v38 = vld [vmem:[%s22945_s1 + $0x4a4] ss:$72 sps:$4 sm:$0xff]  }
  0x97   : > { %3789 = vmatmul.mubr.bf16.gmra.mrb[32].mxu1 %v17212_v44 }
  0x98   : > { %3798 = vmatprep.mubr.bf16.mxu1 %v17215_v46 }
  0x99   : > { %4374 = vmatmul.mubr.bf16.vlgmr.msra.gmra.mrb[40].mxu0 %v16899_v55  ;;  %v15373_v55 = vld [vmem:[%s22945_s1 + $0xa2c] ss:$72 sps:$4 sm:$0xff]  }
  0x9a   : > { %13306 = vmatprep.mubr.msk.bf16.mxu0 %vm3645_vm0, %v16902_v56  ;;  %4741 = vmatpush1.bf16.msra.mxu0 %v15449_v58  ;;  %v15458_v56 = vld [vmem:[%s22945_s1 + $0x140] ss:$72 sps:$4 sm:$0xff]   ;;  %v15439_v58 = vld [vmem:[%s22945_s1 + $0x14] ss:$72 sps:$4 sm:$0xff]  }
  0x9b   : > { %4742 = vmatprep.subr.bf16.mxu0 %v15457_v0  ;;  %v17496_v0 = vld [vmem:[%s16839_s22 + $0x8] ss:$16 sps:$4 sm:$0xff]  }
  0x9f   : > { %3799 = vmatmul.mubr.bf16.gmra.mrb[36].mxu1 %v17235_v53 }
  0xa0   : > { %3974 = vmatprep.mubr.bf16.mxu1 %v16848_v39  ;;  %v15455_v39 = vld [vmem:[%s22945_s1 + $0xb0] ss:$72 sps:$4 sm:$0xff]  }
  0xa1   : > { %4743 = vmatpush1.bf16.msra.mxu0 %v15455_v39  ;;  %v17503_v39 = vld [vmem:[%s16839_s22 + $0x2c] ss:$16 sps:$4 sm:$0xff]  }
  0xa2   : > { %4744 = vmatprep.subr.bf16.mxu0 %v15460_v7  ;;  %4384 = vmatmul.mubr.bf16.gmra.mrb[44].mxu0 %v16923_v62  ;;  %v15374_v62 = vld [vmem:[%s22945_s1 + $0xab8] ss:$72 sps:$4 sm:$0xff]   ;;  %v15445_v7 = vld [vmem:[%s22945_s1 + $0x134] ss:$72 sps:$4 sm:$0xff]  }
  0xa3   : > { %13307 = vmatprep.mubr.msk.bf16.mxu0 %vm3645_vm0, %v16926_v63  ;;  %v15379_v63 = vld [vmem:[%s22945_s1 + $0xb4c] ss:$72 sps:$4 sm:$0xff]  }
  0xa5   : > { %4745 = vmatpush1.bf16.msra.mxu0 %v15458_v56  ;;  %v15443_v56 = vld [vmem:[%s22945_s1 + $0x130] ss:$72 sps:$4 sm:$0xff]  }
  0xa7   : > { %3975 = vmatmul.mubr.bf16.vlgmr.msra.gmra.mrb[40].mxu1 %v16917_v60  ;;  %v15466_v60 = vld [vmem:[%s22945_s1 + $0x1d4] ss:$72 sps:$4 sm:$0xff]  }
  0xa8   : > { %4076 = vmatpush1.bf16.msra.mxu1 %v15365_v61  ;;  %3984 = vmatprep.mubr.bf16.mxu1 %v16932_v1  ;;  %v15376_v1 = vld [vmem:[%s22945_s1 + $0xabc] ss:$72 sps:$4 sm:$0xff]  }
  0xa9   : > { %4077 = vmatprep.subr.bf16.mxu1 %v15370_v5  ;;  %4746 = vmatprep.subr.bf16.mxu0 %v15466_v60  ;;  %v15526_v61 = vld [vmem:[%s22945_s1 + $0x804] ss:$72 sps:$4 sm:$0xff]   ;;  %v15440_v5 = vld [vmem:[%s22945_s1 + $0xa0] ss:$72 sps:$4 sm:$0xff]  }
  0xaa   : > { %4747 = vmatpush1.bf16.msra.mxu0 %v15464_v16  ;;  %v15448_v60 = vld [vmem:[%s22945_s1 + $0x1c4] ss:$72 sps:$4 sm:$0xff]   ;;  %v15569_v16 = vld [vmem:[%s22945_s1 + $0xad0] ss:$72 sps:$4 sm:$0xff]  }
  0xab   : > { %4748 = vmatprep.subr.bf16.mxu0 %v15472_v18  ;;  %4394 = vmatmul.mubr.bf16.gmra.mrb[48].mxu0 %v16952_v6  ;;  %v15484_v6 = vld [vmem:[%s22945_s1 + $0x384] ss:$72 sps:$4 sm:$0xff]   ;;  %v17534_v18 = vld [vmem:[%s16839_s22 + $0x28] ss:$16 sps:$4 sm:$0xff]  }
  0xac   : > { %4078 = vmatpush1.bf16.msra.mxu1 %v15368_v10  ;;  %13308 = vmatprep.mubr.msk.bf16.mxu0 %vm3645_vm0, %v16958_v8  ;;  %v15482_v8 = vld [vmem:[%s22945_s1 + $0x380] ss:$72 sps:$4 sm:$0xff]  }
  0xad   : > { %4079 = vmatprep.subr.bf16.mxu1 %v15373_v55  ;;  %v15566_v10 = vld [vmem:[%s22945_s1 + $0xa40] ss:$72 sps:$4 sm:$0xff]   ;;  %v15571_v55 = vld [vmem:[%s22945_s1 + $0xad4] ss:$72 sps:$4 sm:$0xff]  }
  0xae   : > { %4749 = vmatpush1.bf16.msra.mxu0 %v15470_v20  ;;  %v15577_v20 = vld [vmem:[%s22945_s1 + $0xb64] ss:$72 sps:$4 sm:$0xff]  }
  0xaf   : > { %3985 = vmatmul.mubr.bf16.gmra.mrb[44].mxu1 %v16946_v4  ;;  %v15478_v4 = vld [vmem:[%s22945_s1 + $0x2f4] ss:$72 sps:$4 sm:$0xff]  }
  0xb0   : > { %3994 = vmatprep.mubr.bf16.mxu1 %v16961_v9  ;;  %4080 = vmatpush1.bf16.msra.mxu1 %v15371_v11  ;;  %v15385_v9 = vld [vmem:[%s22945_s1 + $0xbdc] ss:$72 sps:$4 sm:$0xff]   ;;  %v17523_v11 = vld [vmem:[%s16839_s22 + $0x20] ss:$16 sps:$4 sm:$0xff]  }
  0xb1   : > { %4081 = vmatprep.subr.bf16.mxu1 %v15376_v1  ;;  %4750 = vmatprep.subr.bf16.mxu0 %v15478_v4  ;;  %v17527_v1 = vld [vmem:[%s16839_s22 + $0x44] ss:$16 sps:$4 sm:$0xff]   ;;  %v15575_v4 = vld [vmem:[%s22945_s1 + $0xb60] ss:$72 sps:$4 sm:$0xff]  }
  0xb2   : > { %4751 = vmatpush1.bf16.msra.mxu0 %v15476_v29  ;;  %v15452_v29 = vld [vmem:[%s22945_s1 + $0x250] ss:$72 sps:$4 sm:$0xff]  }
  0xb3   : > { %4752 = vmatprep.subr.bf16.mxu0 %v15484_v6  ;;  %4404 = vmatmul.mubr.bf16.gmra.mrb[52].mxu0 %v16978_v13  ;;  %v15398_v13 = vld [vmem:[%s22945_s1 + $0xcf8] ss:$72 sps:$4 sm:$0xff]   ;;  %v17568_v6 = vld [vmem:[%s16839_s22 + $0x64] ss:$16 sps:$4 sm:$0xff]  }
  0xb4   : > { %4082 = vmatpush1.bf16.msra.mxu1 %v15374_v62  ;;  %13309 = vmatprep.mubr.msk.bf16.mxu0 %vm3645_vm0, %v16984_v15  ;;  %v15409_v15 = vld [vmem:[%s22945_s1 + $0xd8c] ss:$72 sps:$4 sm:$0xff]   ;;  %v15446_v62 = vld [vmem:[%s22945_s1 + $0x1c0] ss:$72 sps:$4 sm:$0xff]  }
  0xb5   : > { %4083 = vmatprep.subr.bf16.mxu1 %v15379_v63  ;;  %v15454_v63 = vld [vmem:[%s22945_s1 + $0x254] ss:$72 sps:$4 sm:$0xff]  }
  0xb6   : > { %4753 = vmatpush1.bf16.msra.mxu0 %v15482_v8  ;;  %v15581_v8 = vld [vmem:[%s22945_s1 + $0xbf0] ss:$72 sps:$4 sm:$0xff]  }
  0xb7   : > { %3995 = vmatmul.mubr.bf16.gmra.mrb[48].mxu1 %v16981_v14  ;;  %v15487_v14 = vld [vmem:[%s22945_s1 + $0x414] ss:$72 sps:$4 sm:$0xff]  }
  0xb8   : > { %4004 = vmatprep.mubr.bf16.mxu1 %v16990_v17  ;;  %4084 = vmatpush1.bf16.msra.mxu1 %v15377_v24  ;;  %v15400_v17 = vld [vmem:[%s22945_s1 + $0xcfc] ss:$72 sps:$4 sm:$0xff]  }
  0xb9   : > { %4085 = vmatprep.subr.bf16.mxu1 %v15385_v9  ;;  %4754 = vmatprep.subr.bf16.mxu0 %v15487_v14  ;;  %v17547_v24 = vld [vmem:[%s16839_s22 + $0x4c] ss:$16 sps:$4 sm:$0xff]   ;;  %v17575_v14 = vld [vmem:[%s16839_s22 + $0x48] ss:$16 sps:$4 sm:$0xff]  }
  0xba   : > { %4755 = vmatpush1.bf16.msra.mxu0 %v15485_v37  ;;  %v15583_v9 = vld [vmem:[%s22945_s1 + $0xbf4] ss:$72 sps:$4 sm:$0xff]   ;;  %v15461_v37 = vld [vmem:[%s22945_s1 + $0x2e0] ss:$72 sps:$4 sm:$0xff]  }
  0xbb   : > { %4756 = vmatprep.subr.bf16.mxu0 %v15493_v38  ;;  %4414 = vmatmul.mubr.bf16.gmra.mrb[56].mxu0 %v17007_v21  ;;  %v15505_v21 = vld [vmem:[%s22945_s1 + $0x5c4] ss:$72 sps:$4 sm:$0xff]   ;;  %v15469_v38 = vld [vmem:[%s22945_s1 + $0x374] ss:$72 sps:$4 sm:$0xff]  }
  0xbc   : > { %4086 = vmatpush1.bf16.msra.mxu1 %v15383_v31  ;;  %13310 = vmatprep.mubr.msk.bf16.mxu0 %vm3645_vm0, %v17013_v23  ;;  %v15503_v23 = vld [vmem:[%s22945_s1 + $0x5c0] ss:$72 sps:$4 sm:$0xff]   ;;  %v15463_v31 = vld [vmem:[%s22945_s1 + $0x2e4] ss:$72 sps:$4 sm:$0xff]  }
  0xbd   : > { %4087 = vmatprep.subr.bf16.mxu1 %v15391_v33  ;;  %v17564_v33 = vld [vmem:[%s16839_s22 + $0x40] ss:$16 sps:$4 sm:$0xff]  }
  0xbe   : > { %4757 = vmatpush1.bf16.msra.mxu0 %v15491_v40  ;;  %v15467_v40 = vld [vmem:[%s22945_s1 + $0x370] ss:$72 sps:$4 sm:$0xff]  }
  0xbf   : > { %4005 = vmatmul.mubr.bf16.gmra.mrb[52].mxu1 %v17010_v22  ;;  %v15407_v22 = vld [vmem:[%s22945_s1 + $0xd88] ss:$72 sps:$4 sm:$0xff]  }
  0xc0   : > { %4014 = vmatprep.mubr.bf16.mxu1 %v17019_v25  ;;  %4088 = vmatpush1.bf16.msra.mxu1 %v15389_v34  ;;  %v15499_v25 = vld [vmem:[%s22945_s1 + $0x534] ss:$72 sps:$4 sm:$0xff]   ;;  %v15589_v34 = vld [vmem:[%s22945_s1 + $0xc84] ss:$72 sps:$4 sm:$0xff]  }
  0xc1   : > { %4089 = vmatprep.subr.bf16.mxu1 %v15400_v17  ;;  %4758 = vmatprep.subr.bf16.mxu0 %v15499_v25  ;;  %v17582_v17 = vld [vmem:[%s16839_s22 + $0x6c] ss:$16 sps:$4 sm:$0xff]   ;;  %v17605_v25 = vld [vmem:[%s16839_s22 + $0x60] ss:$16 sps:$4 sm:$0xff]  }
  0xc2   : > { %4759 = vmatpush1.bf16.msra.mxu0 %v15497_v47  ;;  %v15593_v47 = vld [vmem:[%s22945_s1 + $0xd10] ss:$72 sps:$4 sm:$0xff]  }
  0xc3   : > { %4760 = vmatprep.subr.bf16.mxu0 %v15505_v21  ;;  %4424 = vmatmul.mubr.bf16.gmra.mrb[60].mxu0 %v17033_v28  ;;  %v15514_v28 = vld [vmem:[%s22945_s1 + $0x6e4] ss:$72 sps:$4 sm:$0xff]   ;;  %v15481_v21 = vld [vmem:[%s22945_s1 + $0x494] ss:$72 sps:$4 sm:$0xff]  }
  0xc4   : > { %4090 = vmatpush1.bf16.msra.mxu1 %v15398_v13  ;;  %13311 = vmatprep.mubr.msk.bf16.mxu0 %vm3645_vm0, %v17054_v35  ;;  %v15512_v35 = vld [vmem:[%s22945_s1 + $0x6e0] ss:$72 sps:$4 sm:$0xff]  }
  0xc5   : > { %4091 = vmatprep.subr.bf16.mxu1 %v15409_v15  ;;  %v15587_v13 = vld [vmem:[%s22945_s1 + $0xc80] ss:$72 sps:$4 sm:$0xff]   ;;  %v15595_v15 = vld [vmem:[%s22945_s1 + $0xd14] ss:$72 sps:$4 sm:$0xff]  }
  0xc6   : > { %4761 = vmatpush1.bf16.msra.mxu0 %v15503_v23  ;;  %v15598_v23 = vld [vmem:[%s22945_s1 + $0xda4] ss:$72 sps:$4 sm:$0xff]  }
  0xc7   : > { %4015 = vmatmul.mubr.bf16.gmra.mrb[56].mxu1 %v17039_v30  ;;  %v15511_v30 = vld [vmem:[%s22945_s1 + $0x654] ss:$72 sps:$4 sm:$0xff]  }
  0xc8   : > { %4024 = vmatprep.mubr.bf16.mxu1 %v17045_v32  ;;  %4092 = vmatpush1.bf16.msra.mxu1 %v15407_v22  ;;  %v15433_v32 = vld [vmem:[%s22945_s1 + $0xf3c] ss:$72 sps:$4 sm:$0xff]  }
  0xc9   : > { %4093 = vmatprep.subr.bf16.mxu1 %v15415_v41  ;;  %4762 = vmatprep.subr.bf16.mxu0 %v15511_v30  ;;  %v15475_v22 = vld [vmem:[%s22945_s1 + $0x404] ss:$72 sps:$4 sm:$0xff]  }
  0xca   : > { %4763 = vmatpush1.bf16.msra.mxu0 %v15509_v54  ;;  %v17609_v41 = vld [vmem:[%s16839_s22 + $0x84] ss:$16 sps:$4 sm:$0xff]   ;;  %v17629_v30 = vld [vmem:[%s16839_s22 + $0x8c] ss:$16 sps:$4 sm:$0xff]   ;;  %v15479_v54 = vld [vmem:[%s22945_s1 + $0x490] ss:$72 sps:$4 sm:$0xff]  }
  0xcb   : > { %4764 = vmatprep.subr.bf16.mxu0 %v15514_v28  ;;  %4434 = vmatmul.mubr.bf16.gmra.mrb[64].mxu0 %v17077_v43  ;;  %v15524_v43 = vld [vmem:[%s22945_s1 + $0x800] ss:$72 sps:$4 sm:$0xff]   ;;  %v15602_v28 = vld [vmem:[%s22945_s1 + $0xe30] ss:$72 sps:$4 sm:$0xff]  }
  0xcc   : > { %4094 = vmatpush1.bf16.msra.mxu1 %v15413_v50  ;;  %13312 = vmatprep.mubr.msk.bf16.mxu0 %vm3645_vm0, %v17095_v49  ;;  %v15532_v49 = vld [vmem:[%s22945_s1 + $0x894] ss:$72 sps:$4 sm:$0xff]   ;;  %v17616_v50 = vld [vmem:[%s16839_s22 + $0x68] ss:$16 sps:$4 sm:$0xff]  }
  0xcd   : > { %4095 = vmatprep.subr.bf16.mxu1 %v15424_v51  ;;  %v15473_v51 = vld [vmem:[%s22945_s1 + $0x400] ss:$72 sps:$4 sm:$0xff]  }
  0xce   : > { %4765 = vmatpush1.bf16.msra.mxu0 %v15512_v35  ;;  %v17653_v35 = vld [vmem:[%s16839_s22 + $0xa4] ss:$16 sps:$4 sm:$0xff]  }
  0xcf   : > { %4025 = vmatmul.mubr.bf16.gmra.mrb[60].mxu1 %v17083_v45  ;;  %v15520_v45 = vld [vmem:[%s22945_s1 + $0x774] ss:$72 sps:$4 sm:$0xff]  }
  0xd0   : > { %4034 = vmatprep.mubr.bf16.mxu1 %v17092_v48  ;;  %4096 = vmatpush1.bf16.msra.mxu1 %v15422_v52  ;;  %v15518_v48 = vld [vmem:[%s22945_s1 + $0x770] ss:$72 sps:$4 sm:$0xff]   ;;  %v15596_v52 = vld [vmem:[%s22945_s1 + $0xda0] ss:$72 sps:$4 sm:$0xff]  }
  0xd1   : > { %4097 = vmatprep.subr.bf16.mxu1 %v15433_v32  ;;  %4766 = vmatprep.subr.bf16.mxu0 %v15520_v45  ;;  %v15604_v32 = vld [vmem:[%s22945_s1 + $0xe34] ss:$72 sps:$4 sm:$0xff]   ;;  %v17657_v45 = vld [vmem:[%s16839_s22 + $0x88] ss:$16 sps:$4 sm:$0xff]  }
  0xd2   : > { %4767 = vmatpush1.bf16.msra.mxu0 %v15518_v48  ;;  %v15488_v48 = vld [vmem:[%s22945_s1 + $0x520] ss:$72 sps:$4 sm:$0xff]  }
  0xd3   : > { %4768 = vmatprep.subr.bf16.mxu0 %v15526_v61  ;;  %4444 = vmatmul.mubr.bf16.gmra.mrb[68].mxu0 %v17118_v57  ;;  %v15556_v57 = vld [vmem:[%s22945_s1 + $0x924] ss:$72 sps:$4 sm:$0xff]  }
  0xd4   : > { %4098 = vmatpush1.bf16.msra.mxu1 %v15431_v42  ;;  %13313 = vmatprep.mubr.msk.bf16.mxu0 %vm3645_vm0, %v17136_v3  ;;  %v17465_v3 = vld [vmem:[%s16839_s22 + $0xc] ss:$16 sps:$4 sm:$0xff]  }
  0xd5   : > { %4208 = vmatprep.subr.bf16.mxu1 %v15439_v58  ;;  %v15490_v42 = vld [vmem:[%s22945_s1 + $0x524] ss:$72 sps:$4 sm:$0xff]   ;;  %v17646_v58 = vld [vmem:[%s16839_s22 + $0x80] ss:$16 sps:$4 sm:$0xff]  }
  0xd6   : > { %4769 = vmatpush1.bf16.msra.mxu0 %v15524_v43  ;;  %v15610_v61 = vld [vmem:[%s22945_s1 + $0xec4] ss:$72 sps:$4 sm:$0xff]  }
  0xd7   : > { %4035 = vmatmul.mubr.bf16.gmra.mrb[64].mxu1 %v17124_v59  ;;  %v15530_v59 = vld [vmem:[%s22945_s1 + $0x890] ss:$72 sps:$4 sm:$0xff]   ;;  %4770 = vmatprep.subr.bf16.mxu0 %v15532_v49  ;;  %v17667_v43 = vld [vmem:[%s16839_s22 + $0xac] ss:$16 sps:$4 sm:$0xff]  }
  0xd8   : > { %4044 = vmatprep.mubr.bf16.mxu1 %v17133_v2  ;;  %v17460_v2 = vld [vmem:[%s16839_s22 + $0x4] ss:$16 sps:$4 sm:$0xff]  }
  0xd9   : > { %v15496_v49 = vld [vmem:[%s22945_s1 + $0x5b4] ss:$72 sps:$4 sm:$0xff]  }
  0xda   : > { %4771 = vmatpush1.bf16.msra.mxu0 %v15530_v59  ;;  %v15608_v59 = vld [vmem:[%s22945_s1 + $0xec0] ss:$72 sps:$4 sm:$0xff]  }
  0xdb   : > { %4454 = vmatmul.mubr.bf16.gmra.mrb[72].mxu0 %v17156_v12  ;;  %4873 = vmatprep.subr.bf16.mxu0 %v15556_v57  ;;  %v15554_v12 = vld [vmem:[%s22945_s1 + $0x920] ss:$72 sps:$4 sm:$0xff]   ;;  %v15616_v57 = vld [vmem:[%s22945_s1 + $0xf54] ss:$72 sps:$4 sm:$0xff]  }
  0xdc   : > { %13314 = vmatprep.mubr.msk.bf16.mxu0 %vm3645_vm0, %v17177_v27  ;;  %v17479_v27 = vld [vmem:[%s16839_s22] ss:$16 sps:$4 sm:$0xff]  }
  0xdf   : > { %4045 = vmatmul.mubr.bf16.gmra.mrb[68].mxu1 %v17165_v19  ;;  %v15562_v19 = vld [vmem:[%s22945_s1 + $0x9b4] ss:$72 sps:$4 sm:$0xff]  }
  0xe0   : > { %4054 = vmatprep.mubr.bf16.mxu1 %v17174_v26  ;;  %v15437_v26 = vld [vmem:[%s22945_s1 + $0x10] ss:$72 sps:$4 sm:$0xff]  }
  0xe3   : > { %4464 = vmatmul.mubr.bf16.gmra.mrb[76].mxu0 %v17197_v36  ;;  %v15442_v36 = vld [vmem:[%s22945_s1 + $0xa4] ss:$72 sps:$4 sm:$0xff]  }
  0xe4   : > { %4772 = vmatprep.mubr.bf16.mxu0 %v17460_v2 }
  0xe7   : > { %4055 = vmatmul.mubr.bf16.gmra.mrb[72].mxu1 %v17212_v44  ;;  %v17486_v44 = vld [vmem:[%s16839_s22 + $0x24] ss:$16 sps:$4 sm:$0xff]  }
  0xe8   : > { %4064 = vmatprep.mubr.bf16.mxu1 %v17215_v46  ;;  %v15560_v46 = vld [vmem:[%s22945_s1 + $0x9b0] ss:$72 sps:$4 sm:$0xff]  }
  0xeb   : > { %4773 = vmatmul.mubr.bf16.vlgmr.msra.gmra.mrb[80].mxu0 %v17479_v27 }
  0xec   : > { %4782 = vmatprep.mubr.bf16.mxu0 %v17486_v44  ;;  %4874 = vmatpush1.bf16.msra.mxu0 %v15554_v12  ;;  %v15494_v12 = vld [vmem:[%s22945_s1 + $0x5b0] ss:$72 sps:$4 sm:$0xff]  }
  0xed   : > { %4875 = vmatprep.subr.bf16.mxu0 %v15562_v19  ;;  %v15502_v19 = vld [vmem:[%s22945_s1 + $0x644] ss:$72 sps:$4 sm:$0xff]  }
  0xef   : > { %4065 = vmatmul.mubr.bf16.gmra.mrb[76].mxu1 %v17235_v53  ;;  %v15568_v53 = vld [vmem:[%s22945_s1 + $0xa44] ss:$72 sps:$4 sm:$0xff]  }
  0xf0   : > { %13295 = vmatprep.mubr.msk.bf16.mxu1 %vm3645_vm0, %v17465_v3  ;;  %4876 = vmatpush1.bf16.msra.mxu0 %v15560_v46  ;;  %v17694_v46 = vld [vmem:[%s16839_s22 + $0xc4] ss:$16 sps:$4 sm:$0xff]  }
  0xf1   : > { %4877 = vmatprep.subr.bf16.mxu0 %v15568_v53  ;;  %v17698_v53 = vld [vmem:[%s16839_s22 + $0xa8] ss:$16 sps:$4 sm:$0xff]  }
  0xf3   : > { %4783 = vmatmul.mubr.bf16.gmra.mrb[84].mxu0 %v17523_v11 }
  0xf4   : > { %4792 = vmatprep.mubr.bf16.mxu0 %v17527_v1  ;;  %4878 = vmatpush1.bf16.msra.mxu0 %v15566_v10  ;;  %v17708_v10 = vld [vmem:[%s16839_s22 + $0xcc] ss:$16 sps:$4 sm:$0xff]  }
  0xf5   : > { %4879 = vmatprep.subr.bf16.mxu0 %v15571_v55 }
  0xf7   : > { %4108 = vmatmul.mubr.bf16.vlgmr.msra.gmra.mrb[40].mxu1 %v17496_v0 }
  0xf8   : > { %4209 = vmatpush1.bf16.msra.mxu1 %v15437_v26  ;;  %13296 = vmatprep.mubr.msk.bf16.mxu1 %vm3645_vm0, %v17503_v39  ;;  %v17687_v26 = vld [vmem:[%s16839_s22 + $0xa0] ss:$16 sps:$4 sm:$0xff]  }
  0xf9   : > { %4210 = vmatprep.subr.bf16.mxu1 %v15442_v36  ;;  %4880 = vmatpush1.bf16.msra.mxu0 %v15569_v16  ;;  %v15614_v36 = vld [vmem:[%s22945_s1 + $0xf50] ss:$72 sps:$4 sm:$0xff]  }
  0xfa   : > { %4881 = vmatprep.subr.bf16.mxu0 %v15577_v20  ;;  %v15628_v20 = vld [vmem:[%s22945_s1 + $0x34] ss:$72 sps:$4 sm:$0xff]  }
  0xfb   : > { %4793 = vmatmul.mubr.bf16.gmra.mrb[88].mxu0 %v17564_v33 }
  0xfc   : > { %4211 = vmatpush1.bf16.msra.mxu1 %v15440_v5  ;;  %4802 = vmatprep.mubr.bf16.mxu0 %v17568_v6  ;;  %v15500_v5 = vld [vmem:[%s22945_s1 + $0x640] ss:$72 sps:$4 sm:$0xff]  }
  0xfd   : > { %4212 = vmatprep.subr.bf16.mxu1 %v15445_v7  ;;  %4882 = vmatpush1.bf16.msra.mxu0 %v15575_v4  ;;  %v15508_v7 = vld [vmem:[%s22945_s1 + $0x6d4] ss:$72 sps:$4 sm:$0xff]   ;;  %v15517_v4 = vld [vmem:[%s22945_s1 + $0x764] ss:$72 sps:$4 sm:$0xff]  }
  0xfe   : > { %4883 = vmatprep.subr.bf16.mxu0 %v15583_v9  ;;  %v17726_v9 = vld [vmem:[%s16839_s22 + $0xe4] ss:$16 sps:$4 sm:$0xff]  }
  0xff   : > { %4118 = vmatmul.mubr.bf16.gmra.mrb[44].mxu1 %v17534_v18 }
 0x100   : > { %4213 = vmatpush1.bf16.msra.mxu1 %v15443_v56  ;;  %13297 = vmatprep.mubr.msk.bf16.mxu1 %vm3645_vm0, %v17547_v24 }
 0x101   : > { %4214 = vmatprep.subr.bf16.mxu1 %v15448_v60  ;;  %4884 = vmatpush1.bf16.msra.mxu0 %v15581_v8  ;;  %v15506_v60 = vld [vmem:[%s22945_s1 + $0x6d0] ss:$72 sps:$4 sm:$0xff]   ;;  %v17737_v8 = vld [vmem:[%s16839_s22 + $0xec] ss:$16 sps:$4 sm:$0xff]  }
 0x102   : > { %4885 = vmatprep.subr.bf16.mxu0 %v15589_v34  ;;  %v15523_v34 = vld [vmem:[%s22945_s1 + $0x7f4] ss:$72 sps:$4 sm:$0xff]  }
 0x103   : > { %4803 = vmatmul.mubr.bf16.gmra.mrb[92].mxu0 %v17605_v25 }
 0x104   : > { %4215 = vmatpush1.bf16.msra.mxu1 %v15446_v62  ;;  %4812 = vmatprep.mubr.bf16.mxu0 %v17609_v41 }
 0x105   : > { %4216 = vmatprep.subr.bf16.mxu1 %v15454_v63  ;;  %4886 = vmatpush1.bf16.msra.mxu0 %v15587_v13  ;;  %v17716_v63 = vld [vmem:[%s16839_s22 + $0xc0] ss:$16 sps:$4 sm:$0xff]  }
 0x106   : > { %4887 = vmatprep.subr.bf16.mxu0 %v15595_v15 }
 0x107   : > { %4128 = vmatmul.mubr.bf16.gmra.mrb[48].mxu1 %v17575_v14 }
 0x108   : > { %4217 = vmatpush1.bf16.msra.mxu1 %v15452_v29  ;;  %13298 = vmatprep.mubr.msk.bf16.mxu1 %vm3645_vm0, %v17582_v17  ;;  %v17730_v29 = vld [vmem:[%s16839_s22 + $0xc8] ss:$16 sps:$4 sm:$0xff]  }
 0x109   : > { %4218 = vmatprep.subr.bf16.mxu1 %v15463_v31  ;;  %4888 = vmatpush1.bf16.msra.mxu0 %v15593_v47  ;;  %v15515_v31 = vld [vmem:[%s22945_s1 + $0x760] ss:$72 sps:$4 sm:$0xff]  }
 0x10a   : > { %4889 = vmatprep.subr.bf16.mxu0 %v15598_v23  ;;  %v17750_v23 = vld [vmem:[%s16839_s22 + $0xe0] ss:$16 sps:$4 sm:$0xff]  }
 0x10b   : > { %4813 = vmatmul.mubr.bf16.gmra.mrb[96].mxu0 %v17646_v58 }
 0x10c   : > { %4219 = vmatpush1.bf16.msra.mxu1 %v15461_v37  ;;  %4822 = vmatprep.mubr.bf16.mxu0 %v17653_v35 }
 0x10d   : > { %4220 = vmatprep.subr.bf16.mxu1 %v15469_v38  ;;  %4890 = vmatpush1.bf16.msra.mxu0 %v15596_v52 }
 0x10e   : > { %4891 = vmatprep.subr.bf16.mxu0 %v15604_v32 }
 0x10f   : > { %4138 = vmatmul.mubr.bf16.gmra.mrb[52].mxu1 %v17616_v50 }
 0x110   : > { %13299 = vmatprep.mubr.msk.bf16.mxu1 %vm3645_vm0, %v17629_v30  ;;  %4221 = vmatpush1.bf16.msra.mxu1 %v15467_v40 }
 0x111   : > { %4222 = vmatprep.subr.bf16.mxu1 %v15475_v22  ;;  %4892 = vmatpush1.bf16.msra.mxu0 %v15602_v28 }
 0x112   : > { %4893 = vmatprep.subr.bf16.mxu0 %v15610_v61  ;;  %v17767_v61 = vld [vmem:[%s16839_s22 + $0xe8] ss:$16 sps:$4 sm:$0xff]  }
 0x113   : > { %4823 = vmatmul.mubr.bf16.gmra.mrb[100].mxu0 %v17687_v26 }
 0x114   : > { %4223 = vmatpush1.bf16.msra.mxu1 %v15473_v51  ;;  %4832 = vmatprep.mubr.bf16.mxu0 %v17694_v46 }
 0x115   : > { %4224 = vmatprep.subr.bf16.mxu1 %v15481_v21  ;;  %4894 = vmatpush1.bf16.msra.mxu0 %v15608_v59  ;;  %v15521_v21 = vld [vmem:[%s22945_s1 + $0x7f0] ss:$72 sps:$4 sm:$0xff]   ;;  %v17774_v59 = vld [vmem:[%s16839_s22 + $0x10c] ss:$16 sps:$4 sm:$0xff]  }
 0x116   : > { %4895 = vmatprep.subr.bf16.mxu0 %v15616_v57  ;;  %v15535_v57 = vld [vmem:[%s22945_s1 + $0x1c] ss:$72 sps:$4 sm:$0xff]  }
 0x117   : > { %4148 = vmatmul.mubr.bf16.gmra.mrb[56].mxu1 %v17657_v45 }
 0x118   : > { %13300 = vmatprep.mubr.msk.bf16.mxu1 %vm3645_vm0, %v17667_v43  ;;  %4225 = vmatpush1.bf16.msra.mxu1 %v15479_v54  ;;  %v15529_v54 = vld [vmem:[%s22945_s1 + $0x884] ss:$72 sps:$4 sm:$0xff]  }
 0x119   : > { %4226 = vmatprep.subr.bf16.mxu1 %v15490_v42  ;;  %4896 = vmatpush1.bf16.msra.mxu0 %v15614_v36  ;;  %v17759_v42 = vld [vmem:[%s16839_s22 + $0x104] ss:$16 sps:$4 sm:$0xff]  }
 0x11a   : > { %5272 = vmatprep.subr.bf16.mxu0 %v15628_v20 }
 0x11b   : > { %4833 = vmatmul.mubr.bf16.gmra.mrb[104].mxu0 %v17716_v63 }
 0x11c   : > { %4227 = vmatpush1.bf16.msra.mxu1 %v15488_v48  ;;  %v3843_v55 = vpop.f32.mrb[0].mxu0  ;;  %4842 = vmatprep.mubr.bf16.mxu0 %v17726_v9 }
 0x11d   : > { %4228 = vmatprep.subr.bf16.mxu1 %v15496_v49  ;;  %v3845_v56 = vpop.f32.mrb[1].mxu0  ;;  %v15527_v49 = vld [vmem:[%s22945_s1 + $0x880] ss:$72 sps:$4 sm:$0xff]  }
 0x11e   : > { %v3847_v16 = vpop.f32.mrb[2].mxu0 }
 0x11f   : > { %4158 = vmatmul.mubr.bf16.gmra.mrb[60].mxu1 %v17698_v53  ;;  %v3849_v62 = vpop.f32.mrb[3].mxu0 }
 0x120   : > { %13301 = vmatprep.mubr.msk.bf16.mxu1 %vm3645_vm0, %v17708_v10  ;;  %4229 = vmatpush1.bf16.msra.mxu1 %v15494_v12 }
 0x121   : > { %4230 = vmatprep.subr.bf16.mxu1 %v15502_v19 }
 0x123   : > { %4843 = vmatmul.mubr.bf16.gmra.mrb[108].mxu0 %v17750_v23 }
 0x124   : > { %4231 = vmatpush1.bf16.msra.mxu1 %v15500_v5  ;;  %v3853_v37 = vpop.f32.mrb[4].mxu0  ;;  %4852 = vmatprep.mubr.bf16.mxu0 %v17759_v42 }
 0x125   : > { %4232 = vmatprep.subr.bf16.mxu1 %v15508_v7  ;;  %v3855_v13 = vpop.f32.mrb[5].mxu0 }
 0x126   : > { %v3857_v40 = vpop.f32.mrb[6].mxu0 }
 0x127   : > { %4168 = vmatmul.mubr.bf16.gmra.mrb[64].mxu1 %v17730_v29  ;;  %v3859_v51 = vpop.f32.mrb[7].mxu0 }
 0x128   : > { %13302 = vmatprep.mubr.msk.bf16.mxu1 %vm3645_vm0, %v17737_v8  ;;  %4233 = vmatpush1.bf16.msra.mxu1 %v15506_v60 }
 0x129   : > { %4234 = vmatprep.subr.bf16.mxu1 %v15517_v4  ;;  %v17790_v4 = vld [vmem:[%s16839_s22 + $0x124] ss:$16 sps:$4 sm:$0xff]  }
 0x12a   : > { %v3710_v38 = vpop.f32.mrb[0].mxu1 }
 0x12b   : > { %v3712_v15 = vpop.f32.mrb[1].mxu1  ;;  %v17744_v22 = vadd.f32 %v3843_v55, %v3710_v38  ;;  %v17802_v38 = vld [vmem:[%s16839_s22 + $0x12c] ss:$16 sps:$4 sm:$0xff]  }
 0x12c   : > { %v3714_v47 = vpop.f32.mrb[2].mxu1  ;;  %4235 = vmatpush1.bf16.msra.mxu1 %v15515_v31  ;;  %v17753_v52 = vadd.f32 %v3845_v56, %v3712_v15  ;;  %v3863_v12 = vpop.f32.mrb[8].mxu0 }
 0x12d   : > { %v3716_v32 = vpop.f32.mrb[3].mxu1  ;;  %4236 = vmatprep.subr.bf16.mxu1 %v15523_v34  ;;  %v17762_v28 = vadd.f32 %v3847_v16, %v3714_v47  ;;  %v3865_v36 = vpop.f32.mrb[9].mxu0  ;;  %v17784_v16 = vld [vmem:[%s16839_s22 + $0x100] ss:$16 sps:$4 sm:$0xff]  }
 0x12e   : > { %v17764_v48 = vadd.f32 %v3849_v62, %v3716_v32  ;;  %v3867_v7 = vpop.f32.mrb[10].mxu0  ;;  %4853 = vmatmul.mubr.bf16.gmra.mrb[112].mxu0 %v17784_v16 }
 0x12f   : > { %4178 = vmatmul.mubr.bf16.gmra.mrb[68].mxu1 %v17767_v61  ;;  %v3869_v60 = vpop.f32.mrb[11].mxu0  ;;  %4862 = vmatprep.mubr.bf16.mxu0 %v17790_v4 }
 0x130   : > { %13303 = vmatprep.mubr.msk.bf16.mxu1 %vm3645_vm0, %v17774_v59  ;;  %4237 = vmatpush1.bf16.msra.mxu1 %v15521_v21 }
 0x131   : > { %4238 = vmatprep.subr.bf16.mxu1 %v15529_v54 }
 0x132   : > { %v3720_v19 = vpop.f32.mrb[4].mxu1 }
 0x133   : > { %v3722_v5 = vpop.f32.mrb[5].mxu1  ;;  %v17781_v55 = vadd.f32 %v3853_v37, %v3720_v19  ;;  %v17798_v37 = vld [vmem:[%s16839_s22 + $0x108] ss:$16 sps:$4 sm:$0xff]  }
 0x134   : > { %v3724_v56 = vpop.f32.mrb[6].mxu1  ;;  %4239 = vmatpush1.bf16.msra.mxu1 %v15527_v49  ;;  %v17787_v62 = vadd.f32 %v3855_v13, %v3722_v5  ;;  %v3873_v13 = vpop.f32.mrb[12].mxu0  ;;  %v17809_v49 = vld [vmem:[%s16839_s22 + $0x120] ss:$16 sps:$4 sm:$0xff]  }
 0x135   : > { %v3726_v20 = vpop.f32.mrb[7].mxu1  ;;  %4474 = vmatprep.subr.bf16.mxu1 %v15535_v57  ;;  %v17793_v31 = vadd.f32 %v3857_v40, %v3724_v56  ;;  %v3875_v47 = vpop.f32.mrb[13].mxu0 }
 0x136   : > { %v17795_v34 = vadd.f32 %v3859_v51, %v3726_v20  ;;  %v3877_v32 = vpop.f32.mrb[14].mxu0  ;;  %4863 = vmatmul.mubr.bf16.gmra.mrb[116].mxu0 %v17809_v49  ;;  %v17821_v20 = vld [vmem:[%s16839_s22 + $0x128] ss:$16 sps:$4 sm:$0xff]  }
 0x137   : > { %4188 = vmatmul.mubr.bf16.gmra.mrb[72].mxu1 %v17798_v37  ;;  %v3879_v51 = vpop.f32.mrb[15].mxu0  ;;  %13325 = vmatprep.mubr.msk.bf16.mxu0 %vm3645_vm0, %v17465_v3 }
 0x138   : > { %23104 = vst [vmem:[#allocation10_spill] sm:$0xff] %v17795_v34  ;;  %13304 = vmatprep.mubr.msk.bf16.mxu1 %vm3645_vm0, %v17802_v38 }
 0x13a   : > { %v3730_v15 = vpop.f32.mrb[8].mxu1 }
 0x13b   : > { %v3732_v21 = vpop.f32.mrb[9].mxu1  ;;  %v17806_v54 = vadd.f32 %v3863_v12, %v3730_v15  ;;  %v15626_v12 = vld [vmem:[%s22945_s1 + $0x30] ss:$72 sps:$4 sm:$0xff]  }
 0x13c   : > { %v3734_v40 = vpop.f32.mrb[10].mxu1  ;;  %v17812_v57 = vadd.f32 %v3865_v36, %v3732_v21  ;;  %v15634_v36 = vld [vmem:[%s22945_s1 + $0xc4] ss:$72 sps:$4 sm:$0xff]   ;;  %v3883_v15 = vpop.f32.mrb[16].mxu0 }
 0x13d   : > { %23105 = vst [vmem:[#allocation11_spill] sm:$0xff] %v17806_v54  ;;  %v3736_v19 = vpop.f32.mrb[11].mxu1  ;;  %v17816_v5 = vadd.f32 %v3867_v7, %v3734_v40  ;;  %v15533_v7 = vld [vmem:[%s22945_s1 + $0x18] ss:$72 sps:$4 sm:$0xff]  }
 0x13e   : > { %23106 = vst [vmem:[#allocation12_spill] sm:$0xff] %v17812_v57  ;;  %v17818_v56 = vadd.f32 %v3869_v60, %v3736_v19  ;;  %v3885_v60 = vpop.f32.mrb[17].mxu0  ;;  %4906 = vmatmul.mubr.bf16.vlgmr.msra.gmra.mrb[80].mxu0 %v17496_v0  ;;  %v15632_v57 = vld [vmem:[%s22945_s1 + $0xc0] ss:$72 sps:$4 sm:$0xff]  }
 0x13f   : > { %23107 = vst [vmem:[#allocation13_spill] sm:$0xff] %v17816_v5  ;;  %4198 = vmatmul.mubr.bf16.gmra.mrb[76].mxu1 %v17821_v20  ;;  %v3887_v40 = vpop.f32.mrb[18].mxu0  ;;  %13326 = vmatprep.mubr.msk.bf16.mxu0 %vm3645_vm0, %v17503_v39  ;;  %v15536_v0 = vld [vmem:[%s22945_s1 + $0xa8] ss:$72 sps:$4 sm:$0xff]   ;;  %v15541_v39 = vld [vmem:[%s22945_s1 + $0x13c] ss:$72 sps:$4 sm:$0xff]  }
 0x140   : > { %23108 = vst [vmem:[#allocation14_spill] sm:$0xff] %v17818_v56  ;;  %4240 = vmatprep.mubr.bf16.mxu1 %v17460_v2  ;;  %v15538_v2 = vld [vmem:[%s22945_s1 + $0xac] ss:$72 sps:$4 sm:$0xff]   ;;  %v3889_v5 = vpop.f32.mrb[19].mxu0  ;;  %5273 = vmatpush1.bf16.msra.mxu0 %v15626_v12 }
 0x141   : > { %5274 = vmatprep.subr.bf16.mxu0 %v15634_v36 }
 0x142   : > { %v3740_v3 = vpop.f32.mrb[12].mxu1 }
 0x143   : > { %v3742_v21 = vpop.f32.mrb[13].mxu1  ;;  %v17837_v19 = vadd.f32 %v3873_v13, %v3740_v3  ;;  %v15637_v13 = vld [vmem:[%s22945_s1 + $0x154] ss:$72 sps:$4 sm:$0xff]  }
 0x144   : > { %v3744_v56 = vpop.f32.mrb[14].mxu1  ;;  %v17843_v54 = vadd.f32 %v3875_v47, %v3742_v21  ;;  %v15635_v47 = vld [vmem:[%s22945_s1 + $0x150] ss:$72 sps:$4 sm:$0xff]   ;;  %5275 = vmatpush1.bf16.msra.mxu0 %v15632_v57 }
 0x145   : > { %23109 = vst [vmem:[#allocation15_spill] sm:$0xff] %v17837_v19  ;;  %v3746_v34 = vpop.f32.mrb[15].mxu1  ;;  %v17850_v3 = vadd.f32 %v3877_v32, %v3744_v56  ;;  %v3893_v32 = vpop.f32.mrb[20].mxu0  ;;  %5276 = vmatprep.subr.bf16.mxu0 %v15637_v13  ;;  %v15544_v13 = vld [vmem:[%s22945_s1 + $0x1cc] ss:$72 sps:$4 sm:$0xff]  }
 0x146   : > { %v17855_v19 = vadd.f32 %v3879_v51, %v3746_v34  ;;  %v15643_v34 = vld [vmem:[%s22945_s1 + $0x1e4] ss:$72 sps:$4 sm:$0xff]   ;;  %4916 = vmatmul.mubr.bf16.gmra.mrb[84].mxu0 %v17534_v18  ;;  %v15641_v18 = vld [vmem:[%s22945_s1 + $0x1e0] ss:$72 sps:$4 sm:$0xff]  }
 0x147   : > { %4241 = vmatmul.mubr.bf16.vlgmr.msra.gmra.mrb[80].mxu1 %v17479_v27  ;;  %v3895_v27 = vpop.f32.mrb[21].mxu0  ;;  %13327 = vmatprep.mubr.msk.bf16.mxu0 %vm3645_vm0, %v17547_v24  ;;  %v15547_v24 = vld [vmem:[%s22945_s1 + $0x25c] ss:$72 sps:$4 sm:$0xff]  }
 0x148   : > { %4475 = vmatpush1.bf16.msra.mxu1 %v15533_v7  ;;  %4250 = vmatprep.mubr.bf16.mxu1 %v17486_v44  ;;  %v3897_v12 = vpop.f32.mrb[22].mxu0  ;;  %v15539_v44 = vld [vmem:[%s22945_s1 + $0x138] ss:$72 sps:$4 sm:$0xff]  }
 0x149   : > { %4476 = vmatprep.subr.bf16.mxu1 %v15538_v2  ;;  %v3899_v21 = vpop.f32.mrb[23].mxu0  ;;  %5277 = vmatpush1.bf16.msra.mxu0 %v15635_v47 }
 0x14a   : > { %v3750_v51 = vpop.f32.mrb[16].mxu1  ;;  %5278 = vmatprep.subr.bf16.mxu0 %v15643_v34 }
 0x14b   : > { %v3752_v56 = vpop.f32.mrb[17].mxu1  ;;  %v17868_v36 = vadd.f32 %v3883_v15, %v3750_v51 }
 0x14c   : > { %v3754_v7 = vpop.f32.mrb[18].mxu1  ;;  %4477 = vmatpush1.bf16.msra.mxu1 %v15536_v0  ;;  %v17874_v57 = vadd.f32 %v3885_v60, %v3752_v56  ;;  %v15542_v0 = vld [vmem:[%s22945_s1 + $0x1c8] ss:$72 sps:$4 sm:$0xff]   ;;  %v15646_v60 = vld [vmem:[%s22945_s1 + $0x274] ss:$72 sps:$4 sm:$0xff]   ;;  %v3903_v47 = vpop.f32.mrb[24].mxu0 }
 0x14d   : > { %v3756_v2 = vpop.f32.mrb[19].mxu1  ;;  %4478 = vmatprep.subr.bf16.mxu1 %v15541_v39  ;;  %v17881_v15 = vadd.f32 %v3887_v40, %v3754_v7  ;;  %v15644_v40 = vld [vmem:[%s22945_s1 + $0x270] ss:$72 sps:$4 sm:$0xff]   ;;  %5279 = vmatpush1.bf16.msra.mxu0 %v15641_v18 }
 0x14e   : > { %23110 = vst [vmem:[#allocation16_spill] sm:$0xff] %v17874_v57  ;;  %v17892_v39 = vadd.f32 %v3889_v5, %v3756_v2  ;;  %v15652_v5 = vld [vmem:[%s22945_s1 + $0x304] ss:$72 sps:$4 sm:$0xff]   ;;  %5280 = vmatprep.subr.bf16.mxu0 %v15646_v60  ;;  %4926 = vmatmul.mubr.bf16.gmra.mrb[88].mxu0 %v17575_v14  ;;  %v15548_v14 = vld [vmem:[%s22945_s1 + $0x2e8] ss:$72 sps:$4 sm:$0xff]  }
 0x14f   : > { %4251 = vmatmul.mubr.bf16.gmra.mrb[84].mxu1 %v17523_v11  ;;  %v3905_v11 = vpop.f32.mrb[25].mxu0  ;;  %13328 = vmatprep.mubr.msk.bf16.mxu0 %vm3645_vm0, %v17582_v17  ;;  %v15553_v17 = vld [vmem:[%s22945_s1 + $0x37c] ss:$72 sps:$4 sm:$0xff]   ;;  %v15715_v57 = vld [vmem:[%s22945_s1 + $0x26c] ss:$72 sps:$4 sm:$0xff]  }
 0x150   : > { %23111 = vst [vmem:[#allocation17_spill] sm:$0xff] %v17892_v39  ;;  %4479 = vmatpush1.bf16.msra.mxu1 %v15539_v44  ;;  %4260 = vmatprep.mubr.bf16.mxu1 %v17527_v1  ;;  %v3907_v7 = vpop.f32.mrb[26].mxu0  ;;  %v15545_v1 = vld [vmem:[%s22945_s1 + $0x258] ss:$72 sps:$4 sm:$0xff]  }
 0x151   : > { %4480 = vmatprep.subr.bf16.mxu1 %v15544_v13  ;;  %v3909_v2 = vpop.f32.mrb[27].mxu0  ;;  %v15550_v13 = vld [vmem:[%s22945_s1 + $0x2ec] ss:$72 sps:$4 sm:$0xff]   ;;  %5281 = vmatpush1.bf16.msra.mxu0 %v15644_v40 }
 0x152   : > { %v3760_v51 = vpop.f32.mrb[20].mxu1  ;;  %5282 = vmatprep.subr.bf16.mxu0 %v15652_v5 }
 0x153   : > { %v3762_v56 = vpop.f32.mrb[21].mxu1  ;;  %v17905_v34 = vadd.f32 %v3893_v32, %v3760_v51  ;;  %v15650_v32 = vld [vmem:[%s22945_s1 + $0x300] ss:$72 sps:$4 sm:$0xff]  }
 0x154   : > { %v3764_v44 = vpop.f32.mrb[22].mxu1  ;;  %4481 = vmatpush1.bf16.msra.mxu1 %v15542_v0  ;;  %v17914_v39 = vadd.f32 %v3895_v27, %v3762_v56  ;;  %v15658_v0 = vld [vmem:[%s22945_s1 + $0x394] ss:$72 sps:$4 sm:$0xff]   ;;  %v15661_v56 = vld [vmem:[%s22945_s1 + $0x424] ss:$72 sps:$4 sm:$0xff]  }
 0x155   : > { %v3766_v18 = vpop.f32.mrb[23].mxu1  ;;  %4482 = vmatprep.subr.bf16.mxu1 %v15547_v24  ;;  %v17924_v60 = vadd.f32 %v3897_v12, %v3764_v44  ;;  %v3913_v12 = vpop.f32.mrb[28].mxu0  ;;  %v15656_v24 = vld [vmem:[%s22945_s1 + $0x390] ss:$72 sps:$4 sm:$0xff]   ;;  %5283 = vmatpush1.bf16.msra.mxu0 %v15650_v32 }
 0x156   : > { %v17929_v27 = vadd.f32 %v3899_v21, %v3766_v18  ;;  %v3915_v40 = vpop.f32.mrb[29].mxu0  ;;  %5284 = vmatprep.subr.bf16.mxu0 %v15658_v0  ;;  %4936 = vmatmul.mubr.bf16.gmra.mrb[92].mxu0 %v17616_v50  ;;  %v15565_v50 = vld [vmem:[%s22945_s1 + $0x49c] ss:$72 sps:$4 sm:$0xff]  }
 0x157   : > { %4261 = vmatmul.mubr.bf16.gmra.mrb[88].mxu1 %v17564_v33  ;;  %v3917_v5 = vpop.f32.mrb[30].mxu0  ;;  %13329 = vmatprep.mubr.msk.bf16.mxu0 %vm3645_vm0, %v17629_v30  ;;  %v15667_v30 = vld [vmem:[%s22945_s1 + $0x4b4] ss:$72 sps:$4 sm:$0xff]  }
 0x158   : > { %23112 = vst [vmem:[#allocation18_spill] sm:$0xff] %v17929_v27  ;;  %4483 = vmatpush1.bf16.msra.mxu1 %v15545_v1  ;;  %4270 = vmatprep.mubr.bf16.mxu1 %v17568_v6  ;;  %v15551_v6 = vld [vmem:[%s22945_s1 + $0x378] ss:$72 sps:$4 sm:$0xff]  }
 0x159   : > { %4484 = vmatprep.subr.bf16.mxu1 %v15550_v13  ;;  %v3919_v13 = vpop.f32.mrb[31].mxu0  ;;  %5285 = vmatpush1.bf16.msra.mxu0 %v15656_v24 }
 0x15a   : > { %v3770_v51 = vpop.f32.mrb[24].mxu1  ;;  %5286 = vmatprep.subr.bf16.mxu0 %v15661_v56  ;;  %v15574_v56 = vld [vmem:[%s22945_s1 + $0x52c] ss:$72 sps:$4 sm:$0xff]  }
 0x15b   : > { %v17939_v21 = vadd.f32 %v3903_v47, %v3770_v51  ;;  %v3772_v33 = vpop.f32.mrb[25].mxu1  ;;  %v15559_v47 = vld [vmem:[%s22945_s1 + $0x40c] ss:$72 sps:$4 sm:$0xff]   ;;  %v15563_v51 = vld [vmem:[%s22945_s1 + $0x498] ss:$72 sps:$4 sm:$0xff]  }
 0x15c   : > { %v17947_v44 = vadd.f32 %v3905_v11, %v3772_v33  ;;  %v3774_v1 = vpop.f32.mrb[26].mxu1  ;;  %4485 = vmatpush1.bf16.msra.mxu1 %v15548_v14  ;;  %v15659_v11 = vld [vmem:[%s22945_s1 + $0x420] ss:$72 sps:$4 sm:$0xff]  }
 0x15d   : > { %v17953_v18 = vadd.f32 %v3907_v7, %v3774_v1  ;;  %v3776_v32 = vpop.f32.mrb[27].mxu1  ;;  %4486 = vmatprep.subr.bf16.mxu1 %v15553_v17  ;;  %v15557_v14 = vld [vmem:[%s22945_s1 + $0x408] ss:$72 sps:$4 sm:$0xff]   ;;  %5287 = vmatpush1.bf16.msra.mxu0 %v15659_v11 }
 0x15e   : > { %v17960_v0 = vadd.f32 %v3909_v2, %v3776_v32  ;;  %v15665_v7 = vld [vmem:[%s22945_s1 + $0x4b0] ss:$72 sps:$4 sm:$0xff]   ;;  %v3923_v2 = vpop.f32.mrb[32].mxu0  ;;  %5288 = vmatprep.subr.bf16.mxu0 %v15667_v30  ;;  %4946 = vmatmul.mubr.bf16.gmra.mrb[96].mxu0 %v17657_v45  ;;  %v15668_v11 = vld [vmem:[%s22945_s1 + $0x540] ss:$72 sps:$4 sm:$0xff]  }
 0x15f   : > { %23113 = vst [vmem:[#allocation19_spill] sm:$0xff] %v17953_v18  ;;  %4271 = vmatmul.mubr.bf16.gmra.mrb[92].mxu1 %v17605_v25  ;;  %v15670_v25 = vld [vmem:[%s22945_s1 + $0x544] ss:$72 sps:$4 sm:$0xff]   ;;  %v3925_v24 = vpop.f32.mrb[33].mxu0  ;;  %13330 = vmatprep.mubr.msk.bf16.mxu0 %vm3645_vm0, %v17667_v43  ;;  %v15674_v43 = vld [vmem:[%s22945_s1 + $0x5d0] ss:$72 sps:$4 sm:$0xff]  }
 0x160   : > { %23114 = vst [vmem:[#allocation20_spill] sm:$0xff] %v17960_v0  ;;  %4280 = vmatprep.mubr.bf16.mxu1 %v17609_v41  ;;  %4487 = vmatpush1.bf16.msra.mxu1 %v15551_v6  ;;  %v3927_v6 = vpop.f32.mrb[34].mxu0  ;;  %v15580_v45 = vld [vmem:[%s22945_s1 + $0x5bc] ss:$72 sps:$4 sm:$0xff]   ;;  %v15578_v30 = vld [vmem:[%s22945_s1 + $0x5b8] ss:$72 sps:$4 sm:$0xff]  }
 0x161   : > { %4488 = vmatprep.subr.bf16.mxu1 %v15559_v47  ;;  %v3929_v32 = vpop.f32.mrb[35].mxu0  ;;  %5289 = vmatpush1.bf16.msra.mxu0 %v15665_v7  ;;  %v18639_v18 = vld [vmem:[%s16839_s22 + $0x88] ss:$16 sps:$4 sm:$0xff]   ;;  %v15742_v0 = vld [vmem:[%s22945_s1 + $0x53c] ss:$72 sps:$4 sm:$0xff]  }
 0x162   : > { %v3780_v17 = vpop.f32.mrb[28].mxu1  ;;  %5290 = vmatprep.subr.bf16.mxu0 %v15670_v25  ;;  %23186 = vst [vmem:[#allocation80_spill] sm:$0xff] %v18639_v18 }
 0x163   : > { %v17982_v33 = vadd.f32 %v3913_v12, %v3780_v17  ;;  %v3782_v41 = vpop.f32.mrb[29].mxu1 }
 0x164   : > { %v17987_v1 = vadd.f32 %v3915_v40, %v3782_v41  ;;  %v3784_v47 = vpop.f32.mrb[30].mxu1  ;;  %4489 = vmatpush1.bf16.msra.mxu1 %v15557_v14  ;;  %v15572_v40 = vld [vmem:[%s22945_s1 + $0x528] ss:$72 sps:$4 sm:$0xff]  }
 0x165   : > { %23115 = vst [vmem:[#allocation21_spill] sm:$0xff] %v17982_v33  ;;  %v17993_v12 = vadd.f32 %v3917_v5, %v3784_v47  ;;  %v3786_v17 = vpop.f32.mrb[31].mxu1  ;;  %4490 = vmatprep.subr.bf16.mxu1 %v15565_v50  ;;  %v15676_v5 = vld [vmem:[%s22945_s1 + $0x5d4] ss:$72 sps:$4 sm:$0xff]   ;;  %5291 = vmatpush1.bf16.msra.mxu0 %v15668_v11 }
 0x166   : > { %v17997_v33 = vadd.f32 %v3919_v13, %v3786_v17  ;;  %v3933_v13 = vpop.f32.mrb[36].mxu0  ;;  %5292 = vmatprep.subr.bf16.mxu0 %v15676_v5  ;;  %4956 = vmatmul.mubr.bf16.gmra.mrb[100].mxu0 %v17698_v53  ;;  %v15586_v11 = vld [vmem:[%s22945_s1 + $0x64c] ss:$72 sps:$4 sm:$0xff]   ;;  %v15584_v53 = vld [vmem:[%s22945_s1 + $0x648] ss:$72 sps:$4 sm:$0xff]  }
 0x167   : > { %4281 = vmatmul.mubr.bf16.gmra.mrb[96].mxu1 %v17646_v58  ;;  %v15682_v58 = vld [vmem:[%s22945_s1 + $0x664] ss:$72 sps:$4 sm:$0xff]   ;;  %v3935_v50 = vpop.f32.mrb[37].mxu0  ;;  %13331 = vmatprep.mubr.msk.bf16.mxu0 %vm3645_vm0, %v17708_v10  ;;  %v15685_v10 = vld [vmem:[%s22945_s1 + $0x6f4] ss:$72 sps:$4 sm:$0xff]  }
 0x168   : > { %23116 = vst [vmem:[#allocation22_spill] sm:$0xff] %v17997_v33  ;;  %4290 = vmatprep.mubr.bf16.mxu1 %v17653_v35  ;;  %4491 = vmatpush1.bf16.msra.mxu1 %v15563_v51  ;;  %v3937_v25 = vpop.f32.mrb[38].mxu0 }
 0x169   : > { %4492 = vmatprep.subr.bf16.mxu1 %v15574_v56  ;;  %v3939_v56 = vpop.f32.mrb[39].mxu0  ;;  %5293 = vmatpush1.bf16.msra.mxu0 %v15674_v43 }
 0x16a   : > { %v3790_v14 = vpop.f32.mrb[32].mxu1  ;;  %5294 = vmatprep.subr.bf16.mxu0 %v15682_v58 }
 0x16b   : > { %v18019_v7 = vadd.f32 %v3923_v2, %v3790_v14  ;;  %v3792_v35 = vpop.f32.mrb[33].mxu1  ;;  %v15680_v2 = vld [vmem:[%s22945_s1 + $0x660] ss:$72 sps:$4 sm:$0xff]  }
 0x16c   : > { %v18021_v51 = vadd.f32 %v3925_v24, %v3792_v35  ;;  %v3794_v41 = vpop.f32.mrb[34].mxu1  ;;  %4493 = vmatpush1.bf16.msra.mxu1 %v15572_v40 }
 0x16d   : > { %v18024_v47 = vadd.f32 %v3927_v6, %v3794_v41  ;;  %v3796_v17 = vpop.f32.mrb[35].mxu1  ;;  %4494 = vmatprep.subr.bf16.mxu1 %v15580_v45  ;;  %v15592_v6 = vld [vmem:[%s22945_s1 + $0x6dc] ss:$72 sps:$4 sm:$0xff]   ;;  %v15590_v45 = vld [vmem:[%s22945_s1 + $0x6d8] ss:$72 sps:$4 sm:$0xff]   ;;  %5295 = vmatpush1.bf16.msra.mxu0 %v15680_v2 }
 0x16e   : > { %v18034_v24 = vadd.f32 %v3929_v32, %v3796_v17  ;;  %v15683_v32 = vld [vmem:[%s22945_s1 + $0x6f0] ss:$72 sps:$4 sm:$0xff]   ;;  %5296 = vmatprep.subr.bf16.mxu0 %v15685_v10  ;;  %4966 = vmatmul.mubr.bf16.gmra.mrb[104].mxu0 %v17730_v29  ;;  %v15694_v29 = vld [vmem:[%s22945_s1 + $0x814] ss:$72 sps:$4 sm:$0xff]   ;;  %v15698_v17 = vld [vmem:[%s22945_s1 + $0x8a0] ss:$72 sps:$4 sm:$0xff]  }
 0x16f   : > { %4291 = vmatmul.mubr.bf16.gmra.mrb[100].mxu1 %v17687_v26  ;;  %v15691_v26 = vld [vmem:[%s22945_s1 + $0x784] ss:$72 sps:$4 sm:$0xff]   ;;  %13332 = vmatprep.mubr.msk.bf16.mxu0 %vm3645_vm0, %v17737_v8  ;;  %v15599_v41 = vld [vmem:[%s22945_s1 + $0x768] ss:$72 sps:$4 sm:$0xff]   ;;  %v15736_v2 = vld [vmem:[%s22945_s1 + $0xa54] ss:$72 sps:$4 sm:$0xff]  }
 0x170   : > { %23117 = vst [vmem:[#allocation23_spill] sm:$0xff] %v18034_v24  ;;  %4300 = vmatprep.mubr.bf16.mxu1 %v17694_v46  ;;  %4495 = vmatpush1.bf16.msra.mxu1 %v15578_v30  ;;  %v15601_v46 = vld [vmem:[%s22945_s1 + $0x76c] ss:$72 sps:$4 sm:$0xff]   ;;  %v15607_v8 = vld [vmem:[%s22945_s1 + $0x7fc] ss:$72 sps:$4 sm:$0xff]  }
 0x171   : > { %4496 = vmatprep.subr.bf16.mxu1 %v15586_v11  ;;  %5297 = vmatpush1.bf16.msra.mxu0 %v15683_v32  ;;  %v15611_v11 = vld [vmem:[%s22945_s1 + $0x888] ss:$72 sps:$4 sm:$0xff]   ;;  %v15739_v32 = vld [vmem:[%s22945_s1 + $0xae4] ss:$72 sps:$4 sm:$0xff]  }
 0x172   : > { %v3800_v40 = vpop.f32.mrb[36].mxu1  ;;  %5298 = vmatprep.subr.bf16.mxu0 %v15691_v26  ;;  %v15734_v10 = vld [vmem:[%s22945_s1 + $0xa50] ss:$72 sps:$4 sm:$0xff]   ;;  %v18153_v26 = vpop.f32.mrb[40].mxu0 }
 0x173   : > { %v18056_v5 = vadd.f32 %v3933_v13, %v3800_v40  ;;  %v3802_v43 = vpop.f32.mrb[37].mxu1  ;;  %v18155_v40 = vpop.f32.mrb[41].mxu0 }
 0x174   : > { %v18061_v58 = vadd.f32 %v3935_v50, %v3802_v43  ;;  %v3804_v14 = vpop.f32.mrb[38].mxu1  ;;  %4497 = vmatpush1.bf16.msra.mxu1 %v15584_v53  ;;  %v15689_v50 = vld [vmem:[%s22945_s1 + $0x780] ss:$72 sps:$4 sm:$0xff]  }
 0x175   : > { %v18064_v30 = vadd.f32 %v3937_v25, %v3804_v14  ;;  %v3806_v35 = vpop.f32.mrb[39].mxu1  ;;  %4498 = vmatprep.subr.bf16.mxu1 %v15592_v6  ;;  %v15692_v25 = vld [vmem:[%s22945_s1 + $0x810] ss:$72 sps:$4 sm:$0xff]   ;;  %5299 = vmatpush1.bf16.msra.mxu0 %v15689_v50  ;;  %v15625_v6 = vld [vmem:[%s22945_s1 + $0xa3c] ss:$72 sps:$4 sm:$0xff]  }
 0x176   : > { %23118 = vst [vmem:[#allocation24_spill] sm:$0xff] %v18061_v58  ;;  %v18068_v13 = vadd.f32 %v3939_v56, %v3806_v35  ;;  %v15700_v56 = vld [vmem:[%s22945_s1 + $0x8a4] ss:$72 sps:$4 sm:$0xff]   ;;  %5300 = vmatprep.subr.bf16.mxu0 %v15694_v29  ;;  %4976 = vmatmul.mubr.bf16.gmra.mrb[108].mxu0 %v17767_v61  ;;  %v15620_v53 = vld [vmem:[%s22945_s1 + $0x9a8] ss:$72 sps:$4 sm:$0xff]  }
 0x177   : > { %23119 = vst [vmem:[#allocation25_spill] sm:$0xff] %v18064_v30  ;;  %4301 = vmatmul.mubr.bf16.gmra.mrb[104].mxu1 %v17716_v63  ;;  %v15605_v63 = vld [vmem:[%s22945_s1 + $0x7f8] ss:$72 sps:$4 sm:$0xff]   ;;  %13333 = vmatprep.mubr.msk.bf16.mxu0 %vm3645_vm0, %v17774_v59  ;;  %v15619_v61 = vld [vmem:[%s22945_s1 + $0x91c] ss:$72 sps:$4 sm:$0xff]  }
 0x178   : > { %23120 = vst [vmem:[#allocation26_spill] sm:$0xff] %v18068_v13  ;;  %4310 = vmatprep.mubr.bf16.mxu1 %v17726_v9  ;;  %4499 = vmatpush1.bf16.msra.mxu1 %v15590_v45  ;;  %v15613_v9 = vld [vmem:[%s22945_s1 + $0x88c] ss:$72 sps:$4 sm:$0xff]   ;;  %v15722_v59 = vld [vmem:[%s22945_s1 + $0x930] ss:$72 sps:$4 sm:$0xff]   ;;  %v18157_v45 = vpop.f32.mrb[42].mxu0 }
 0x179   : > { %4500 = vmatprep.subr.bf16.mxu1 %v15601_v46  ;;  %5301 = vmatpush1.bf16.msra.mxu0 %v15692_v25  ;;  %v15623_v43 = vld [vmem:[%s22945_s1 + $0xa38] ss:$72 sps:$4 sm:$0xff]   ;;  %v18163_v14 = vpop.f32.mrb[43].mxu0  ;;  %v15631_v35 = vld [vmem:[%s22945_s1 + $0xacc] ss:$72 sps:$4 sm:$0xff]  }
 0x17a   : > { %5302 = vmatprep.subr.bf16.mxu0 %v15700_v56  ;;  %v16454_v46 = vld [vmem:[%s16839_s22 + $0x20] ss:$16 sps:$4 sm:$0xff]   ;;  %v15640_v25 = vld [vmem:[%s22945_s1 + $0xb5c] ss:$72 sps:$4 sm:$0xff]  }
 0x17b   : > { %v15629_v50 = vld [vmem:[%s22945_s1 + $0xac8] ss:$72 sps:$4 sm:$0xff]   ;;  %v18803_v30 = vld [vmem:[%s16839_s22 + $0x10c] ss:$16 sps:$4 sm:$0xff]  }
 0x17c   : > { %4501 = vmatpush1.bf16.msra.mxu1 %v15599_v41  ;;  %v16455_v41 = vld [vmem:[%s16839_s22 + $0x44] ss:$16 sps:$4 sm:$0xff]   ;;  %v15737_v29 = vld [vmem:[%s22945_s1 + $0xae0] ss:$72 sps:$4 sm:$0xff]   ;;  %v15743_v56 = vld [vmem:[%s22945_s1 + $0xb70] ss:$72 sps:$4 sm:$0xff]  }
 0x17d   : > { %4502 = vmatprep.subr.bf16.mxu1 %v15607_v8  ;;  %5303 = vmatpush1.bf16.msra.mxu0 %v15698_v17  ;;  %v15745_v8 = vld [vmem:[%s22945_s1 + $0xb74] ss:$72 sps:$4 sm:$0xff]  }
 0x17e   : > { %4986 = vmatmul.mubr.bf16.gmra.mrb[112].mxu0 %v17798_v37  ;;  %v15730_v37 = vld [vmem:[%s22945_s1 + $0x9c4] ss:$72 sps:$4 sm:$0xff]  }
 0x17f   : > { %4311 = vmatmul.mubr.bf16.gmra.mrb[108].mxu1 %v17750_v23  ;;  %v15724_v23 = vld [vmem:[%s22945_s1 + $0x934] ss:$72 sps:$4 sm:$0xff]   ;;  %13334 = vmatprep.mubr.msk.bf16.mxu0 %vm3645_vm0, %v17802_v38 }
 0x180   : > { %4320 = vmatprep.mubr.bf16.mxu1 %v17759_v42  ;;  %4503 = vmatpush1.bf16.msra.mxu1 %v15605_v63  ;;  %v16451_v42 = vld [vmem:[%s16839_s22 + $0x4] ss:$16 sps:$4 sm:$0xff]  }
 0x181   : > { %4504 = vmatprep.subr.bf16.mxu1 %v15613_v9  ;;  %5405 = vmatprep.subr.bf16.mxu0 %v15724_v23  ;;  %v15622_v38 = vld [vmem:[%s22945_s1 + $0x9ac] ss:$72 sps:$4 sm:$0xff]   ;;  %v18187_v9 = vpop.f32.mrb[44].mxu0  ;;  %v16456_v23 = vld [vmem:[%s16839_s22 + $0x40] ss:$16 sps:$4 sm:$0xff]  }
 0x182   : > { %v15751_v63 = vld [vmem:[%s22945_s1 + $0xc04] ss:$72 sps:$4 sm:$0xff]   ;;  %v18189_v17 = vpop.f32.mrb[45].mxu0 }
 0x184   : > { %4505 = vmatpush1.bf16.msra.mxu1 %v15611_v11  ;;  %v18191_v11 = vpop.f32.mrb[46].mxu0 }
 0x185   : > { %4607 = vmatprep.subr.bf16.mxu1 %v15619_v61  ;;  %v15638_v61 = vld [vmem:[%s22945_s1 + $0xb58] ss:$72 sps:$4 sm:$0xff]  }
 0x186   : > { %4996 = vmatmul.mubr.bf16.gmra.mrb[116].mxu0 %v17821_v20  ;;  %v15728_v20 = vld [vmem:[%s22945_s1 + $0x9c0] ss:$72 sps:$4 sm:$0xff]  }
 0x187   : > { %4321 = vmatmul.mubr.bf16.gmra.mrb[112].mxu1 %v17784_v16  ;;  %5304 = vmatprep.mubr.bf16.mxu0 %v16451_v42  ;;  %v15617_v16 = vld [vmem:[%s22945_s1 + $0x918] ss:$72 sps:$4 sm:$0xff]  }
 0x188   : > { %4330 = vmatprep.mubr.bf16.mxu1 %v17790_v4  ;;  %v16452_v4 = vld [vmem:[%s16839_s22] ss:$16 sps:$4 sm:$0xff]  }
 0x18e   : > { %5305 = vmatmul.mubr.bf16.vlgmr.msra.gmra.mrb[120].mxu0 %v16452_v4 }
 0x18f   : > { %4331 = vmatmul.mubr.bf16.gmra.mrb[116].mxu1 %v17809_v49  ;;  %v16453_v49 = vld [vmem:[%s16839_s22 + $0x24] ss:$16 sps:$4 sm:$0xff]   ;;  %5406 = vmatpush1.bf16.msra.mxu0 %v15722_v59 }
 0x190   : > { %4506 = vmatprep.mubr.bf16.mxu1 %v16451_v42  ;;  %5314 = vmatprep.mubr.bf16.mxu0 %v16453_v49  ;;  %v18197_v42 = vpop.f32.mrb[47].mxu0  ;;  %v15649_v59 = vld [vmem:[%s22945_s1 + $0xbec] ss:$72 sps:$4 sm:$0xff]  }
 0x191   : > { %5407 = vmatprep.subr.bf16.mxu0 %v15730_v37  ;;  %v16457_v37 = vld [vmem:[%s16839_s22 + $0x64] ss:$16 sps:$4 sm:$0xff]  }
 0x193   : > { %5408 = vmatpush1.bf16.msra.mxu0 %v15728_v20  ;;  %v15755_v20 = vld [vmem:[%s22945_s1 + $0xc90] ss:$72 sps:$4 sm:$0xff]  }
 0x194   : > { %5409 = vmatprep.subr.bf16.mxu0 %v15736_v2  ;;  %v15763_v2 = vld [vmem:[%s22945_s1 + $0xd24] ss:$72 sps:$4 sm:$0xff]  }
 0x196   : > { %5315 = vmatmul.mubr.bf16.gmra.mrb[124].mxu0 %v16454_v46 }
 0x197   : > { %4507 = vmatmul.mubr.bf16.vlgmr.msra.gmra.mrb[120].mxu1 %v16452_v4  ;;  %5324 = vmatprep.mubr.bf16.mxu0 %v16455_v41  ;;  %v15647_v4 = vld [vmem:[%s22945_s1 + $0xbe8] ss:$72 sps:$4 sm:$0xff]  }
 0x198   : > { %4608 = vmatpush1.bf16.msra.mxu1 %v15617_v16  ;;  %4516 = vmatprep.mubr.bf16.mxu1 %v16453_v49  ;;  %v15749_v16 = vld [vmem:[%s22945_s1 + $0xc00] ss:$72 sps:$4 sm:$0xff]   ;;  %v15757_v49 = vld [vmem:[%s22945_s1 + $0xc94] ss:$72 sps:$4 sm:$0xff]  }
 0x199   : > { %4609 = vmatprep.subr.bf16.mxu1 %v15622_v38  ;;  %5410 = vmatpush1.bf16.msra.mxu0 %v15734_v10  ;;  %v15655_v38 = vld [vmem:[%s22945_s1 + $0xc7c] ss:$72 sps:$4 sm:$0xff]  }
 0x19a   : > { %5411 = vmatprep.subr.bf16.mxu0 %v15739_v32  ;;  %v15653_v32 = vld [vmem:[%s22945_s1 + $0xc78] ss:$72 sps:$4 sm:$0xff]  }
 0x19c   : > { %4610 = vmatpush1.bf16.msra.mxu1 %v15620_v53  ;;  %v18221_v53 = vpop.f32.mrb[48].mxu0 }
 0x19d   : > { %4611 = vmatprep.subr.bf16.mxu1 %v15625_v6  ;;  %5412 = vmatpush1.bf16.msra.mxu0 %v15737_v29  ;;  %v18223_v6 = vpop.f32.mrb[49].mxu0  ;;  %v15766_v29 = vld [vmem:[%s22945_s1 + $0xdb4] ss:$72 sps:$4 sm:$0xff]  }
 0x19e   : > { %5413 = vmatprep.subr.bf16.mxu0 %v15745_v8  ;;  %5325 = vmatmul.mubr.bf16.gmra.mrb[128].mxu0 %v16456_v23  ;;  %23121 = vst [vmem:[#allocation27_spill] sm:$0xff] %v18223_v6  ;;  %v18225_v10 = vpop.f32.mrb[50].mxu0  ;;  %v15662_v8 = vld [vmem:[%s22945_s1 + $0xd08] ss:$72 sps:$4 sm:$0xff]   ;;  %v16471_v6 = vld [vmem:[%s16839_s22 + $0xc] ss:$16 sps:$4 sm:$0xff]  }
 0x19f   : > { %4517 = vmatmul.mubr.bf16.gmra.mrb[124].mxu1 %v16454_v46  ;;  %5334 = vmatprep.mubr.bf16.mxu0 %v16457_v37  ;;  %23122 = vst [vmem:[#allocation28_spill] sm:$0xff] %v18225_v10  ;;  %v18231_v46 = vpop.f32.mrb[51].mxu0  ;;  %v15802_v10 = vld [vmem:[%s22945_s1 + $0xd4] ss:$72 sps:$4 sm:$0xff]  }
 0x1a0   : > { %4526 = vmatprep.mubr.bf16.mxu1 %v16455_v41  ;;  %4612 = vmatpush1.bf16.msra.mxu1 %v15623_v43  ;;  %v16458_v43 = vld [vmem:[%s16839_s22 + $0x60] ss:$16 sps:$4 sm:$0xff]   ;;  %23123 = vst [vmem:[#allocation29_spill] sm:$0xff] %v18231_v46  ;;  %v16459_v41 = vld [vmem:[%s16839_s22 + $0x84] ss:$16 sps:$4 sm:$0xff]  }
 0x1a1   : > { %4613 = vmatprep.subr.bf16.mxu1 %v15631_v35  ;;  %5414 = vmatpush1.bf16.msra.mxu0 %v15743_v56  ;;  %v15664_v35 = vld [vmem:[%s22945_s1 + $0xd0c] ss:$72 sps:$4 sm:$0xff]   ;;  %v15764_v56 = vld [vmem:[%s22945_s1 + $0xdb0] ss:$72 sps:$4 sm:$0xff]   ;;  %v15794_v46 = vld [vmem:[%s22945_s1 + $0x40] ss:$72 sps:$4 sm:$0xff]  }
 0x1a2   : > { %5415 = vmatprep.subr.bf16.mxu0 %v15751_v63  ;;  %v18252_v63 = vpop.f32.mrb[52].mxu0 }
 0x1a3   : > { %23124 = vst [vmem:[#allocation30_spill] sm:$0xff] %v18252_v63  ;;  %v16472_v63 = vld [vmem:[%s16839_s22 + $0x8] ss:$16 sps:$4 sm:$0xff]  }
 0x1a4   : > { %4614 = vmatpush1.bf16.msra.mxu1 %v15629_v50  ;;  %v15761_v50 = vld [vmem:[%s22945_s1 + $0xd20] ss:$72 sps:$4 sm:$0xff]  }
 0x1a5   : > { %4615 = vmatprep.subr.bf16.mxu1 %v15640_v25  ;;  %5416 = vmatpush1.bf16.msra.mxu0 %v15749_v16  ;;  %v15673_v25 = vld [vmem:[%s22945_s1 + $0xd9c] ss:$72 sps:$4 sm:$0xff]  }
 0x1a6   : > { %5417 = vmatprep.subr.bf16.mxu0 %v15757_v49  ;;  %5335 = vmatmul.mubr.bf16.gmra.mrb[132].mxu0 %v16458_v43 }
 0x1a7   : > { %4527 = vmatmul.mubr.bf16.gmra.mrb[128].mxu1 %v16456_v23  ;;  %5344 = vmatprep.mubr.bf16.mxu0 %v16459_v41  ;;  %v15772_v23 = vld [vmem:[%s22945_s1 + $0xe44] ss:$72 sps:$4 sm:$0xff]  }
 0x1a8   : > { %4536 = vmatprep.mubr.bf16.mxu1 %v16457_v37  ;;  %4616 = vmatpush1.bf16.msra.mxu1 %v15638_v61  ;;  %v15671_v61 = vld [vmem:[%s22945_s1 + $0xd98] ss:$72 sps:$4 sm:$0xff]   ;;  %v15679_v37 = vld [vmem:[%s22945_s1 + $0xe2c] ss:$72 sps:$4 sm:$0xff]  }
 0x1a9   : > { %4617 = vmatprep.subr.bf16.mxu1 %v15649_v59  ;;  %5418 = vmatpush1.bf16.msra.mxu0 %v15755_v20  ;;  %v18260_v59 = vpop.f32.mrb[53].mxu0  ;;  %v16461_v20 = vld [vmem:[%s16839_s22 + $0xa4] ss:$16 sps:$4 sm:$0xff]  }
 0x1aa   : > { %5419 = vmatprep.subr.bf16.mxu0 %v15763_v2  ;;  %23125 = vst [vmem:[#allocation31_spill] sm:$0xff] %v18260_v59  ;;  %v18265_v16 = vpop.f32.mrb[54].mxu0  ;;  %v15677_v2 = vld [vmem:[%s22945_s1 + $0xe28] ss:$72 sps:$4 sm:$0xff]  }
 0x1ab   : > { %23126 = vst [vmem:[#allocation32_spill] sm:$0xff] %v18265_v16  ;;  %v18271_v49 = vpop.f32.mrb[55].mxu0  ;;  %v18443_v16 = vld [vmem:[%s16839_s22 + $0x2c] ss:$16 sps:$4 sm:$0xff]  }
 0x1ac   : > { %4618 = vmatpush1.bf16.msra.mxu1 %v15647_v4  ;;  %v16460_v4 = vld [vmem:[%s16839_s22 + $0x80] ss:$16 sps:$4 sm:$0xff]   ;;  %23127 = vst [vmem:[#allocation33_spill] sm:$0xff] %v18271_v49  ;;  %23165 = vst [vmem:[#allocation62_spill] sm:$0xff] %v18443_v16 }
 0x1ad   : > { %4619 = vmatprep.subr.bf16.mxu1 %v15655_v38  ;;  %5420 = vmatpush1.bf16.msra.mxu0 %v15761_v50  ;;  %v15770_v38 = vld [vmem:[%s22945_s1 + $0xe40] ss:$72 sps:$4 sm:$0xff]   ;;  %v18289_v50 = vpop.f32.mrb[56].mxu0 }
 0x1ae   : > { %5421 = vmatprep.subr.bf16.mxu0 %v15766_v29  ;;  %5345 = vmatmul.mubr.bf16.gmra.mrb[136].mxu0 %v16460_v4  ;;  %23128 = vst [vmem:[#allocation34_spill] sm:$0xff] %v18289_v50  ;;  %v15686_v29 = vld [vmem:[%s22945_s1 + $0xeb8] ss:$72 sps:$4 sm:$0xff]  }
 0x1af   : > { %4537 = vmatmul.mubr.bf16.gmra.mrb[132].mxu1 %v16458_v43  ;;  %5354 = vmatprep.mubr.bf16.mxu0 %v16461_v20  ;;  %v15778_v43 = vld [vmem:[%s22945_s1 + $0xed4] ss:$72 sps:$4 sm:$0xff]  }
 0x1b0   : > { %4546 = vmatprep.mubr.bf16.mxu1 %v16459_v41  ;;  %4620 = vmatpush1.bf16.msra.mxu1 %v15653_v32  ;;  %v15688_v32 = vld [vmem:[%s22945_s1 + $0xebc] ss:$72 sps:$4 sm:$0xff]  }
 0x1b1   : > { %4621 = vmatprep.subr.bf16.mxu1 %v15664_v35  ;;  %5422 = vmatpush1.bf16.msra.mxu0 %v15764_v56  ;;  %v15776_v35 = vld [vmem:[%s22945_s1 + $0xed0] ss:$72 sps:$4 sm:$0xff]   ;;  %v15784_v41 = vld [vmem:[%s22945_s1 + $0xf64] ss:$72 sps:$4 sm:$0xff]  }
 0x1b2   : > { %5423 = vmatprep.subr.bf16.mxu0 %v15772_v23 }
 0x1b4   : > { %4622 = vmatpush1.bf16.msra.mxu1 %v15662_v8  ;;  %v18294_v8 = vpop.f32.mrb[57].mxu0 }
 0x1b5   : > { %4623 = vmatprep.subr.bf16.mxu1 %v15673_v25  ;;  %5424 = vmatpush1.bf16.msra.mxu0 %v15770_v38  ;;  %23129 = vst [vmem:[#allocation35_spill] sm:$0xff] %v18294_v8  ;;  %v15697_v25 = vld [vmem:[%s22945_s1 + $0xf4c] ss:$72 sps:$4 sm:$0xff]   ;;  %v18299_v56 = vpop.f32.mrb[58].mxu0  ;;  %v15782_v38 = vld [vmem:[%s22945_s1 + $0xf60] ss:$72 sps:$4 sm:$0xff]  }
 0x1b6   : > { %5425 = vmatprep.subr.bf16.mxu0 %v15778_v43  ;;  %23130 = vst [vmem:[#allocation36_spill] sm:$0xff] %v18299_v56  ;;  %v18302_v23 = vpop.f32.mrb[59].mxu0  ;;  %v23144_v8 = vld [vmem:[#allocation10_spill] sm:$0xff] }
 0x1b7   : > { %4547 = vmatmul.mubr.bf16.gmra.mrb[136].mxu1 %v16460_v4  ;;  %23131 = vst [vmem:[#allocation37_spill] sm:$0xff] %v18302_v23  ;;  %v15695_v4 = vld [vmem:[%s22945_s1 + $0xf48] ss:$72 sps:$4 sm:$0xff]  }
 0x1b8   : > { %4556 = vmatprep.mubr.bf16.mxu1 %v16461_v20  ;;  %4624 = vmatpush1.bf16.msra.mxu1 %v15671_v61  ;;  %v16462_v61 = vld [vmem:[%s16839_s22 + $0xa0] ss:$16 sps:$4 sm:$0xff]   ;;  %v15703_v20 = vld [vmem:[%s22945_s1 + $0x2c] ss:$72 sps:$4 sm:$0xff]  }
 0x1b9   : > { %4625 = vmatprep.subr.bf16.mxu1 %v15679_v37  ;;  %5355 = vmatmul.mubr.bf16.gmra.mrb[140].mxu0 %v16462_v61  ;;  %v16463_v37 = vld [vmem:[%s16839_s22 + $0xc4] ss:$16 sps:$4 sm:$0xff]  }
 0x1ba   : > { %5364 = vmatprep.mubr.bf16.mxu0 %v16463_v37  ;;  %5426 = vmatpush1.bf16.msra.mxu0 %v15776_v35  ;;  %v16464_v35 = vld [vmem:[%s16839_s22 + $0xc0] ss:$16 sps:$4 sm:$0xff]  }
 0x1bb   : > { %5427 = vmatprep.subr.bf16.mxu0 %v15784_v41  ;;  %v15796_v41 = vld [vmem:[%s22945_s1 + $0x44] ss:$72 sps:$4 sm:$0xff]  }
 0x1bc   : > { %4626 = vmatpush1.bf16.msra.mxu1 %v15677_v2  ;;  %v18314_v2 = vpop.f32.mrb[60].mxu0 }
 0x1bd   : > { %4627 = vmatprep.subr.bf16.mxu1 %v15688_v32  ;;  %23132 = vst [vmem:[#allocation38_spill] sm:$0xff] %v18314_v2  ;;  %v18316_v32 = vpop.f32.mrb[61].mxu0 }
 0x1be   : > { %5428 = vmatpush1.bf16.msra.mxu0 %v15782_v38  ;;  %23133 = vst [vmem:[#allocation39_spill] sm:$0xff] %v18316_v32  ;;  %v18318_v43 = vpop.f32.mrb[62].mxu0  ;;  %v16467_v38 = vld [vmem:[%s16839_s22 + $0x104] ss:$16 sps:$4 sm:$0xff]  }
 0x1bf   : > { %4557 = vmatmul.mubr.bf16.gmra.mrb[140].mxu1 %v16462_v61  ;;  %23134 = vst [vmem:[#allocation40_spill] sm:$0xff] %v18318_v43  ;;  %v18321_v61 = vpop.f32.mrb[63].mxu0  ;;  %5804 = vmatprep.subr.bf16.mxu0 %v15796_v41 }
 0x1c0   : > { %4566 = vmatprep.mubr.bf16.mxu1 %v16463_v37  ;;  %4628 = vmatpush1.bf16.msra.mxu1 %v15686_v29  ;;  %23135 = vst [vmem:[#allocation41_spill] sm:$0xff] %v18321_v61  ;;  %v16465_v29 = vld [vmem:[%s16839_s22 + $0xe4] ss:$16 sps:$4 sm:$0xff]  }
 0x1c1   : > { %4629 = vmatprep.subr.bf16.mxu1 %v15697_v25  ;;  %5365 = vmatmul.mubr.bf16.gmra.mrb[144].mxu0 %v16464_v35  ;;  %v18327_v25 = vpop.f32.mrb[64].mxu0 }
 0x1c2   : > { %5374 = vmatprep.mubr.bf16.mxu0 %v16465_v29  ;;  %23136 = vst [vmem:[#allocation42_spill] sm:$0xff] %v18327_v25 }
 0x1c4   : > { %4630 = vmatpush1.bf16.msra.mxu1 %v15695_v4  ;;  %v18331_v4 = vpop.f32.mrb[65].mxu0 }
 0x1c5   : > { %5006 = vmatprep.subr.bf16.mxu1 %v15703_v20  ;;  %23137 = vst [vmem:[#allocation43_spill] sm:$0xff] %v18331_v4  ;;  %v18337_v43 = vpop.f32.mrb[66].mxu0 }
 0x1c6   : > { %23138 = vst [vmem:[#allocation44_spill] sm:$0xff] %v18337_v43 }
 0x1c7   : > { %4567 = vmatmul.mubr.bf16.gmra.mrb[144].mxu1 %v16464_v35  ;;  %v16466_v35 = vld [vmem:[%s16839_s22 + $0xe0] ss:$16 sps:$4 sm:$0xff]  }
 0x1c8   : > { %4576 = vmatprep.mubr.bf16.mxu1 %v16465_v29  ;;  %v18344_v29 = vpop.f32.mrb[67].mxu0 }
 0x1c9   : > { %5375 = vmatmul.mubr.bf16.gmra.mrb[148].mxu0 %v16466_v35  ;;  %23139 = vst [vmem:[#allocation45_spill] sm:$0xff] %v18344_v29  ;;  %v18353_v20 = vpop.f32.mrb[68].mxu0  ;;  %v16469_v29 = vld [vmem:[%s16839_s22 + $0x124] ss:$16 sps:$4 sm:$0xff]  }
 0x1ca   : > { %v18329_v37 = vpop.f32.mrb[40].mxu1  ;;  %5384 = vmatprep.mubr.bf16.mxu0 %v16467_v38  ;;  %23140 = vst [vmem:[#allocation46_spill] sm:$0xff] %v18353_v20  ;;  %v18357_v2 = vpop.f32.mrb[69].mxu0 }
 0x1cb   : > { %v18335_v61 = vpop.f32.mrb[41].mxu1  ;;  %23141 = vst [vmem:[#allocation47_spill] sm:$0xff] %v18357_v2  ;;  %v18363_v23 = vpop.f32.mrb[70].mxu0 }
 0x1cc   : > { %v18341_v41 = vpop.f32.mrb[42].mxu1  ;;  %23142 = vst [vmem:[#allocation48_spill] sm:$0xff] %v18363_v23 }
 0x1cd   : > { %v18348_v25 = vpop.f32.mrb[43].mxu1 }
 0x1cf   : > { %4577 = vmatmul.mubr.bf16.gmra.mrb[148].mxu1 %v16466_v35  ;;  %v16468_v35 = vld [vmem:[%s16839_s22 + $0x100] ss:$16 sps:$4 sm:$0xff]  }
 0x1d0   : > { %4586 = vmatprep.mubr.bf16.mxu1 %v16467_v38  ;;  %v18370_v38 = vpop.f32.mrb[71].mxu0 }
 0x1d1   : > { %5385 = vmatmul.mubr.bf16.gmra.mrb[152].mxu0 %v16468_v35  ;;  %23143 = vst [vmem:[#allocation49_spill] sm:$0xff] %v18370_v38  ;;  %v18379_v56 = vpop.f32.mrb[72].mxu0  ;;  %v23148_v38 = vld [vmem:[#allocation11_spill] sm:$0xff] }
 0x1d2   : > { %v18355_v32 = vpop.f32.mrb[44].mxu1  ;;  %5394 = vmatprep.mubr.bf16.mxu0 %v16469_v29  ;;  %23145 = vst [vmem:[#allocation10_spill] sm:$0xff] %v18379_v56  ;;  %v18383_v49 = vpop.f32.mrb[73].mxu0 }
 0x1d3   : > { %v18361_v4 = vpop.f32.mrb[45].mxu1  ;;  %23147 = vst [vmem:[#allocation51_spill] sm:$0xff] %v18383_v49  ;;  %v18389_v59 = vpop.f32.mrb[74].mxu0 }
 0x1d4   : > { %v18367_v43 = vpop.f32.mrb[46].mxu1  ;;  %23150 = vst [vmem:[#allocation52_spill] sm:$0xff] %v18389_v59  ;;  %v23159_v59 = vld [vmem:[#allocation15_spill] sm:$0xff] }
 0x1d5   : > { %v18374_v20 = vpop.f32.mrb[47].mxu1 }
 0x1d7   : > { %4587 = vmatmul.mubr.bf16.gmra.mrb[152].mxu1 %v16468_v35  ;;  %v16470_v35 = vld [vmem:[%s16839_s22 + $0x120] ss:$16 sps:$4 sm:$0xff]  }
 0x1d8   : > { %4596 = vmatprep.mubr.bf16.mxu1 %v16469_v29  ;;  %v18396_v29 = vpop.f32.mrb[75].mxu0 }
 0x1d9   : > { %5395 = vmatmul.mubr.bf16.gmra.mrb[156].mxu0 %v16470_v35  ;;  %23153 = vst [vmem:[#allocation54_spill] sm:$0xff] %v18396_v29  ;;  %v18413_v29 = vpop.f32.mrb[76].mxu0 }
 0x1da   : > { %v18381_v50 = vpop.f32.mrb[48].mxu1  ;;  %13345 = vmatprep.mubr.msk.bf16.mxu0 %vm3645_vm0, %v16471_v6  ;;  %23157 = vst [vmem:[#allocation56_spill] sm:$0xff] %v18413_v29  ;;  %v18417_v56 = vpop.f32.mrb[77].mxu0  ;;  %v15701_v29 = vld [vmem:[%s22945_s1 + $0x28] ss:$72 sps:$4 sm:$0xff]  }
 0x1db   : > { %23146 = vst [vmem:[#allocation50_spill] sm:$0xff] %v18381_v50  ;;  %v18387_v2 = vpop.f32.mrb[49].mxu1  ;;  %23158 = vst [vmem:[#allocation57_spill] sm:$0xff] %v18417_v56 }
 0x1dc   : > { %23149 = vst [vmem:[#allocation11_spill] sm:$0xff] %v18387_v2  ;;  %v18393_v23 = vpop.f32.mrb[50].mxu1 }
 0x1dd   : > { %23152 = vst [vmem:[#allocation53_spill] sm:$0xff] %v18393_v23  ;;  %v18400_v49 = vpop.f32.mrb[51].mxu1 }
 0x1de   : > { %23155 = vst [vmem:[#allocation55_spill] sm:$0xff] %v18400_v49 }
 0x1df   : > { %4597 = vmatmul.mubr.bf16.gmra.mrb[156].mxu1 %v16470_v35  ;;  %v15805_v35 = vld [vmem:[%s22945_s1 + $0x164] ss:$72 sps:$4 sm:$0xff]  }
 0x1e0   : > { %13315 = vmatprep.mubr.msk.bf16.mxu1 %vm3645_vm0, %v16471_v6  ;;  %v18423_v6 = vpop.f32.mrb[78].mxu0 }
 0x1e1   : > { %23161 = vst [vmem:[#allocation58_spill] sm:$0xff] %v18423_v6  ;;  %5438 = vmatmul.mubr.bf16.vlgmr.msra.gmra.mrb[120].mxu0 %v16472_v63  ;;  %v18433_v50 = vpop.f32.mrb[79].mxu0  ;;  %v15706_v6 = vld [vmem:[%s22945_s1 + $0xbc] ss:$72 sps:$4 sm:$0xff]  }
 0x1e2   : > { %v18415_v23 = vpop.f32.mrb[52].mxu1  ;;  %23163 = vst [vmem:[#allocation60_spill] sm:$0xff] %v18433_v50  ;;  %13346 = vmatprep.mubr.msk.bf16.mxu0 %vm3645_vm0, %v18443_v16  ;;  %5805 = vmatpush1.bf16.msra.mxu0 %v15794_v46  ;;  %v15709_v46 = vld [vmem:[%s22945_s1 + $0x14c] ss:$72 sps:$4 sm:$0xff]  }
 0x1e3   : > { %v18421_v49 = vpop.f32.mrb[53].mxu1  ;;  %5806 = vmatprep.subr.bf16.mxu0 %v15802_v10 }
 0x1e4   : > { %23160 = vst [vmem:[#allocation15_spill] sm:$0xff] %v18421_v49  ;;  %v18427_v2 = vpop.f32.mrb[54].mxu1  ;;  %v15800_v49 = vld [vmem:[%s22945_s1 + $0xd0] ss:$72 sps:$4 sm:$0xff]  }
 0x1e5   : > { %23162 = vst [vmem:[#allocation59_spill] sm:$0xff] %v18427_v2  ;;  %v18437_v56 = vpop.f32.mrb[55].mxu1  ;;  %v15704_v2 = vld [vmem:[%s22945_s1 + $0xb8] ss:$72 sps:$4 sm:$0xff]  }
 0x1e6   : > { %23164 = vst [vmem:[#allocation61_spill] sm:$0xff] %v18437_v56  ;;  %5807 = vmatpush1.bf16.msra.mxu0 %v15800_v49  ;;  %v15707_v56 = vld [vmem:[%s22945_s1 + $0x148] ss:$72 sps:$4 sm:$0xff]   ;;  %v15712_v49 = vld [vmem:[%s22945_s1 + $0x1dc] ss:$72 sps:$4 sm:$0xff]  }
 0x1e7   : > { %4640 = vmatmul.mubr.bf16.vlgmr.msra.gmra.mrb[120].mxu1 %v16472_v63  ;;  %v15803_v63 = vld [vmem:[%s22945_s1 + $0x160] ss:$72 sps:$4 sm:$0xff]   ;;  %5808 = vmatprep.subr.bf16.mxu0 %v15805_v35 }
 0x1e8   : > { %5007 = vmatpush1.bf16.msra.mxu1 %v15701_v29  ;;  %13316 = vmatprep.mubr.msk.bf16.mxu1 %vm3645_vm0, %v18443_v16  ;;  %v18483_v35 = vld [vmem:[%s16839_s22 + $0x28] ss:$16 sps:$4 sm:$0xff]  }
 0x1e9   : > { %5008 = vmatprep.subr.bf16.mxu1 %v15706_v6  ;;  %v15811_v6 = vld [vmem:[%s22945_s1 + $0x1f4] ss:$72 sps:$4 sm:$0xff]   ;;  %23169 = vst [vmem:[#allocation66_spill] sm:$0xff] %v18483_v35  ;;  %5448 = vmatmul.mubr.bf16.gmra.mrb[124].mxu0 %v18483_v35  ;;  %v15809_v29 = vld [vmem:[%s22945_s1 + $0x1f0] ss:$72 sps:$4 sm:$0xff]  }
 0x1ea   : > { %v18463_v10 = vpop.f32.mrb[56].mxu1  ;;  %5809 = vmatpush1.bf16.msra.mxu0 %v15803_v63  ;;  %v15710_v63 = vld [vmem:[%s22945_s1 + $0x1d8] ss:$72 sps:$4 sm:$0xff]  }
 0x1eb   : > { %23166 = vst [vmem:[#allocation63_spill] sm:$0xff] %v18463_v10  ;;  %v18470_v50 = vpop.f32.mrb[57].mxu1  ;;  %5810 = vmatprep.subr.bf16.mxu0 %v15811_v6 }
 0x1ec   : > { %23167 = vst [vmem:[#allocation64_spill] sm:$0xff] %v18470_v50  ;;  %v18477_v16 = vpop.f32.mrb[58].mxu1  ;;  %5009 = vmatpush1.bf16.msra.mxu1 %v15704_v2  ;;  %v18494_v50 = vld [vmem:[%s16839_s22 + $0x4c] ss:$16 sps:$4 sm:$0xff]  }
 0x1ed   : > { %23168 = vst [vmem:[#allocation65_spill] sm:$0xff] %v18477_v16  ;;  %v18488_v10 = vpop.f32.mrb[59].mxu1  ;;  %5010 = vmatprep.subr.bf16.mxu1 %v15709_v46  ;;  %23171 = vst [vmem:[#allocation68_spill] sm:$0xff] %v18494_v50  ;;  %13347 = vmatprep.mubr.msk.bf16.mxu0 %vm3645_vm0, %v18494_v50  ;;  %v15814_v46 = vld [vmem:[%s22945_s1 + $0x284] ss:$72 sps:$4 sm:$0xff]  }
 0x1ee   : > { %23170 = vst [vmem:[#allocation67_spill] sm:$0xff] %v18488_v10  ;;  %5811 = vmatpush1.bf16.msra.mxu0 %v15809_v29  ;;  %v15713_v29 = vld [vmem:[%s22945_s1 + $0x268] ss:$72 sps:$4 sm:$0xff]   ;;  %v15718_v10 = vld [vmem:[%s22945_s1 + $0x2fc] ss:$72 sps:$4 sm:$0xff]  }
 0x1ef   : > { %4650 = vmatmul.mubr.bf16.gmra.mrb[124].mxu1 %v18483_v35  ;;  %5812 = vmatprep.subr.bf16.mxu0 %v15814_v46  ;;  %v18535_v16 = vld [vmem:[%s16839_s22 + $0x48] ss:$16 sps:$4 sm:$0xff]  }
 0x1f0   : > { %5011 = vmatpush1.bf16.msra.mxu1 %v15707_v56  ;;  %13317 = vmatprep.mubr.msk.bf16.mxu1 %vm3645_vm0, %v18494_v50  ;;  %v15812_v56 = vld [vmem:[%s22945_s1 + $0x280] ss:$72 sps:$4 sm:$0xff]   ;;  %23175 = vst [vmem:[#allocation71_spill] sm:$0xff] %v18535_v16  ;;  %v15818_v46 = vld [vmem:[%s22945_s1 + $0x310] ss:$72 sps:$4 sm:$0xff]  }
 0x1f1   : > { %5012 = vmatprep.subr.bf16.mxu1 %v15712_v49  ;;  %v15820_v49 = vld [vmem:[%s22945_s1 + $0x314] ss:$72 sps:$4 sm:$0xff]   ;;  %5458 = vmatmul.mubr.bf16.gmra.mrb[128].mxu0 %v18535_v16 }
 0x1f2   : > { %v18515_v35 = vpop.f32.mrb[60].mxu1  ;;  %5813 = vmatpush1.bf16.msra.mxu0 %v15812_v56  ;;  %v15716_v56 = vld [vmem:[%s22945_s1 + $0x2f8] ss:$72 sps:$4 sm:$0xff]  }
 0x1f3   : > { %v18522_v50 = vpop.f32.mrb[61].mxu1  ;;  %5814 = vmatprep.subr.bf16.mxu0 %v15820_v49  ;;  %v15824_v49 = vld [vmem:[%s22945_s1 + $0x3a0] ss:$72 sps:$4 sm:$0xff]  }
 0x1f4   : > { %23173 = vst [vmem:[#allocation69_spill] sm:$0xff] %v18522_v50  ;;  %v18529_v2 = vpop.f32.mrb[62].mxu1  ;;  %5013 = vmatpush1.bf16.msra.mxu1 %v15710_v63  ;;  %v18546_v50 = vld [vmem:[%s16839_s22 + $0x6c] ss:$16 sps:$4 sm:$0xff]  }
 0x1f5   : > { %23174 = vst [vmem:[#allocation70_spill] sm:$0xff] %v18529_v2  ;;  %v18540_v6 = vpop.f32.mrb[63].mxu1  ;;  %5014 = vmatprep.subr.bf16.mxu1 %v15715_v57  ;;  %23177 = vst [vmem:[#allocation73_spill] sm:$0xff] %v18546_v50  ;;  %13348 = vmatprep.mubr.msk.bf16.mxu0 %vm3645_vm0, %v18546_v50  ;;  %v15826_v57 = vld [vmem:[%s22945_s1 + $0x3a4] ss:$72 sps:$4 sm:$0xff]  }
 0x1f6   : > { %23176 = vst [vmem:[#allocation72_spill] sm:$0xff] %v18540_v6  ;;  %v15721_v63 = vld [vmem:[%s22945_s1 + $0x38c] ss:$72 sps:$4 sm:$0xff]   ;;  %5815 = vmatpush1.bf16.msra.mxu0 %v15818_v46  ;;  %v15719_v46 = vld [vmem:[%s22945_s1 + $0x388] ss:$72 sps:$4 sm:$0xff]  }
 0x1f7   : > { %4660 = vmatmul.mubr.bf16.gmra.mrb[128].mxu1 %v18535_v16  ;;  %5816 = vmatprep.subr.bf16.mxu0 %v15826_v57  ;;  %v18587_v2 = vld [vmem:[%s16839_s22 + $0x68] ss:$16 sps:$4 sm:$0xff]   ;;  %v15727_v6 = vld [vmem:[%s22945_s1 + $0x41c] ss:$72 sps:$4 sm:$0xff]  }
 0x1f8   : > { %5015 = vmatpush1.bf16.msra.mxu1 %v15713_v29  ;;  %13318 = vmatprep.mubr.msk.bf16.mxu1 %vm3645_vm0, %v18546_v50  ;;  %23180 = vst [vmem:[#allocation76_spill] sm:$0xff] %v18587_v2  ;;  %v15827_v57 = vld [vmem:[%s22945_s1 + $0x430] ss:$72 sps:$4 sm:$0xff]  }
 0x1f9   : > { %5016 = vmatprep.subr.bf16.mxu1 %v15718_v10  ;;  %v15829_v10 = vld [vmem:[%s22945_s1 + $0x434] ss:$72 sps:$4 sm:$0xff]   ;;  %5468 = vmatmul.mubr.bf16.gmra.mrb[132].mxu0 %v18587_v2 }
 0x1fa   : > { %v18567_v16 = vpop.f32.mrb[64].mxu1  ;;  %5817 = vmatpush1.bf16.msra.mxu0 %v15824_v49  ;;  %v15725_v49 = vld [vmem:[%s22945_s1 + $0x418] ss:$72 sps:$4 sm:$0xff]  }
 0x1fb   : > { %v18574_v50 = vpop.f32.mrb[65].mxu1  ;;  %5818 = vmatprep.subr.bf16.mxu0 %v15829_v10  ;;  %v15833_v10 = vld [vmem:[%s22945_s1 + $0x4c0] ss:$72 sps:$4 sm:$0xff]  }
 0x1fc   : > { %23178 = vst [vmem:[#allocation74_spill] sm:$0xff] %v18574_v50  ;;  %v18581_v27 = vpop.f32.mrb[66].mxu1  ;;  %5017 = vmatpush1.bf16.msra.mxu1 %v15716_v56  ;;  %v18598_v50 = vld [vmem:[%s16839_s22 + $0x8c] ss:$16 sps:$4 sm:$0xff]  }
 0x1fd   : > { %23179 = vst [vmem:[#allocation75_spill] sm:$0xff] %v18581_v27  ;;  %v18592_v29 = vpop.f32.mrb[67].mxu1  ;;  %5018 = vmatprep.subr.bf16.mxu1 %v15721_v63  ;;  %23182 = vst [vmem:[#allocation78_spill] sm:$0xff] %v18598_v50  ;;  %13349 = vmatprep.mubr.msk.bf16.mxu0 %vm3645_vm0, %v18598_v50  ;;  %v15835_v63 = vld [vmem:[%s22945_s1 + $0x4c4] ss:$72 sps:$4 sm:$0xff]  }
 0x1fe   : > { %23181 = vst [vmem:[#allocation77_spill] sm:$0xff] %v18592_v29  ;;  %v15733_v56 = vld [vmem:[%s22945_s1 + $0x4ac] ss:$72 sps:$4 sm:$0xff]   ;;  %5819 = vmatpush1.bf16.msra.mxu0 %v15827_v57  ;;  %v15731_v57 = vld [vmem:[%s22945_s1 + $0x4a8] ss:$72 sps:$4 sm:$0xff]  }
 0x1ff   : > { %4670 = vmatmul.mubr.bf16.gmra.mrb[132].mxu1 %v18587_v2  ;;  %5820 = vmatprep.subr.bf16.mxu0 %v15835_v63  ;;  %v15836_v63 = vld [vmem:[%s22945_s1 + $0x550] ss:$72 sps:$4 sm:$0xff]  }
 0x200   : > { %13319 = vmatprep.mubr.msk.bf16.mxu1 %vm3645_vm0, %v18598_v50  ;;  %5019 = vmatpush1.bf16.msra.mxu1 %v15719_v46  ;;  %v23183_v50 = vld [vmem:[#allocation21_spill] sm:$0xff] }
 0x201   : > { %5020 = vmatprep.subr.bf16.mxu1 %v15727_v6  ;;  %v15838_v6 = vld [vmem:[%s22945_s1 + $0x554] ss:$72 sps:$4 sm:$0xff]   ;;  %5478 = vmatmul.mubr.bf16.gmra.mrb[136].mxu0 %v18639_v18 }
 0x202   : > { %v18619_v2 = vpop.f32.mrb[68].mxu1  ;;  %5821 = vmatpush1.bf16.msra.mxu0 %v15833_v10  ;;  %v15740_v10 = vld [vmem:[%s22945_s1 + $0x538] ss:$72 sps:$4 sm:$0xff]  }
 0x203   : > { %v18626_v29 = vpop.f32.mrb[69].mxu1  ;;  %5822 = vmatprep.subr.bf16.mxu0 %v15838_v6  ;;  %v15842_v6 = vld [vmem:[%s22945_s1 + $0x5e0] ss:$72 sps:$4 sm:$0xff]  }
 0x204   : > { %23184 = vst [vmem:[#allocation21_spill] sm:$0xff] %v18626_v29  ;;  %v18633_v27 = vpop.f32.mrb[70].mxu1  ;;  %5021 = vmatpush1.bf16.msra.mxu1 %v15725_v49  ;;  %v18650_v29 = vld [vmem:[%s16839_s22 + $0xac] ss:$16 sps:$4 sm:$0xff]  }
 0x205   : > { %23185 = vst [vmem:[#allocation79_spill] sm:$0xff] %v18633_v27  ;;  %v18644_v46 = vpop.f32.mrb[71].mxu1  ;;  %5022 = vmatprep.subr.bf16.mxu1 %v15733_v56  ;;  %23188 = vst [vmem:[#allocation82_spill] sm:$0xff] %v18650_v29  ;;  %13350 = vmatprep.mubr.msk.bf16.mxu0 %vm3645_vm0, %v18650_v29  ;;  %v15844_v56 = vld [vmem:[%s22945_s1 + $0x5e4] ss:$72 sps:$4 sm:$0xff]  }
 0x206   : > { %23187 = vst [vmem:[#allocation81_spill] sm:$0xff] %v18644_v46  ;;  %v15748_v49 = vld [vmem:[%s22945_s1 + $0x5cc] ss:$72 sps:$4 sm:$0xff]   ;;  %5823 = vmatpush1.bf16.msra.mxu0 %v15836_v63  ;;  %v15746_v63 = vld [vmem:[%s22945_s1 + $0x5c8] ss:$72 sps:$4 sm:$0xff]  }
 0x207   : > { %4680 = vmatmul.mubr.bf16.gmra.mrb[136].mxu1 %v18639_v18  ;;  %5824 = vmatprep.subr.bf16.mxu0 %v15844_v56  ;;  %v18691_v27 = vld [vmem:[%s16839_s22 + $0xa8] ss:$16 sps:$4 sm:$0xff]   ;;  %v15754_v46 = vld [vmem:[%s22945_s1 + $0x65c] ss:$72 sps:$4 sm:$0xff]  }
 0x208   : > { %13320 = vmatprep.mubr.msk.bf16.mxu1 %vm3645_vm0, %v18650_v29  ;;  %5023 = vmatpush1.bf16.msra.mxu1 %v15731_v57  ;;  %23191 = vst [vmem:[#allocation85_spill] sm:$0xff] %v18691_v27  ;;  %v15848_v56 = vld [vmem:[%s22945_s1 + $0x670] ss:$72 sps:$4 sm:$0xff]  }
 0x209   : > { %5024 = vmatprep.subr.bf16.mxu1 %v15742_v0  ;;  %v15850_v0 = vld [vmem:[%s22945_s1 + $0x674] ss:$72 sps:$4 sm:$0xff]   ;;  %5488 = vmatmul.mubr.bf16.gmra.mrb[140].mxu0 %v18691_v27 }
 0x20a   : > { %v18671_v18 = vpop.f32.mrb[72].mxu1  ;;  %5825 = vmatpush1.bf16.msra.mxu0 %v15842_v6  ;;  %v15752_v6 = vld [vmem:[%s22945_s1 + $0x658] ss:$72 sps:$4 sm:$0xff]  }
 0x20b   : > { %v18678_v29 = vpop.f32.mrb[73].mxu1  ;;  %5826 = vmatprep.subr.bf16.mxu0 %v15850_v0  ;;  %v15851_v0 = vld [vmem:[%s22945_s1 + $0x700] ss:$72 sps:$4 sm:$0xff]  }
 0x20c   : > { %23189 = vst [vmem:[#allocation83_spill] sm:$0xff] %v18678_v29  ;;  %v18685_v33 = vpop.f32.mrb[74].mxu1  ;;  %5025 = vmatpush1.bf16.msra.mxu1 %v15740_v10  ;;  %v18702_v29 = vld [vmem:[%s16839_s22 + $0xcc] ss:$16 sps:$4 sm:$0xff]  }
 0x20d   : > { %23190 = vst [vmem:[#allocation84_spill] sm:$0xff] %v18685_v33  ;;  %v18696_v57 = vpop.f32.mrb[75].mxu1  ;;  %5026 = vmatprep.subr.bf16.mxu1 %v15748_v49  ;;  %23193 = vst [vmem:[#allocation87_spill] sm:$0xff] %v18702_v29  ;;  %13351 = vmatprep.mubr.msk.bf16.mxu0 %vm3645_vm0, %v18702_v29  ;;  %v15853_v49 = vld [vmem:[%s22945_s1 + $0x704] ss:$72 sps:$4 sm:$0xff]  }
 0x20e   : > { %23192 = vst [vmem:[#allocation86_spill] sm:$0xff] %v18696_v57  ;;  %v15760_v10 = vld [vmem:[%s22945_s1 + $0x6ec] ss:$72 sps:$4 sm:$0xff]   ;;  %5827 = vmatpush1.bf16.msra.mxu0 %v15848_v56  ;;  %v15758_v56 = vld [vmem:[%s22945_s1 + $0x6e8] ss:$72 sps:$4 sm:$0xff]  }
 0x20f   : > { %4690 = vmatmul.mubr.bf16.gmra.mrb[140].mxu1 %v18691_v27  ;;  %5828 = vmatprep.subr.bf16.mxu0 %v15853_v49  ;;  %v18743_v33 = vld [vmem:[%s16839_s22 + $0xc8] ss:$16 sps:$4 sm:$0xff]   ;;  %v15769_v57 = vld [vmem:[%s22945_s1 + $0x77c] ss:$72 sps:$4 sm:$0xff]  }
 0x210   : > { %13321 = vmatprep.mubr.msk.bf16.mxu1 %vm3645_vm0, %v18702_v29  ;;  %5027 = vmatpush1.bf16.msra.mxu1 %v15746_v63  ;;  %23196 = vst [vmem:[#allocation90_spill] sm:$0xff] %v18743_v33  ;;  %v15857_v49 = vld [vmem:[%s22945_s1 + $0x790] ss:$72 sps:$4 sm:$0xff]  }
 0x211   : > { %5028 = vmatprep.subr.bf16.mxu1 %v15754_v46  ;;  %v15859_v46 = vld [vmem:[%s22945_s1 + $0x794] ss:$72 sps:$4 sm:$0xff]   ;;  %5498 = vmatmul.mubr.bf16.gmra.mrb[144].mxu0 %v18743_v33 }
 0x212   : > { %v18723_v27 = vpop.f32.mrb[76].mxu1  ;;  %5829 = vmatpush1.bf16.msra.mxu0 %v15851_v0  ;;  %v15767_v0 = vld [vmem:[%s22945_s1 + $0x778] ss:$72 sps:$4 sm:$0xff]  }
 0x213   : > { %v18730_v29 = vpop.f32.mrb[77].mxu1  ;;  %5830 = vmatprep.subr.bf16.mxu0 %v15859_v46  ;;  %v15775_v46 = vld [vmem:[%s22945_s1 + $0x80c] ss:$72 sps:$4 sm:$0xff]  }
 0x214   : > { %23194 = vst [vmem:[#allocation88_spill] sm:$0xff] %v18730_v29  ;;  %v18737_v24 = vpop.f32.mrb[78].mxu1  ;;  %5029 = vmatpush1.bf16.msra.mxu1 %v15752_v6  ;;  %v18754_v29 = vld [vmem:[%s16839_s22 + $0xec] ss:$16 sps:$4 sm:$0xff]  }
 0x215   : > { %23195 = vst [vmem:[#allocation89_spill] sm:$0xff] %v18737_v24  ;;  %v18748_v63 = vpop.f32.mrb[79].mxu1  ;;  %5030 = vmatprep.subr.bf16.mxu1 %v15760_v10  ;;  %23198 = vst [vmem:[#allocation92_spill] sm:$0xff] %v18754_v29  ;;  %13352 = vmatprep.mubr.msk.bf16.mxu0 %vm3645_vm0, %v18754_v29  ;;  %v18764_v10 = vpop.f32.mrb[80].mxu0  ;;  %v15862_v24 = vld [vmem:[%s22945_s1 + $0x824] ss:$72 sps:$4 sm:$0xff]  }
 0x216   : > { %23197 = vst [vmem:[#allocation91_spill] sm:$0xff] %v18748_v63  ;;  %23199 = vst [vmem:[#allocation93_spill] sm:$0xff] %v18764_v10  ;;  %v18774_v6 = vpop.f32.mrb[81].mxu0  ;;  %5831 = vmatpush1.bf16.msra.mxu0 %v15857_v49  ;;  %v15773_v49 = vld [vmem:[%s22945_s1 + $0x808] ss:$72 sps:$4 sm:$0xff]  }
 0x217   : > { %4700 = vmatmul.mubr.bf16.gmra.mrb[144].mxu1 %v18743_v33  ;;  %23200 = vst [vmem:[#allocation94_spill] sm:$0xff] %v18774_v6  ;;  %v18779_v10 = vpop.f32.mrb[82].mxu0  ;;  %5832 = vmatprep.subr.bf16.mxu0 %v15862_v24  ;;  %v15781_v24 = vld [vmem:[%s22945_s1 + $0x89c] ss:$72 sps:$4 sm:$0xff]  }
 0x218   : > { %13322 = vmatprep.mubr.msk.bf16.mxu1 %vm3645_vm0, %v18754_v29  ;;  %5031 = vmatpush1.bf16.msra.mxu1 %v15758_v56  ;;  %23201 = vst [vmem:[#allocation95_spill] sm:$0xff] %v18779_v10  ;;  %v18781_v63 = vpop.f32.mrb[83].mxu0  ;;  %v15860_v56 = vld [vmem:[%s22945_s1 + $0x820] ss:$72 sps:$4 sm:$0xff]  }
 0x219   : > { %5032 = vmatprep.subr.bf16.mxu1 %v15769_v57  ;;  %23202 = vst [vmem:[#allocation96_spill] sm:$0xff] %v18781_v63  ;;  %v15868_v57 = vld [vmem:[%s22945_s1 + $0x8b4] ss:$72 sps:$4 sm:$0xff]   ;;  %v18795_v63 = vld [vmem:[%s16839_s22 + $0xe8] ss:$16 sps:$4 sm:$0xff]   ;;  %v18822_v58 = vpop.f32.mrb[84].mxu0 }
 0x21a   : > { %v4242_v33 = vpop.f32.mrb[80].mxu1  ;;  %5508 = vmatmul.mubr.bf16.gmra.mrb[148].mxu0 %v18795_v63 }
 0x21b   : > { %v4376_v29 = vadd.f32 %v18153_v26, %v4242_v33  ;;  %v4244_v6 = vpop.f32.mrb[81].mxu1  ;;  %13353 = vmatprep.mubr.msk.bf16.mxu0 %vm3645_vm0, %v18803_v30  ;;  %5833 = vmatpush1.bf16.msra.mxu0 %v15860_v56 }
 0x21c   : > { %v4378_v13 = vadd.f32 %v18155_v40, %v4244_v6  ;;  %v4246_v10 = vpop.f32.mrb[82].mxu1  ;;  %5033 = vmatpush1.bf16.msra.mxu1 %v15767_v0  ;;  %v23203_v40 = vmax.f32 %v17744_v22, %v18329_v37  ;;  %5834 = vmatprep.subr.bf16.mxu0 %v15868_v57  ;;  %v23205_v22 = vmax.f32 %v17762_v28, %v18341_v41  ;;  %v15787_v28 = vld [vmem:[%s22945_s1 + $0x92c] ss:$72 sps:$4 sm:$0xff]  }
 0x21d   : > { %v4380_v33 = vadd.f32 %v18157_v45, %v4246_v10  ;;  %v4248_v26 = vpop.f32.mrb[83].mxu1  ;;  %5034 = vmatprep.subr.bf16.mxu1 %v15775_v46  ;;  %v15866_v45 = vld [vmem:[%s22945_s1 + $0x8b0] ss:$72 sps:$4 sm:$0xff]   ;;  %v23204_v10 = vmax.f32 %v17753_v52, %v18335_v61 }
 0x21e   : > { %v18810_v6 = vmax.f32 %v23203_v40, %v4376_v29  ;;  %v4382_v0 = vadd.f32 %v18163_v14, %v4248_v26  ;;  %v15779_v52 = vld [vmem:[%s22945_s1 + $0x898] ss:$72 sps:$4 sm:$0xff]   ;;  %v23206_v14 = vmax.f32 %v17764_v48, %v18348_v25  ;;  %v15892_v26 = vld [vmem:[%s22945_s1 + $0x944] ss:$72 sps:$4 sm:$0xff]  }
 0x21f   : > { %v18819_v46 = vmax.f32 %v23204_v10, %v4378_v13  ;;  %4710 = vmatmul.mubr.bf16.gmra.mrb[148].mxu1 %v18795_v63  ;;  %v18827_v37 = vmax.f32 %v23205_v22, %v4380_v33  ;;  %v18834_v13 = vpop.f32.mrb[85].mxu0  ;;  %5835 = vmatpush1.bf16.msra.mxu0 %v15866_v45  ;;  %v18851_v25 = vld [vmem:[%s16839_s22 + $0x108] ss:$16 sps:$4 sm:$0xff]   ;;  %v23208_v10 = vmax.f32 %v17787_v62, %v18361_v4 }
 0x220   : > { %13323 = vmatprep.mubr.msk.bf16.mxu1 %vm3645_vm0, %v18803_v30  ;;  %5035 = vmatpush1.bf16.msra.mxu1 %v15773_v49  ;;  %v18839_v61 = vmax.f32 %v23206_v14, %v4382_v0  ;;  %v18844_v41 = vpop.f32.mrb[86].mxu0  ;;  %v18859_v0 = vld [vmem:[%s16839_s22 + $0x12c] ss:$16 sps:$4 sm:$0xff]   ;;  %v23211_v62 = vmax.f32 %v23144_v8, %v18374_v20  ;;  %v18903_v20 = vld [vmem:[%s16839_s22 + $0x4] ss:$16 sps:$4 sm:$0xff]  }
 0x221   : > { %5036 = vmatprep.subr.bf16.mxu1 %v15781_v24  ;;  %v18846_v56 = vpop.f32.mrb[87].mxu0  ;;  %5937 = vmatprep.subr.bf16.mxu0 %v15892_v26 }
 0x222   : > { %v4252_v29 = vpop.f32.mrb[84].mxu1  ;;  %5518 = vmatmul.mubr.bf16.gmra.mrb[152].mxu0 %v18851_v25  ;;  %v18875_v22 = vpop.f32.mrb[88].mxu0 }
 0x223   : > { %v4386_v57 = vadd.f32 %v18187_v9, %v4252_v29  ;;  %v4254_v49 = vpop.f32.mrb[85].mxu1  ;;  %13354 = vmatprep.mubr.msk.bf16.mxu0 %vm3645_vm0, %v18859_v0  ;;  %v23207_v9 = vmax.f32 %v17781_v55, %v18355_v32  ;;  %v23214_v29 = vld [vmem:[#allocation27_spill] sm:$0xff] }
 0x224   : > { %v4388_v33 = vadd.f32 %v18189_v17, %v4254_v49  ;;  %v4256_v48 = vpop.f32.mrb[86].mxu1  ;;  %5037 = vmatpush1.bf16.msra.mxu1 %v15779_v52  ;;  %v23209_v52 = vmax.f32 %v17793_v31, %v18367_v43  ;;  %23216 = vst [vmem:[#allocation27_spill] sm:$0xff] %v18903_v20 }
 0x225   : > { %v4390_v24 = vadd.f32 %v18191_v11, %v4256_v48  ;;  %v4258_v40 = vpop.f32.mrb[87].mxu1  ;;  %5139 = vmatprep.subr.bf16.mxu1 %v15787_v28  ;;  %v18866_v17 = vmax.f32 %v23207_v9, %v4386_v57  ;;  %v23215_v48 = vld [vmem:[#allocation28_spill] sm:$0xff] }
 0x226   : > { %v4392_v45 = vadd.f32 %v18197_v42, %v4258_v40  ;;  %v18872_v11 = vmax.f32 %v23208_v10, %v4388_v33  ;;  %v18884_v42 = vpop.f32.mrb[89].mxu0  ;;  %v18898_v33 = vld [vmem:[%s16839_s22 + $0x128] ss:$16 sps:$4 sm:$0xff]   ;;  %v23220_v10 = vld [vmem:[#allocation12_spill] sm:$0xff] }
 0x227   : > { %4720 = vmatmul.mubr.bf16.gmra.mrb[152].mxu1 %v18851_v25  ;;  %v18880_v55 = vmax.f32 %v23209_v52, %v4390_v24  ;;  %23210 = vst [vmem:[#allocation97_spill] sm:$0xff] %v18884_v42  ;;  %v18891_v4 = vpop.f32.mrb[90].mxu0  ;;  %v23217_v24 = vld [vmem:[#allocation50_spill] sm:$0xff]  ;;  %v23221_v52 = vld [vmem:[#allocation11_spill] sm:$0xff] }
 0x228   : > { %13324 = vmatprep.mubr.msk.bf16.mxu1 %vm3645_vm0, %v18859_v0  ;;  %v18889_v32 = vmax.f32 %v23211_v62, %v4392_v45  ;;  %23212 = vst [vmem:[#allocation98_spill] sm:$0xff] %v18891_v4  ;;  %v18893_v28 = vpop.f32.mrb[91].mxu0  ;;  %v23218_v40 = vmax.f32 %v23148_v38, %v23217_v24  ;;  %v23222_v62 = vmax.f32 %v23220_v10, %v23221_v52  ;;  %v23241_v4 = vld [vmem:[#allocation15_spill] sm:$0xff] }
 0x229   : > { %23213 = vst [vmem:[#allocation99_spill] sm:$0xff] %v18893_v28  ;;  %v23242_v42 = vmax.f32 %v17843_v54, %v23241_v4  ;;  %v23247_v54 = vld [vmem:[#allocation61_spill] sm:$0xff] }
 0x22a   : > { %v4262_v14 = vpop.f32.mrb[88].mxu1  ;;  %5528 = vmatmul.mubr.bf16.gmra.mrb[156].mxu0 %v18898_v33 }
 0x22b   : > { %v4396_v31 = vadd.f32 %v18221_v53, %v4262_v14  ;;  %v4264_v43 = vpop.f32.mrb[89].mxu1  ;;  %5836 = vmatprep.mubr.bf16.mxu0 %v18903_v20  ;;  %v23219_v53 = vld [vmem:[#allocation29_spill] sm:$0xff] }
 0x22c   : > { %v4398_v57 = vadd.f32 %v23214_v29, %v4264_v43  ;;  %v4266_v49 = vpop.f32.mrb[90].mxu1  ;;  %v18918_v43 = vpop.f32.mrb[92].mxu0  ;;  %v23224_v29 = vld [vmem:[#allocation13_spill] sm:$0xff] }
 0x22d   : > { %v4400_v26 = vadd.f32 %v23215_v48, %v4266_v49  ;;  %v4268_v8 = vpop.f32.mrb[91].mxu1  ;;  %v18909_v9 = vmax.f32 %v23218_v40, %v4396_v31  ;;  %23223 = vst [vmem:[#allocation28_spill] sm:$0xff] %v18918_v43  ;;  %v23225_v49 = vld [vmem:[#allocation53_spill] sm:$0xff]  ;;  %v18926_v38 = vpop.f32.mrb[93].mxu0  ;;  %v23228_v31 = vld [vmem:[#allocation14_spill] sm:$0xff] }
 0x22e   : > { %v4402_v45 = vadd.f32 %v23219_v53, %v4268_v8  ;;  %v18915_v14 = vmax.f32 %v23222_v62, %v4398_v57  ;;  %v23226_v48 = vmax.f32 %v23224_v29, %v23225_v49  ;;  %23227 = vst [vmem:[#allocation50_spill] sm:$0xff] %v18926_v38  ;;  %v23229_v8 = vld [vmem:[#allocation55_spill] sm:$0xff]  ;;  %v18933_v57 = vpop.f32.mrb[94].mxu0  ;;  %v15890_v53 = vld [vmem:[%s22945_s1 + $0x940] ss:$72 sps:$4 sm:$0xff]   ;;  %v23234_v62 = vld [vmem:[#allocation30_spill] sm:$0xff] }
 0x22f   : > { %4730 = vmatmul.mubr.bf16.gmra.mrb[156].mxu1 %v18898_v33  ;;  %v23230_v24 = vmax.f32 %v23228_v31, %v23229_v8  ;;  %23232 = vst [vmem:[#allocation12_spill] sm:$0xff] %v18933_v57  ;;  %v18938_v52 = vpop.f32.mrb[95].mxu0  ;;  %v15785_v8 = vld [vmem:[%s22945_s1 + $0x928] ss:$72 sps:$4 sm:$0xff]   ;;  %v23237_v57 = vld [vmem:[#allocation32_spill] sm:$0xff] }
 0x230   : > { %v18923_v28 = vmax.f32 %v23226_v48, %v4400_v26  ;;  %5038 = vmatprep.mubr.bf16.mxu1 %v18903_v20  ;;  %23233 = vst [vmem:[#allocation11_spill] sm:$0xff] %v18938_v52  ;;  %v15898_v26 = vld [vmem:[%s22945_s1 + $0x9d4] ss:$72 sps:$4 sm:$0xff]   ;;  %v15904_v20 = vld [vmem:[%s22945_s1 + $0xa64] ss:$72 sps:$4 sm:$0xff]  }
 0x231   : > { %v18931_v40 = vmax.f32 %v23230_v24, %v4402_v45  ;;  %v23235_v48 = vld [vmem:[#allocation31_spill] sm:$0xff]  ;;  %v18949_v24 = vld [vmem:[%s16839_s22] ss:$16 sps:$4 sm:$0xff]  }
 0x232   : > { %v4272_v10 = vpop.f32.mrb[92].mxu1  ;;  %23236 = vst [vmem:[#allocation13_spill] sm:$0xff] %v18949_v24  ;;  %5837 = vmatmul.mubr.bf16.vlgmr.msra.gmra.mrb[160].mxu0 %v18949_v24  ;;  %v15790_v43 = vld [vmem:[%s22945_s1 + $0x9bc] ss:$72 sps:$4 sm:$0xff]  }
 0x233   : > { %23231 = vst [vmem:[#allocation29_spill] sm:$0xff] %v18931_v40  ;;  %v4406_v29 = vadd.f32 %v23234_v62, %v4272_v10  ;;  %v4274_v49 = vpop.f32.mrb[93].mxu1  ;;  %v18957_v10 = vld [vmem:[%s16839_s22 + $0x24] ss:$16 sps:$4 sm:$0xff]   ;;  %5938 = vmatpush1.bf16.msra.mxu0 %v15890_v53  ;;  %v15896_v62 = vld [vmem:[%s22945_s1 + $0x9d0] ss:$72 sps:$4 sm:$0xff]  }
 0x234   : > { %v4408_v45 = vadd.f32 %v23235_v48, %v4274_v49  ;;  %v4276_v31 = vpop.f32.mrb[94].mxu1  ;;  %23238 = vst [vmem:[#allocation53_spill] sm:$0xff] %v18957_v10  ;;  %5846 = vmatprep.mubr.bf16.mxu0 %v18957_v10  ;;  %v23239_v49 = vmax.f32 %v23159_v59, %v18415_v23  ;;  %5939 = vmatprep.subr.bf16.mxu0 %v15898_v26  ;;  %v18978_v40 = vpop.f32.mrb[96].mxu0  ;;  %v23244_v59 = vld [vmem:[#allocation59_spill] sm:$0xff] }
 0x235   : > { %v4410_v52 = vadd.f32 %v23237_v57, %v4276_v31  ;;  %v4278_v38 = vpop.f32.mrb[95].mxu1  ;;  %v23240_v57 = vld [vmem:[#allocation33_spill] sm:$0xff]  ;;  %23243 = vst [vmem:[#allocation14_spill] sm:$0xff] %v18978_v40  ;;  %v23245_v23 = vmax.f32 %v17850_v3, %v23244_v59  ;;  %v18989_v26 = vpop.f32.mrb[97].mxu0  ;;  %v23253_v59 = vld [vmem:[#allocation35_spill] sm:$0xff] }
 0x236   : > { %v18966_v48 = vmax.f32 %v23239_v49, %v4406_v29  ;;  %v4412_v31 = vadd.f32 %v23240_v57, %v4278_v38  ;;  %v18975_v53 = vmax.f32 %v23242_v42, %v4408_v45  ;;  %v15788_v38 = vld [vmem:[%s22945_s1 + $0x9b8] ss:$72 sps:$4 sm:$0xff]   ;;  %23246 = vst [vmem:[#allocation55_spill] sm:$0xff] %v18989_v26  ;;  %v23248_v42 = vmax.f32 %v17855_v19, %v23247_v54  ;;  %v15793_v3 = vld [vmem:[%s22945_s1 + $0xa4c] ss:$72 sps:$4 sm:$0xff]  }
 0x237   : > { %5039 = vmatmul.mubr.bf16.vlgmr.msra.gmra.mrb[160].mxu1 %v18949_v24  ;;  %v18983_v29 = vmax.f32 %v23245_v23, %v4410_v52  ;;  %v18999_v52 = vpop.f32.mrb[98].mxu0  ;;  %5940 = vmatpush1.bf16.msra.mxu0 %v15896_v62  ;;  %v15902_v49 = vld [vmem:[%s22945_s1 + $0xa60] ss:$72 sps:$4 sm:$0xff]   ;;  %v23252_v19 = vld [vmem:[#allocation34_spill] sm:$0xff] }
 0x238   : > { %5140 = vmatpush1.bf16.msra.mxu1 %v15785_v8  ;;  %5048 = vmatprep.mubr.bf16.mxu1 %v18957_v10  ;;  %v18994_v4 = vmax.f32 %v23248_v42, %v4412_v31  ;;  %23250 = vst [vmem:[#allocation31_spill] sm:$0xff] %v18999_v52  ;;  %v19001_v8 = vpop.f32.mrb[99].mxu0  ;;  %v15791_v62 = vld [vmem:[%s22945_s1 + $0xa48] ss:$72 sps:$4 sm:$0xff]   ;;  %v19023_v52 = vld [vmem:[%s16839_s22 + $0x44] ss:$16 sps:$4 sm:$0xff]  }
 0x239   : > { %5141 = vmatprep.subr.bf16.mxu1 %v15790_v43  ;;  %23251 = vst [vmem:[#allocation32_spill] sm:$0xff] %v19001_v8  ;;  %5941 = vmatprep.subr.bf16.mxu0 %v15904_v20  ;;  %v15907_v43 = vld [vmem:[%s22945_s1 + $0xaf4] ss:$72 sps:$4 sm:$0xff]   ;;  %v19015_v42 = vld [vmem:[%s16839_s22 + $0x20] ss:$16 sps:$4 sm:$0xff]   ;;  %23256 = vst [vmem:[#allocation15_spill] sm:$0xff] %v19023_v52 }
 0x23a   : > { %23249 = vst [vmem:[#allocation30_spill] sm:$0xff] %v18994_v4  ;;  %v4282_v45 = vpop.f32.mrb[96].mxu1  ;;  %23254 = vst [vmem:[#allocation33_spill] sm:$0xff] %v19015_v42  ;;  %5847 = vmatmul.mubr.bf16.gmra.mrb[164].mxu0 %v19015_v42  ;;  %v23255_v20 = vld [vmem:[#allocation36_spill] sm:$0xff]  ;;  %v23259_v26 = vld [vmem:[#allocation37_spill] sm:$0xff]  ;;  %v19041_v4 = vpop.f32.mrb[100].mxu0 }
 0x23b   : > { %v4416_v57 = vadd.f32 %v23252_v19, %v4282_v45  ;;  %v4284_v31 = vpop.f32.mrb[97].mxu1  ;;  %v15799_v19 = vld [vmem:[%s22945_s1 + $0xadc] ss:$72 sps:$4 sm:$0xff]   ;;  %5856 = vmatprep.mubr.bf16.mxu0 %v19023_v52  ;;  %5942 = vmatpush1.bf16.msra.mxu0 %v15902_v49  ;;  %23263 = vst [vmem:[#allocation59_spill] sm:$0xff] %v19041_v4 }
 0x23c   : > { %v4418_v23 = vadd.f32 %v23253_v59, %v4284_v31  ;;  %v4286_v54 = vpop.f32.mrb[98].mxu1  ;;  %5142 = vmatpush1.bf16.msra.mxu1 %v15788_v38  ;;  %v23257_v38 = vld [vmem:[#allocation63_spill] sm:$0xff]  ;;  %5943 = vmatprep.subr.bf16.mxu0 %v15907_v43 }
 0x23d   : > { %v4420_v8 = vadd.f32 %v23255_v20, %v4286_v54  ;;  %v4288_v45 = vpop.f32.mrb[99].mxu1  ;;  %5143 = vmatprep.subr.bf16.mxu1 %v15793_v3  ;;  %v23258_v31 = vmax.f32 %v17868_v36, %v23257_v38  ;;  %v15905_v3 = vld [vmem:[%s22945_s1 + $0xaf0] ss:$72 sps:$4 sm:$0xff]   ;;  %v23260_v54 = vld [vmem:[#allocation16_spill] sm:$0xff] }
 0x23e   : > { %v4422_v40 = vadd.f32 %v23259_v26, %v4288_v45  ;;  %v23261_v20 = vld [vmem:[#allocation64_spill] sm:$0xff]  ;;  %v23264_v26 = vld [vmem:[#allocation65_spill] sm:$0xff]  ;;  %v23268_v43 = vld [vmem:[#allocation67_spill] sm:$0xff] }
 0x23f   : > { %v19029_v59 = vmax.f32 %v23258_v31, %v4416_v57  ;;  %v23262_v10 = vmax.f32 %v23260_v54, %v23261_v20  ;;  %5049 = vmatmul.mubr.bf16.gmra.mrb[164].mxu1 %v19015_v42  ;;  %v15913_v36 = vld [vmem:[%s22945_s1 + $0xb84] ss:$72 sps:$4 sm:$0xff]   ;;  %v23265_v49 = vmax.f32 %v17881_v15, %v23264_v26  ;;  %5944 = vmatpush1.bf16.msra.mxu0 %v15905_v3  ;;  %v15911_v20 = vld [vmem:[%s22945_s1 + $0xb80] ss:$72 sps:$4 sm:$0xff]   ;;  %v23272_v26 = vld [vmem:[#allocation38_spill] sm:$0xff] }
 0x240   : > { %5058 = vmatprep.mubr.bf16.mxu1 %v19023_v52  ;;  %5144 = vmatpush1.bf16.msra.mxu1 %v15791_v62  ;;  %v23267_v45 = vld [vmem:[#allocation17_spill] sm:$0xff] }
 0x241   : > { %v19038_v24 = vmax.f32 %v23262_v10, %v4418_v23  ;;  %v19049_v57 = vmax.f32 %v23265_v49, %v4420_v8  ;;  %v15797_v10 = vld [vmem:[%s22945_s1 + $0xad8] ss:$72 sps:$4 sm:$0xff]   ;;  %v19055_v23 = vpop.f32.mrb[101].mxu0  ;;  %v23269_v38 = vmax.f32 %v23267_v45, %v23268_v43  ;;  %5145 = vmatprep.subr.bf16.mxu1 %v15799_v19  ;;  %v15808_v15 = vld [vmem:[%s22945_s1 + $0xb6c] ss:$72 sps:$4 sm:$0xff]   ;;  %5945 = vmatprep.subr.bf16.mxu0 %v15913_v36 }
 0x242   : > { %23266 = vst [vmem:[#allocation61_spill] sm:$0xff] %v19055_v23  ;;  %v19065_v8 = vpop.f32.mrb[102].mxu0  ;;  %v4292_v62 = vpop.f32.mrb[100].mxu1  ;;  %v15919_v19 = vld [vmem:[%s22945_s1 + $0xc14] ss:$72 sps:$4 sm:$0xff]  }
 0x243   : > { %v19060_v31 = vmax.f32 %v23269_v38, %v4422_v40  ;;  %23270 = vst [vmem:[#allocation34_spill] sm:$0xff] %v19065_v8  ;;  %v19067_v54 = vpop.f32.mrb[103].mxu0  ;;  %v4426_v40 = vadd.f32 %v23272_v26, %v4292_v62  ;;  %v4294_v49 = vpop.f32.mrb[101].mxu1  ;;  %v23273_v45 = vld [vmem:[#allocation39_spill] sm:$0xff]  ;;  %v15806_v3 = vld [vmem:[%s22945_s1 + $0xb68] ss:$72 sps:$4 sm:$0xff]   ;;  %5946 = vmatpush1.bf16.msra.mxu0 %v15911_v20 }
 0x244   : > { %23271 = vst [vmem:[#allocation35_spill] sm:$0xff] %v19067_v54  ;;  %v4428_v43 = vadd.f32 %v23273_v45, %v4294_v49  ;;  %v4296_v38 = vpop.f32.mrb[102].mxu1  ;;  %5146 = vmatpush1.bf16.msra.mxu1 %v15797_v10  ;;  %v19081_v54 = vld [vmem:[%s16839_s22 + $0x40] ss:$16 sps:$4 sm:$0xff]   ;;  %v15817_v36 = vld [vmem:[%s22945_s1 + $0xbfc] ss:$72 sps:$4 sm:$0xff]   ;;  %v23277_v10 = vmax.f32 %v17905_v34, %v18515_v35  ;;  %5947 = vmatprep.subr.bf16.mxu0 %v15919_v19 }
 0x245   : > { %23274 = vst [vmem:[#allocation36_spill] sm:$0xff] %v19081_v54  ;;  %5857 = vmatmul.mubr.bf16.gmra.mrb[168].mxu0 %v19081_v54  ;;  %v23275_v8 = vld [vmem:[#allocation40_spill] sm:$0xff]  ;;  %v4298_v26 = vpop.f32.mrb[103].mxu1  ;;  %5147 = vmatprep.subr.bf16.mxu1 %v15808_v15  ;;  %v23278_v45 = vld [vmem:[#allocation41_spill] sm:$0xff]  ;;  %v15917_v15 = vld [vmem:[%s22945_s1 + $0xc10] ss:$72 sps:$4 sm:$0xff]  }
 0x246   : > { %v4430_v62 = vadd.f32 %v23275_v8, %v4296_v38  ;;  %v19089_v23 = vld [vmem:[%s16839_s22 + $0x64] ss:$16 sps:$4 sm:$0xff]   ;;  %v19095_v49 = vmax.f32 %v23277_v10, %v4426_v40  ;;  %v4432_v4 = vadd.f32 %v23278_v45, %v4298_v26  ;;  %v23279_v8 = vld [vmem:[#allocation69_spill] sm:$0xff]  ;;  %v19107_v42 = vpop.f32.mrb[104].mxu0 }
 0x247   : > { %23276 = vst [vmem:[#allocation63_spill] sm:$0xff] %v19089_v23  ;;  %5866 = vmatprep.mubr.bf16.mxu0 %v19089_v23  ;;  %v23280_v38 = vmax.f32 %v17914_v39, %v23279_v8  ;;  %5059 = vmatmul.mubr.bf16.gmra.mrb[168].mxu1 %v19081_v54  ;;  %23281 = vst [vmem:[#allocation37_spill] sm:$0xff] %v19107_v42  ;;  %v15925_v34 = vld [vmem:[%s22945_s1 + $0xca4] ss:$72 sps:$4 sm:$0xff]   ;;  %v23282_v35 = vld [vmem:[#allocation70_spill] sm:$0xff] }
 0x248   : > { %v23283_v20 = vmax.f32 %v17924_v60, %v23282_v35  ;;  %5068 = vmatprep.mubr.bf16.mxu1 %v19089_v23  ;;  %5148 = vmatpush1.bf16.msra.mxu1 %v15806_v3  ;;  %v15815_v39 = vld [vmem:[%s22945_s1 + $0xbf8] ss:$72 sps:$4 sm:$0xff]   ;;  %v23285_v26 = vld [vmem:[#allocation18_spill] sm:$0xff] }
 0x249   : > { %v19104_v52 = vmax.f32 %v23280_v38, %v4428_v43  ;;  %v19121_v43 = vpop.f32.mrb[105].mxu0  ;;  %v23286_v19 = vld [vmem:[#allocation72_spill] sm:$0xff]  ;;  %5149 = vmatprep.subr.bf16.mxu1 %v15817_v36  ;;  %v15823_v60 = vld [vmem:[%s22945_s1 + $0xc8c] ss:$72 sps:$4 sm:$0xff]   ;;  %5948 = vmatpush1.bf16.msra.mxu0 %v15917_v15  ;;  %v15821_v15 = vld [vmem:[%s22945_s1 + $0xc88] ss:$72 sps:$4 sm:$0xff]  }
 0x24a   : > { %v19115_v40 = vmax.f32 %v23283_v20, %v4430_v62  ;;  %23284 = vst [vmem:[#allocation16_spill] sm:$0xff] %v19121_v43  ;;  %v23287_v10 = vmax.f32 %v23285_v26, %v23286_v19  ;;  %v19131_v62 = vpop.f32.mrb[106].mxu0  ;;  %v4302_v3 = vpop.f32.mrb[104].mxu1  ;;  %v15923_v38 = vld [vmem:[%s22945_s1 + $0xca0] ss:$72 sps:$4 sm:$0xff]   ;;  %v23290_v35 = vld [vmem:[#allocation42_spill] sm:$0xff]  ;;  %5949 = vmatprep.subr.bf16.mxu0 %v15925_v34 }
 0x24b   : > { %23288 = vst [vmem:[#allocation64_spill] sm:$0xff] %v19131_v62  ;;  %v19133_v8 = vpop.f32.mrb[107].mxu0  ;;  %v4304_v20 = vpop.f32.mrb[105].mxu1  ;;  %v15931_v36 = vld [vmem:[%s22945_s1 + $0xd34] ss:$72 sps:$4 sm:$0xff]   ;;  %v23293_v62 = vld [vmem:[#allocation44_spill] sm:$0xff] }
 0x24c   : > { %v19126_v45 = vmax.f32 %v23287_v10, %v4432_v4  ;;  %23289 = vst [vmem:[#allocation65_spill] sm:$0xff] %v19133_v8  ;;  %v4436_v4 = vadd.f32 %v23290_v35, %v4302_v3  ;;  %v23291_v26 = vld [vmem:[#allocation43_spill] sm:$0xff]  ;;  %v4306_v10 = vpop.f32.mrb[106].mxu1  ;;  %5150 = vmatpush1.bf16.msra.mxu1 %v15815_v39  ;;  %v19147_v8 = vld [vmem:[%s16839_s22 + $0x60] ss:$16 sps:$4 sm:$0xff]   ;;  %v23295_v39 = vmax.f32 %v17939_v21, %v18567_v16  ;;  %v19173_v54 = vpop.f32.mrb[108].mxu0 }
 0x24d   : > { %v4438_v19 = vadd.f32 %v23291_v26, %v4304_v20  ;;  %23292 = vst [vmem:[#allocation17_spill] sm:$0xff] %v19147_v8  ;;  %5867 = vmatmul.mubr.bf16.gmra.mrb[172].mxu0 %v19147_v8  ;;  %v4440_v3 = vadd.f32 %v23293_v62, %v4306_v10  ;;  %v4308_v35 = vpop.f32.mrb[107].mxu1  ;;  %5151 = vmatprep.subr.bf16.mxu1 %v15823_v60  ;;  %v15832_v34 = vld [vmem:[%s22945_s1 + $0xd1c] ss:$72 sps:$4 sm:$0xff]   ;;  %v23296_v26 = vld [vmem:[#allocation45_spill] sm:$0xff]  ;;  %v23297_v62 = vld [vmem:[#allocation74_spill] sm:$0xff] }
 0x24e   : > { %v19155_v43 = vld [vmem:[%s16839_s22 + $0x84] ss:$16 sps:$4 sm:$0xff]   ;;  %v19161_v20 = vmax.f32 %v23295_v39, %v4436_v4  ;;  %v4442_v42 = vadd.f32 %v23296_v26, %v4308_v35  ;;  %5950 = vmatpush1.bf16.msra.mxu0 %v15923_v38  ;;  %v15929_v60 = vld [vmem:[%s22945_s1 + $0xd30] ss:$72 sps:$4 sm:$0xff]   ;;  %v23298_v10 = vmax.f32 %v17947_v44, %v23297_v62  ;;  %23299 = vst [vmem:[#allocation38_spill] sm:$0xff] %v19173_v54 }
 0x24f   : > { %23294 = vst [vmem:[#allocation67_spill] sm:$0xff] %v19155_v43  ;;  %5876 = vmatprep.mubr.bf16.mxu0 %v19155_v43  ;;  %5069 = vmatmul.mubr.bf16.gmra.mrb[172].mxu1 %v19147_v8  ;;  %v15934_v21 = vld [vmem:[%s22945_s1 + $0xdc4] ss:$72 sps:$4 sm:$0xff]   ;;  %v23300_v16 = vld [vmem:[#allocation19_spill] sm:$0xff] }
 0x250   : > { %v19170_v23 = vmax.f32 %v23298_v10, %v4438_v19  ;;  %5951 = vmatprep.subr.bf16.mxu0 %v15931_v36  ;;  %v23301_v38 = vld [vmem:[#allocation75_spill] sm:$0xff]  ;;  %5078 = vmatprep.mubr.bf16.mxu1 %v19155_v43  ;;  %v19187_v19 = vpop.f32.mrb[109].mxu0  ;;  %v23304_v39 = vld [vmem:[#allocation20_spill] sm:$0xff]  ;;  %v23305_v36 = vld [vmem:[#allocation77_spill] sm:$0xff] }
 0x251   : > { %v23302_v4 = vmax.f32 %v23300_v16, %v23301_v38  ;;  %5152 = vmatpush1.bf16.msra.mxu1 %v15821_v15  ;;  %v15830_v44 = vld [vmem:[%s22945_s1 + $0xd18] ss:$72 sps:$4 sm:$0xff]   ;;  %23303 = vst [vmem:[#allocation39_spill] sm:$0xff] %v19187_v19  ;;  %v23306_v26 = vmax.f32 %v23304_v39, %v23305_v36  ;;  %v19197_v10 = vpop.f32.mrb[110].mxu0  ;;  %v19221_v54 = vld [vmem:[%s16839_s22 + $0xa4] ss:$16 sps:$4 sm:$0xff]  }
 0x252   : > { %5153 = vmatprep.subr.bf16.mxu1 %v15832_v34  ;;  %23308 = vst [vmem:[#allocation41_spill] sm:$0xff] %v19197_v10  ;;  %v4312_v15 = vpop.f32.mrb[108].mxu1  ;;  %v19199_v16 = vpop.f32.mrb[111].mxu0  ;;  %5952 = vmatpush1.bf16.msra.mxu0 %v15929_v60  ;;  %v15932_v38 = vld [vmem:[%s22945_s1 + $0xdc0] ss:$72 sps:$4 sm:$0xff]   ;;  %v23311_v36 = vld [vmem:[#allocation47_spill] sm:$0xff] }
 0x253   : > { %v19181_v35 = vmax.f32 %v23302_v4, %v4440_v3  ;;  %v19192_v62 = vmax.f32 %v23306_v26, %v4442_v42  ;;  %v15841_v3 = vld [vmem:[%s22945_s1 + $0xdac] ss:$72 sps:$4 sm:$0xff]   ;;  %23309 = vst [vmem:[#allocation69_spill] sm:$0xff] %v19199_v16  ;;  %v4314_v39 = vpop.f32.mrb[109].mxu1  ;;  %5953 = vmatprep.subr.bf16.mxu0 %v15934_v21  ;;  %v15839_v60 = vld [vmem:[%s22945_s1 + $0xda8] ss:$72 sps:$4 sm:$0xff]  }
 0x254   : > { %v23310_v4 = vld [vmem:[#allocation46_spill] sm:$0xff]  ;;  %v4448_v26 = vadd.f32 %v23311_v36, %v4314_v39  ;;  %v4316_v10 = vpop.f32.mrb[110].mxu1  ;;  %v23313_v19 = vld [vmem:[#allocation48_spill] sm:$0xff]  ;;  %23314 = vst [vmem:[#allocation18_spill] sm:$0xff] %v19221_v54  ;;  %v23316_v36 = vld [vmem:[#allocation49_spill] sm:$0xff] }
 0x255   : > { %23307 = vst [vmem:[#allocation40_spill] sm:$0xff] %v19192_v62  ;;  %v4446_v42 = vadd.f32 %v23310_v4, %v4312_v15  ;;  %v15940_v34 = vld [vmem:[%s22945_s1 + $0xe54] ss:$72 sps:$4 sm:$0xff]   ;;  %5154 = vmatpush1.bf16.msra.mxu1 %v15830_v44  ;;  %v19213_v16 = vld [vmem:[%s16839_s22 + $0x80] ss:$16 sps:$4 sm:$0xff]   ;;  %v4450_v15 = vadd.f32 %v23313_v19, %v4316_v10  ;;  %v4318_v4 = vpop.f32.mrb[111].mxu1  ;;  %v23315_v44 = vmax.f32 %v23183_v50, %v18619_v2 }
 0x256   : > { %23312 = vst [vmem:[#allocation70_spill] sm:$0xff] %v19213_v16  ;;  %5877 = vmatmul.mubr.bf16.gmra.mrb[176].mxu0 %v19213_v16  ;;  %5155 = vmatprep.subr.bf16.mxu1 %v15841_v3  ;;  %v15847_v21 = vld [vmem:[%s22945_s1 + $0xe3c] ss:$72 sps:$4 sm:$0xff]   ;;  %v4452_v43 = vadd.f32 %v23316_v36, %v4318_v4  ;;  %v15938_v19 = vld [vmem:[%s22945_s1 + $0xe50] ss:$72 sps:$4 sm:$0xff]   ;;  %v23317_v3 = vld [vmem:[#allocation21_spill] sm:$0xff] }
 0x257   : > { %5886 = vmatprep.mubr.bf16.mxu0 %v19221_v54  ;;  %v19227_v39 = vmax.f32 %v23315_v44, %v4446_v42  ;;  %5954 = vmatpush1.bf16.msra.mxu0 %v15932_v38  ;;  %v23318_v10 = vmax.f32 %v17987_v1, %v23317_v3  ;;  %v19239_v62 = vpop.f32.mrb[112].mxu0  ;;  %v15946_v50 = vld [vmem:[%s22945_s1 + $0xee4] ss:$72 sps:$4 sm:$0xff]   ;;  %v23320_v2 = vld [vmem:[#allocation79_spill] sm:$0xff]  ;;  %v23323_v4 = vld [vmem:[#allocation22_spill] sm:$0xff] }
 0x258   : > { %5079 = vmatmul.mubr.bf16.gmra.mrb[176].mxu1 %v19213_v16  ;;  %23319 = vst [vmem:[#allocation72_spill] sm:$0xff] %v19239_v62  ;;  %5955 = vmatprep.subr.bf16.mxu0 %v15940_v34  ;;  %v23321_v38 = vmax.f32 %v17993_v12, %v23320_v2  ;;  %v15845_v1 = vld [vmem:[%s22945_s1 + $0xe38] ss:$72 sps:$4 sm:$0xff]   ;;  %v23324_v34 = vld [vmem:[#allocation81_spill] sm:$0xff]  ;;  %v23328_v2 = vld [vmem:[#allocation10_spill] sm:$0xff] }
 0x259   : > { %v19236_v8 = vmax.f32 %v23318_v10, %v4448_v26  ;;  %5088 = vmatprep.mubr.bf16.mxu1 %v19221_v54  ;;  %5156 = vmatpush1.bf16.msra.mxu1 %v15839_v60  ;;  %v19253_v26 = vpop.f32.mrb[113].mxu0  ;;  %v23325_v44 = vmax.f32 %v23323_v4, %v23324_v34  ;;  %v15856_v12 = vld [vmem:[%s22945_s1 + $0xecc] ss:$72 sps:$4 sm:$0xff]   ;;  %v15944_v10 = vld [vmem:[%s22945_s1 + $0xee0] ss:$72 sps:$4 sm:$0xff]   ;;  %v23329_v4 = vld [vmem:[#allocation51_spill] sm:$0xff] }
 0x25a   : > { %v19247_v42 = vmax.f32 %v23321_v38, %v4450_v15  ;;  %23322 = vst [vmem:[#allocation42_spill] sm:$0xff] %v19253_v26  ;;  %5157 = vmatprep.subr.bf16.mxu1 %v15847_v21  ;;  %v19263_v15 = vpop.f32.mrb[114].mxu0  ;;  %v4322_v60 = vpop.f32.mrb[112].mxu1  ;;  %v15952_v21 = vld [vmem:[%s22945_s1 + $0xf74] ss:$72 sps:$4 sm:$0xff]  }
 0x25b   : > { %v19258_v36 = vmax.f32 %v23325_v44, %v4452_v43  ;;  %23326 = vst [vmem:[#allocation43_spill] sm:$0xff] %v19263_v15  ;;  %v19265_v3 = vpop.f32.mrb[115].mxu0  ;;  %5956 = vmatpush1.bf16.msra.mxu0 %v15938_v19  ;;  %v4456_v43 = vadd.f32 %v23328_v2, %v4322_v60  ;;  %v4324_v38 = vpop.f32.mrb[113].mxu1  ;;  %v15854_v19 = vld [vmem:[%s22945_s1 + $0xec8] ss:$72 sps:$4 sm:$0xff]   ;;  %v23330_v15 = vld [vmem:[#allocation52_spill] sm:$0xff] }
 0x25c   : > { %23327 = vst [vmem:[#allocation44_spill] sm:$0xff] %v19265_v3  ;;  %5957 = vmatprep.subr.bf16.mxu0 %v15946_v50  ;;  %v4458_v34 = vadd.f32 %v23329_v4, %v4324_v38  ;;  %v4326_v44 = vpop.f32.mrb[114].mxu1  ;;  %v19279_v3 = vld [vmem:[%s16839_s22 + $0xa0] ss:$16 sps:$4 sm:$0xff]   ;;  %v15865_v50 = vld [vmem:[%s22945_s1 + $0xf5c] ss:$72 sps:$4 sm:$0xff]  }
 0x25d   : > { %5158 = vmatpush1.bf16.msra.mxu1 %v15845_v1  ;;  %v4460_v60 = vadd.f32 %v23330_v15, %v4326_v44  ;;  %v4328_v2 = vpop.f32.mrb[115].mxu1  ;;  %v19287_v26 = vld [vmem:[%s16839_s22 + $0xc4] ss:$16 sps:$4 sm:$0xff]   ;;  %v23332_v1 = vmax.f32 %v18019_v7, %v18671_v18  ;;  %v23334_v15 = vld [vmem:[#allocation83_spill] sm:$0xff]  ;;  %v19305_v16 = vpop.f32.mrb[116].mxu0 }
 0x25e   : > { %5887 = vmatmul.mubr.bf16.gmra.mrb[180].mxu0 %v19279_v3  ;;  %5159 = vmatprep.subr.bf16.mxu1 %v15856_v12  ;;  %23331 = vst [vmem:[#allocation45_spill] sm:$0xff] %v19287_v26  ;;  %v23333_v4 = vld [vmem:[#allocation54_spill] sm:$0xff]  ;;  %v23335_v44 = vmax.f32 %v18021_v51, %v23334_v15  ;;  %23336 = vst [vmem:[#allocation74_spill] sm:$0xff] %v19305_v16  ;;  %v23337_v18 = vld [vmem:[#allocation84_spill] sm:$0xff] }
 0x25f   : > { %5896 = vmatprep.mubr.bf16.mxu0 %v19287_v26  ;;  %v19293_v38 = vmax.f32 %v23332_v1, %v4456_v43  ;;  %v4462_v62 = vadd.f32 %v23333_v4, %v4328_v2  ;;  %5958 = vmatpush1.bf16.msra.mxu0 %v15944_v10  ;;  %v15950_v12 = vld [vmem:[%s22945_s1 + $0xf70] ss:$72 sps:$4 sm:$0xff]   ;;  %v23338_v7 = vmax.f32 %v18024_v47, %v23337_v18  ;;  %v19316_v10 = vpop.f32.mrb[117].mxu0  ;;  %v15871_v47 = vld [vmem:[%s22945_s1 + $0x3c] ss:$72 sps:$4 sm:$0xff]  }
 0x260   : > { %v19302_v54 = vmax.f32 %v23335_v44, %v4458_v34  ;;  %5089 = vmatmul.mubr.bf16.gmra.mrb[180].mxu1 %v19279_v3  ;;  %5959 = vmatprep.subr.bf16.mxu0 %v15952_v21  ;;  %v15863_v51 = vld [vmem:[%s22945_s1 + $0xf58] ss:$72 sps:$4 sm:$0xff]   ;;  %23339 = vst [vmem:[#allocation19_spill] sm:$0xff] %v19316_v10  ;;  %v23341_v2 = vld [vmem:[#allocation86_spill] sm:$0xff]  ;;  %v19326_v21 = vpop.f32.mrb[118].mxu0 }
 0x261   : > { %v19310_v43 = vmax.f32 %v23338_v7, %v4460_v60  ;;  %5098 = vmatprep.mubr.bf16.mxu1 %v19287_v26  ;;  %5160 = vmatpush1.bf16.msra.mxu1 %v15854_v19  ;;  %v23340_v34 = vld [vmem:[#allocation23_spill] sm:$0xff]  ;;  %23343 = vst [vmem:[#allocation75_spill] sm:$0xff] %v19326_v21  ;;  %v19328_v60 = vpop.f32.mrb[119].mxu0  ;;  %v23345_v15 = vld [vmem:[#allocation56_spill] sm:$0xff]  ;;  %v23346_v7 = vld [vmem:[#allocation57_spill] sm:$0xff] }
 0x262   : > { %v23342_v1 = vmax.f32 %v23340_v34, %v23341_v2  ;;  %5161 = vmatprep.subr.bf16.mxu1 %v15865_v50  ;;  %v4332_v19 = vpop.f32.mrb[116].mxu1  ;;  %23344 = vst [vmem:[#allocation20_spill] sm:$0xff] %v19328_v60  ;;  %v23347_v50 = vld [vmem:[#allocation58_spill] sm:$0xff] }
 0x263   : > { %5960 = vmatpush1.bf16.msra.mxu0 %v15950_v12  ;;  %v4466_v44 = vadd.f32 %v23345_v15, %v4332_v19  ;;  %v4334_v18 = vpop.f32.mrb[117].mxu1  ;;  %v19338_v60 = vld [vmem:[%s16839_s22 + $0xe4] ss:$16 sps:$4 sm:$0xff]   ;;  %v23348_v12 = vmax.f32 %v18056_v5, %v18723_v27  ;;  %v23357_v5 = vld [vmem:[#allocation91_spill] sm:$0xff] }
 0x264   : > { %v19321_v4 = vmax.f32 %v23342_v1, %v4462_v62  ;;  %v4468_v10 = vadd.f32 %v23346_v7, %v4334_v18  ;;  %v4336_v34 = vpop.f32.mrb[118].mxu1  ;;  %v19333_v62 = vld [vmem:[%s16839_s22 + $0xc0] ss:$16 sps:$4 sm:$0xff]  }
 0x265   : > { %5162 = vmatpush1.bf16.msra.mxu1 %v15863_v51  ;;  %v4470_v2 = vadd.f32 %v23347_v50, %v4336_v34  ;;  %v4338_v1 = vpop.f32.mrb[119].mxu1  ;;  %v19344_v19 = vmax.f32 %v23348_v12, %v4466_v44  ;;  %v23349_v51 = vld [vmem:[#allocation60_spill] sm:$0xff]  ;;  %v23354_v34 = vld [vmem:[#allocation89_spill] sm:$0xff]  ;;  %v23356_v27 = vld [vmem:[#allocation26_spill] sm:$0xff] }
 0x266   : > { %5897 = vmatmul.mubr.bf16.gmra.mrb[184].mxu0 %v19333_v62  ;;  %5538 = vmatprep.subr.bf16.mxu1 %v15871_v47  ;;  %v4472_v15 = vadd.f32 %v23349_v51, %v4338_v1  ;;  %v23350_v18 = vld [vmem:[#allocation24_spill] sm:$0xff]  ;;  %v23353_v47 = vld [vmem:[#allocation25_spill] sm:$0xff]  ;;  %v23358_v44 = vmax.f32 %v23356_v27, %v23357_v5 }
 0x267   : > { %5906 = vmatprep.mubr.bf16.mxu0 %v19338_v60  ;;  %v23351_v7 = vld [vmem:[#allocation88_spill] sm:$0xff]  ;;  %v23355_v50 = vmax.f32 %v23353_v47, %v23354_v34  ;;  %v15874_v47 = vld [vmem:[%s22945_s1 + $0xcc] ss:$72 sps:$4 sm:$0xff]  }
 0x268   : > { %v23352_v21 = vmax.f32 %v23350_v18, %v23351_v7  ;;  %5099 = vmatmul.mubr.bf16.gmra.mrb[184].mxu1 %v19333_v62  ;;  %v19362_v1 = vmax.f32 %v23358_v44, %v4472_v15  ;;  %v19365_v12 = vld [vmem:[%s16839_s22 + $0xe0] ss:$16 sps:$4 sm:$0xff]   ;;  %v19389_v15 = vld [vmem:[%s16839_s22 + $0xc] ss:$16 sps:$4 sm:$0xff]   ;;  %v19400_v7 = vld [vmem:[%s16839_s22 + $0x8] ss:$16 sps:$4 sm:$0xff]  }
 0x269   : > { %v19356_v26 = vmax.f32 %v23355_v50, %v4470_v2  ;;  %5108 = vmatprep.mubr.bf16.mxu1 %v19338_v60  ;;  %v19379_v2 = vld [vmem:[%s16839_s22 + $0x124] ss:$16 sps:$4 sm:$0xff]   ;;  %v19385_v51 = vld [vmem:[%s16839_s22 + $0x120] ss:$16 sps:$4 sm:$0xff]   ;;  %23362 = vst [vmem:[#allocation48_spill] sm:$0xff] %v19389_v15  ;;  %23363 = vst [vmem:[#allocation49_spill] sm:$0xff] %v19400_v7 }
 0x26a   : > { %v19350_v16 = vmax.f32 %v23352_v21, %v4468_v10  ;;  %v19369_v10 = vld [vmem:[%s16839_s22 + $0x104] ss:$16 sps:$4 sm:$0xff]   ;;  %v19375_v21 = vld [vmem:[%s16839_s22 + $0x100] ss:$16 sps:$4 sm:$0xff]   ;;  %23360 = vst [vmem:[#allocation46_spill] sm:$0xff] %v19379_v2  ;;  %23361 = vst [vmem:[#allocation47_spill] sm:$0xff] %v19385_v51 }
 0x26b   : > { %23359 = vst [vmem:[#allocation77_spill] sm:$0xff] %v19375_v21  ;;  %v15869_v18 = vld [vmem:[%s22945_s1 + $0x38] ss:$72 sps:$4 sm:$0xff]   ;;  %v23364_v34 = vld [vmem:[#allocation62_spill] sm:$0xff]  ;;  %v19413_v27 = vld [vmem:[%s16839_s22 + $0x2c] ss:$16 sps:$4 sm:$0xff]  }
 0x26c   : > { %v15872_v50 = vld [vmem:[%s22945_s1 + $0xc8] ss:$72 sps:$4 sm:$0xff]   ;;  %23365 = vst [vmem:[#allocation21_spill] sm:$0xff] %v19413_v27  ;;  %v15877_v5 = vld [vmem:[%s22945_s1 + $0x15c] ss:$72 sps:$4 sm:$0xff]  }
 0x26d   : > { %v15875_v44 = vld [vmem:[%s22945_s1 + $0x158] ss:$72 sps:$4 sm:$0xff]  }
 0x26e   : > { %5907 = vmatmul.mubr.bf16.gmra.mrb[188].mxu0 %v19365_v12 }
 0x26f   : > { %5916 = vmatprep.mubr.bf16.mxu0 %v19369_v10 }
 0x270   : > { %5109 = vmatmul.mubr.bf16.gmra.mrb[188].mxu1 %v19365_v12 }
 0x271   : > { %5118 = vmatprep.mubr.bf16.mxu1 %v19369_v10 }
 0x276   : > { %5917 = vmatmul.mubr.bf16.gmra.mrb[192].mxu0 %v19375_v21 }
 0x277   : > { %5926 = vmatprep.mubr.bf16.mxu0 %v19379_v2 }
 0x278   : > { %5119 = vmatmul.mubr.bf16.gmra.mrb[192].mxu1 %v19375_v21 }
 0x279   : > { %5128 = vmatprep.mubr.bf16.mxu1 %v19379_v2 }
 0x27e   : > { %5927 = vmatmul.mubr.bf16.gmra.mrb[196].mxu0 %v19385_v51 }
 0x27f   : > { %13365 = vmatprep.mubr.msk.bf16.mxu0 %vm3645_vm0, %v19389_v15 }
 0x280   : > { %5129 = vmatmul.mubr.bf16.gmra.mrb[196].mxu1 %v19385_v51 }
 0x281   : > { %13335 = vmatprep.mubr.msk.bf16.mxu1 %vm3645_vm0, %v19389_v15 }
 0x286   : > { %5970 = vmatmul.mubr.bf16.vlgmr.msra.gmra.mrb[160].mxu0 %v19400_v7 }
 0x287   : > { %13366 = vmatprep.mubr.msk.bf16.mxu0 %vm3645_vm0, %v23364_v34  ;;  %v15880_v34 = vld [vmem:[%s22945_s1 + $0x1ec] ss:$72 sps:$4 sm:$0xff]  }
 0x288   : > { %5172 = vmatmul.mubr.bf16.vlgmr.msra.gmra.mrb[160].mxu1 %v19400_v7  ;;  %v23367_v7 = vld [vmem:[#allocation68_spill] sm:$0xff] }
 0x289   : > { %5539 = vmatpush1.bf16.msra.mxu1 %v15869_v18  ;;  %13336 = vmatprep.mubr.msk.bf16.mxu1 %vm3645_vm0, %v19413_v27  ;;  %v23366_v18 = vld [vmem:[#allocation66_spill] sm:$0xff]  ;;  %v23368_v27 = vld [vmem:[#allocation71_spill] sm:$0xff] }
 0x28a   : > { %5540 = vmatprep.subr.bf16.mxu1 %v15874_v47  ;;  %v15878_v47 = vld [vmem:[%s22945_s1 + $0x1e8] ss:$72 sps:$4 sm:$0xff]  }
 0x28d   : > { %5541 = vmatpush1.bf16.msra.mxu1 %v15872_v50  ;;  %v15883_v50 = vld [vmem:[%s22945_s1 + $0x27c] ss:$72 sps:$4 sm:$0xff]  }
 0x28e   : > { %5980 = vmatmul.mubr.bf16.gmra.mrb[164].mxu0 %v23366_v18  ;;  %5542 = vmatprep.subr.bf16.mxu1 %v15877_v5  ;;  %v15881_v5 = vld [vmem:[%s22945_s1 + $0x278] ss:$72 sps:$4 sm:$0xff]  }
 0x28f   : > { %13367 = vmatprep.mubr.msk.bf16.mxu0 %vm3645_vm0, %v23367_v7 }
 0x290   : > { %5182 = vmatmul.mubr.bf16.gmra.mrb[164].mxu1 %v23366_v18  ;;  %v15884_v18 = vld [vmem:[%s22945_s1 + $0x308] ss:$72 sps:$4 sm:$0xff]  }
 0x291   : > { %5543 = vmatpush1.bf16.msra.mxu1 %v15875_v44  ;;  %13337 = vmatprep.mubr.msk.bf16.mxu1 %vm3645_vm0, %v23367_v7  ;;  %v15886_v7 = vld [vmem:[%s22945_s1 + $0x30c] ss:$72 sps:$4 sm:$0xff]  }
 0x292   : > { %5544 = vmatprep.subr.bf16.mxu1 %v15880_v34  ;;  %v23369_v44 = vld [vmem:[#allocation73_spill] sm:$0xff]  ;;  %v15889_v34 = vld [vmem:[%s22945_s1 + $0x39c] ss:$72 sps:$4 sm:$0xff]  }
 0x295   : > { %5545 = vmatpush1.bf16.msra.mxu1 %v15878_v47  ;;  %v15887_v47 = vld [vmem:[%s22945_s1 + $0x398] ss:$72 sps:$4 sm:$0xff]  }
 0x296   : > { %5990 = vmatmul.mubr.bf16.gmra.mrb[168].mxu0 %v23368_v27  ;;  %5546 = vmatprep.subr.bf16.mxu1 %v15883_v50  ;;  %v23370_v50 = vld [vmem:[#allocation76_spill] sm:$0xff] }
 0x297   : > { %13368 = vmatprep.mubr.msk.bf16.mxu0 %vm3645_vm0, %v23369_v44 }
 0x298   : > { %5192 = vmatmul.mubr.bf16.gmra.mrb[168].mxu1 %v23368_v27  ;;  %v15895_v27 = vld [vmem:[%s22945_s1 + $0x42c] ss:$72 sps:$4 sm:$0xff]  }
 0x299   : > { %5547 = vmatpush1.bf16.msra.mxu1 %v15881_v5  ;;  %13338 = vmatprep.mubr.msk.bf16.mxu1 %vm3645_vm0, %v23369_v44  ;;  %v23371_v5 = vld [vmem:[#allocation78_spill] sm:$0xff]  ;;  %v15901_v44 = vld [vmem:[%s22945_s1 + $0x4bc] ss:$72 sps:$4 sm:$0xff]  }
 0x29a   : > { %5548 = vmatprep.subr.bf16.mxu1 %v15886_v7  ;;  %v15893_v7 = vld [vmem:[%s22945_s1 + $0x428] ss:$72 sps:$4 sm:$0xff]  }
 0x29d   : > { %5549 = vmatpush1.bf16.msra.mxu1 %v15884_v18  ;;  %v15899_v18 = vld [vmem:[%s22945_s1 + $0x4b8] ss:$72 sps:$4 sm:$0xff]  }
 0x29e   : > { %6000 = vmatmul.mubr.bf16.gmra.mrb[172].mxu0 %v23370_v50  ;;  %5550 = vmatprep.subr.bf16.mxu1 %v15889_v34  ;;  %v23372_v34 = vld [vmem:[#allocation80_spill] sm:$0xff] }
 0x29f   : > { %13369 = vmatprep.mubr.msk.bf16.mxu0 %vm3645_vm0, %v23371_v5 }
 0x2a0   : > { %5202 = vmatmul.mubr.bf16.gmra.mrb[172].mxu1 %v23370_v50  ;;  %v23373_v50 = vld [vmem:[#allocation82_spill] sm:$0xff] }
 0x2a1   : > { %13339 = vmatprep.mubr.msk.bf16.mxu1 %vm3645_vm0, %v23371_v5  ;;  %5551 = vmatpush1.bf16.msra.mxu1 %v15887_v47  ;;  %v15910_v47 = vld [vmem:[%s22945_s1 + $0x54c] ss:$72 sps:$4 sm:$0xff]   ;;  %v15916_v5 = vld [vmem:[%s22945_s1 + $0x5dc] ss:$72 sps:$4 sm:$0xff]  }
 0x2a2   : > { %5552 = vmatprep.subr.bf16.mxu1 %v15895_v27  ;;  %v15908_v27 = vld [vmem:[%s22945_s1 + $0x548] ss:$72 sps:$4 sm:$0xff]  }
 0x2a5   : > { %5553 = vmatpush1.bf16.msra.mxu1 %v15893_v7  ;;  %v15914_v7 = vld [vmem:[%s22945_s1 + $0x5d8] ss:$72 sps:$4 sm:$0xff]  }
 0x2a6   : > { %6010 = vmatmul.mubr.bf16.gmra.mrb[176].mxu0 %v23372_v34  ;;  %5554 = vmatprep.subr.bf16.mxu1 %v15901_v44  ;;  %v23374_v44 = vld [vmem:[#allocation85_spill] sm:$0xff] }
 0x2a7   : > { %13370 = vmatprep.mubr.msk.bf16.mxu0 %vm3645_vm0, %v23373_v50 }
 0x2a8   : > { %5212 = vmatmul.mubr.bf16.gmra.mrb[176].mxu1 %v23372_v34  ;;  %v23375_v34 = vld [vmem:[#allocation87_spill] sm:$0xff] }
 0x2a9   : > { %13340 = vmatprep.mubr.msk.bf16.mxu1 %vm3645_vm0, %v23373_v50  ;;  %5555 = vmatpush1.bf16.msra.mxu1 %v15899_v18  ;;  %v15922_v18 = vld [vmem:[%s22945_s1 + $0x66c] ss:$72 sps:$4 sm:$0xff]   ;;  %v15928_v50 = vld [vmem:[%s22945_s1 + $0x6fc] ss:$72 sps:$4 sm:$0xff]  }
 0x2aa   : > { %5556 = vmatprep.subr.bf16.mxu1 %v15910_v47  ;;  %v15920_v47 = vld [vmem:[%s22945_s1 + $0x668] ss:$72 sps:$4 sm:$0xff]  }
 0x2ad   : > { %5557 = vmatpush1.bf16.msra.mxu1 %v15908_v27  ;;  %v15926_v27 = vld [vmem:[%s22945_s1 + $0x6f8] ss:$72 sps:$4 sm:$0xff]  }
 0x2ae   : > { %6020 = vmatmul.mubr.bf16.gmra.mrb[180].mxu0 %v23374_v44  ;;  %5558 = vmatprep.subr.bf16.mxu1 %v15916_v5  ;;  %v23376_v5 = vld [vmem:[#allocation90_spill] sm:$0xff] }
 0x2af   : > { %13371 = vmatprep.mubr.msk.bf16.mxu0 %vm3645_vm0, %v23375_v34 }
 0x2b0   : > { %5222 = vmatmul.mubr.bf16.gmra.mrb[180].mxu1 %v23374_v44  ;;  %v23377_v44 = vld [vmem:[#allocation92_spill] sm:$0xff] }
 0x2b1   : > { %13341 = vmatprep.mubr.msk.bf16.mxu1 %vm3645_vm0, %v23375_v34  ;;  %5559 = vmatpush1.bf16.msra.mxu1 %v15914_v7  ;;  %v15937_v7 = vld [vmem:[%s22945_s1 + $0x78c] ss:$72 sps:$4 sm:$0xff]   ;;  %v15935_v34 = vld [vmem:[%s22945_s1 + $0x788] ss:$72 sps:$4 sm:$0xff]  }
 0x2b2   : > { %5560 = vmatprep.subr.bf16.mxu1 %v15922_v18 }
 0x2b4   : > { %v19520_v18 = vpop.f32.mrb[120].mxu0 }
 0x2b5   : > { %5561 = vmatpush1.bf16.msra.mxu1 %v15920_v47  ;;  %23378 = vst [vmem:[#allocation79_spill] sm:$0xff] %v19520_v18  ;;  %v19527_v47 = vpop.f32.mrb[121].mxu0 }
 0x2b6   : > { %6030 = vmatmul.mubr.bf16.gmra.mrb[184].mxu0 %v23376_v5  ;;  %5562 = vmatprep.subr.bf16.mxu1 %v15928_v50  ;;  %23379 = vst [vmem:[#allocation22_spill] sm:$0xff] %v19527_v47  ;;  %v15943_v50 = vld [vmem:[%s22945_s1 + $0x81c] ss:$72 sps:$4 sm:$0xff]   ;;  %v19532_v15 = vpop.f32.mrb[122].mxu0 }
 0x2b7   : > { %13372 = vmatprep.mubr.msk.bf16.mxu0 %vm3645_vm0, %v23377_v44  ;;  %v19534_v51 = vpop.f32.mrb[123].mxu0 }
 0x2b8   : > { %5232 = vmatmul.mubr.bf16.gmra.mrb[184].mxu1 %v23376_v5  ;;  %23380 = vst [vmem:[#allocation81_spill] sm:$0xff] %v19534_v51  ;;  %v15949_v51 = vld [vmem:[%s22945_s1 + $0x8ac] ss:$72 sps:$4 sm:$0xff]  }
 0x2b9   : > { %13342 = vmatprep.mubr.msk.bf16.mxu1 %vm3645_vm0, %v23377_v44  ;;  %5563 = vmatpush1.bf16.msra.mxu1 %v15926_v27 }
 0x2ba   : > { %5564 = vmatprep.subr.bf16.mxu1 %v15937_v7  ;;  %v4641_v5 = vpop.f32.mrb[120].mxu1  ;;  %v15941_v7 = vld [vmem:[%s22945_s1 + $0x818] ss:$72 sps:$4 sm:$0xff]  }
 0x2bb   : > { %v6150_v18 = vmax.f32 %v18810_v6, %v4641_v5  ;;  %v4643_v44 = vpop.f32.mrb[121].mxu1  ;;  %v23381_v6 = vld [vmem:[#allocation93_spill] sm:$0xff]  ;;  %v23382_v5 = vld [vmem:[#allocation94_spill] sm:$0xff] }
 0x2bc   : > { %v6151_v27 = vmax.f32 %v18819_v46, %v4643_v44  ;;  %v4645_v2 = vpop.f32.mrb[122].mxu1 }
 0x2bd   : > { %5565 = vmatpush1.bf16.msra.mxu1 %v15935_v34  ;;  %v6152_v47 = vmax.f32 %v18827_v37, %v4645_v2  ;;  %v4647_v21 = vpop.f32.mrb[123].mxu1  ;;  %v19549_v46 = vmax.f32 %v6150_v18, %v23381_v6  ;;  %v19556_v37 = vpop.f32.mrb[124].mxu0  ;;  %v23384_v2 = vld [vmem:[#allocation95_spill] sm:$0xff]  ;;  %v15947_v18 = vld [vmem:[%s22945_s1 + $0x8a8] ss:$72 sps:$4 sm:$0xff]  }
 0x2be   : > { %6040 = vmatmul.mubr.bf16.gmra.mrb[188].mxu0 %v18795_v63  ;;  %5566 = vmatprep.subr.bf16.mxu1 %v15943_v50  ;;  %v6153_v34 = vmax.f32 %v18839_v61, %v4647_v21  ;;  %v19553_v44 = vmax.f32 %v6151_v27, %v23382_v5  ;;  %23383 = vst [vmem:[#allocation10_spill] sm:$0xff] %v19556_v37  ;;  %v19566_v6 = vpop.f32.mrb[125].mxu0  ;;  %v23385_v61 = vld [vmem:[#allocation96_spill] sm:$0xff] }
 0x2bf   : > { %13373 = vmatprep.mubr.msk.bf16.mxu0 %vm3645_vm0, %v18803_v30  ;;  %v19559_v50 = vmax.f32 %v6152_v47, %v23384_v2  ;;  %v19574_v47 = vpop.f32.mrb[126].mxu0 }
 0x2c0   : > { %5242 = vmatmul.mubr.bf16.gmra.mrb[188].mxu1 %v18795_v63  ;;  %v19569_v21 = vmax.f32 %v6153_v34, %v23385_v61  ;;  %v15955_v63 = vld [vmem:[%s22945_s1 + $0x93c] ss:$72 sps:$4 sm:$0xff]   ;;  %v19576_v5 = vpop.f32.mrb[127].mxu0 }
 0x2c1   : > { %13343 = vmatprep.mubr.msk.bf16.mxu1 %vm3645_vm0, %v18803_v30  ;;  %5567 = vmatpush1.bf16.msra.mxu1 %v15941_v7  ;;  %23386 = vst [vmem:[#allocation51_spill] sm:$0xff] %v19576_v5 }
 0x2c2   : > { %5568 = vmatprep.subr.bf16.mxu1 %v15949_v51  ;;  %v4651_v27 = vpop.f32.mrb[124].mxu1 }
 0x2c3   : > { %v6154_v30 = vmax.f32 %v18866_v17, %v4651_v27  ;;  %v4653_v7 = vpop.f32.mrb[125].mxu1 }
 0x2c4   : > { %v6155_v2 = vmax.f32 %v18872_v11, %v4653_v7  ;;  %v4655_v37 = vpop.f32.mrb[126].mxu1  ;;  %v19592_v11 = vpop.f32.mrb[128].mxu0 }
 0x2c5   : > { %5569 = vmatpush1.bf16.msra.mxu1 %v15947_v18  ;;  %v6156_v51 = vmax.f32 %v18880_v55, %v4655_v37  ;;  %v4657_v34 = vpop.f32.mrb[127].mxu1  ;;  %v19585_v61 = vmax.f32 %v6154_v30, %v18822_v58  ;;  %v19599_v55 = vpop.f32.mrb[129].mxu0 }
 0x2c6   : > { %6050 = vmatmul.mubr.bf16.gmra.mrb[192].mxu0 %v18851_v25  ;;  %5671 = vmatprep.subr.bf16.mxu1 %v15955_v63  ;;  %v6157_v5 = vmax.f32 %v18889_v32, %v4657_v34  ;;  %v19589_v17 = vmax.f32 %v6155_v2, %v18834_v13  ;;  %v19604_v37 = vpop.f32.mrb[130].mxu0  ;;  %v23389_v2 = vld [vmem:[#allocation97_spill] sm:$0xff]  ;;  %v23391_v34 = vld [vmem:[#allocation98_spill] sm:$0xff] }
 0x2c7   : > { %13374 = vmatprep.mubr.msk.bf16.mxu0 %vm3645_vm0, %v18859_v0  ;;  %v19595_v18 = vmax.f32 %v6156_v51, %v18844_v41  ;;  %v19606_v13 = vpop.f32.mrb[131].mxu0 }
 0x2c8   : > { %5252 = vmatmul.mubr.bf16.gmra.mrb[192].mxu1 %v18851_v25  ;;  %v19602_v58 = vmax.f32 %v6157_v5, %v18846_v56  ;;  %23387 = vst [vmem:[#allocation52_spill] sm:$0xff] %v19606_v13  ;;  %v23388_v56 = vld [vmem:[#allocation29_spill] sm:$0xff] }
 0x2c9   : > { %13344 = vmatprep.mubr.msk.bf16.mxu1 %vm3645_vm0, %v18859_v0 }
 0x2ca   : > { %v4661_v32 = vpop.f32.mrb[128].mxu1 }
 0x2cb   : > { %v6158_v25 = vmax.f32 %v18909_v9, %v4661_v32  ;;  %v4663_v63 = vpop.f32.mrb[129].mxu1  ;;  %v23392_v32 = vld [vmem:[#allocation27_spill] sm:$0xff] }
 0x2cc   : > { %v6159_v27 = vmax.f32 %v18915_v14, %v4663_v63  ;;  %v4665_v41 = vpop.f32.mrb[130].mxu1  ;;  %v19620_v9 = vpop.f32.mrb[132].mxu0 }
 0x2cd   : > { %v6160_v0 = vmax.f32 %v18923_v28, %v4665_v41  ;;  %v4667_v30 = vpop.f32.mrb[131].mxu1  ;;  %v19613_v7 = vmax.f32 %v6158_v25, %v18875_v22  ;;  %23390 = vst [vmem:[#allocation54_spill] sm:$0xff] %v19620_v9  ;;  %v19626_v63 = vpop.f32.mrb[133].mxu0  ;;  %v23394_v28 = vld [vmem:[#allocation99_spill] sm:$0xff]  ;;  %v23402_v9 = vld [vmem:[#allocation12_spill] sm:$0xff] }
 0x2ce   : > { %6060 = vmatmul.mubr.bf16.gmra.mrb[196].mxu0 %v18898_v33  ;;  %v6161_v5 = vmax.f32 %v23388_v56, %v4667_v30  ;;  %v19617_v51 = vmax.f32 %v6159_v27, %v23389_v2  ;;  %23393 = vst [vmem:[#allocation83_spill] sm:$0xff] %v19626_v63  ;;  %v19631_v22 = vpop.f32.mrb[134].mxu0 }
 0x2cf   : > { %v19623_v14 = vmax.f32 %v6160_v0, %v23391_v34  ;;  %23395 = vst [vmem:[#allocation84_spill] sm:$0xff] %v19631_v22  ;;  %v19633_v30 = vpop.f32.mrb[135].mxu0  ;;  %v15953_v0 = vld [vmem:[%s22945_s1 + $0x938] ss:$72 sps:$4 sm:$0xff]  }
 0x2d0   : > { %5262 = vmatmul.mubr.bf16.gmra.mrb[196].mxu1 %v18898_v33  ;;  %v19629_v41 = vmax.f32 %v6161_v5, %v23394_v28  ;;  %23396 = vst [vmem:[#allocation23_spill] sm:$0xff] %v19633_v30  ;;  %v15958_v5 = vld [vmem:[%s22945_s1 + $0x9cc] ss:$72 sps:$4 sm:$0xff]   ;;  %v23397_v28 = vld [vmem:[#allocation28_spill] sm:$0xff] }
 0x2d1   : > { %5570 = vmatprep.mubr.bf16.mxu1 %v23392_v32  ;;  %v23398_v30 = vld [vmem:[#allocation30_spill] sm:$0xff] }
 0x2d2   : > { %v4671_v25 = vpop.f32.mrb[132].mxu1 }
 0x2d3   : > { %v6162_v27 = vmax.f32 %v18966_v48, %v4671_v25  ;;  %v4673_v33 = vpop.f32.mrb[133].mxu1  ;;  %v23399_v25 = vld [vmem:[#allocation50_spill] sm:$0xff] }
 0x2d4   : > { %v6163_v56 = vmax.f32 %v18975_v53, %v4673_v33  ;;  %v4675_v2 = vpop.f32.mrb[134].mxu1  ;;  %v23400_v53 = vld [vmem:[#allocation13_spill] sm:$0xff]  ;;  %v19652_v33 = vpop.f32.mrb[136].mxu0 }
 0x2d5   : > { %v6164_v34 = vmax.f32 %v18983_v29, %v4675_v2  ;;  %v4677_v32 = vpop.f32.mrb[135].mxu1  ;;  %v19645_v22 = vmax.f32 %v6162_v27, %v23397_v28  ;;  %23401 = vst [vmem:[#allocation86_spill] sm:$0xff] %v19652_v33  ;;  %v23403_v29 = vld [vmem:[#allocation53_spill] sm:$0xff]  ;;  %v19661_v2 = vpop.f32.mrb[137].mxu0  ;;  %v23412_v33 = vld [vmem:[#allocation31_spill] sm:$0xff] }
 0x2d6   : > { %v6165_v48 = vmax.f32 %v23398_v30, %v4677_v32  ;;  %v19649_v63 = vmax.f32 %v6163_v56, %v23399_v25  ;;  %v15956_v27 = vld [vmem:[%s22945_s1 + $0x9c8] ss:$72 sps:$4 sm:$0xff]   ;;  %23404 = vst [vmem:[#allocation56_spill] sm:$0xff] %v19661_v2  ;;  %v23405_v30 = vld [vmem:[#allocation11_spill] sm:$0xff]  ;;  %v19669_v28 = vpop.f32.mrb[138].mxu0 }
 0x2d7   : > { %v19655_v13 = vmax.f32 %v6164_v34, %v23402_v9  ;;  %v15961_v56 = vld [vmem:[%s22945_s1 + $0xa5c] ss:$72 sps:$4 sm:$0xff]   ;;  %23406 = vst [vmem:[#allocation57_spill] sm:$0xff] %v19669_v28  ;;  %v15964_v28 = vld [vmem:[%s22945_s1 + $0xaec] ss:$72 sps:$4 sm:$0xff]  }
 0x2d8   : > { %5571 = vmatmul.mubr.bf16.vlgmr.msra.gmra.mrb[200].mxu1 %v23400_v53  ;;  %v19664_v32 = vmax.f32 %v6165_v48, %v23405_v30 }
 0x2d9   : > { %5672 = vmatpush1.bf16.msra.mxu1 %v15953_v0  ;;  %5580 = vmatprep.mubr.bf16.mxu1 %v23403_v29  ;;  %v19671_v0 = vpop.f32.mrb[139].mxu0 }
 0x2da   : > { %5673 = vmatprep.subr.bf16.mxu1 %v15958_v5  ;;  %v4681_v9 = vpop.f32.mrb[136].mxu1  ;;  %23407 = vst [vmem:[#allocation58_spill] sm:$0xff] %v19671_v0  ;;  %v15959_v5 = vld [vmem:[%s22945_s1 + $0xa58] ss:$72 sps:$4 sm:$0xff]   ;;  %v23408_v0 = vld [vmem:[#allocation14_spill] sm:$0xff] }
 0x2db   : > { %v6166_v34 = vmax.f32 %v19029_v59, %v4681_v9  ;;  %v4683_v25 = vpop.f32.mrb[137].mxu1 }
 0x2dc   : > { %v6167_v53 = vmax.f32 %v19038_v24, %v4683_v25  ;;  %v4685_v29 = vpop.f32.mrb[138].mxu1  ;;  %v23409_v24 = vld [vmem:[#allocation55_spill] sm:$0xff]  ;;  %v19690_v25 = vpop.f32.mrb[140].mxu0 }
 0x2dd   : > { %5674 = vmatpush1.bf16.msra.mxu1 %v15956_v27  ;;  %v6168_v48 = vmax.f32 %v19049_v57, %v4685_v29  ;;  %v4687_v30 = vpop.f32.mrb[139].mxu1  ;;  %v19683_v2 = vmax.f32 %v6166_v34, %v23408_v0  ;;  %v23410_v27 = vld [vmem:[#allocation33_spill] sm:$0xff]  ;;  %23411 = vst [vmem:[#allocation60_spill] sm:$0xff] %v19690_v25  ;;  %v19699_v34 = vpop.f32.mrb[141].mxu0  ;;  %v23422_v25 = vld [vmem:[#allocation34_spill] sm:$0xff] }
 0x2de   : > { %5675 = vmatprep.subr.bf16.mxu1 %v15961_v56  ;;  %v6169_v59 = vmax.f32 %v19060_v31, %v4687_v30  ;;  %v19687_v9 = vmax.f32 %v6167_v53, %v23409_v24  ;;  %v23413_v56 = vld [vmem:[#allocation15_spill] sm:$0xff]  ;;  %v15962_v0 = vld [vmem:[%s22945_s1 + $0xae8] ss:$72 sps:$4 sm:$0xff]   ;;  %23414 = vst [vmem:[#allocation24_spill] sm:$0xff] %v19699_v34  ;;  %v23415_v31 = vld [vmem:[#allocation32_spill] sm:$0xff]  ;;  %v19707_v30 = vpop.f32.mrb[142].mxu0 }
 0x2df   : > { %v19693_v57 = vmax.f32 %v6168_v48, %v23412_v33  ;;  %v15967_v53 = vld [vmem:[%s22945_s1 + $0xb7c] ss:$72 sps:$4 sm:$0xff]   ;;  %23416 = vst [vmem:[#allocation88_spill] sm:$0xff] %v19707_v30  ;;  %v19709_v48 = vpop.f32.mrb[143].mxu0  ;;  %v15970_v30 = vld [vmem:[%s22945_s1 + $0xc0c] ss:$72 sps:$4 sm:$0xff]  }
 0x2e0   : > { %5581 = vmatmul.mubr.bf16.gmra.mrb[204].mxu1 %v23410_v27  ;;  %v19702_v29 = vmax.f32 %v6169_v59, %v23415_v31  ;;  %23417 = vst [vmem:[#allocation25_spill] sm:$0xff] %v19709_v48  ;;  %v23418_v48 = vld [vmem:[#allocation59_spill] sm:$0xff] }
 0x2e1   : > { %5590 = vmatprep.mubr.bf16.mxu1 %v23413_v56  ;;  %5676 = vmatpush1.bf16.msra.mxu1 %v15959_v5 }
 0x2e2   : > { %5677 = vmatprep.subr.bf16.mxu1 %v15964_v28  ;;  %v4691_v33 = vpop.f32.mrb[140].mxu1  ;;  %v15965_v28 = vld [vmem:[%s22945_s1 + $0xb78] ss:$72 sps:$4 sm:$0xff]  }
 0x2e3   : > { %v6170_v5 = vmax.f32 %v19095_v49, %v4691_v33  ;;  %v4693_v24 = vpop.f32.mrb[141].mxu1 }
 0x2e4   : > { %v6171_v27 = vmax.f32 %v19104_v52, %v4693_v24  ;;  %v4695_v56 = vpop.f32.mrb[142].mxu1  ;;  %v23419_v52 = vld [vmem:[#allocation61_spill] sm:$0xff]  ;;  %v19728_v24 = vpop.f32.mrb[144].mxu0 }
 0x2e5   : > { %5678 = vmatpush1.bf16.msra.mxu1 %v15962_v0  ;;  %v6172_v59 = vmax.f32 %v19115_v40, %v4695_v56  ;;  %v4697_v31 = vpop.f32.mrb[143].mxu1  ;;  %v19721_v34 = vmax.f32 %v6170_v5, %v23418_v48  ;;  %v23420_v0 = vld [vmem:[#allocation36_spill] sm:$0xff]  ;;  %23421 = vst [vmem:[#allocation89_spill] sm:$0xff] %v19728_v24  ;;  %v15968_v48 = vld [vmem:[%s22945_s1 + $0xc08] ss:$72 sps:$4 sm:$0xff]   ;;  %v19737_v5 = vpop.f32.mrb[145].mxu0 }
 0x2e6   : > { %5679 = vmatprep.subr.bf16.mxu1 %v15967_v53  ;;  %v6173_v49 = vmax.f32 %v19126_v45, %v4697_v31  ;;  %v19725_v33 = vmax.f32 %v6171_v27, %v23419_v52  ;;  %v23423_v53 = vld [vmem:[#allocation63_spill] sm:$0xff]  ;;  %23424 = vst [vmem:[#allocation26_spill] sm:$0xff] %v19737_v5  ;;  %v19745_v31 = vpop.f32.mrb[146].mxu0 }
 0x2e7   : > { %v19731_v40 = vmax.f32 %v6172_v59, %v23422_v25  ;;  %v23425_v45 = vld [vmem:[#allocation35_spill] sm:$0xff]  ;;  %23427 = vst [vmem:[#allocation62_spill] sm:$0xff] %v19745_v31  ;;  %v19747_v59 = vpop.f32.mrb[147].mxu0  ;;  %v15976_v31 = vld [vmem:[%s22945_s1 + $0xd2c] ss:$72 sps:$4 sm:$0xff]  }
 0x2e8   : > { %5591 = vmatmul.mubr.bf16.gmra.mrb[208].mxu1 %v23420_v0  ;;  %v19740_v56 = vmax.f32 %v6173_v49, %v23425_v45  ;;  %v15973_v27 = vld [vmem:[%s22945_s1 + $0xc9c] ss:$72 sps:$4 sm:$0xff]   ;;  %23428 = vst [vmem:[#allocation66_spill] sm:$0xff] %v19747_v59  ;;  %v23429_v59 = vld [vmem:[#allocation37_spill] sm:$0xff] }
 0x2e9   : > { %5600 = vmatprep.mubr.bf16.mxu1 %v23423_v53  ;;  %5680 = vmatpush1.bf16.msra.mxu1 %v15965_v28 }
 0x2ea   : > { %23426 = vst [vmem:[#allocation91_spill] sm:$0xff] %v19740_v56  ;;  %5681 = vmatprep.subr.bf16.mxu1 %v15970_v30  ;;  %v4701_v25 = vpop.f32.mrb[144].mxu1  ;;  %v15971_v30 = vld [vmem:[%s22945_s1 + $0xc98] ss:$72 sps:$4 sm:$0xff]  }
 0x2eb   : > { %v6174_v28 = vmax.f32 %v19161_v20, %v4701_v25  ;;  %v4703_v52 = vpop.f32.mrb[145].mxu1  ;;  %v23430_v20 = vld [vmem:[#allocation40_spill] sm:$0xff] }
 0x2ec   : > { %v6175_v0 = vmax.f32 %v19170_v23, %v4703_v52  ;;  %v4705_v53 = vpop.f32.mrb[146].mxu1  ;;  %v23431_v23 = vld [vmem:[#allocation16_spill] sm:$0xff] }
 0x2ed   : > { %5682 = vmatpush1.bf16.msra.mxu1 %v15968_v48  ;;  %v6176_v49 = vmax.f32 %v19181_v35, %v4705_v53  ;;  %v4707_v45 = vpop.f32.mrb[147].mxu1  ;;  %v19759_v5 = vmax.f32 %v6174_v28, %v23429_v59  ;;  %v23432_v48 = vld [vmem:[#allocation17_spill] sm:$0xff]  ;;  %v19766_v24 = vpop.f32.mrb[148].mxu0  ;;  %v23434_v56 = vld [vmem:[#allocation64_spill] sm:$0xff] }
 0x2ee   : > { %5683 = vmatprep.subr.bf16.mxu1 %v15973_v27  ;;  %v6177_v25 = vmax.f32 %v23430_v20, %v4707_v45  ;;  %v19763_v52 = vmax.f32 %v6175_v0, %v23431_v23  ;;  %23433 = vst [vmem:[#allocation68_spill] sm:$0xff] %v19766_v24  ;;  %v23435_v27 = vld [vmem:[#allocation67_spill] sm:$0xff]  ;;  %v15974_v59 = vld [vmem:[%s22945_s1 + $0xd28] ss:$72 sps:$4 sm:$0xff]   ;;  %v19775_v28 = vpop.f32.mrb[149].mxu0 }
 0x2ef   : > { %v19769_v35 = vmax.f32 %v6176_v49, %v23434_v56  ;;  %23436 = vst [vmem:[#allocation71_spill] sm:$0xff] %v19775_v28  ;;  %v23437_v53 = vld [vmem:[#allocation65_spill] sm:$0xff]  ;;  %v15979_v0 = vld [vmem:[%s22945_s1 + $0xdbc] ss:$72 sps:$4 sm:$0xff]   ;;  %v19783_v20 = vpop.f32.mrb[150].mxu0 }
 0x2f0   : > { %5601 = vmatmul.mubr.bf16.gmra.mrb[212].mxu1 %v23432_v48  ;;  %v19778_v45 = vmax.f32 %v6177_v25, %v23437_v53  ;;  %23438 = vst [vmem:[#allocation73_spill] sm:$0xff] %v19783_v20  ;;  %v19785_v49 = vpop.f32.mrb[151].mxu0  ;;  %v15982_v20 = vld [vmem:[%s22945_s1 + $0xe4c] ss:$72 sps:$4 sm:$0xff]  }
 0x2f1   : > { %5610 = vmatprep.mubr.bf16.mxu1 %v23435_v27  ;;  %5684 = vmatpush1.bf16.msra.mxu1 %v15971_v30  ;;  %23439 = vst [vmem:[#allocation76_spill] sm:$0xff] %v19785_v49  ;;  %v23440_v49 = vld [vmem:[#allocation38_spill] sm:$0xff]  ;;  %v23444_v24 = vld [vmem:[#allocation41_spill] sm:$0xff] }
 0x2f2   : > { %5685 = vmatprep.subr.bf16.mxu1 %v15976_v31  ;;  %v4711_v56 = vpop.f32.mrb[148].mxu1  ;;  %v15977_v31 = vld [vmem:[%s22945_s1 + $0xdb8] ss:$72 sps:$4 sm:$0xff]  }
 0x2f3   : > { %v6178_v30 = vmax.f32 %v19227_v39, %v4711_v56  ;;  %v4713_v23 = vpop.f32.mrb[149].mxu1 }
 0x2f4   : > { %v6179_v48 = vmax.f32 %v19236_v8, %v4713_v23  ;;  %v4715_v27 = vpop.f32.mrb[150].mxu1  ;;  %v23441_v8 = vld [vmem:[#allocation39_spill] sm:$0xff] }
 0x2f5   : > { %5686 = vmatpush1.bf16.msra.mxu1 %v15974_v59  ;;  %v6180_v25 = vmax.f32 %v19247_v42, %v4715_v27  ;;  %v4717_v53 = vpop.f32.mrb[151].mxu1  ;;  %v19797_v28 = vmax.f32 %v6178_v30, %v23440_v49  ;;  %v23442_v59 = vld [vmem:[#allocation70_spill] sm:$0xff]  ;;  %v19804_v23 = vpop.f32.mrb[152].mxu0 }
 0x2f6   : > { %5687 = vmatprep.subr.bf16.mxu1 %v15979_v0  ;;  %v6181_v39 = vmax.f32 %v19258_v36, %v4717_v53  ;;  %v19801_v56 = vmax.f32 %v6179_v48, %v23441_v8  ;;  %23443 = vst [vmem:[#allocation78_spill] sm:$0xff] %v19804_v23  ;;  %v23445_v0 = vld [vmem:[#allocation18_spill] sm:$0xff]  ;;  %v19813_v30 = vpop.f32.mrb[153].mxu0  ;;  %v23447_v36 = vld [vmem:[#allocation69_spill] sm:$0xff]  ;;  %v15985_v48 = vld [vmem:[%s22945_s1 + $0xedc] ss:$72 sps:$4 sm:$0xff]  }
 0x2f7   : > { %v19807_v42 = vmax.f32 %v6180_v25, %v23444_v24  ;;  %v15980_v49 = vld [vmem:[%s22945_s1 + $0xe48] ss:$72 sps:$4 sm:$0xff]   ;;  %23446 = vst [vmem:[#allocation80_spill] sm:$0xff] %v19813_v30  ;;  %v19821_v53 = vpop.f32.mrb[154].mxu0 }
 0x2f8   : > { %5611 = vmatmul.mubr.bf16.gmra.mrb[216].mxu1 %v23442_v59  ;;  %v19816_v27 = vmax.f32 %v6181_v39, %v23447_v36  ;;  %23448 = vst [vmem:[#allocation82_spill] sm:$0xff] %v19821_v53  ;;  %v19823_v25 = vpop.f32.mrb[155].mxu0  ;;  %v15988_v53 = vld [vmem:[%s22945_s1 + $0xf6c] ss:$72 sps:$4 sm:$0xff]  }
 0x2f9   : > { %5620 = vmatprep.mubr.bf16.mxu1 %v23445_v0  ;;  %5688 = vmatpush1.bf16.msra.mxu1 %v15977_v31  ;;  %23449 = vst [vmem:[#allocation85_spill] sm:$0xff] %v19823_v25  ;;  %v23450_v25 = vld [vmem:[#allocation72_spill] sm:$0xff] }
 0x2fa   : > { %5689 = vmatprep.subr.bf16.mxu1 %v15982_v20  ;;  %v4721_v24 = vpop.f32.mrb[152].mxu1  ;;  %v15983_v20 = vld [vmem:[%s22945_s1 + $0xed8] ss:$72 sps:$4 sm:$0xff]  }
 0x2fb   : > { %v6182_v31 = vmax.f32 %v19293_v38, %v4721_v24  ;;  %v4723_v8 = vpop.f32.mrb[153].mxu1 }
 0x2fc   : > { %v6183_v59 = vmax.f32 %v19302_v54, %v4723_v8  ;;  %v4725_v0 = vpop.f32.mrb[154].mxu1  ;;  %v23451_v54 = vld [vmem:[#allocation42_spill] sm:$0xff]  ;;  %v23453_v8 = vld [vmem:[#allocation43_spill] sm:$0xff] }
 0x2fd   : > { %5690 = vmatpush1.bf16.msra.mxu1 %v15980_v49  ;;  %v6184_v39 = vmax.f32 %v19310_v43, %v4725_v0  ;;  %v4727_v36 = vpop.f32.mrb[155].mxu1  ;;  %v19835_v30 = vmax.f32 %v6182_v31, %v23450_v25  ;;  %v19842_v49 = vpop.f32.mrb[156].mxu0  ;;  %v15986_v25 = vld [vmem:[%s22945_s1 + $0xf68] ss:$72 sps:$4 sm:$0xff]  }
 0x2fe   : > { %5691 = vmatprep.subr.bf16.mxu1 %v15985_v48  ;;  %v6185_v38 = vmax.f32 %v19321_v4, %v4727_v36  ;;  %v19839_v24 = vmax.f32 %v6183_v59, %v23451_v54  ;;  %23452 = vst [vmem:[#allocation87_spill] sm:$0xff] %v19842_v49  ;;  %v23454_v48 = vld [vmem:[#allocation45_spill] sm:$0xff]  ;;  %v19851_v31 = vpop.f32.mrb[157].mxu0  ;;  %v23456_v4 = vld [vmem:[#allocation44_spill] sm:$0xff] }
 0x2ff   : > { %v19845_v43 = vmax.f32 %v6184_v39, %v23453_v8  ;;  %23455 = vst [vmem:[#allocation90_spill] sm:$0xff] %v19851_v31  ;;  %v19856_v59 = vpop.f32.mrb[158].mxu0  ;;  %v23458_v31 = vld [vmem:[#allocation74_spill] sm:$0xff] }
 0x300   : > { %5621 = vmatmul.mubr.bf16.gmra.mrb[220].mxu1 %v19279_v3  ;;  %v19854_v0 = vmax.f32 %v6185_v38, %v23456_v4  ;;  %v19858_v36 = vpop.f32.mrb[159].mxu0  ;;  %v23459_v38 = vld [vmem:[#allocation19_spill] sm:$0xff] }
 0x301   : > { %5630 = vmatprep.mubr.bf16.mxu1 %v23454_v48  ;;  %5692 = vmatpush1.bf16.msra.mxu1 %v15983_v20  ;;  %23457 = vst [vmem:[#allocation92_spill] sm:$0xff] %v19858_v36  ;;  %v23460_v36 = vld [vmem:[#allocation75_spill] sm:$0xff] }
 0x302   : > { %5693 = vmatprep.subr.bf16.mxu1 %v15988_v53  ;;  %v4731_v3 = vpop.f32.mrb[156].mxu1 }
 0x303   : > { %v6186_v39 = vmax.f32 %v19344_v19, %v4731_v3  ;;  %v4733_v54 = vpop.f32.mrb[157].mxu1  ;;  %v23467_v3 = vld [vmem:[#allocation21_spill] sm:$0xff] }
 0x304   : > { %v6187_v20 = vmax.f32 %v19350_v16, %v4733_v54  ;;  %v4735_v8 = vpop.f32.mrb[158].mxu1  ;;  %v23461_v16 = vld [vmem:[#allocation20_spill] sm:$0xff]  ;;  %v15995_v54 = vld [vmem:[%s22947_s3 + $0xe8] ss:$8 sps:$4 sm:$0xff]  }
 0x305   : > { %5694 = vmatpush1.bf16.msra.mxu1 %v15986_v25  ;;  %v6188_v48 = vmax.f32 %v19356_v26, %v4735_v8  ;;  %v4737_v49 = vpop.f32.mrb[159].mxu1  ;;  %v19864_v23 = vmax.f32 %v6186_v39, %v23458_v31  ;;  %v23462_v26 = vld [vmem:[#allocation77_spill] sm:$0xff]  ;;  %v23465_v31 = vld [vmem:[#allocation48_spill] sm:$0xff] }
 0x306   : > { %v6189_v53 = vmax.f32 %v19362_v1, %v4737_v49  ;;  %v19868_v4 = vmax.f32 %v6187_v20, %v23459_v38  ;;  %v23463_v1 = vld [vmem:[#allocation46_spill] sm:$0xff]  ;;  %v23464_v49 = vld [vmem:[#allocation47_spill] sm:$0xff] }
 0x307   : > { %v19872_v19 = vmax.f32 %v6188_v48, %v23460_v36  ;;  %v15992_v36 = vld [vmem:[%s22947_s3 + $0xd8] ss:$8 sps:$4 sm:$0xff]   ;;  %v15997_v39 = vld [vmem:[%s22947_s3 + $0xec] ss:$8 sps:$4 sm:$0xff]   ;;  %v16000_v20 = vld [vmem:[%s22947_s3 + $0xfc] ss:$8 sps:$4 sm:$0xff]  }
 0x308   : > { %5631 = vmatmul.mubr.bf16.gmra.mrb[224].mxu1 %v19333_v62  ;;  %v19876_v25 = vmax.f32 %v6189_v53, %v23461_v16  ;;  %v15991_v62 = vld [vmem:[%s22947_s3 + $0xcc] ss:$8 sps:$4 sm:$0xff]   ;;  %v16514_v8 = vld [vmem:[%s16839_s22 + $0x28] ss:$16 sps:$4 sm:$0xff]  }
 0x309   : > { %5640 = vmatprep.mubr.bf16.mxu1 %v19338_v60  ;;  %v15989_v60 = vld [vmem:[%s22947_s3 + $0xc8] ss:$8 sps:$4 sm:$0xff]   ;;  %6985 = vmatprep.subr.bf16.mxu1 %v15991_v62  ;;  %v16515_v48 = vld [vmem:[%s16839_s22 + $0x4c] ss:$16 sps:$4 sm:$0xff]   ;;  %v15998_v53 = vld [vmem:[%s22947_s3 + $0xf8] ss:$8 sps:$4 sm:$0xff]  }
 0x30a   : > { %v16003_v38 = vld [vmem:[%s22947_s3 + $0x10c] ss:$8 sps:$4 sm:$0xff]   ;;  %v16001_v16 = vld [vmem:[%s22947_s3 + $0x108] ss:$8 sps:$4 sm:$0xff]  }
 0x30b   : > { %v16007_v62 = vld [vmem:[%s22947_s3 + $0x128] ss:$8 sps:$4 sm:$0xff]  }
 0x310   : > { %5641 = vmatmul.mubr.bf16.gmra.mrb[228].mxu1 %v19365_v12  ;;  %v23466_v12 = vld [vmem:[#allocation49_spill] sm:$0xff] }
 0x311   : > { %5650 = vmatprep.mubr.bf16.mxu1 %v19369_v10  ;;  %v15994_v10 = vld [vmem:[%s22947_s3 + $0xdc] ss:$8 sps:$4 sm:$0xff]  }
 0x318   : > { %5651 = vmatmul.mubr.bf16.gmra.mrb[232].mxu1 %v23462_v26  ;;  %v16006_v26 = vld [vmem:[%s22947_s3 + $0x11c] ss:$8 sps:$4 sm:$0xff]  }
 0x319   : > { %5660 = vmatprep.mubr.bf16.mxu1 %v23463_v1  ;;  %v16516_v1 = vld [vmem:[%s16839_s22 + $0x48] ss:$16 sps:$4 sm:$0xff]  }
 0x320   : > { %5661 = vmatmul.mubr.bf16.gmra.mrb[236].mxu1 %v23464_v49  ;;  %v16517_v49 = vld [vmem:[%s16839_s22 + $0x6c] ss:$16 sps:$4 sm:$0xff]  }
 0x321   : > { %13355 = vmatprep.mubr.msk.bf16.mxu1 %vm3645_vm0, %v23465_v31  ;;  %v16004_v31 = vld [vmem:[%s22947_s3 + $0x118] ss:$8 sps:$4 sm:$0xff]  }
 0x328   : > { %5704 = vmatmul.mubr.bf16.vlgmr.msra.gmra.mrb[200].mxu1 %v23466_v12  ;;  %v16518_v12 = vld [vmem:[%s16839_s22 + $0x68] ss:$16 sps:$4 sm:$0xff]  }
 0x329   : > { %13356 = vmatprep.mubr.msk.bf16.mxu1 %vm3645_vm0, %v23467_v3  ;;  %6986 = vmatpush1.bf16.msra.mxu1 %v15989_v60  ;;  %v16009_v60 = vld [vmem:[%s22947_s3 + $0x12c] ss:$8 sps:$4 sm:$0xff]   ;;  %v16520_v3 = vld [vmem:[%s16839_s22 + $0x88] ss:$16 sps:$4 sm:$0xff]  }
 0x32a   : > { %6987 = vmatprep.subr.bf16.mxu1 %v15994_v10  ;;  %v16519_v10 = vld [vmem:[%s16839_s22 + $0x8c] ss:$16 sps:$4 sm:$0xff]  }
 0x32d   : > { %6988 = vmatpush1.bf16.msra.mxu1 %v15992_v36  ;;  %v16521_v36 = vld [vmem:[%s16839_s22 + $0xac] ss:$16 sps:$4 sm:$0xff]  }
 0x32e   : > { %6989 = vmatprep.subr.bf16.mxu1 %v15997_v39  ;;  %v16522_v39 = vld [vmem:[%s16839_s22 + $0xa8] ss:$16 sps:$4 sm:$0xff]  }
 0x330   : > { %5714 = vmatmul.mubr.bf16.gmra.mrb[204].mxu1 %v16514_v8 }
 0x331   : > { %13357 = vmatprep.mubr.msk.bf16.mxu1 %vm3645_vm0, %v16515_v48  ;;  %6990 = vmatpush1.bf16.msra.mxu1 %v15995_v54  ;;  %v16523_v54 = vld [vmem:[%s16839_s22 + $0xcc] ss:$16 sps:$4 sm:$0xff]  }
 0x332   : > { %6991 = vmatprep.subr.bf16.mxu1 %v16000_v20  ;;  %v16524_v20 = vld [vmem:[%s16839_s22 + $0xc8] ss:$16 sps:$4 sm:$0xff]   ;;  %v16525_v48 = vld [vmem:[%s16839_s22 + $0xec] ss:$16 sps:$4 sm:$0xff]  }
 0x335   : > { %6992 = vmatpush1.bf16.msra.mxu1 %v15998_v53 }
 0x336   : > { %6993 = vmatprep.subr.bf16.mxu1 %v16003_v38 }
 0x338   : > { %5724 = vmatmul.mubr.bf16.gmra.mrb[208].mxu1 %v16516_v1 }
 0x339   : > { %13358 = vmatprep.mubr.msk.bf16.mxu1 %vm3645_vm0, %v16517_v49  ;;  %6994 = vmatpush1.bf16.msra.mxu1 %v16001_v16 }
 0x33a   : > { %6995 = vmatprep.subr.bf16.mxu1 %v16006_v26 }
 0x33d   : > { %6996 = vmatpush1.bf16.msra.mxu1 %v16004_v31 }
 0x33e   : > { %6997 = vmatprep.subr.bf16.mxu1 %v16009_v60 }
 0x340   : > { %5734 = vmatmul.mubr.bf16.gmra.mrb[212].mxu1 %v16518_v12 }
 0x341   : > { %13359 = vmatprep.mubr.msk.bf16.mxu1 %vm3645_vm0, %v16519_v10  ;;  %6998 = vmatpush1.bf16.msra.mxu1 %v16007_v62  ;;  %v23468_v10 = vld [vmem:[#allocation79_spill] sm:$0xff] }
 0x348   : > { %5744 = vmatmul.mubr.bf16.gmra.mrb[216].mxu1 %v16520_v3 }
 0x349   : > { %13360 = vmatprep.mubr.msk.bf16.mxu1 %vm3645_vm0, %v16521_v36 }
 0x350   : > { %5754 = vmatmul.mubr.bf16.gmra.mrb[220].mxu1 %v16522_v39  ;;  %v23469_v39 = vld [vmem:[#allocation22_spill] sm:$0xff] }
 0x351   : > { %13361 = vmatprep.mubr.msk.bf16.mxu1 %vm3645_vm0, %v16523_v54 }
 0x358   : > { %5764 = vmatmul.mubr.bf16.gmra.mrb[224].mxu1 %v16524_v20  ;;  %v16526_v20 = vld [vmem:[%s16839_s22 + $0xe8] ss:$16 sps:$4 sm:$0xff]  }
 0x359   : > { %v19946_v8 = vpop.f32.mrb[160].mxu0  ;;  %13362 = vmatprep.mubr.msk.bf16.mxu1 %vm3645_vm0, %v16525_v48 }
 0x35a   : > { %v19950_v53 = vpop.f32.mrb[161].mxu0 }
 0x35b   : > { %v19952_v38 = vpop.f32.mrb[162].mxu0  ;;  %v5173_v16 = vpop.f32.mrb[160].mxu1 }
 0x35c   : > { %v19954_v26 = vpop.f32.mrb[163].mxu0  ;;  %v6230_v1 = vmax.f32 %v19549_v46, %v5173_v16  ;;  %v5175_v49 = vpop.f32.mrb[161].mxu1  ;;  %v23470_v16 = vld [vmem:[#allocation81_spill] sm:$0xff] }
 0x35d   : > { %v6231_v31 = vmax.f32 %v19553_v44, %v5175_v49  ;;  %v5177_v60 = vpop.f32.mrb[162].mxu1  ;;  %v16527_v44 = vld [vmem:[%s16839_s22 + $0x10c] ss:$16 sps:$4 sm:$0xff]  }
 0x35e   : > { %v6232_v62 = vmax.f32 %v19559_v50, %v5177_v60  ;;  %v5179_v12 = vpop.f32.mrb[163].mxu1  ;;  %v19960_v3 = vmax.f32 %v6230_v1, %v23468_v10 }
 0x35f   : > { %v6233_v36 = vmax.f32 %v19569_v21, %v5179_v12  ;;  %v19964_v54 = vmax.f32 %v6231_v31, %v23469_v39 }
 0x360   : > { %5774 = vmatmul.mubr.bf16.gmra.mrb[228].mxu1 %v16526_v20  ;;  %v19970_v46 = vmax.f32 %v6232_v62, %v19532_v15  ;;  %v23473_v20 = vld [vmem:[#allocation10_spill] sm:$0xff] }
 0x361   : > { %v19967_v48 = vpop.f32.mrb[164].mxu0  ;;  %13363 = vmatprep.mubr.msk.bf16.mxu1 %vm3645_vm0, %v16527_v44  ;;  %v19977_v1 = vmax.f32 %v6233_v36, %v23470_v16 }
 0x362   : > { %v19974_v50 = vpop.f32.mrb[165].mxu0 }
 0x363   : > { %v19979_v21 = vpop.f32.mrb[166].mxu0  ;;  %v5183_v49 = vpop.f32.mrb[164].mxu1 }
 0x364   : > { %23471 = vst [vmem:[#allocation93_spill] sm:$0xff] %v19979_v21  ;;  %v19981_v31 = vpop.f32.mrb[167].mxu0  ;;  %v6234_v60 = vmax.f32 %v19585_v61, %v5183_v49  ;;  %v5185_v12 = vpop.f32.mrb[165].mxu1  ;;  %v16528_v21 = vld [vmem:[%s16839_s22 + $0x108] ss:$16 sps:$4 sm:$0xff]  }
 0x365   : > { %23472 = vst [vmem:[#allocation94_spill] sm:$0xff] %v19981_v31  ;;  %v6235_v15 = vmax.f32 %v19589_v17, %v5185_v12  ;;  %v5187_v62 = vpop.f32.mrb[166].mxu1  ;;  %v16529_v17 = vld [vmem:[%s16839_s22 + $0x12c] ss:$16 sps:$4 sm:$0xff]  }
 0x366   : > { %v6236_v10 = vmax.f32 %v19595_v18, %v5187_v62  ;;  %v5189_v39 = vpop.f32.mrb[167].mxu1  ;;  %v19987_v44 = vmax.f32 %v6234_v60, %v23473_v20  ;;  %v23474_v49 = vld [vmem:[#allocation51_spill] sm:$0xff] }
 0x367   : > { %v6237_v36 = vmax.f32 %v19602_v58, %v5189_v39  ;;  %v19991_v16 = vmax.f32 %v6235_v15, %v19566_v6 }
 0x368   : > { %5784 = vmatmul.mubr.bf16.gmra.mrb[232].mxu1 %v16528_v21  ;;  %v19997_v61 = vmax.f32 %v6236_v10, %v19574_v47 }
 0x369   : > { %v19994_v31 = vpop.f32.mrb[168].mxu0  ;;  %13364 = vmatprep.mubr.msk.bf16.mxu1 %vm3645_vm0, %v16529_v17  ;;  %v20004_v60 = vmax.f32 %v6237_v36, %v23474_v49  ;;  %v16530_v49 = vld [vmem:[%s16839_s22 + $0x128] ss:$16 sps:$4 sm:$0xff]   ;;  %s16547_s22 = scalar_lea.vmem %s22904_s14, 128 }
 0x36a   : > { %v20001_v18 = vpop.f32.mrb[169].mxu0  ;;  %p16548_p11 = scmp.ne.s32.totalorder %s22904_s14, %s16547_s22  ;;  %p16555_p1 = scmp.lt.s32.totalorder %s16553_s13, %s16547_s22 }
 0x36b   : > { %v20006_v58 = vpop.f32.mrb[170].mxu0  ;;  %v5193_v6 = vpop.f32.mrb[168].mxu1 }
 0x36c   : > { %v20008_v12 = vpop.f32.mrb[171].mxu0  ;;  %v6238_v21 = vmax.f32 %v19613_v7, %v5193_v6  ;;  %v5195_v15 = vpop.f32.mrb[169].mxu1  ;;  %v23478_v6 = vld [vmem:[#allocation52_spill] sm:$0xff]  ;;  %p16549_p12 = pnand %p16548_p11, %p16714_p5  ;;  %p16556_p2 = por %p16555_p1, %p16554_p0 }
 0x36d   : > { %23475 = vst [vmem:[#allocation95_spill] sm:$0xff] %v20008_v12  ;;  %v6239_v47 = vmax.f32 %v19617_v51, %v5195_v15  ;;  %v5197_v62 = vpop.f32.mrb[170].mxu1 }
 0x36e   : > { %v6240_v10 = vmax.f32 %v19623_v14, %v5197_v62  ;;  %v5199_v39 = vpop.f32.mrb[171].mxu1  ;;  %v20014_v20 = vmax.f32 %v6238_v21, %v19592_v11  ;;  %p16550_p13 = pneg %p16549_p12 }
 0x36f   : > { %v6241_v36 = vmax.f32 %v19629_v41, %v5199_v39  ;;  %v20018_v17 = vmax.f32 %v6239_v47, %v19599_v55 }
 0x370   : > { %5794 = vmatmul.mubr.bf16.gmra.mrb[236].mxu1 %v16530_v49  ;;  %v20024_v7 = vmax.f32 %v6240_v10, %v19604_v37  ;;  %v23481_v10 = vld [vmem:[#allocation54_spill] sm:$0xff]  ;;  %p16557_p3 = pnand %p16556_p2, %p16550_p13 }
 0x371   : > { %v20021_v12 = vpop.f32.mrb[172].mxu0  ;;  %v20029_v14 = vmax.f32 %v6241_v36, %v23478_v6  ;;  %v23482_v6 = vld [vmem:[#allocation83_spill] sm:$0xff] }
 0x372   : > { %23476 = vst [vmem:[#allocation96_spill] sm:$0xff] %v20021_v12  ;;  %v20026_v51 = vpop.f32.mrb[173].mxu0 }
 0x373   : > { %23477 = vst [vmem:[#allocation29_spill] sm:$0xff] %v20026_v51  ;;  %v20031_v15 = vpop.f32.mrb[174].mxu0  ;;  %v5203_v11 = vpop.f32.mrb[172].mxu1 }
 0x374   : > { %23479 = vst [vmem:[#allocation97_spill] sm:$0xff] %v20031_v15  ;;  %v20033_v21 = vpop.f32.mrb[175].mxu0  ;;  %v6242_v55 = vmax.f32 %v19645_v22, %v5203_v11  ;;  %v5205_v41 = vpop.f32.mrb[173].mxu1 }
 0x375   : > { %23480 = vst [vmem:[#allocation98_spill] sm:$0xff] %v20033_v21  ;;  %v6243_v47 = vmax.f32 %v19649_v63, %v5205_v41  ;;  %v5207_v62 = vpop.f32.mrb[174].mxu1  ;;  %v23484_v21 = vld [vmem:[#allocation84_spill] sm:$0xff]  ;;  %v23486_v63 = vld [vmem:[#allocation23_spill] sm:$0xff] }
 0x376   : > { %v6244_v39 = vmax.f32 %v19655_v13, %v5207_v62  ;;  %v5209_v37 = vpop.f32.mrb[175].mxu1  ;;  %v20039_v49 = vmax.f32 %v6242_v55, %v23481_v10 }
 0x377   : > { %v6245_v36 = vmax.f32 %v19664_v32, %v5209_v37  ;;  %v20043_v51 = vmax.f32 %v6243_v47, %v23482_v6 }
 0x378   : > { %v20048_v12 = vmax.f32 %v6244_v39, %v23484_v21  ;;  %v23489_v39 = vld [vmem:[#allocation86_spill] sm:$0xff] }
 0x379   : > { %v20045_v15 = vpop.f32.mrb[176].mxu0  ;;  %v20053_v11 = vmax.f32 %v6245_v36, %v23486_v63  ;;  %v23490_v63 = vld [vmem:[#allocation56_spill] sm:$0xff] }
 0x37a   : > { %23483 = vst [vmem:[#allocation27_spill] sm:$0xff] %v20045_v15  ;;  %v20050_v22 = vpop.f32.mrb[177].mxu0 }
 0x37b   : > { %23485 = vst [vmem:[#allocation99_spill] sm:$0xff] %v20050_v22  ;;  %v20055_v13 = vpop.f32.mrb[178].mxu0  ;;  %v5213_v41 = vpop.f32.mrb[176].mxu1 }
 0x37c   : > { %23487 = vst [vmem:[#allocation28_spill] sm:$0xff] %v20055_v13  ;;  %v20057_v55 = vpop.f32.mrb[179].mxu0  ;;  %v6246_v32 = vmax.f32 %v19683_v2, %v5213_v41  ;;  %v5215_v62 = vpop.f32.mrb[177].mxu1 }
 0x37d   : > { %23488 = vst [vmem:[#allocation30_spill] sm:$0xff] %v20057_v55  ;;  %v6247_v47 = vmax.f32 %v19687_v9, %v5215_v62  ;;  %v5217_v37 = vpop.f32.mrb[178].mxu1  ;;  %v23492_v55 = vld [vmem:[#allocation57_spill] sm:$0xff]  ;;  %v23494_v9 = vld [vmem:[#allocation58_spill] sm:$0xff] }
 0x37e   : > { %v6248_v10 = vmax.f32 %v19693_v57, %v5217_v37  ;;  %v5219_v21 = vpop.f32.mrb[179].mxu1  ;;  %v20063_v6 = vmax.f32 %v6246_v32, %v23489_v39 }
 0x37f   : > { %v6249_v36 = vmax.f32 %v19702_v29, %v5219_v21  ;;  %v20067_v22 = vmax.f32 %v6247_v47, %v23490_v63  ;;  %v16010_v47 = vld [vmem:[%s22947_s3 + $0x138] ss:$8 sps:$4 sm:$0xff]  }
 0x380   : > { %v20072_v15 = vmax.f32 %v6248_v10, %v23492_v55  ;;  %v16012_v55 = vld [vmem:[%s22947_s3 + $0x13c] ss:$8 sps:$4 sm:$0xff]  }
 0x381   : > { %v20069_v13 = vpop.f32.mrb[180].mxu0  ;;  %v20077_v41 = vmax.f32 %v6249_v36, %v23494_v9  ;;  %6999 = vmatprep.subr.bf16.mxu1 %v16012_v55  ;;  %v23497_v63 = vld [vmem:[#allocation60_spill] sm:$0xff] }
 0x382   : > { %23491 = vst [vmem:[#allocation50_spill] sm:$0xff] %v20069_v13  ;;  %v20074_v2 = vpop.f32.mrb[181].mxu0  ;;  %7000 = vmatpush1.bf16.msra.mxu1 %v16010_v47  ;;  %v23501_v55 = vld [vmem:[#allocation88_spill] sm:$0xff]  ;;  %v23502_v47 = vld [vmem:[#allocation25_spill] sm:$0xff] }
 0x383   : > { %23493 = vst [vmem:[#allocation13_spill] sm:$0xff] %v20074_v2  ;;  %v20079_v57 = vpop.f32.mrb[182].mxu0  ;;  %v5223_v62 = vpop.f32.mrb[180].mxu1 }
 0x384   : > { %23495 = vst [vmem:[#allocation12_spill] sm:$0xff] %v20079_v57  ;;  %v20081_v32 = vpop.f32.mrb[183].mxu0  ;;  %v6250_v29 = vmax.f32 %v19721_v34, %v5223_v62  ;;  %v5225_v37 = vpop.f32.mrb[181].mxu1  ;;  %v23498_v34 = vld [vmem:[#allocation91_spill] sm:$0xff]  ;;  %v16015_v57 = vld [vmem:[%s22947_s3 + $0x14c] ss:$8 sps:$4 sm:$0xff]  }
 0x385   : > { %23496 = vst [vmem:[#allocation53_spill] sm:$0xff] %v20081_v32  ;;  %v6251_v10 = vmax.f32 %v19725_v33, %v5225_v37  ;;  %v5227_v21 = vpop.f32.mrb[182].mxu1  ;;  %v16013_v32 = vld [vmem:[%s22947_s3 + $0x148] ss:$8 sps:$4 sm:$0xff]   ;;  %v23499_v33 = vld [vmem:[#allocation24_spill] sm:$0xff]  ;;  %7001 = vmatprep.subr.bf16.mxu1 %v16015_v57 }
 0x386   : > { %v6252_v39 = vmax.f32 %v19731_v40, %v5227_v21  ;;  %v5229_v36 = vpop.f32.mrb[183].mxu1  ;;  %v20093_v9 = vmax.f32 %v6250_v29, %v23497_v63  ;;  %7002 = vmatpush1.bf16.msra.mxu1 %v16013_v32  ;;  %v23506_v32 = vld [vmem:[#allocation26_spill] sm:$0xff] }
 0x387   : > { %v6253_v62 = vmax.f32 %v23498_v34, %v5229_v36  ;;  %v20103_v37 = vmax.f32 %v6251_v10, %v23499_v33 }
 0x388   : > { %v20108_v21 = vmax.f32 %v6252_v39, %v23501_v55  ;;  %v16018_v39 = vld [vmem:[%s22947_s3 + $0x15c] ss:$8 sps:$4 sm:$0xff]   ;;  %v16016_v55 = vld [vmem:[%s22947_s3 + $0x158] ss:$8 sps:$4 sm:$0xff]  }
 0x389   : > { %v20105_v40 = vpop.f32.mrb[184].mxu0  ;;  %v20113_v36 = vmax.f32 %v6253_v62, %v23502_v47  ;;  %v23505_v47 = vld [vmem:[#allocation89_spill] sm:$0xff]  ;;  %7003 = vmatprep.subr.bf16.mxu1 %v16018_v39 }
 0x38a   : > { %23500 = vst [vmem:[#allocation11_spill] sm:$0xff] %v20105_v40  ;;  %v20110_v29 = vpop.f32.mrb[185].mxu0  ;;  %7004 = vmatpush1.bf16.msra.mxu1 %v16016_v55 }
 0x38b   : > { %v20115_v63 = vpop.f32.mrb[186].mxu0  ;;  %v5233_v34 = vpop.f32.mrb[184].mxu1 }
 0x38c   : > { %23503 = vst [vmem:[#allocation14_spill] sm:$0xff] %v20115_v63  ;;  %v20117_v2 = vpop.f32.mrb[187].mxu0  ;;  %v6254_v10 = vmax.f32 %v19759_v5, %v5233_v34  ;;  %v5235_v33 = vpop.f32.mrb[185].mxu1 }
 0x38d   : > { %23504 = vst [vmem:[#allocation55_spill] sm:$0xff] %v20117_v2  ;;  %v6255_v40 = vmax.f32 %v19763_v52, %v5235_v33  ;;  %v5237_v13 = vpop.f32.mrb[186].mxu1  ;;  %v23508_v33 = vld [vmem:[#allocation62_spill] sm:$0xff] }
 0x38e   : > { %v6256_v57 = vmax.f32 %v19769_v35, %v5237_v13  ;;  %v5239_v62 = vpop.f32.mrb[187].mxu1  ;;  %v20129_v2 = vmax.f32 %v6254_v10, %v23505_v47  ;;  %v16021_v13 = vld [vmem:[%s22947_s3 + $0x16c] ss:$8 sps:$4 sm:$0xff]  }
 0x38f   : > { %v6257_v5 = vmax.f32 %v19778_v45, %v5239_v62  ;;  %v20133_v52 = vmax.f32 %v6255_v40, %v23506_v32  ;;  %v23510_v10 = vld [vmem:[#allocation66_spill] sm:$0xff]  ;;  %7005 = vmatprep.subr.bf16.mxu1 %v16021_v13 }
 0x390   : > { %v20138_v63 = vmax.f32 %v6256_v57, %v23508_v33  ;;  %v16019_v40 = vld [vmem:[%s22947_s3 + $0x168] ss:$8 sps:$4 sm:$0xff]  }
 0x391   : > { %v20135_v34 = vpop.f32.mrb[188].mxu0  ;;  %v20146_v47 = vmax.f32 %v6257_v5, %v23510_v10  ;;  %7006 = vmatpush1.bf16.msra.mxu1 %v16019_v40  ;;  %v16024_v5 = vld [vmem:[%s22947_s3 + $0x17c] ss:$8 sps:$4 sm:$0xff]  }
 0x392   : > { %23507 = vst [vmem:[#allocation33_spill] sm:$0xff] %v20135_v34  ;;  %v20140_v35 = vpop.f32.mrb[189].mxu0  ;;  %7007 = vmatprep.subr.bf16.mxu1 %v16024_v5  ;;  %v23515_v40 = vld [vmem:[#allocation71_spill] sm:$0xff] }
 0x393   : > { %23509 = vst [vmem:[#allocation31_spill] sm:$0xff] %v20140_v35  ;;  %v20148_v45 = vpop.f32.mrb[190].mxu0  ;;  %v5243_v39 = vpop.f32.mrb[188].mxu1  ;;  %v16022_v35 = vld [vmem:[%s22947_s3 + $0x178] ss:$8 sps:$4 sm:$0xff]  }
 0x394   : > { %23511 = vst [vmem:[#allocation15_spill] sm:$0xff] %v20148_v45  ;;  %v20153_v62 = vpop.f32.mrb[191].mxu0  ;;  %v6258_v57 = vmax.f32 %v19797_v28, %v5243_v39  ;;  %v5245_v55 = vpop.f32.mrb[189].mxu1 }
 0x395   : > { %23512 = vst [vmem:[#allocation32_spill] sm:$0xff] %v20153_v62  ;;  %v6259_v32 = vmax.f32 %v19801_v56, %v5245_v55  ;;  %v5247_v33 = vpop.f32.mrb[190].mxu1  ;;  %v23513_v62 = vld [vmem:[#allocation68_spill] sm:$0xff]  ;;  %7008 = vmatpush1.bf16.msra.mxu1 %v16022_v35  ;;  %v23517_v55 = vld [vmem:[#allocation73_spill] sm:$0xff] }
 0x396   : > { %v6260_v10 = vmax.f32 %v19807_v42, %v5247_v33  ;;  %v5249_v45 = vpop.f32.mrb[191].mxu1  ;;  %v20165_v13 = vmax.f32 %v6258_v57, %v23513_v62  ;;  %v13399_v42 = vld [vmem:[%s22947_s3 + $0x188] sm:$0xff] }
 0x397   : > { %v6261_v28 = vmax.f32 %v19816_v27, %v5249_v45  ;;  %v20169_v56 = vmax.f32 %v6259_v32, %v23515_v40  ;;  %v13425_v62 = vcombine.high %v13399_v42, %v13399_v42  ;;  %v13424_v57 = vcombine.low %v13399_v42, %v13399_v42 }
 0x398   : > { %23514 = vst [vmem:[#allocation59_spill] sm:$0xff] %v20165_v13  ;;  %v20177_v33 = vmax.f32 %v6260_v10, %v23517_v55  ;;  %v23519_v13 = vld [vmem:[#allocation76_spill] sm:$0xff] }
 0x399   : > { %v20171_v39 = vpop.f32.mrb[192].mxu0  ;;  %v20182_v27 = vmax.f32 %v6261_v28, %v23519_v13  ;;  %13426 = vmatprep.subr.msk.bf16.mxu1 %vm6978_vm1, %v13425_v62  ;;  %v6980_v35 = vsel %vm6978_vm1, %v13424_v57, 0  ;;  %v23525_v57 = vld [vmem:[#allocation82_spill] sm:$0xff] }
 0x39a   : > { %23516 = vst [vmem:[#allocation61_spill] sm:$0xff] %v20171_v39  ;;  %v20179_v34 = vpop.f32.mrb[193].mxu0  ;;  %7010 = vmatpush1.bf16.msra.mxu1 %v6980_v35 }
 0x39b   : > { %23518 = vst [vmem:[#allocation36_spill] sm:$0xff] %v20179_v34  ;;  %23520 = vst [vmem:[#allocation34_spill] sm:$0xff] %v20182_v27  ;;  %v20184_v45 = vpop.f32.mrb[194].mxu0  ;;  %v5253_v32 = vpop.f32.mrb[192].mxu1  ;;  %v23523_v34 = vld [vmem:[#allocation78_spill] sm:$0xff] }
 0x39c   : > { %23521 = vst [vmem:[#allocation63_spill] sm:$0xff] %v20184_v45  ;;  %v20186_v5 = vpop.f32.mrb[195].mxu0  ;;  %v6262_v10 = vmax.f32 %v19835_v30, %v5253_v32  ;;  %v5255_v40 = vpop.f32.mrb[193].mxu1 }
 0x39d   : > { %23522 = vst [vmem:[#allocation35_spill] sm:$0xff] %v20186_v5  ;;  %v6263_v55 = vmax.f32 %v19839_v24, %v5255_v40  ;;  %v5257_v42 = vpop.f32.mrb[194].mxu1  ;;  %v23524_v5 = vld [vmem:[#allocation80_spill] sm:$0xff]  ;;  %v23526_v24 = vld [vmem:[#allocation85_spill] sm:$0xff] }
 0x39e   : > { %v6264_v13 = vmax.f32 %v19845_v43, %v5257_v42  ;;  %v5259_v28 = vpop.f32.mrb[195].mxu1  ;;  %v20194_v45 = vmax.f32 %v6262_v10, %v23523_v34 }
 0x39f   : > { %v6265_v39 = vmax.f32 %v19854_v0, %v5259_v28  ;;  %v20198_v27 = vmax.f32 %v6263_v55, %v23524_v5  ;;  %v23529_v28 = vld [vmem:[#allocation87_spill] sm:$0xff] }
 0x3a0   : > { %v20203_v30 = vmax.f32 %v6264_v13, %v23525_v57 }
 0x3a1   : > { %v20200_v62 = vpop.f32.mrb[196].mxu0  ;;  %v20208_v35 = vmax.f32 %v6265_v39, %v23526_v24  ;;  %v16029_v24 = vld [vmem:[%s22947_s3 + $0x4] ss:$8 sps:$4 sm:$0xff]  }
 0x3a2   : > { %v20205_v32 = vpop.f32.mrb[197].mxu0  ;;  %7270 = vmatprep.subr.bf16.mxu1 %v16029_v24 }
 0x3a3   : > { %v20210_v43 = vpop.f32.mrb[198].mxu0  ;;  %v5263_v40 = vpop.f32.mrb[196].mxu1 }
 0x3a4   : > { %23527 = vst [vmem:[#allocation37_spill] sm:$0xff] %v20210_v43  ;;  %v20212_v34 = vpop.f32.mrb[199].mxu0  ;;  %v6266_v0 = vmax.f32 %v19864_v23, %v5263_v40  ;;  %v5265_v10 = vpop.f32.mrb[197].mxu1  ;;  %v23530_v43 = vld [vmem:[#allocation90_spill] sm:$0xff] }
 0x3a5   : > { %23528 = vst [vmem:[#allocation40_spill] sm:$0xff] %v20212_v34  ;;  %v6267_v5 = vmax.f32 %v19868_v4, %v5265_v10  ;;  %v5267_v55 = vpop.f32.mrb[198].mxu1  ;;  %v23531_v4 = vld [vmem:[#allocation92_spill] sm:$0xff] }
 0x3a6   : > { %v6268_v42 = vmax.f32 %v19872_v19, %v5267_v55  ;;  %v5269_v13 = vpop.f32.mrb[199].mxu1  ;;  %v20218_v57 = vmax.f32 %v6266_v0, %v23529_v28  ;;  %v16611_v19 = vmov 0.0  }
 0x3a7   : > { %v6269_v39 = vmax.f32 %v19876_v25, %v5269_v13  ;;  %v20225_v34 = vmax.f32 %v6267_v5, %v23530_v43  ;;  %6524 = vst.msk [vmem:[#allocation2 + $0x148] sm:$0xff] %vm6483_vm2, %v16611_v19  ;;  %6523 = vst [vmem:[#allocation2 + $0x140] sm:$0xff] %v16611_v19  ;;  %v6392_v25 = vlaneseq }
 0x3a8   : > { %v20228_v23 = vmax.f32 %v6268_v42, %v19856_v59  ;;  %8889 = vst [vmem:[#allocation3 + $0x140] sm:$0xff] %v16611_v19  ;;  %v6390_v59 = vld [vmem:[%s22946_s2] sm:$0x3] }
 0x3a9   : > { %v20231_v40 = vmax.f32 %v6269_v39, %v23531_v4  ;;  %v20234_v0 = vshrl.u32 %v6392_v25, 7 }
 0x3ab   : > { %23532 = vst [vmem:[#allocation16_spill] sm:$0xff] %v20231_v40  ;;  %23533 = vst [vmem:[#allocation17_spill] sm:$0xff] %v20234_v0  ;;  %v23043_v10 = vsub.s32 0, %v20234_v0  ;;  %v23044_v43 = vsub.s32 1, %v20234_v0 }
 0x3ad   : > { %v20244_v42 = vrot.slane %v6390_v59, %v23043_v10  ;;  %v20249_v39 = vrot.slane %v6390_v59, %v23044_v43 }
 0x3fb   : > { %v5705_v5 = vpop.f32.mrb[200].mxu1 }
 0x3fc   : > { %v6310_v55 = vmax.f32 %v19960_v3, %v5705_v5  ;;  %v5707_v13 = vpop.f32.mrb[201].mxu1 }
 0x3fd   : > { %v6311_v28 = vmax.f32 %v19964_v54, %v5707_v13  ;;  %v5709_v24 = vpop.f32.mrb[202].mxu1 }
 0x3fe   : > { %v6350_v4 = vmax.f32 %v6310_v55, %v19946_v8  ;;  %v6312_v19 = vmax.f32 %v19970_v46, %v5709_v24  ;;  %v5711_v25 = vpop.f32.mrb[203].mxu1 }
 0x3ff   : > { %v6351_v40 = vmax.f32 %v6311_v28, %v19950_v53  ;;  %v6313_v3 = vmax.f32 %v19977_v1, %v5711_v25  ;;  %v23535_v25 = vld [vmem:[#allocation94_spill] sm:$0xff] }
 0x400   : > { %v6402_v5 = vadd.f32 %v20244_v42, %v6350_v4  ;;  %v6352_v10 = vmax.f32 %v6312_v19, %v19952_v38 }
 0x401   : > { %v6403_v54 = vadd.f32 %v20249_v39, %v6351_v40  ;;  %v6353_v13 = vmax.f32 %v6313_v3, %v19954_v26 }
 0x402   : > { %v6442_v59 = vmax.f32 %v6402_v5, 0.0  ;;  %v6404_v43 = vadd.f32 %v20244_v42, %v6352_v10 }
 0x403   : > { %v6443_v0 = vmax.f32 %v6403_v54, 0.0  ;;  %v6405_v8 = vadd.f32 %v20249_v39, %v6353_v13  ;;  %v5715_v46 = vpop.f32.mrb[204].mxu1 }
 0x404   : > { %6482 = vst [vmem:[#allocation2] sm:$0xff] %v6442_v59  ;;  %v20261_v55 = vmax.f32 %v6404_v43, 0.0  ;;  %v6314_v53 = vmax.f32 %v19987_v44, %v5715_v46  ;;  %v5717_v1 = vpop.f32.mrb[205].mxu1 }
 0x405   : > { %6484 = vst.msk [vmem:[#allocation2 + $0x8] sm:$0xff] %vm6483_vm2, %v6443_v0  ;;  %v6445_v38 = vmax.f32 %v6405_v8, 0.0  ;;  %v6315_v40 = vmax.f32 %v19991_v16, %v5717_v1  ;;  %v5719_v28 = vpop.f32.mrb[206].mxu1  ;;  %v23534_v0 = vld [vmem:[#allocation93_spill] sm:$0xff] }
 0x406   : > { %6485 = vst [vmem:[#allocation2 + $0x10] sm:$0xff] %v20261_v55  ;;  %v6354_v26 = vmax.f32 %v6314_v53, %v19967_v48  ;;  %v6316_v10 = vmax.f32 %v19997_v61, %v5719_v28  ;;  %v5721_v24 = vpop.f32.mrb[207].mxu1 }
 0x407   : > { %6486 = vst.msk [vmem:[#allocation2 + $0x18] sm:$0xff] %vm6483_vm2, %v6445_v38  ;;  %v6355_v43 = vmax.f32 %v6315_v40, %v19974_v50  ;;  %v6317_v44 = vmax.f32 %v20004_v60, %v5721_v24 }
 0x408   : > { %v6406_v4 = vadd.f32 %v20244_v42, %v6354_v26  ;;  %v6356_v19 = vmax.f32 %v6316_v10, %v23534_v0  ;;  %v23536_v0 = vld [vmem:[#allocation95_spill] sm:$0xff] }
 0x409   : > { %v6407_v16 = vadd.f32 %v20249_v39, %v6355_v43  ;;  %v6357_v3 = vmax.f32 %v6317_v44, %v23535_v25 }
 0x40a   : > { %v6446_v5 = vmax.f32 %v6406_v4, 0.0  ;;  %v6408_v48 = vadd.f32 %v20244_v42, %v6356_v19 }
 0x40b   : > { %v6447_v54 = vmax.f32 %v6407_v16, 0.0  ;;  %v6409_v61 = vadd.f32 %v20249_v39, %v6357_v3  ;;  %v5725_v13 = vpop.f32.mrb[208].mxu1  ;;  %v6610_v59 = vld [vmem:[#allocation2] sm:$0xfe] }
 0x40c   : > { %v6448_v8 = vmax.f32 %v6408_v48, 0.0  ;;  %v6318_v50 = vmax.f32 %v20014_v20, %v5725_v13  ;;  %v5727_v60 = vpop.f32.mrb[209].mxu1  ;;  %v6611_v10 = vld [vmem:[#allocation2 + $0x8] sm:$0xfe]  ;;  %v6614_v43 = vpack.c.bf16 %v20261_v55, %v6610_v59 }
 0x40d   : > { %6488 = vst.msk [vmem:[#allocation2 + $0x28] sm:$0xff] %vm6483_vm2, %v6447_v54  ;;  %v6449_v46 = vmax.f32 %v6409_v61, 0.0  ;;  %v6319_v53 = vmax.f32 %v20018_v17, %v5727_v60  ;;  %v5729_v1 = vpop.f32.mrb[210].mxu1  ;;  %v23537_v60 = vld [vmem:[#allocation96_spill] sm:$0xff] }
 0x40e   : > { %v6358_v38 = vmax.f32 %v6318_v50, %v19994_v31  ;;  %v6320_v40 = vmax.f32 %v20024_v7, %v5729_v1  ;;  %v5731_v28 = vpop.f32.mrb[211].mxu1  ;;  %v20283_v26 = vld [vmem:[#allocation2 + $0x18] sm:$0xff]  ;;  %v20285_v24 = vpack.c.bf16 %v6448_v8, %v6446_v5  ;;  %v6648_v3 = vshll.u32 %v6614_v43, 16 }
 0x40f   : > { %6490 = vst.msk [vmem:[#allocation2 + $0x38] sm:$0xff] %vm6483_vm2, %v6449_v46  ;;  %v6359_v20 = vmax.f32 %v6319_v53, %v20001_v18  ;;  %v6321_v44 = vmax.f32 %v20029_v14, %v5731_v28  ;;  %v6615_v17 = vpack.c.bf16 %v20283_v26, %v6611_v10 }
 0x410   : > { %v6410_v31 = vadd.f32 %v20244_v42, %v6358_v38  ;;  %v6360_v7 = vmax.f32 %v6320_v40, %v20006_v58  ;;  %v6653_v50 = vshll.u32 %v20285_v24, 16  ;;  %v6650_v28 = vrot.slane %v6648_v3, 1 }
 0x411   : > { %v6411_v4 = vadd.f32 %v20249_v39, %v6359_v20  ;;  %v6361_v19 = vmax.f32 %v6321_v44, %v23536_v0  ;;  %v6660_v54 = vshll.u32 %v6615_v17, 16  ;;  %v6658_v3 = vshrl.u32 %v6615_v17, 16 }
 0x412   : > { %v6450_v16 = vmax.f32 %v6410_v31, 0.0  ;;  %v6412_v25 = vadd.f32 %v20244_v42, %v6360_v7 }
 0x413   : > { %v6451_v5 = vmax.f32 %v6411_v4, 0.0  ;;  %v6413_v48 = vadd.f32 %v20249_v39, %v6361_v19  ;;  %v5735_v18 = vpop.f32.mrb[212].mxu1  ;;  %v6662_v31 = vrot.slane %v6660_v54, 1  ;;  %v23539_v4 = vld [vmem:[#allocation97_spill] sm:$0xff]  ;;  %v6655_v54 = vrot.slane %v6653_v50, 1 }
 0x414   : > { %v6452_v14 = vmax.f32 %v6412_v25, 0.0  ;;  %v6322_v61 = vmax.f32 %v20039_v49, %v5735_v18  ;;  %v5737_v13 = vpop.f32.mrb[213].mxu1  ;;  %v6530_v38 = vld [vmem:[#allocation2 + $0x28] sm:$0xff]  ;;  %v23540_v25 = vld [vmem:[#allocation98_spill] sm:$0xff] }
 0x415   : > { %6492 = vst.msk [vmem:[#allocation2 + $0x48] sm:$0xff] %vm6483_vm2, %v6451_v5  ;;  %v6453_v58 = vmax.f32 %v6413_v48, 0.0  ;;  %v6323_v59 = vmax.f32 %v20043_v51, %v5737_v13  ;;  %v5739_v8 = vpop.f32.mrb[214].mxu1  ;;  %v23538_v49 = vld [vmem:[#allocation29_spill] sm:$0xff] }
 0x416   : > { %v6362_v46 = vmax.f32 %v6322_v61, %v23537_v60  ;;  %v6324_v53 = vmax.f32 %v20048_v12, %v5739_v8  ;;  %v5741_v1 = vpop.f32.mrb[215].mxu1  ;;  %v6532_v40 = vld [vmem:[#allocation2 + $0x38] sm:$0xff]  ;;  %v20304_v10 = vpack.c.bf16 %v6452_v14, %v6450_v16  ;;  %v6646_v12 = vshrl.u32 %v6614_v43, 16  ;;  %v16027_v60 = vld [vmem:[%s22947_s3] ss:$8 sps:$4 sm:$0xff]  }
 0x417   : > { %6494 = vst.msk [vmem:[#allocation2 + $0x58] sm:$0xff] %vm6483_vm2, %v6453_v58  ;;  %v6363_v20 = vmax.f32 %v6323_v59, %v23538_v49  ;;  %v6325_v44 = vmax.f32 %v20053_v11, %v5741_v1  ;;  %v20309_v51 = vpack.c.bf16 %v6532_v40, %v6530_v38  ;;  %v6663_v58 = vor.u32 %v6662_v31, %v6658_v3  ;;  %v16032_v40 = vld [vmem:[%s22947_s3 + $0x14] ss:$8 sps:$4 sm:$0xff]  }
 0x418   : > { %v6414_v7 = vadd.f32 %v20244_v42, %v6362_v46  ;;  %v6364_v0 = vmax.f32 %v6324_v53, %v23539_v4  ;;  %v6651_v11 = vor.u32 %v6650_v28, %v6646_v12  ;;  %v6673_v28 = vshll.u32 %v20304_v10, 16 }
 0x419   : > { %v6415_v19 = vadd.f32 %v20249_v39, %v6363_v20  ;;  %v6365_v16 = vmax.f32 %v6325_v44, %v23540_v25  ;;  %v6665_v5 = vshll.u32 %v20309_v51, 16 }
 0x41a   : > { %v6454_v48 = vmax.f32 %v6414_v7, 0.0  ;;  %v6416_v18 = vadd.f32 %v20244_v42, %v6364_v0  ;;  %v6656_v31 = vsel %vm6644_vm3, %v6651_v11, %v6655_v54  ;;  %v23542_v0 = vld [vmem:[#allocation99_spill] sm:$0xff]  ;;  %v6669_v11 = vshrl.u32 %v20285_v24, 16 }
 0x41b   : > { %v6455_v14 = vmax.f32 %v6415_v19, 0.0  ;;  %v6417_v61 = vadd.f32 %v20249_v39, %v6365_v16  ;;  %v5745_v13 = vpop.f32.mrb[216].mxu1  ;;  %v6667_v43 = vrot.slane %v6665_v5, 1  ;;  %v23543_v16 = vld [vmem:[#allocation28_spill] sm:$0xff] }
 0x41c   : > { %v6456_v59 = vmax.f32 %v6416_v18, 0.0  ;;  %v6326_v17 = vmax.f32 %v20063_v6, %v5745_v13  ;;  %v5747_v8 = vpop.f32.mrb[217].mxu1  ;;  %v23541_v6 = vld [vmem:[#allocation27_spill] sm:$0xff]  ;;  %v6534_v7 = vld [vmem:[#allocation2 + $0x48] sm:$0xff]  ;;  %v6677_v18 = vshrl.u32 %v20309_v51, 16 }
 0x41d   : > { %6496 = vst.msk [vmem:[#allocation2 + $0x68] sm:$0xff] %vm6483_vm2, %v6455_v14  ;;  %v6457_v46 = vmax.f32 %v6417_v61, 0.0  ;;  %v6327_v53 = vmax.f32 %v20067_v22, %v5747_v8  ;;  %v5749_v1 = vpop.f32.mrb[218].mxu1  ;;  %v6668_v38 = vsel %vm6644_vm3, %v6663_v58, %v6667_v43  ;;  %v23544_v61 = vld [vmem:[#allocation30_spill] sm:$0xff]  ;;  %v6675_v58 = vrot.slane %v6673_v28, 1 }
 0x41e   : > { %v6366_v49 = vmax.f32 %v6326_v17, %v23541_v6  ;;  %v6328_v20 = vmax.f32 %v20072_v15, %v5749_v1  ;;  %v5751_v44 = vpop.f32.mrb[219].mxu1  ;;  %13427 = vmatprep.mubr.msk.bf16.mxu1 %vm6483_vm2, %v6668_v38  ;;  %v6536_v22 = vld [vmem:[#allocation2 + $0x58] sm:$0xff]  ;;  %v20337_v4 = vpack.c.bf16 %v6456_v59, %v6454_v48  ;;  %v16035_v59 = vld [vmem:[%s22947_s3 + $0x24] ss:$8 sps:$4 sm:$0xff]   ;;  %v6679_v38 = vor.u32 %v6677_v18, %v6667_v43 }
 0x41f   : > { %6498 = vst.msk [vmem:[#allocation2 + $0x78] sm:$0xff] %vm6483_vm2, %v6457_v46  ;;  %v6367_v12 = vmax.f32 %v6327_v53, %v23542_v0  ;;  %v6329_v19 = vmax.f32 %v20077_v41, %v5751_v44  ;;  %7018 = vmatmul.mubr.bf16.vlgmr.msra.gmra.mrb[240].mxu1 %v6656_v31  ;;  %v20342_v25 = vpack.c.bf16 %v6536_v22, %v6534_v7  ;;  %v16030_v48 = vld [vmem:[%s22947_s3 + $0x10] ss:$8 sps:$4 sm:$0xff]   ;;  %v16033_v44 = vld [vmem:[%s22947_s3 + $0x20] ss:$8 sps:$4 sm:$0xff]  }
 0x420   : > { %v6418_v15 = vadd.f32 %v20244_v42, %v6366_v49  ;;  %v6368_v3 = vmax.f32 %v6328_v20, %v23543_v16  ;;  %7271 = vmatpush1.bf16.msra.mxu1 %v16027_v60  ;;  %v6671_v60 = vor.u32 %v6669_v11, %v6655_v54  ;;  %v23545_v0 = vld [vmem:[#allocation50_spill] sm:$0xff] }
 0x421   : > { %v6419_v14 = vadd.f32 %v20249_v39, %v6367_v12  ;;  %v6369_v41 = vmax.f32 %v6329_v19, %v23544_v61  ;;  %v6681_v13 = vshll.u32 %v20342_v25, 16  ;;  %7272 = vmatprep.subr.bf16.mxu1 %v16032_v40 }
 0x422   : > { %v6458_v17 = vmax.f32 %v6418_v15, 0.0  ;;  %v6420_v8 = vadd.f32 %v20244_v42, %v6368_v3  ;;  %v6676_v22 = vsel %vm6644_vm3, %v6671_v60, %v6675_v58 }
 0x423   : > { %v6459_v46 = vmax.f32 %v6419_v14, 0.0  ;;  %v6421_v53 = vadd.f32 %v20249_v39, %v6369_v41  ;;  %v5755_v1 = vpop.f32.mrb[220].mxu1  ;;  %v6683_v40 = vrot.slane %v6681_v13, 1  ;;  %v23546_v14 = vld [vmem:[#allocation13_spill] sm:$0xff] }
 0x424   : > { %v6460_v6 = vmax.f32 %v6420_v8, 0.0  ;;  %v6330_v49 = vmax.f32 %v20093_v9, %v5755_v1  ;;  %v5757_v20 = vpop.f32.mrb[221].mxu1  ;;  %7273 = vmatpush1.bf16.msra.mxu1 %v16030_v48  ;;  %v16038_v9 = vld [vmem:[%s22947_s3 + $0x34] ss:$8 sps:$4 sm:$0xff]   ;;  %v6538_v16 = vld [vmem:[#allocation2 + $0x68] sm:$0xff]  ;;  %v23547_v8 = vld [vmem:[#allocation12_spill] sm:$0xff] }
 0x425   : > { %6500 = vst.msk [vmem:[#allocation2 + $0x88] sm:$0xff] %vm6483_vm2, %v6459_v46  ;;  %v6461_v54 = vmax.f32 %v6421_v53, 0.0  ;;  %v6331_v31 = vmax.f32 %v20103_v37, %v5757_v20  ;;  %v5759_v7 = vpop.f32.mrb[222].mxu1  ;;  %v6684_v43 = vsel %vm6644_vm3, %v6679_v38, %v6683_v40  ;;  %7274 = vmatprep.subr.bf16.mxu1 %v16035_v59  ;;  %v6689_v37 = vshll.u32 %v20337_v4, 16  ;;  %v16036_v46 = vld [vmem:[%s22947_s3 + $0x30] ss:$8 sps:$4 sm:$0xff]  }
 0x426   : > { %v6370_v12 = vmax.f32 %v6330_v49, %v23545_v0  ;;  %v6332_v19 = vmax.f32 %v20108_v21, %v5759_v7  ;;  %v5761_v15 = vpop.f32.mrb[223].mxu1  ;;  %13428 = vmatprep.mubr.msk.bf16.mxu1 %vm6483_vm2, %v6684_v43  ;;  %v6540_v3 = vld [vmem:[#allocation2 + $0x78] sm:$0xff]  ;;  %v20382_v48 = vpack.c.bf16 %v6460_v6, %v6458_v17  ;;  %v23548_v53 = vld [vmem:[#allocation53_spill] sm:$0xff]  ;;  %v6693_v38 = vshrl.u32 %v20342_v25, 16 }
 0x427   : > { %6502 = vst.msk [vmem:[#allocation2 + $0x98] sm:$0xff] %vm6483_vm2, %v6461_v54  ;;  %v6371_v61 = vmax.f32 %v6331_v31, %v23546_v14  ;;  %v6333_v41 = vmax.f32 %v20113_v36, %v5761_v15  ;;  %7028 = vmatmul.mubr.bf16.gmra.mrb[244].mxu1 %v6676_v22  ;;  %v20387_v59 = vpack.c.bf16 %v6540_v3, %v6538_v16  ;;  %v16041_v6 = vld [vmem:[%s22947_s3 + $0x44] ss:$8 sps:$4 sm:$0xff]   ;;  %v6691_v54 = vrot.slane %v6689_v37, 1  ;;  %v16039_v16 = vld [vmem:[%s22947_s3 + $0x40] ss:$8 sps:$4 sm:$0xff]  }
 0x428   : > { %v6422_v21 = vadd.f32 %v20244_v42, %v6370_v12  ;;  %v6372_v60 = vmax.f32 %v6332_v19, %v23547_v8  ;;  %7275 = vmatpush1.bf16.msra.mxu1 %v16033_v44  ;;  %v6685_v44 = vshrl.u32 %v20304_v10, 16  ;;  %v6695_v22 = vor.u32 %v6693_v38, %v6683_v40 }
 0x429   : > { %v6423_v17 = vadd.f32 %v20249_v39, %v6371_v61  ;;  %v6373_v1 = vmax.f32 %v6333_v41, %v23548_v53  ;;  %v6697_v36 = vshll.u32 %v20387_v59, 16  ;;  %7276 = vmatprep.subr.bf16.mxu1 %v16038_v9  ;;  %v6705_v41 = vshll.u32 %v20382_v48, 16 }
 0x42a   : > { %v6462_v49 = vmax.f32 %v6422_v21, 0.0  ;;  %v6424_v20 = vadd.f32 %v20244_v42, %v6372_v60  ;;  %v6687_v15 = vor.u32 %v6685_v44, %v6675_v58  ;;  %v23549_v58 = vld [vmem:[#allocation11_spill] sm:$0xff] }
 0x42b   : > { %v6463_v31 = vmax.f32 %v6423_v17, 0.0  ;;  %v6425_v7 = vadd.f32 %v20249_v39, %v6373_v1  ;;  %v5765_v43 = vpop.f32.mrb[224].mxu1  ;;  %v6699_v9 = vrot.slane %v6697_v36, 1 }
 0x42c   : > { %v6464_v0 = vmax.f32 %v6424_v20, 0.0  ;;  %v6334_v12 = vmax.f32 %v20129_v2, %v5765_v43  ;;  %v5767_v19 = vpop.f32.mrb[225].mxu1  ;;  %7277 = vmatpush1.bf16.msra.mxu1 %v16036_v46  ;;  %v16044_v2 = vld [vmem:[%s22947_s3 + $0x54] ss:$8 sps:$4 sm:$0xff]   ;;  %v6692_v46 = vsel %vm6644_vm3, %v6687_v15, %v6691_v54  ;;  %v6709_v43 = vshrl.u32 %v20387_v59, 16 }
 0x42d   : > { %6504 = vst.msk [vmem:[#allocation2 + $0xa8] sm:$0xff] %vm6483_vm2, %v6463_v31  ;;  %v6465_v3 = vmax.f32 %v6425_v7, 0.0  ;;  %v6335_v40 = vmax.f32 %v20133_v52, %v5767_v19  ;;  %v5769_v14 = vpop.f32.mrb[226].mxu1  ;;  %v6700_v61 = vsel %vm6644_vm3, %v6695_v22, %v6699_v9  ;;  %7278 = vmatprep.subr.bf16.mxu1 %v16041_v6  ;;  %v6542_v52 = vld [vmem:[#allocation2 + $0x88] sm:$0xff]  ;;  %v23550_v31 = vld [vmem:[#allocation14_spill] sm:$0xff]  ;;  %v6701_v22 = vshrl.u32 %v20337_v4, 16 }
 0x42e   : > { %v6374_v21 = vmax.f32 %v6334_v12, %v23549_v58  ;;  %v6336_v8 = vmax.f32 %v20138_v63, %v5769_v14  ;;  %v5771_v60 = vpop.f32.mrb[227].mxu1  ;;  %13429 = vmatprep.mubr.msk.bf16.mxu1 %vm6483_vm2, %v6700_v61  ;;  %v6544_v17 = vld [vmem:[#allocation2 + $0x98] sm:$0xff]  ;;  %v20427_v53 = vpack.c.bf16 %v6464_v0, %v6462_v49  ;;  %v6707_v19 = vrot.slane %v6705_v41, 1  ;;  %v16047_v15 = vld [vmem:[%s22947_s3 + $0x64] ss:$8 sps:$4 sm:$0xff]  }
 0x42f   : > { %6506 = vst.msk [vmem:[#allocation2 + $0xb8] sm:$0xff] %vm6483_vm2, %v6465_v3  ;;  %v6375_v1 = vmax.f32 %v6335_v40, %v20110_v29  ;;  %v6337_v6 = vmax.f32 %v20146_v47, %v5771_v60  ;;  %7038 = vmatmul.mubr.bf16.gmra.mrb[248].mxu1 %v6692_v46  ;;  %v20432_v20 = vpack.c.bf16 %v6544_v17, %v6542_v52  ;;  %v16042_v49 = vld [vmem:[%s22947_s3 + $0x50] ss:$8 sps:$4 sm:$0xff]   ;;  %v16045_v17 = vld [vmem:[%s22947_s3 + $0x60] ss:$8 sps:$4 sm:$0xff]  }
 0x430   : > { %v6426_v63 = vadd.f32 %v20244_v42, %v6374_v21  ;;  %v6376_v7 = vmax.f32 %v6336_v8, %v23550_v31  ;;  %7279 = vmatpush1.bf16.msra.mxu1 %v16039_v16  ;;  %v23551_v0 = vld [vmem:[#allocation55_spill] sm:$0xff]  ;;  %v6703_v40 = vor.u32 %v6701_v22, %v6691_v54  ;;  %v6711_v21 = vor.u32 %v6709_v43, %v6699_v9 }
 0x431   : > { %v6427_v29 = vadd.f32 %v20249_v39, %v6375_v1  ;;  %v6377_v47 = vmax.f32 %v6337_v6, %v23551_v0  ;;  %v6713_v12 = vshll.u32 %v20432_v20, 16  ;;  %7280 = vmatprep.subr.bf16.mxu1 %v16044_v2  ;;  %v23552_v60 = vld [vmem:[#allocation59_spill] sm:$0xff] }
 0x432   : > { %v6466_v3 = vmax.f32 %v6426_v63, 0.0  ;;  %v6428_v16 = vadd.f32 %v20244_v42, %v6376_v7  ;;  %v6708_v63 = vsel %vm6644_vm3, %v6703_v40, %v6707_v19  ;;  %v16050_v31 = vld [vmem:[%s22947_s3 + $0x74] ss:$8 sps:$4 sm:$0xff]   ;;  %v23553_v7 = vld [vmem:[#allocation33_spill] sm:$0xff] }
 0x433   : > { %v6467_v14 = vmax.f32 %v6427_v29, 0.0  ;;  %v6429_v61 = vadd.f32 %v20249_v39, %v6377_v47  ;;  %v5775_v58 = vpop.f32.mrb[228].mxu1  ;;  %v6715_v2 = vrot.slane %v6713_v12, 1 }
 0x434   : > { %v6468_v8 = vmax.f32 %v6428_v16, 0.0  ;;  %v6338_v46 = vmax.f32 %v23552_v60, %v5775_v58  ;;  %v5777_v52 = vpop.f32.mrb[229].mxu1  ;;  %7281 = vmatpush1.bf16.msra.mxu1 %v16042_v49  ;;  %v6546_v47 = vld [vmem:[#allocation2 + $0xa8] sm:$0xff]  ;;  %v23556_v60 = vld [vmem:[#allocation15_spill] sm:$0xff] }
 0x435   : > { %6508 = vst.msk [vmem:[#allocation2 + $0xc8] sm:$0xff] %vm6483_vm2, %v6467_v14  ;;  %v6469_v54 = vmax.f32 %v6429_v61, 0.0  ;;  %v6339_v1 = vmax.f32 %v20169_v56, %v5777_v52  ;;  %v5779_v6 = vpop.f32.mrb[230].mxu1  ;;  %v6716_v9 = vsel %vm6644_vm3, %v6711_v21, %v6715_v2  ;;  %7282 = vmatprep.subr.bf16.mxu1 %v16047_v15  ;;  %v6721_v56 = vshll.u32 %v20427_v53, 16  ;;  %v23554_v15 = vld [vmem:[#allocation31_spill] sm:$0xff]  ;;  %v23555_v61 = vld [vmem:[#allocation34_spill] sm:$0xff] }
 0x436   : > { %v6378_v49 = vmax.f32 %v6338_v46, %v23553_v7  ;;  %v6340_v29 = vmax.f32 %v20177_v33, %v5779_v6  ;;  %v5781_v0 = vpop.f32.mrb[231].mxu1  ;;  %13430 = vmatprep.mubr.msk.bf16.mxu1 %vm6483_vm2, %v6716_v9  ;;  %v6548_v16 = vld [vmem:[#allocation2 + $0xb8] sm:$0xff]  ;;  %v20472_v14 = vpack.c.bf16 %v6468_v8, %v6466_v3  ;;  %v23557_v8 = vld [vmem:[#allocation32_spill] sm:$0xff]  ;;  %v6717_v7 = vshrl.u32 %v20382_v48, 16 }
 0x437   : > { %6510 = vst.msk [vmem:[#allocation2 + $0xd8] sm:$0xff] %vm6483_vm2, %v6469_v54  ;;  %v6379_v40 = vmax.f32 %v6339_v1, %v23554_v15  ;;  %v6341_v58 = vmax.f32 %v23555_v61, %v5781_v0  ;;  %7048 = vmatmul.mubr.bf16.gmra.mrb[252].mxu1 %v6708_v63  ;;  %v20477_v21 = vpack.c.bf16 %v6548_v16, %v6546_v47  ;;  %v16048_v52 = vld [vmem:[%s22947_s3 + $0x70] ss:$8 sps:$4 sm:$0xff]   ;;  %v6725_v1 = vshrl.u32 %v20432_v20, 16  ;;  %v16053_v9 = vld [vmem:[%s22947_s3 + $0x84] ss:$8 sps:$4 sm:$0xff]  }
 0x438   : > { %v6430_v33 = vadd.f32 %v20244_v42, %v6378_v49  ;;  %v6380_v46 = vmax.f32 %v6340_v29, %v23556_v60  ;;  %7283 = vmatpush1.bf16.msra.mxu1 %v16045_v17  ;;  %v6723_v49 = vrot.slane %v6721_v56, 1 }
 0x439   : > { %v6431_v3 = vadd.f32 %v20249_v39, %v6379_v40  ;;  %v6381_v54 = vmax.f32 %v6341_v58, %v23557_v8  ;;  %v23047_v6 = vshll.u32 %v20477_v21, 16  ;;  %7284 = vmatprep.subr.bf16.mxu1 %v16050_v31  ;;  %v6727_v16 = vor.u32 %v6725_v1, %v6715_v2 }
 0x43a   : > { %v6470_v63 = vmax.f32 %v6430_v33, 0.0  ;;  %v6432_v17 = vadd.f32 %v20244_v42, %v6380_v46  ;;  %v6719_v40 = vor.u32 %v6717_v7, %v6707_v19  ;;  %v16051_v33 = vld [vmem:[%s22947_s3 + $0x80] ss:$8 sps:$4 sm:$0xff]   ;;  %v23048_v8 = vshll.u32 %v20472_v14, 16 }
 0x43b   : > { %v6471_v29 = vmax.f32 %v6431_v3, 0.0  ;;  %v6433_v0 = vadd.f32 %v20249_v39, %v6381_v54  ;;  %v5785_v47 = vpop.f32.mrb[232].mxu1  ;;  %v6731_v31 = vrot.slane %v23047_v6, 1  ;;  %v23558_v19 = vld [vmem:[#allocation61_spill] sm:$0xff] }
 0x43c   : > { %v6472_v15 = vmax.f32 %v6432_v17, 0.0  ;;  %v6342_v61 = vmax.f32 %v20194_v45, %v5785_v47  ;;  %v5787_v58 = vpop.f32.mrb[233].mxu1  ;;  %7285 = vmatpush1.bf16.msra.mxu1 %v16048_v52  ;;  %v16056_v45 = vld [vmem:[%s22947_s3 + $0x94] ss:$8 sps:$4 sm:$0xff]  }
 0x43d   : > { %6512 = vst.msk [vmem:[#allocation2 + $0xe8] sm:$0xff] %vm6483_vm2, %v6471_v29  ;;  %v6473_v60 = vmax.f32 %v6433_v0, 0.0  ;;  %v6343_v2 = vmax.f32 %v20198_v27, %v5787_v58  ;;  %v5789_v46 = vpop.f32.mrb[234].mxu1  ;;  %v6732_v3 = vsel %vm6644_vm3, %v6727_v16, %v6731_v31  ;;  %7286 = vmatprep.subr.bf16.mxu1 %v16053_v9  ;;  %v6724_v29 = vsel %vm6644_vm3, %v6719_v40, %v6723_v49  ;;  %v6550_v27 = vld [vmem:[#allocation2 + $0xc8] sm:$0xff]  ;;  %v23559_v9 = vld [vmem:[#allocation36_spill] sm:$0xff] }
 0x43e   : > { %v6382_v52 = vmax.f32 %v6342_v61, %v23558_v19  ;;  %v6344_v54 = vmax.f32 %v20203_v30, %v5789_v46  ;;  %v5791_v17 = vpop.f32.mrb[235].mxu1  ;;  %13431 = vmatprep.mubr.msk.bf16.mxu1 %vm6483_vm2, %v6732_v3  ;;  %v6552_v0 = vld [vmem:[#allocation2 + $0xd8] sm:$0xff]  ;;  %v20517_v47 = vpack.c.bf16 %v6472_v15, %v6470_v63  ;;  %v6741_v3 = vshrl.u32 %v20477_v21, 16 }
 0x43f   : > { %6514 = vst.msk [vmem:[#allocation2 + $0xf8] sm:$0xff] %vm6483_vm2, %v6473_v60  ;;  %v6383_v16 = vmax.f32 %v6343_v2, %v23559_v9  ;;  %v6345_v58 = vmax.f32 %v20208_v35, %v5791_v17  ;;  %7058 = vmatmul.mubr.bf16.gmra.mrb[0].mxu1 %v6724_v29  ;;  %v20522_v6 = vpack.c.bf16 %v6552_v0, %v6550_v27  ;;  %v23560_v61 = vld [vmem:[#allocation63_spill] sm:$0xff]  ;;  %v6733_v40 = vshrl.u32 %v20427_v53, 16 }
 0x440   : > { %v6434_v30 = vadd.f32 %v20244_v42, %v6382_v52  ;;  %v6384_v46 = vmax.f32 %v6344_v54, %v23560_v61  ;;  %7287 = vmatpush1.bf16.msra.mxu1 %v16051_v33  ;;  %v16054_v63 = vld [vmem:[%s22947_s3 + $0x90] ss:$8 sps:$4 sm:$0xff]   ;;  %v6739_v19 = vrot.slane %v23048_v8, 1  ;;  %v16059_v52 = vld [vmem:[%s22947_s3 + $0xa4] ss:$8 sps:$4 sm:$0xff]   ;;  %v6743_v9 = vor.u32 %v6741_v3, %v6731_v31 }
 0x441   : > { %v6435_v15 = vadd.f32 %v20249_v39, %v6383_v16  ;;  %v23561_v60 = vld [vmem:[#allocation35_spill] sm:$0xff]  ;;  %v6745_v2 = vshll.u32 %v20522_v6, 16  ;;  %7288 = vmatprep.subr.bf16.mxu1 %v16056_v45  ;;  %v6735_v17 = vor.u32 %v6733_v40, %v6723_v49 }
 0x442   : > { %v6385_v35 = vmax.f32 %v6345_v58, %v23561_v60  ;;  %v6474_v54 = vmax.f32 %v6434_v30, 0.0  ;;  %v6436_v33 = vadd.f32 %v20244_v42, %v6384_v46  ;;  %v16057_v30 = vld [vmem:[%s22947_s3 + $0xa0] ss:$8 sps:$4 sm:$0xff]  }
 0x443   : > { %v6475_v29 = vmax.f32 %v6435_v15, 0.0  ;;  %v5795_v0 = vpop.f32.mrb[236].mxu1  ;;  %v6747_v45 = vrot.slane %v6745_v2, 1  ;;  %v6740_v60 = vsel %vm6644_vm3, %v6735_v17, %v6739_v19  ;;  %v6753_v17 = vshll.u32 %v20517_v47, 16 }
 0x444   : > { %v6437_v27 = vadd.f32 %v20249_v39, %v6385_v35  ;;  %v6476_v16 = vmax.f32 %v6436_v33, 0.0  ;;  %v6346_v58 = vmax.f32 %v20218_v57, %v5795_v0  ;;  %v5797_v61 = vpop.f32.mrb[237].mxu1  ;;  %7289 = vmatpush1.bf16.msra.mxu1 %v16054_v63  ;;  %v16062_v57 = vld [vmem:[%s22947_s3 + $0xb4] ss:$8 sps:$4 sm:$0xff]   ;;  %v6609_v63 = vld [vmem:[%s22947_s3 + $0xc0] sm:$0xff] }
 0x445   : > { %6516 = vst.msk [vmem:[#allocation2 + $0x108] sm:$0xff] %vm6483_vm2, %v6475_v29  ;;  %v6347_v46 = vmax.f32 %v20225_v34, %v5797_v61  ;;  %v5799_v15 = vpop.f32.mrb[238].mxu1  ;;  %v6748_v31 = vsel %vm6644_vm3, %v6743_v9, %v6747_v45  ;;  %7290 = vmatprep.subr.bf16.mxu1 %v16059_v52  ;;  %v6554_v34 = vld [vmem:[#allocation2 + $0xe8] sm:$0xff]  ;;  %v23562_v9 = vld [vmem:[#allocation16_spill] sm:$0xff] }
 0x446   : > { %v6477_v49 = vmax.f32 %v6437_v27, 0.0  ;;  %v6386_v35 = vmax.f32 %v6346_v58, %v20200_v62  ;;  %v6348_v33 = vmax.f32 %v20228_v23, %v5799_v15  ;;  %v5801_v29 = vpop.f32.mrb[239].mxu1  ;;  %13432 = vmatprep.mubr.msk.bf16.mxu1 %vm6483_vm2, %v6748_v31  ;;  %v6556_v27 = vld [vmem:[#allocation2 + $0xf8] sm:$0xff]  ;;  %v20565_v52 = vpack.c.bf16 %v6476_v16, %v6474_v54  ;;  %v23563_v23 = vld [vmem:[#allocation37_spill] sm:$0xff]  ;;  %v23564_v31 = vld [vmem:[#allocation40_spill] sm:$0xff] }
 0x447   : > { %v6387_v0 = vmax.f32 %v6347_v46, %v20205_v32  ;;  %v6349_v61 = vmax.f32 %v23562_v9, %v5801_v29  ;;  %7068 = vmatmul.mubr.bf16.gmra.mrb[4].mxu1 %v6740_v60  ;;  %v20570_v8 = vpack.c.bf16 %v6556_v27, %v6554_v34  ;;  %v16060_v15 = vld [vmem:[%s22947_s3 + $0xb0] ss:$8 sps:$4 sm:$0xff]   ;;  %v13462_v54 = vcombine.high %v6609_v63, %v6609_v63 }
 0x448   : > { %6518 = vst.msk [vmem:[#allocation2 + $0x118] sm:$0xff] %vm6483_vm2, %v6477_v49  ;;  %v6438_v62 = vadd.f32 %v20244_v42, %v6386_v35  ;;  %v6388_v58 = vmax.f32 %v6348_v33, %v23563_v23  ;;  %7291 = vmatpush1.bf16.msra.mxu1 %v16057_v30  ;;  %v13461_v16 = vcombine.low %v6609_v63, %v6609_v63  ;;  %v6757_v46 = vshrl.u32 %v20522_v6, 16 }
 0x449   : > { %v6439_v49 = vadd.f32 %v20249_v39, %v6387_v0  ;;  %v6389_v32 = vmax.f32 %v6349_v61, %v23564_v31  ;;  %v6761_v60 = vshll.u32 %v20570_v8, 16  ;;  %7292 = vmatprep.subr.bf16.mxu1 %v16062_v57  ;;  %v6749_v30 = vshrl.u32 %v20472_v14, 16  ;;  %v6613_v31 = vld [vmem:[#allocation2 + $0x148] sm:$0x1] }
 0x44a   : > { %v6478_v29 = vmax.f32 %v6438_v62, 0.0  ;;  %v6440_v35 = vadd.f32 %v20244_v42, %v6388_v58  ;;  %v6755_v33 = vrot.slane %v6753_v17, 1  ;;  %v6759_v27 = vor.u32 %v6757_v46, %v6747_v45  ;;  %v6612_v42 = vld [vmem:[#allocation2 + $0x140] sm:$0x1]  ;;  %v16067_v45 = vld [vmem:[%s22947_s3 + $0x194] ss:$8 sps:$4 sm:$0xff]  }
 0x44b   : > { %v6479_v34 = vmax.f32 %v6439_v49, 0.0  ;;  %v6441_v63 = vadd.f32 %v20249_v39, %v6389_v32  ;;  %v6763_v0 = vrot.slane %v6761_v60, 1  ;;  %v6751_v57 = vor.u32 %v6749_v30, %v6739_v19 }
 0x44c   : > { %v6480_v9 = vmax.f32 %v6440_v35, 0.0  ;;  %7293 = vmatpush1.bf16.msra.mxu1 %v16060_v15  ;;  %v7265_v39 = vsel %vm6978_vm1, %v13461_v16, 0  ;;  %v6558_v19 = vld [vmem:[#allocation2 + $0x108] sm:$0xff]  ;;  %v23050_v15 = vshll.u32 %v20565_v52, 16  ;;  %v6616_v16 = vpack.c.bf16 %v6612_v42, %v6612_v42 }
 0x44d   : > { %6520 = vst.msk [vmem:[#allocation2 + $0x128] sm:$0xff] %vm6483_vm2, %v6479_v34  ;;  %v6481_v61 = vmax.f32 %v6441_v63, 0.0  ;;  %v6764_v62 = vsel %vm6644_vm3, %v6759_v27, %v6763_v0  ;;  %13463 = vmatprep.subr.msk.bf16.mxu1 %vm6978_vm1, %v13462_v54  ;;  %v6756_v23 = vsel %vm6644_vm3, %v6751_v57, %v6755_v33  ;;  %v6773_v32 = vshrl.u32 %v20570_v8, 16 }
 0x44e   : > { %13433 = vmatprep.mubr.msk.bf16.mxu1 %vm6483_vm2, %v6764_v62  ;;  %v20602_v49 = vpack.c.bf16 %v6480_v9, %v6478_v29  ;;  %v6617_v34 = vpack.c.bf16 %v6613_v31, %v6613_v31  ;;  %v6765_v63 = vshrl.u32 %v20517_v47, 16  ;;  %v6771_v29 = vrot.slane %v23050_v15, 1 }
 0x44f   : > { %v6560_v58 = vld [vmem:[#allocation2 + $0x118] sm:$0xff]  ;;  %6522 = vst.msk [vmem:[#allocation2 + $0x138] sm:$0xff] %vm6483_vm2, %v6481_v61  ;;  %7078 = vmatmul.mubr.bf16.gmra.mrb[8].mxu1 %v6756_v23  ;;  %v7901_v27 = vrot.slane %v6677_v18, 1  ;;  %v6775_v9 = vor.u32 %v6773_v32, %v6763_v0  ;;  %v6801_v42 = vshll.u32 %v6616_v16, 16  ;;  %v7902_v61 = vrot.slane %v6665_v5, 2 }
 0x450   : > { %v20605_v54 = vpack.c.bf16 %v6560_v58, %v6558_v19  ;;  %7295 = vmatpush1.bf16.msra.mxu1 %v7265_v39  ;;  %v6767_v62 = vor.u32 %v6765_v63, %v6755_v33  ;;  %v23049_v39 = vshll.u32 %v20602_v49, 16  ;;  %v6809_v23 = vshll.u32 %v6617_v34, 16 }
 0x451   : > { %7673 = vmatprep.subr.bf16.mxu1 %v16067_v45  ;;  %v20626_v58 = vor.u32 %v7902_v61, %v7901_v27  ;;  %v6803_v5 = vrot.slane %v6801_v42, 1  ;;  %v7909_v33 = vrot.slane %v6693_v38, 1  ;;  %v7910_v16 = vrot.slane %v6681_v13, 2  ;;  %v20639_v27 = vld [vmem:[#allocation2 + $0x8] sm:$0xff] }
 0x452   : > { %v6777_v35 = vshll.u32 %v20605_v54, 16  ;;  %v6772_v18 = vsel %vm6644_vm3, %v6767_v62, %v6771_v29  ;;  %v7889_v34 = vrot.slane %v6669_v11, 1  ;;  %v6787_v62 = vrot.slane %v23049_v39, 1 }
 0x453   : > { %v7890_v61 = vrot.slane %v6653_v50, 2  ;;  %v6789_v42 = vshrl.u32 %v20605_v54, 16  ;;  %v6566_v13 = vpack.c.bf16 %v20283_v26, %v20639_v27 }
 0x454   : > { %v6779_v57 = vrot.slane %v6777_v35, 1  ;;  %v6562_v0 = vld [vmem:[#allocation2 + $0x128] sm:$0xff] }
 0x455   : > { %v20659_v27 = vor.u32 %v7890_v61, %v7889_v34  ;;  %v7913_v34 = vrot.slane %v6701_v22, 1  ;;  %v7914_v61 = vrot.slane %v6689_v37, 2  ;;  %v7921_v37 = vrot.slane %v6717_v7, 1 }
 0x456   : > { %v6780_v45 = vsel %vm6644_vm3, %v6775_v9, %v6779_v57  ;;  %v6564_v19 = vld [vmem:[#allocation2 + $0x138] sm:$0xff]  ;;  %v6781_v9 = vshrl.u32 %v20565_v52, 16  ;;  %v6791_v39 = vor.u32 %v6789_v42, %v6779_v57  ;;  %v7933_v7 = vrot.slane %v6741_v3, 1 }
 0x457   : > { %13434 = vmatprep.mubr.msk.bf16.mxu1 %vm6483_vm2, %v6780_v45  ;;  %v20628_v31 = vpack.c.bf16 %v6564_v19, %v6562_v0  ;;  %v6811_v45 = vrot.slane %v6809_v23, 1  ;;  %v7911_v0 = vor.u32 %v7910_v16, %v7909_v33  ;;  %v7905_v19 = vrot.slane %v6685_v44, 1 }
 0x458   : > { %7088 = vmatmul.mubr.bf16.gmra.mrb[12].mxu1 %v6772_v18  ;;  %v6783_v11 = vor.u32 %v6781_v9, %v6771_v29  ;;  %v6797_v18 = vshrl.u32 %v20602_v49, 16  ;;  %v7906_v23 = vrot.slane %v6673_v28, 2  ;;  %v7917_v44 = vrot.slane %v6709_v43, 1 }
 0x459   : > { %v23051_v38 = vshll.u32 %v20628_v31, 16  ;;  %v6805_v15 = vshrl.u32 %v20628_v31, 16  ;;  %v20663_v29 = vsel %vm7880_vm4, %v20626_v58, %v7911_v0  ;;  %v7925_v43 = vrot.slane %v6725_v1, 1 }
 0x45a   : > { %v6799_v26 = vor.u32 %v6797_v18, %v6787_v62  ;;  %v7907_v16 = vor.u32 %v7906_v23, %v7905_v19  ;;  %v6788_v28 = vsel %vm6644_vm3, %v6783_v11, %v6787_v62  ;;  %v7926_v62 = vrot.slane %v6713_v12, 2 }
 0x45b   : > { %v6795_v50 = vrot.slane %v23051_v38, 1  ;;  %v7918_v38 = vrot.slane %v6697_v36, 2  ;;  %v7915_v11 = vor.u32 %v7914_v61, %v7913_v34  ;;  %v7922_v1 = vrot.slane %v6705_v41, 2 }
 0x45c   : > { %v20681_v19 = vsel %vm7880_vm4, %v20659_v27, %v7907_v16  ;;  %v6804_v22 = vsel %vm6644_vm3, %v6799_v26, %v6803_v5  ;;  %v7930_v12 = vrot.slane %v6721_v56, 2  ;;  %v23565_v26 = vshll.u32 %v20477_v21, 16 }
 0x45d   : > { %v6796_v57 = vsel %vm6644_vm3, %v6791_v39, %v6795_v50  ;;  %v6807_v33 = vor.u32 %v6805_v15, %v6795_v50  ;;  %v7919_v36 = vor.u32 %v7918_v38, %v7917_v44  ;;  %v7927_v50 = vor.u32 %v7926_v62, %v7925_v43 }
 0x45e   : > { %13435 = vmatprep.mubr.msk.bf16.mxu1 %vm6483_vm2, %v6796_v57  ;;  %v7929_v38 = vrot.slane %v6733_v40, 1  ;;  %v20699_v23 = vsel %vm7880_vm4, %v7907_v16, %v7915_v11  ;;  %v7923_v5 = vor.u32 %v7922_v1, %v7921_v37  ;;  %v7934_v41 = vrot.slane %v23565_v26, 2 }
 0x45f   : > { %v6812_v39 = vsel %vm6644_vm3, %v6807_v33, %v6811_v45  ;;  %v20692_v45 = vsel %vm7880_vm4, %v7911_v0, %v7919_v36  ;;  %v20706_v0 = vsel %vm7880_vm4, %v7919_v36, %v7927_v50  ;;  %v7941_v40 = vrot.slane %v6757_v46, 1 }
 0x460   : > { %7098 = vmatmul.mubr.bf16.gmra.mrb[16].mxu1 %v6788_v28  ;;  %v7931_v44 = vor.u32 %v7930_v12, %v7929_v38  ;;  %v7942_v56 = vrot.slane %v6745_v2, 2  ;;  %v20713_v57 = vsel %vm7880_vm4, %v7915_v11, %v7923_v5  ;;  %v7935_v33 = vor.u32 %v7934_v41, %v7933_v7 }
 0x461   : > { %13436 = vmatprep.mubr.msk.bf16.mxu1 %vm6483_vm2, %v6812_v39  ;;  %v7937_v3 = vrot.slane %v6749_v30, 1  ;;  %v23566_v16 = vshll.u32 %v20472_v14, 16  ;;  %v7949_v46 = vrot.slane %v6773_v32, 1  ;;  %v7950_v2 = vrot.slane %v6761_v60, 2 }
 0x462   : > { %v20720_v34 = vsel %vm7880_vm4, %v7923_v5, %v7931_v44  ;;  %v7943_v61 = vor.u32 %v7942_v56, %v7941_v40  ;;  %v20727_v43 = vsel %vm7880_vm4, %v7927_v50, %v7935_v33  ;;  %v7945_v30 = vrot.slane %v6765_v63, 1  ;;  %v6525_v5 = vld [vmem:[#allocation2] sm:$0xff] }
 0x463   : > { %v7938_v28 = vrot.slane %v23566_v16, 2  ;;  %v7946_v36 = vrot.slane %v6753_v17, 2  ;;  %v7951_v11 = vor.u32 %v7950_v2, %v7949_v46  ;;  %v7957_v37 = vrot.slane %v6789_v42, 1  ;;  %v16071_v46 = vld [vmem:[%s22947_s3 + $0x1b0] ss:$8 sps:$4 sm:$0xff]  }
 0x464   : > { %v20734_v62 = vsel %vm7880_vm4, %v7935_v33, %v7943_v61  ;;  %v7958_v32 = vrot.slane %v6777_v35, 2  ;;  %v7953_v63 = vrot.slane %v6781_v9, 1  ;;  %v23567_v17 = vshll.u32 %v20565_v52, 16  ;;  %v16076_v2 = vld [vmem:[%s22947_s3 + $0x1c4] ss:$8 sps:$4 sm:$0xff]  }
 0x465   : > { %v7939_v39 = vor.u32 %v7938_v28, %v7937_v3  ;;  %v7947_v1 = vor.u32 %v7946_v36, %v7945_v30  ;;  %v20747_v50 = vsel %vm7880_vm4, %v7943_v61, %v7951_v11  ;;  %v7965_v42 = vrot.slane %v6805_v15, 1  ;;  %v16065_v15 = vld [vmem:[%s22947_s3 + $0x190] ss:$8 sps:$4 sm:$0xff]   ;;  %v16073_v61 = vld [vmem:[%s22947_s3 + $0x1b4] ss:$8 sps:$4 sm:$0xff]  }
 0x466   : > { %v7959_v38 = vor.u32 %v7958_v32, %v7957_v37  ;;  %v23568_v12 = vshll.u32 %v20628_v31, 16  ;;  %v7961_v26 = vrot.slane %v6797_v18, 1  ;;  %v23569_v9 = vshll.u32 %v20602_v49, 16  ;;  %v16070_v18 = vld [vmem:[%s22947_s3 + $0x1a4] ss:$8 sps:$4 sm:$0xff]  }
 0x467   : > { %v20740_v60 = vsel %vm7880_vm4, %v7931_v44, %v7939_v39  ;;  %v6565_v3 = vpack.c.bf16 %v20261_v55, %v6525_v5  ;;  %v16068_v55 = vld [vmem:[%s22947_s3 + $0x1a0] ss:$8 sps:$4 sm:$0xff]   ;;  %v16079_v30 = vld [vmem:[%s22947_s3 + $0x1d4] ss:$8 sps:$4 sm:$0xff]   ;;  %v16077_v36 = vld [vmem:[%s22947_s3 + $0x1d0] ss:$8 sps:$4 sm:$0xff]  }
 0x468   : > { %7108 = vmatmul.mubr.bf16.gmra.mrb[20].mxu1 %v6804_v22  ;;  %v7954_v22 = vrot.slane %v23567_v17, 2  ;;  %v7966_v35 = vrot.slane %v23568_v12, 2  ;;  %v7962_v41 = vrot.slane %v23569_v9, 2  ;;  %v20759_v44 = vsel %vm7880_vm4, %v7951_v11, %v7959_v38  ;;  %v16082_v11 = vld [vmem:[%s22947_s3 + $0x1e4] ss:$8 sps:$4 sm:$0xff]  }
 0x469   : > { %13464 = vmatprep.mubr.msk.bf16.mxu1 %vm6483_vm2, %v6566_v13  ;;  %v20752_v13 = vsel %vm7880_vm4, %v7939_v39, %v7947_v1  ;;  %v16074_v39 = vld [vmem:[%s22947_s3 + $0x1c0] ss:$8 sps:$4 sm:$0xff]   ;;  %v16085_v32 = vld [vmem:[%s22947_s3 + $0x1f4] ss:$8 sps:$4 sm:$0xff]   ;;  %v16095_v5 = vld [vmem:[%s22947_s3 + $0x230] ss:$8 sps:$4 sm:$0xff]  }
 0x46a   : > { %v7955_v7 = vor.u32 %v7954_v22, %v7953_v63  ;;  %v20761_v40 = vor.u32 %v7966_v35, %v7965_v42  ;;  %v20769_v33 = vor.u32 %v7962_v41, %v7961_v26  ;;  %v16080_v37 = vld [vmem:[%s22947_s3 + $0x1e0] ss:$8 sps:$4 sm:$0xff]   ;;  %v16088_v63 = vld [vmem:[%s22947_s3 + $0x204] ss:$8 sps:$4 sm:$0xff]   ;;  %v16091_v22 = vld [vmem:[%s22947_s3 + $0x214] ss:$8 sps:$4 sm:$0xff]  }
 0x46b   : > { %v16086_v17 = vld [vmem:[%s22947_s3 + $0x200] ss:$8 sps:$4 sm:$0xff]   ;;  %v16094_v42 = vld [vmem:[%s22947_s3 + $0x224] ss:$8 sps:$4 sm:$0xff]   ;;  %v16097_v35 = vld [vmem:[%s22947_s3 + $0x234] ss:$8 sps:$4 sm:$0xff]  }
 0x46c   : > { %v20767_v56 = vsel %vm7880_vm4, %v7947_v1, %v7955_v7  ;;  %v20777_v16 = vsel %vm7880_vm4, %v7959_v38, %v20761_v40  ;;  %v20781_v28 = vsel %vm7880_vm4, %v7955_v7, %v20769_v33  ;;  %v16083_v1 = vld [vmem:[%s22947_s3 + $0x1f0] ss:$8 sps:$4 sm:$0xff]   ;;  %v16092_v12 = vld [vmem:[%s22947_s3 + $0x220] ss:$8 sps:$4 sm:$0xff]   ;;  %v16100_v7 = vld [vmem:[%s22947_s3 + $0x244] ss:$8 sps:$4 sm:$0xff]  }
 0x46d   : > { %v16089_v38 = vld [vmem:[%s22947_s3 + $0x210] ss:$8 sps:$4 sm:$0xff]   ;;  %v16098_v9 = vld [vmem:[%s22947_s3 + $0x240] ss:$8 sps:$4 sm:$0xff]  }
 0x46e   : > { %v13498_v26 = vld [vmem:[%s22947_s3 + $0x250] sm:$0xff] }
 0x46f   : > { %v13524_v41 = vcombine.high %v13498_v26, %v13498_v26 }
 0x470   : > { %7303 = vmatmul.mubr.bf16.vlgmr.msra.gmra.mrb[240].mxu1 %v6565_v3 }
 0x471   : > { %13465 = vmatprep.mubr.msk.bf16.mxu1 %vm6483_vm2, %v20309_v51  ;;  %7674 = vmatpush1.bf16.msra.mxu1 %v16065_v15  ;;  %v13523_v15 = vcombine.low %v13498_v26, %v13498_v26  ;;  %v16109_v26 = vld [vmem:[%s22947_s3 + $0x278] ss:$8 sps:$4 sm:$0xff]  }
 0x472   : > { %7675 = vmatprep.subr.bf16.mxu1 %v16070_v18  ;;  %v16105_v18 = vld [vmem:[%s22947_s3 + $0x25c] ss:$8 sps:$4 sm:$0xff]  }
 0x473   : > { %v7668_v3 = vsel %vm6978_vm1, %v13523_v15, 0 }
 0x475   : > { %7676 = vmatpush1.bf16.msra.mxu1 %v16068_v55  ;;  %v7404_v55 = vld [vmem:[#allocation2 + $0x8] sm:$0xfc] }
 0x476   : > { %7677 = vmatprep.subr.bf16.mxu1 %v16073_v61  ;;  %v20880_v61 = vld [vmem:[#allocation2 + $0x18] sm:$0xff] }
 0x478   : > { %7313 = vmatmul.mubr.bf16.gmra.mrb[244].mxu1 %v20285_v24 }
 0x479   : > { %13466 = vmatprep.mubr.msk.bf16.mxu1 %vm6483_vm2, %v20342_v25  ;;  %7678 = vmatpush1.bf16.msra.mxu1 %v16071_v46  ;;  %v7408_v46 = vpack.c.bf16 %v20880_v61, %v7404_v55  ;;  %v7470_v55 = vrot.slane %v20337_v4, 1 }
 0x47a   : > { %7679 = vmatprep.subr.bf16.mxu1 %v16076_v2  ;;  %v7464_v2 = vrot.slane %v20309_v51, 1 }
 0x47d   : > { %7680 = vmatpush1.bf16.msra.mxu1 %v16074_v39  ;;  %v7463_v39 = vrot.slane %v7408_v46, 1  ;;  %v7476_v46 = vrot.slane %v20432_v20, 1 }
 0x47e   : > { %7681 = vmatprep.subr.bf16.mxu1 %v16079_v30  ;;  %v7403_v30 = vld [vmem:[#allocation2] sm:$0xfc] }
 0x480   : > { %7323 = vmatmul.mubr.bf16.gmra.mrb[248].mxu1 %v20304_v10 }
 0x481   : > { %13467 = vmatprep.mubr.msk.bf16.mxu1 %vm6483_vm2, %v20387_v59  ;;  %7682 = vmatpush1.bf16.msra.mxu1 %v16077_v36  ;;  %v7465_v36 = vsel %vm7459_vm5, %v7463_v39, %v7464_v2  ;;  %v16120_v39 = vld [vmem:[%s22947_s3 + $0x2ac] ss:$8 sps:$4 sm:$0xff]  }
 0x482   : > { %7683 = vmatprep.subr.bf16.mxu1 %v16082_v11  ;;  %v20887_v11 = vld [vmem:[#allocation2 + $0x10] sm:$0xff] }
 0x485   : > { %7684 = vmatpush1.bf16.msra.mxu1 %v16080_v37  ;;  %v7407_v37 = vpack.c.bf16 %v20887_v11, %v7403_v30 }
 0x486   : > { %7685 = vmatprep.subr.bf16.mxu1 %v16085_v32  ;;  %v7461_v32 = vrot.slane %v20285_v24, 1 }
 0x488   : > { %7333 = vmatmul.mubr.bf16.gmra.mrb[252].mxu1 %v20337_v4 }
 0x489   : > { %13468 = vmatprep.mubr.msk.bf16.mxu1 %vm6483_vm2, %v20432_v20  ;;  %7686 = vmatpush1.bf16.msra.mxu1 %v16083_v1  ;;  %v7468_v1 = vrot.slane %v20342_v25, 1 }
 0x48a   : > { %7687 = vmatprep.subr.bf16.mxu1 %v16088_v63  ;;  %v7460_v63 = vrot.slane %v7407_v37, 1  ;;  %v16118_v37 = vld [vmem:[%s22947_s3 + $0x2a8] ss:$8 sps:$4 sm:$0xff]  }
 0x48d   : > { %7688 = vmatpush1.bf16.msra.mxu1 %v16086_v17  ;;  %v16103_v17 = vld [vmem:[%s22947_s3 + $0x258] ss:$8 sps:$4 sm:$0xff]  }
 0x48e   : > { %7689 = vmatprep.subr.bf16.mxu1 %v16091_v22  ;;  %v16108_v22 = vld [vmem:[%s22947_s3 + $0x26c] ss:$8 sps:$4 sm:$0xff]  }
 0x490   : > { %7343 = vmatmul.mubr.bf16.gmra.mrb[0].mxu1 %v20382_v48 }
 0x491   : > { %13469 = vmatprep.mubr.msk.bf16.mxu1 %vm6483_vm2, %v20477_v21  ;;  %7690 = vmatpush1.bf16.msra.mxu1 %v16089_v38  ;;  %v7462_v38 = vsel %vm7459_vm5, %v7460_v63, %v7461_v32  ;;  %v7480_v63 = vrot.slane %v20477_v21, 1 }
 0x492   : > { %7691 = vmatprep.subr.bf16.mxu1 %v16094_v42  ;;  %v7469_v42 = vsel %vm7459_vm5, %v7464_v2, %v7468_v1  ;;  %v16115_v2 = vld [vmem:[%s22947_s3 + $0x298] ss:$8 sps:$4 sm:$0xff]  }
 0x495   : > { %7692 = vmatpush1.bf16.msra.mxu1 %v16092_v12  ;;  %v16106_v12 = vld [vmem:[%s22947_s3 + $0x268] ss:$8 sps:$4 sm:$0xff]  }
 0x496   : > { %7693 = vmatprep.subr.bf16.mxu1 %v16097_v35  ;;  %v16111_v35 = vld [vmem:[%s22947_s3 + $0x27c] ss:$8 sps:$4 sm:$0xff]  }
 0x498   : > { %7353 = vmatmul.mubr.bf16.gmra.mrb[4].mxu1 %v20427_v53 }
 0x499   : > { %13470 = vmatprep.mubr.msk.bf16.mxu1 %vm6483_vm2, %v20522_v6  ;;  %7694 = vmatpush1.bf16.msra.mxu1 %v16095_v5  ;;  %v7466_v5 = vrot.slane %v20304_v10, 1 }
 0x49a   : > { %7695 = vmatprep.subr.bf16.mxu1 %v16100_v7  ;;  %v7472_v7 = vrot.slane %v20387_v59, 1 }
 0x49b   : > { %v7471_v30 = vsel %vm7459_vm5, %v7466_v5, %v7470_v55 }
 0x49c   : > { %v7473_v15 = vsel %vm7459_vm5, %v7468_v1, %v7472_v7  ;;  %v7474_v1 = vrot.slane %v20382_v48, 1 }
 0x49d   : > { %7696 = vmatpush1.bf16.msra.mxu1 %v16098_v9  ;;  %v16114_v9 = vld [vmem:[%s22947_s3 + $0x28c] ss:$8 sps:$4 sm:$0xff]  }
 0x49e   : > { %13525 = vmatprep.subr.msk.bf16.mxu1 %vm6978_vm1, %v13524_v41  ;;  %v7467_v41 = vsel %vm7459_vm5, %v7461_v32, %v7466_v5  ;;  %v16123_v32 = vld [vmem:[%s22947_s3 + $0x2bc] ss:$8 sps:$4 sm:$0xff]   ;;  %v7478_v5 = vrot.slane %v20427_v53, 1 }
 0x4a0   : > { %7363 = vmatmul.mubr.bf16.gmra.mrb[8].mxu1 %v20472_v14 }
 0x4a1   : > { %13471 = vmatprep.mubr.msk.bf16.mxu1 %vm6483_vm2, %v20570_v8  ;;  %7698 = vmatpush1.bf16.msra.mxu1 %v7668_v3  ;;  %v16112_v3 = vld [vmem:[%s22947_s3 + $0x288] ss:$8 sps:$4 sm:$0xff]  }
 0x4a2   : > { %8158 = vmatprep.subr.bf16.mxu1 %v16105_v18  ;;  %v16117_v18 = vld [vmem:[%s22947_s3 + $0x29c] ss:$8 sps:$4 sm:$0xff]  }
 0x4a8   : > { %7373 = vmatmul.mubr.bf16.gmra.mrb[12].mxu1 %v20517_v47 }
 0x4a9   : > { %13472 = vmatprep.mubr.msk.bf16.mxu1 %vm6483_vm2, %v20605_v54 }
 0x4b0   : > { %7383 = vmatmul.mubr.bf16.gmra.mrb[16].mxu1 %v20565_v52 }
 0x4b1   : > { %13473 = vmatprep.mubr.msk.bf16.mxu1 %vm6483_vm2, %v20628_v31 }
 0x4b8   : > { %7393 = vmatmul.mubr.bf16.gmra.mrb[20].mxu1 %v20602_v49 }
 0x4b9   : > { %13526 = vmatprep.mubr.msk.bf16.mxu1 %vm6483_vm2, %v7465_v36  ;;  %v7477_v36 = vsel %vm7459_vm5, %v7472_v7, %v7476_v46  ;;  %v7484_v7 = vrot.slane %v20522_v6, 1 }
 0x4c0   : > { %7706 = vmatmul.mubr.bf16.vlgmr.msra.gmra.mrb[240].mxu1 %v7462_v38  ;;  %v7475_v38 = vsel %vm7459_vm5, %v7470_v55, %v7474_v1  ;;  %v7482_v55 = vrot.slane %v20472_v14, 1 }
 0x4c1   : > { %13527 = vmatprep.mubr.msk.bf16.mxu1 %vm6483_vm2, %v7469_v42  ;;  %8159 = vmatpush1.bf16.msra.mxu1 %v16103_v17  ;;  %v16121_v17 = vld [vmem:[%s22947_s3 + $0x2b8] ss:$8 sps:$4 sm:$0xff]   ;;  %v7481_v42 = vsel %vm7459_vm5, %v7476_v46, %v7480_v63  ;;  %v7488_v46 = vrot.slane %v20570_v8, 1 }
 0x4c2   : > { %8160 = vmatprep.subr.bf16.mxu1 %v16108_v22  ;;  %v16126_v22 = vld [vmem:[%s22947_s3 + $0x2cc] ss:$8 sps:$4 sm:$0xff]  }
 0x4c5   : > { %8161 = vmatpush1.bf16.msra.mxu1 %v16106_v12  ;;  %v16124_v12 = vld [vmem:[%s22947_s3 + $0x2c8] ss:$8 sps:$4 sm:$0xff]  }
 0x4c6   : > { %8162 = vmatprep.subr.bf16.mxu1 %v16111_v35  ;;  %v16129_v35 = vld [vmem:[%s22947_s3 + $0x2dc] ss:$8 sps:$4 sm:$0xff]  }
 0x4c8   : > { %7716 = vmatmul.mubr.bf16.gmra.mrb[244].mxu1 %v7467_v41  ;;  %v7479_v41 = vsel %vm7459_vm5, %v7474_v1, %v7478_v5 }
 0x4c9   : > { %13528 = vmatprep.mubr.msk.bf16.mxu1 %vm6483_vm2, %v7473_v15  ;;  %8163 = vmatpush1.bf16.msra.mxu1 %v16109_v26  ;;  %v16127_v26 = vld [vmem:[%s22947_s3 + $0x2d8] ss:$8 sps:$4 sm:$0xff]   ;;  %v7485_v15 = vsel %vm7459_vm5, %v7480_v63, %v7484_v7 }
 0x4ca   : > { %8164 = vmatprep.subr.bf16.mxu1 %v16114_v9  ;;  %v16132_v9 = vld [vmem:[%s22947_s3 + $0x2ec] ss:$8 sps:$4 sm:$0xff]  }
 0x4cd   : > { %8165 = vmatpush1.bf16.msra.mxu1 %v16112_v3  ;;  %v16130_v3 = vld [vmem:[%s22947_s3 + $0x2e8] ss:$8 sps:$4 sm:$0xff]  }
 0x4ce   : > { %8166 = vmatprep.subr.bf16.mxu1 %v16117_v18  ;;  %v16135_v18 = vld [vmem:[%s22947_s3 + $0x2fc] ss:$8 sps:$4 sm:$0xff]  }
 0x4d0   : > { %7726 = vmatmul.mubr.bf16.gmra.mrb[248].mxu1 %v7471_v30  ;;  %v7483_v30 = vsel %vm7459_vm5, %v7478_v5, %v7482_v55  ;;  %v7490_v5 = vrot.slane %v20565_v52, 1 }
 0x4d1   : > { %13529 = vmatprep.mubr.msk.bf16.mxu1 %vm6483_vm2, %v7477_v36  ;;  %8167 = vmatpush1.bf16.msra.mxu1 %v16115_v2  ;;  %v16133_v2 = vld [vmem:[%s22947_s3 + $0x2f8] ss:$8 sps:$4 sm:$0xff]  }
 0x4d2   : > { %8168 = vmatprep.subr.bf16.mxu1 %v16120_v39  ;;  %v16138_v39 = vld [vmem:[%s22947_s3 + $0x30c] ss:$8 sps:$4 sm:$0xff]   ;;  %v13560_v36 = vld [vmem:[%s22947_s3 + $0x318] sm:$0xff] }
 0x4d3   : > { %v13586_v1 = vcombine.high %v13560_v36, %v13560_v36  ;;  %v13585_v63 = vcombine.low %v13560_v36, %v13560_v36  ;;  %v7846_v36 = vld [vmem:[#allocation2] sm:$0xf8] }
 0x4d5   : > { %8169 = vmatpush1.bf16.msra.mxu1 %v16118_v37  ;;  %v7489_v37 = vsel %vm7459_vm5, %v7484_v7, %v7488_v46  ;;  %v7496_v7 = vrot.slane %v20628_v31, 1 }
 0x4d6   : > { %8170 = vmatprep.subr.bf16.mxu1 %v16123_v32  ;;  %v16136_v32 = vld [vmem:[%s22947_s3 + $0x308] ss:$8 sps:$4 sm:$0xff]  }
 0x4d8   : > { %7736 = vmatmul.mubr.bf16.gmra.mrb[252].mxu1 %v7475_v38  ;;  %v8153_v38 = vsel %vm6978_vm1, %v13585_v63, 0  ;;  %v7850_v63 = vpack.c.bf16 %v20887_v11, %v7846_v36  ;;  %v16159_v36 = vld [vmem:[%s22947_s3 + $0x380] ss:$8 sps:$4 sm:$0xff]  }
 0x4d9   : > { %13530 = vmatprep.mubr.msk.bf16.mxu1 %vm6483_vm2, %v7481_v42  ;;  %8171 = vmatpush1.bf16.msra.mxu1 %v16121_v17  ;;  %v7486_v17 = vrot.slane %v20517_v47, 1  ;;  %v16143_v42 = vld [vmem:[%s22947_s3 + $0x324] ss:$8 sps:$4 sm:$0xff]  }
 0x4da   : > { %8172 = vmatprep.subr.bf16.mxu1 %v16126_v22  ;;  %v7492_v22 = vrot.slane %v20605_v54, 1 }
 0x4dd   : > { %8173 = vmatpush1.bf16.msra.mxu1 %v16124_v12  ;;  %v7487_v12 = vsel %vm7459_vm5, %v7482_v55, %v7486_v17  ;;  %v7494_v55 = vrot.slane %v20602_v49, 1 }
 0x4de   : > { %8174 = vmatprep.subr.bf16.mxu1 %v16129_v35  ;;  %v7493_v35 = vsel %vm7459_vm5, %v7488_v46, %v7492_v22 }
 0x4e0   : > { %7746 = vmatmul.mubr.bf16.gmra.mrb[0].mxu1 %v7479_v41  ;;  %v7497_v41 = vsel %vm7459_vm5, %v7492_v22, %v7496_v7 }
 0x4e1   : > { %13531 = vmatprep.mubr.msk.bf16.mxu1 %vm6483_vm2, %v7485_v15  ;;  %8175 = vmatpush1.bf16.msra.mxu1 %v16127_v26  ;;  %v7406_v26 = vld [vmem:[#allocation2 + $0x148] sm:$0x3] }
 0x4e2   : > { %8176 = vmatprep.subr.bf16.mxu1 %v16132_v9  ;;  %v7491_v9 = vsel %vm7459_vm5, %v7486_v17, %v7490_v5  ;;  %v7410_v15 = vpack.c.bf16 %v7406_v26, %v7406_v26 }
 0x4e4   : > { %v7500_v46 = vrot.slane %v7410_v15, 1  ;;  %v16141_v15 = vld [vmem:[%s22947_s3 + $0x320] ss:$8 sps:$4 sm:$0xff]  }
 0x4e5   : > { %8177 = vmatpush1.bf16.msra.mxu1 %v16130_v3  ;;  %v7847_v3 = vld [vmem:[#allocation2 + $0x8] sm:$0xf8] }
 0x4e6   : > { %8178 = vmatprep.subr.bf16.mxu1 %v16135_v18  ;;  %v7851_v18 = vpack.c.bf16 %v20880_v61, %v7847_v3  ;;  %v16146_v3 = vld [vmem:[%s22947_s3 + $0x334] ss:$8 sps:$4 sm:$0xff]  }
 0x4e8   : > { %7756 = vmatmul.mubr.bf16.gmra.mrb[4].mxu1 %v7483_v30  ;;  %v7897_v30 = vshll.u32 %v7851_v18, 16 }
 0x4e9   : > { %13532 = vmatprep.mubr.msk.bf16.mxu1 %vm6483_vm2, %v7489_v37  ;;  %8179 = vmatpush1.bf16.msra.mxu1 %v16133_v2  ;;  %v7405_v2 = vld [vmem:[#allocation2 + $0x140] sm:$0x3]  ;;  %v7495_v37 = vsel %vm7459_vm5, %v7490_v5, %v7494_v55 }
 0x4ea   : > { %8180 = vmatprep.subr.bf16.mxu1 %v16138_v39  ;;  %v7894_v39 = vshrl.u32 %v7851_v18, 16  ;;  %v7899_v22 = vrot.slane %v7897_v30, 2  ;;  %v16161_v30 = vld [vmem:[%s22947_s3 + $0x384] ss:$8 sps:$4 sm:$0xff]  }
 0x4ec   : > { %v7896_v17 = vrot.slane %v7894_v39, 1  ;;  %v16153_v39 = vld [vmem:[%s22947_s3 + $0x360] ss:$8 sps:$4 sm:$0xff]  }
 0x4ed   : > { %8181 = vmatpush1.bf16.msra.mxu1 %v16136_v32  ;;  %v7409_v32 = vpack.c.bf16 %v7405_v2, %v7405_v2  ;;  %v16155_v2 = vld [vmem:[%s22947_s3 + $0x364] ss:$8 sps:$4 sm:$0xff]  }
 0x4ee   : > { %13587 = vmatprep.subr.msk.bf16.mxu1 %vm6978_vm1, %v13586_v1  ;;  %v7501_v1 = vsel %vm7459_vm5, %v7496_v7, %v7500_v46  ;;  %v16147_v46 = vld [vmem:[%s22947_s3 + $0x340] ss:$8 sps:$4 sm:$0xff]  }
 0x4f0   : > { %7766 = vmatmul.mubr.bf16.gmra.mrb[8].mxu1 %v7487_v12  ;;  %v7885_v12 = vshll.u32 %v7850_v63, 16 }
 0x4f1   : > { %13533 = vmatprep.mubr.msk.bf16.mxu1 %vm6483_vm2, %v7493_v35  ;;  %8183 = vmatpush1.bf16.msra.mxu1 %v8153_v38  ;;  %v7498_v38 = vrot.slane %v7409_v32, 1  ;;  %v7900_v35 = vor.u32 %v7899_v22, %v7896_v17  ;;  %v16162_v32 = vld [vmem:[%s22947_s3 + $0x390] ss:$8 sps:$4 sm:$0xff]   ;;  %v16165_v17 = vld [vmem:[%s22947_s3 + $0x3a0] ss:$8 sps:$4 sm:$0xff]  }
 0x4f2   : > { %8583 = vmatprep.subr.bf16.mxu1 %v16143_v42  ;;  %v7882_v42 = vshrl.u32 %v7850_v63, 16  ;;  %v7887_v7 = vrot.slane %v7885_v12, 2  ;;  %v16187_v63 = vld [vmem:[%s22949_s5 + $0x124] ss:$12 sps:$4 sm:$0xff]   ;;  %v16170_v22 = vld [vmem:[%s22947_s3 + $0x3b4] ss:$8 sps:$4 sm:$0xff]  }
 0x4f3   : > { %v7499_v26 = vsel %vm7459_vm5, %v7494_v55, %v7498_v38  ;;  %v7904_v5 = vsel %vm7880_vm4, %v7900_v35, %v20626_v58  ;;  %v16144_v58 = vld [vmem:[%s22947_s3 + $0x330] ss:$8 sps:$4 sm:$0xff]   ;;  %v16149_v55 = vld [vmem:[%s22947_s3 + $0x344] ss:$8 sps:$4 sm:$0xff]  }
 0x4f4   : > { %v16185_v38 = vld [vmem:[%s22949_s5 + $0x120] ss:$12 sps:$4 sm:$0xff]   ;;  %v16168_v12 = vld [vmem:[%s22947_s3 + $0x3b0] ss:$8 sps:$4 sm:$0xff]  }
 0x4f5   : > { %v16173_v35 = vld [vmem:[%s22947_s3 + $0x3c4] ss:$8 sps:$4 sm:$0xff]  }
 0x4f8   : > { %7776 = vmatmul.mubr.bf16.gmra.mrb[12].mxu1 %v7491_v9  ;;  %v7884_v9 = vrot.slane %v7882_v42, 1  ;;  %v16190_v42 = vld [vmem:[%s22949_s5 + $0x13c] ss:$12 sps:$4 sm:$0xff]  }
 0x4f9   : > { %13534 = vmatprep.mubr.msk.bf16.mxu1 %vm6483_vm2, %v7497_v41 }
 0x4fa   : > { %v7888_v41 = vor.u32 %v7887_v7, %v7884_v9  ;;  %v13622_v9 = vld [vmem:[%s22947_s3 + $0x3e0] sm:$0xff]  ;;  %v16191_v7 = vld [vmem:[%s22949_s5 + $0x150] ss:$12 sps:$4 sm:$0xff]  }
 0x4fc   : > { %v7892_v18 = vsel %vm7880_vm4, %v7888_v41, %v20659_v27  ;;  %v16152_v27 = vld [vmem:[%s22947_s3 + $0x354] ss:$8 sps:$4 sm:$0xff]   ;;  %v16196_v41 = vld [vmem:[%s22949_s5 + $0x16c] ss:$12 sps:$4 sm:$0xff]  }
 0x500   : > { %7786 = vmatmul.mubr.bf16.gmra.mrb[16].mxu1 %v7495_v37  ;;  %v16181_v37 = vld [vmem:[%s22949_s5 + $0xf4] ss:$12 sps:$4 sm:$0xff]  }
 0x501   : > { %13535 = vmatprep.mubr.msk.bf16.mxu1 %vm6483_vm2, %v7501_v1  ;;  %v16167_v1 = vld [vmem:[%s22947_s3 + $0x3a4] ss:$8 sps:$4 sm:$0xff]   ;;  %9408 = vmatprep.subr.bf16.mxu0 %v16181_v37 }
 0x508   : > { %7796 = vmatmul.mubr.bf16.gmra.mrb[20].mxu1 %v7499_v26  ;;  %v16171_v26 = vld [vmem:[%s22947_s3 + $0x3c0] ss:$8 sps:$4 sm:$0xff]  }
 0x509   : > { %13588 = vmatprep.mubr.msk.bf16.mxu1 %vm6483_vm2, %v7904_v5  ;;  %v16176_v5 = vld [vmem:[%s22947_s3 + $0x3d4] ss:$8 sps:$4 sm:$0xff]  }
 0x510   : > { %8191 = vmatmul.mubr.bf16.vlgmr.msra.gmra.mrb[240].mxu1 %v7892_v18  ;;  %v13647_v18 = vcombine.low %v13622_v9, %v13622_v9 }
 0x511   : > { %13589 = vmatprep.mubr.msk.bf16.mxu1 %vm6483_vm2, %v20663_v29  ;;  %8584 = vmatpush1.bf16.msra.mxu1 %v16141_v15  ;;  %v16150_v29 = vld [vmem:[%s22947_s3 + $0x350] ss:$8 sps:$4 sm:$0xff]  }
 0x512   : > { %8585 = vmatprep.subr.bf16.mxu1 %v16146_v3  ;;  %v16174_v15 = vld [vmem:[%s22947_s3 + $0x3d0] ss:$8 sps:$4 sm:$0xff]   ;;  %v13648_v3 = vcombine.high %v13622_v9, %v13622_v9 }
 0x515   : > { %8586 = vmatpush1.bf16.msra.mxu1 %v16144_v58  ;;  %v7849_v58 = vld [vmem:[#allocation2 + $0x148] sm:$0x7] }
 0x516   : > { %8587 = vmatprep.subr.bf16.mxu1 %v16149_v55  ;;  %v7853_v55 = vpack.c.bf16 %v7849_v58, %v7849_v58  ;;  %v8333_v58 = vld [vmem:[#allocation2 + $0x140] sm:$0xf] }
 0x518   : > { %8201 = vmatmul.mubr.bf16.gmra.mrb[244].mxu1 %v20681_v19  ;;  %v16158_v19 = vld [vmem:[%s22947_s3 + $0x374] ss:$8 sps:$4 sm:$0xff]  }
 0x519   : > { %13590 = vmatprep.mubr.msk.bf16.mxu1 %vm6483_vm2, %v20692_v45  ;;  %8588 = vmatpush1.bf16.msra.mxu1 %v16147_v46  ;;  %v16156_v45 = vld [vmem:[%s22947_s3 + $0x370] ss:$8 sps:$4 sm:$0xff]   ;;  %v7979_v46 = vshrl.u32 %v7853_v55, 16 }
 0x51a   : > { %8589 = vmatprep.subr.bf16.mxu1 %v16152_v27  ;;  %v7982_v27 = vshll.u32 %v7853_v55, 16  ;;  %v8337_v55 = vpack.c.bf16 %v8333_v58, %v8333_v58 }
 0x51d   : > { %8590 = vmatpush1.bf16.msra.mxu1 %v16150_v29  ;;  %v7848_v29 = vld [vmem:[#allocation2 + $0x140] sm:$0x7] }
 0x51e   : > { %8591 = vmatprep.subr.bf16.mxu1 %v16155_v2  ;;  %v7852_v2 = vpack.c.bf16 %v7848_v29, %v7848_v29  ;;  %v16533_v29 = vld [vmem:[#allocation2 + $0x140] sm:$0xff] }
 0x51f   : > { %8890 = vst.msk [vmem:[#allocation3 + $0x148] sm:$0xff] %vm8849_vm7, %v16533_v29 }
 0x520   : > { %8211 = vmatmul.mubr.bf16.gmra.mrb[248].mxu1 %v20699_v23  ;;  %v16164_v23 = vld [vmem:[%s22947_s3 + $0x394] ss:$8 sps:$4 sm:$0xff]  }
 0x521   : > { %13591 = vmatprep.mubr.msk.bf16.mxu1 %vm6483_vm2, %v20706_v0  ;;  %8592 = vmatpush1.bf16.msra.mxu1 %v16153_v39  ;;  %v16179_v0 = vld [vmem:[%s22949_s5 + $0xf0] ss:$12 sps:$4 sm:$0xff]   ;;  %v7981_v39 = vrot.slane %v7979_v46, 1 }
 0x522   : > { %8593 = vmatprep.subr.bf16.mxu1 %v16158_v19  ;;  %9409 = vmatpush1.bf16.msra.mxu0 %v16179_v0  ;;  %v7984_v19 = vrot.slane %v7982_v27, 2  ;;  %v8332_v0 = vld [vmem:[#allocation2 + $0x8] sm:$0xf0] }
 0x523   : > { %v16197_v27 = vld [vmem:[%s22949_s5 + $0x180] ss:$12 sps:$4 sm:$0xff]  }
 0x525   : > { %8594 = vmatpush1.bf16.msra.mxu1 %v16156_v45  ;;  %v7970_v45 = vshrl.u32 %v7852_v2, 16 }
 0x526   : > { %8595 = vmatprep.subr.bf16.mxu1 %v16161_v30  ;;  %v7973_v30 = vshll.u32 %v7852_v2, 16  ;;  %v16200_v2 = vld [vmem:[%s22949_s5 + $0x198] ss:$12 sps:$4 sm:$0xff]  }
 0x528   : > { %8221 = vmatmul.mubr.bf16.gmra.mrb[252].mxu1 %v20713_v57  ;;  %v16184_v57 = vld [vmem:[%s22949_s5 + $0x10c] ss:$12 sps:$4 sm:$0xff]  }
 0x529   : > { %13592 = vmatprep.mubr.msk.bf16.mxu1 %vm6483_vm2, %v20727_v43  ;;  %8596 = vmatpush1.bf16.msra.mxu1 %v16159_v36  ;;  %v16182_v43 = vld [vmem:[%s22949_s5 + $0x108] ss:$12 sps:$4 sm:$0xff]   ;;  %v7985_v36 = vor.u32 %v7984_v19, %v7981_v39  ;;  %v16203_v19 = vld [vmem:[%s22949_s5 + $0x1b0] ss:$12 sps:$4 sm:$0xff]  }
 0x52a   : > { %8597 = vmatprep.subr.bf16.mxu1 %v16164_v23  ;;  %9410 = vmatprep.subr.bf16.mxu0 %v16184_v57  ;;  %v7975_v23 = vrot.slane %v7973_v30, 2  ;;  %v16202_v39 = vld [vmem:[%s22949_s5 + $0x19c] ss:$12 sps:$4 sm:$0xff]  }
 0x52b   : > { %9411 = vmatpush1.bf16.msra.mxu0 %v16182_v43  ;;  %v8371_v43 = vrot.slane %v20285_v24, 2  ;;  %v8380_v24 = vrot.slane %v20337_v4, 2  ;;  %v8388_v4 = vrot.slane %v20427_v53, 2  ;;  %v8396_v53 = vrot.slane %v20517_v47, 2  ;;  %v16206_v30 = vld [vmem:[%s22949_s5 + $0x3c8] ss:$12 sps:$4 sm:$0xff]  }
 0x52c   : > { %9412 = vmatprep.subr.bf16.mxu0 %v16187_v63 }
 0x52d   : > { %8598 = vmatpush1.bf16.msra.mxu1 %v16162_v32  ;;  %v8374_v32 = vrot.slane %v20309_v51, 2 }
 0x52e   : > { %8599 = vmatprep.subr.bf16.mxu1 %v16167_v1 }
 0x52f   : > { %9413 = vmatpush1.bf16.msra.mxu0 %v16185_v38 }
 0x530   : > { %8231 = vmatmul.mubr.bf16.gmra.mrb[0].mxu1 %v20720_v34  ;;  %v16188_v34 = vld [vmem:[%s22949_s5 + $0x138] ss:$12 sps:$4 sm:$0xff]   ;;  %9414 = vmatprep.subr.bf16.mxu0 %v16190_v42 }
 0x531   : > { %13593 = vmatprep.mubr.msk.bf16.mxu1 %vm6483_vm2, %v20734_v62  ;;  %8600 = vmatpush1.bf16.msra.mxu1 %v16165_v17  ;;  %v16193_v62 = vld [vmem:[%s22949_s5 + $0x154] ss:$12 sps:$4 sm:$0xff]  }
 0x532   : > { %8601 = vmatprep.subr.bf16.mxu1 %v16170_v22  ;;  %v8382_v22 = vrot.slane %v20387_v59, 2  ;;  %v8390_v59 = vrot.slane %v20477_v21, 2  ;;  %v8398_v21 = vrot.slane %v20570_v8, 2  ;;  %v8406_v8 = vrot.slane %v20628_v31, 2 }
 0x533   : > { %9415 = vmatpush1.bf16.msra.mxu0 %v16188_v34  ;;  %v8408_v31 = vrot.slane %v8337_v55, 2 }
 0x534   : > { %9416 = vmatprep.subr.bf16.mxu0 %v16193_v62 }
 0x535   : > { %8602 = vmatpush1.bf16.msra.mxu1 %v16168_v12 }
 0x536   : > { %8603 = vmatprep.subr.bf16.mxu1 %v16173_v35 }
 0x537   : > { %9417 = vmatpush1.bf16.msra.mxu0 %v16191_v7 }
 0x538   : > { %8241 = vmatmul.mubr.bf16.gmra.mrb[4].mxu1 %v20740_v60  ;;  %v16194_v60 = vld [vmem:[%s22949_s5 + $0x168] ss:$12 sps:$4 sm:$0xff]   ;;  %9418 = vmatprep.subr.bf16.mxu0 %v16196_v41 }
 0x539   : > { %13594 = vmatprep.mubr.msk.bf16.mxu1 %vm6483_vm2, %v20747_v50  ;;  %8604 = vmatpush1.bf16.msra.mxu1 %v16171_v26  ;;  %v8578_v50 = vsel %vm6978_vm1, %v13647_v18, 0 }
 0x53a   : > { %8605 = vmatprep.subr.bf16.mxu1 %v16176_v5 }
 0x53b   : > { %9419 = vmatpush1.bf16.msra.mxu0 %v16194_v60 }
 0x53d   : > { %8606 = vmatpush1.bf16.msra.mxu1 %v16174_v15  ;;  %v8334_v15 = vld [vmem:[#allocation2 + $0x148] sm:$0xf] }
 0x53e   : > { %13649 = vmatprep.subr.msk.bf16.mxu1 %vm6978_vm1, %v13648_v3  ;;  %v8338_v47 = vpack.c.bf16 %v8334_v15, %v8334_v15 }
 0x540   : > { %8251 = vmatmul.mubr.bf16.gmra.mrb[8].mxu1 %v20752_v13  ;;  %v7972_v13 = vrot.slane %v7970_v45, 1  ;;  %v8410_v60 = vrot.slane %v8338_v47, 2  ;;  %v16205_v45 = vld [vmem:[%s22949_s5 + $0x1b4] ss:$12 sps:$4 sm:$0xff]  }
 0x541   : > { %13595 = vmatprep.mubr.msk.bf16.mxu1 %vm6483_vm2, %v20759_v44  ;;  %8608 = vmatpush1.bf16.msra.mxu1 %v8578_v50  ;;  %v7986_v44 = vsel %vm7880_vm4, %v20761_v40, %v7985_v36  ;;  %v23059_v36 = vmov 0  }
 0x542   : > { %v7976_v37 = vor.u32 %v7975_v23, %v7972_v13  ;;  %14282 = vmatprep.subr.bf16.mxu1 %v23059_v36  ;;  %v16207_v13 = vld [vmem:[%s22949_s5 + $0x1c8] ss:$12 sps:$4 sm:$0xff]   ;;  %v16209_v23 = vld [vmem:[%s22949_s5 + $0x1cc] ss:$12 sps:$4 sm:$0xff]  }
 0x544   : > { %v7977_v1 = vsel %vm7880_vm4, %v20769_v33, %v7976_v37  ;;  %v8376_v33 = vrot.slane %v20304_v10, 2  ;;  %v8384_v10 = vrot.slane %v20382_v48, 2  ;;  %v8392_v48 = vrot.slane %v20472_v14, 2  ;;  %v16214_v37 = vld [vmem:[%s22949_s5 + $0x428] ss:$12 sps:$4 sm:$0xff]  }
 0x545   : > { %v8400_v14 = vrot.slane %v20565_v52, 2  ;;  %v8411_v52 = vsel %vm8369_vm6, %v8406_v8, %v8410_v60 }
 0x546   : > { %v8377_v38 = vsel %vm8369_vm6, %v8371_v43, %v8376_v33  ;;  %v8381_v42 = vsel %vm8369_vm6, %v8376_v33, %v8380_v24  ;;  %v8385_v35 = vsel %vm8369_vm6, %v8380_v24, %v8384_v10  ;;  %v8389_v62 = vsel %vm8369_vm6, %v8384_v10, %v8388_v4 }
 0x547   : > { %v8393_v5 = vsel %vm8369_vm6, %v8388_v4, %v8392_v48  ;;  %v8397_v7 = vsel %vm8369_vm6, %v8392_v48, %v8396_v53  ;;  %v8401_v3 = vsel %vm8369_vm6, %v8396_v53, %v8400_v14 }
 0x548   : > { %8261 = vmatmul.mubr.bf16.gmra.mrb[12].mxu1 %v20767_v56  ;;  %v8336_v56 = vpack.c.bf16 %v20880_v61, %v8332_v0  ;;  %v8378_v61 = vrot.slane %v20342_v25, 2  ;;  %v8386_v25 = vrot.slane %v20432_v20, 2  ;;  %v8394_v20 = vrot.slane %v20522_v6, 2  ;;  %v16211_v0 = vld [vmem:[%s22949_s5 + $0x3f8] ss:$12 sps:$4 sm:$0xff]  }
 0x549   : > { %13596 = vmatprep.mubr.msk.bf16.mxu1 %vm6483_vm2, %v20777_v16  ;;  %v8331_v16 = vld [vmem:[#allocation2] sm:$0xf0]  ;;  %v8402_v6 = vrot.slane %v20605_v54, 2  ;;  %v8404_v54 = vrot.slane %v20602_v49, 2 }
 0x54a   : > { %v8373_v57 = vrot.slane %v8336_v56, 2  ;;  %v8335_v40 = vpack.c.bf16 %v20887_v11, %v8331_v16  ;;  %v8379_v17 = vsel %vm8369_vm6, %v8374_v32, %v8378_v61  ;;  %v8383_v11 = vsel %vm8369_vm6, %v8378_v61, %v8382_v22  ;;  %v16199_v49 = vld [vmem:[%s22949_s5 + $0x184] ss:$12 sps:$4 sm:$0xff]  }
 0x54b   : > { %v8387_v12 = vsel %vm8369_vm6, %v8382_v22, %v8386_v25  ;;  %v8391_v34 = vsel %vm8369_vm6, %v8386_v25, %v8390_v59  ;;  %v8395_v26 = vsel %vm8369_vm6, %v8390_v59, %v8394_v20  ;;  %v8399_v9 = vsel %vm8369_vm6, %v8394_v20, %v8398_v21  ;;  %9420 = vmatprep.subr.bf16.mxu0 %v16199_v49  ;;  %v16213_v56 = vld [vmem:[%s22949_s5 + $0x410] ss:$12 sps:$4 sm:$0xff]  }
 0x54c   : > { %v8370_v63 = vrot.slane %v8335_v40, 2  ;;  %v8403_v41 = vsel %vm8369_vm6, %v8398_v21, %v8402_v6  ;;  %v8407_v18 = vsel %vm8369_vm6, %v8402_v6, %v8406_v8  ;;  %v8405_v50 = vsel %vm8369_vm6, %v8400_v14, %v8404_v54  ;;  %9421 = vmatpush1.bf16.msra.mxu0 %v16197_v27  ;;  %v16219_v16 = vld [vmem:[%s22949_s5 + $0x470] ss:$12 sps:$4 sm:$0xff]   ;;  %v8756_v40 = vld [vmem:[%s22948_s4] sm:$0x3] }
 0x54d   : > { %v8409_v46 = vsel %vm8369_vm6, %v8404_v54, %v8408_v31  ;;  %9422 = vmatprep.subr.bf16.mxu0 %v16202_v39 }
 0x54e   : > { %v8372_v51 = vsel %vm8369_vm6, %v8370_v63, %v8371_v43  ;;  %v23570_v43 = vld [vmem:[#allocation17_spill] sm:$0xff] }
 0x54f   : > { %v23571_v61 = vsub.s32 0, %v23570_v43 }
 0x550   : > { %8271 = vmatmul.mubr.bf16.gmra.mrb[16].mxu1 %v20781_v28  ;;  %v8375_v28 = vsel %vm8369_vm6, %v8373_v57, %v8374_v32  ;;  %9423 = vmatpush1.bf16.msra.mxu0 %v16200_v2  ;;  %v16216_v32 = vld [vmem:[%s22949_s5 + $0x440] ss:$12 sps:$4 sm:$0xff]   ;;  %v16217_v57 = vld [vmem:[%s22949_s5 + $0x458] ss:$12 sps:$4 sm:$0xff]  }
 0x551   : > { %13597 = vmatprep.mubr.msk.bf16.mxu1 %vm6483_vm2, %v7986_v44  ;;  %9424 = vmatprep.subr.bf16.mxu0 %v16205_v45  ;;  %v16210_v44 = vld [vmem:[%s22949_s5 + $0x3e0] ss:$12 sps:$4 sm:$0xff]   ;;  %v21279_v63 = vrot.slane %v8756_v40, %v23571_v61 }
 0x554   : > { %9425 = vmatpush1.bf16.msra.mxu0 %v16203_v19 }
 0x555   : > { %9426 = vmatprep.subr.bf16.mxu0 %v16209_v23 }
 0x558   : > { %8281 = vmatmul.mubr.bf16.gmra.mrb[20].mxu1 %v7977_v1  ;;  %9427 = vmatpush1.bf16.msra.mxu0 %v16207_v13  ;;  %v16220_v1 = vld [vmem:[%s22949_s5 + $0x488] ss:$12 sps:$4 sm:$0xff]  }
 0x559   : > { %13650 = vmatprep.mubr.msk.bf16.mxu1 %vm6483_vm2, %v8375_v28  ;;  %9541 = vmatprep.subr.bf16.mxu0 %v23059_v36  ;;  %v16222_v28 = vld [vmem:[%s22949_s5 + $0x4a0] ss:$12 sps:$4 sm:$0xff]  }
 0x560   : > { %8616 = vmatmul.mubr.bf16.vlgmr.msra.gmra.mrb[240].mxu1 %v8372_v51  ;;  %v23572_v51 = vsub.s32 1, %v23570_v43 }
 0x561   : > { %13651 = vmatprep.mubr.msk.bf16.mxu1 %vm6483_vm2, %v8379_v17  ;;  %14292 = vmatpush1.bf16.msra.mxu1 %v16206_v30 }
 0x562   : > { %14283 = vmatprep.subr.bf16.mxu1 %v23059_v36  ;;  %v21283_v17 = vrot.slane %v8756_v40, %v23572_v51 }
 0x565   : > { %14293 = vmatpush1.bf16.msra.mxu1 %v16210_v44 }
 0x566   : > { %14284 = vmatprep.subr.bf16.mxu1 %v23059_v36 }
 0x568   : > { %8626 = vmatmul.mubr.bf16.gmra.mrb[244].mxu1 %v8377_v38 }
 0x569   : > { %13652 = vmatprep.mubr.msk.bf16.mxu1 %vm6483_vm2, %v8383_v11  ;;  %14294 = vmatpush1.bf16.msra.mxu1 %v16211_v0 }
 0x56a   : > { %14285 = vmatprep.subr.bf16.mxu1 %v23059_v36 }
 0x56d   : > { %14295 = vmatpush1.bf16.msra.mxu1 %v16213_v56 }
 0x56e   : > { %14286 = vmatprep.subr.bf16.mxu1 %v23059_v36 }
 0x570   : > { %8636 = vmatmul.mubr.bf16.gmra.mrb[248].mxu1 %v8381_v42 }
 0x571   : > { %13653 = vmatprep.mubr.msk.bf16.mxu1 %vm6483_vm2, %v8387_v12  ;;  %14296 = vmatpush1.bf16.msra.mxu1 %v16214_v37 }
 0x572   : > { %14287 = vmatprep.subr.bf16.mxu1 %v23059_v36 }
 0x575   : > { %14297 = vmatpush1.bf16.msra.mxu1 %v16216_v32 }
 0x576   : > { %14288 = vmatprep.subr.bf16.mxu1 %v23059_v36 }
 0x578   : > { %8646 = vmatmul.mubr.bf16.gmra.mrb[252].mxu1 %v8385_v35 }
 0x579   : > { %13654 = vmatprep.mubr.msk.bf16.mxu1 %vm6483_vm2, %v8391_v34  ;;  %14298 = vmatpush1.bf16.msra.mxu1 %v16217_v57 }
 0x57a   : > { %14289 = vmatprep.subr.bf16.mxu1 %v23059_v36 }
 0x57d   : > { %14299 = vmatpush1.bf16.msra.mxu1 %v16219_v16 }
 0x57e   : > { %14290 = vmatprep.subr.bf16.mxu1 %v23059_v36 }
 0x580   : > { %8656 = vmatmul.mubr.bf16.gmra.mrb[0].mxu1 %v8389_v62 }
 0x581   : > { %13655 = vmatprep.mubr.msk.bf16.mxu1 %vm6483_vm2, %v8395_v26  ;;  %14300 = vmatpush1.bf16.msra.mxu1 %v16220_v1 }
 0x582   : > { %14291 = vmatprep.subr.bf16.mxu1 %v23059_v36 }
 0x585   : > { %14301 = vmatpush1.bf16.msra.mxu1 %v16222_v28 }
 0x586   : > { %14194 = vmatprep.subr.bf16.mxu1 %v16533_v29 }
 0x588   : > { %8666 = vmatmul.mubr.bf16.gmra.mrb[4].mxu1 %v8393_v5 }
 0x589   : > { %13656 = vmatprep.mubr.msk.bf16.mxu1 %vm6483_vm2, %v8399_v9 }
 0x590   : > { %8676 = vmatmul.mubr.bf16.gmra.mrb[8].mxu1 %v8397_v7 }
 0x591   : > { %13657 = vmatprep.mubr.msk.bf16.mxu1 %vm6483_vm2, %v8403_v41 }
 0x598   : > { %8686 = vmatmul.mubr.bf16.gmra.mrb[12].mxu1 %v8401_v3 }
 0x599   : > { %13658 = vmatprep.mubr.msk.bf16.mxu1 %vm6483_vm2, %v8407_v18 }
 0x5a0   : > { %8696 = vmatmul.mubr.bf16.gmra.mrb[16].mxu1 %v8405_v50 }
 0x5a1   : > { %13659 = vmatprep.mubr.msk.bf16.mxu1 %vm6483_vm2, %v8411_v52 }
 0x5a8   : > { %8706 = vmatmul.mubr.bf16.gmra.mrb[20].mxu1 %v8409_v46 }
 0x633   : > { %v8617_v33 = vpop.f32.mrb[240].mxu1 }
 0x634   : > { %v8768_v22 = vadd.f32 %v21279_v63, %v8617_v33  ;;  %v8619_v38 = vpop.f32.mrb[241].mxu1 }
 0x635   : > { %v8769_v11 = vadd.f32 %v21283_v17, %v8619_v38  ;;  %v8621_v24 = vpop.f32.mrb[242].mxu1 }
 0x636   : > { %v8808_v25 = vmax.f32 %v8768_v22, 0.0  ;;  %v8770_v42 = vadd.f32 %v21279_v63, %v8621_v24  ;;  %v8623_v12 = vpop.f32.mrb[243].mxu1 }
 0x637   : > { %v8809_v10 = vmax.f32 %v8769_v11, 0.0  ;;  %v8771_v59 = vadd.f32 %v21283_v17, %v8623_v12 }
 0x638   : > { %8848 = vst [vmem:[#allocation3] sm:$0xff] %v8808_v25  ;;  %v21289_v35 = vmax.f32 %v8770_v42, 0.0 }
 0x639   : > { %8850 = vst.msk [vmem:[#allocation3 + $0x8] sm:$0xff] %vm8849_vm7, %v8809_v10  ;;  %v8811_v34 = vmax.f32 %v8771_v59, 0.0 }
 0x63a   : > { %8851 = vst [vmem:[#allocation3 + $0x10] sm:$0xff] %v21289_v35 }
 0x63b   : > { %8852 = vst.msk [vmem:[#allocation3 + $0x18] sm:$0xff] %vm8849_vm7, %v8811_v34  ;;  %v8627_v4 = vpop.f32.mrb[244].mxu1 }
 0x63c   : > { %v8772_v20 = vadd.f32 %v21279_v63, %v8627_v4  ;;  %v8629_v62 = vpop.f32.mrb[245].mxu1 }
 0x63d   : > { %v8773_v26 = vadd.f32 %v21283_v17, %v8629_v62  ;;  %v8631_v48 = vpop.f32.mrb[246].mxu1 }
 0x63e   : > { %v8812_v21 = vmax.f32 %v8772_v20, 0.0  ;;  %v8774_v5 = vadd.f32 %v21279_v63, %v8631_v48  ;;  %v8633_v9 = vpop.f32.mrb[247].mxu1 }
 0x63f   : > { %v8813_v53 = vmax.f32 %v8773_v26, 0.0  ;;  %v8775_v6 = vadd.f32 %v21283_v17, %v8633_v9  ;;  %v8991_v7 = vld [vmem:[#allocation3] sm:$0xfe]  ;;  %v16212_v26 = vld [vmem:[%s22949_s5 + $0xf8] ss:$12 sps:$4 sm:$0xff]  }
 0x640   : > { %v8814_v41 = vmax.f32 %v8774_v5, 0.0  ;;  %v8995_v14 = vpack.c.bf16 %v21289_v35, %v8991_v7  ;;  %v8992_v3 = vld [vmem:[#allocation3 + $0x8] sm:$0xfe] }
 0x641   : > { %8854 = vst.msk [vmem:[#allocation3 + $0x28] sm:$0xff] %vm8849_vm7, %v8813_v53  ;;  %v8815_v8 = vmax.f32 %v8775_v6, 0.0  ;;  %v10701_v23 = vld [vmem:[#allocation3 + $0x8] sm:$0xf8] }
 0x642   : > { %v8894_v15 = vld [vmem:[#allocation3 + $0x18] sm:$0xff]  ;;  %v21300_v18 = vpack.c.bf16 %v8814_v41, %v8812_v21  ;;  %v9043_v50 = vshll.u32 %v8995_v14, 16  ;;  %v9041_v37 = vshrl.u32 %v8995_v14, 16 }
 0x643   : > { %8856 = vst.msk [vmem:[#allocation3 + $0x38] sm:$0xff] %vm8849_vm7, %v8815_v8  ;;  %v8637_v47 = vpop.f32.mrb[248].mxu1  ;;  %v8996_v54 = vpack.c.bf16 %v8894_v15, %v8992_v3  ;;  %v10705_v57 = vpack.c.bf16 %v8894_v15, %v10701_v23  ;;  %v10700_v8 = vld [vmem:[#allocation3] sm:$0xf8] }
 0x644   : > { %v8776_v60 = vadd.f32 %v21279_v63, %v8637_v47  ;;  %v8639_v58 = vpop.f32.mrb[249].mxu1  ;;  %v9045_v19 = vrot.slane %v9043_v50, 1  ;;  %v9048_v30 = vshll.u32 %v21300_v18, 16  ;;  %v9064_v13 = vshrl.u32 %v21300_v18, 16  ;;  %v16215_v50 = vld [vmem:[%s22949_s5 + $0x110] ss:$12 sps:$4 sm:$0xff]  }
 0x645   : > { %v8777_v55 = vadd.f32 %v21283_v17, %v8639_v58  ;;  %v8641_v52 = vpop.f32.mrb[250].mxu1  ;;  %v9055_v49 = vshll.u32 %v8996_v54, 16  ;;  %v9053_v43 = vshrl.u32 %v8996_v54, 16  ;;  %v10762_v10 = vshrl.u32 %v10705_v57, 16 }
 0x646   : > { %v8816_v31 = vmax.f32 %v8776_v60, 0.0  ;;  %v8778_v46 = vadd.f32 %v21279_v63, %v8641_v52  ;;  %v8643_v27 = vpop.f32.mrb[251].mxu1  ;;  %v9046_v61 = vor.u32 %v9045_v19, %v9041_v37  ;;  %v9050_v38 = vrot.slane %v9048_v30, 1 }
 0x647   : > { %v8817_v29 = vmax.f32 %v8777_v55, 0.0  ;;  %v8779_v2 = vadd.f32 %v21283_v17, %v8643_v27  ;;  %v9057_v56 = vrot.slane %v9055_v49, 1  ;;  %v10757_v11 = vrot.slane %v9064_v13, 1 }
 0x648   : > { %v8818_v39 = vmax.f32 %v8778_v46, 0.0  ;;  %v8896_v44 = vld [vmem:[#allocation3 + $0x28] sm:$0xff]  ;;  %v10758_v20 = vrot.slane %v9048_v30, 2  ;;  %v10765_v21 = vshll.u32 %v10705_v57, 16  ;;  %v21333_v53 = vsel %vm6644_vm3, %v9046_v61, %v9050_v38 }
 0x649   : > { %8858 = vst.msk [vmem:[#allocation3 + $0x48] sm:$0xff] %vm8849_vm7, %v8817_v29  ;;  %v8819_v45 = vmax.f32 %v8779_v2, 0.0  ;;  %v9058_v12 = vor.u32 %v9057_v56, %v9053_v43  ;;  %v10764_v47 = vrot.slane %v10762_v10, 1  ;;  %v10704_v29 = vpack.c.bf16 %v21289_v35, %v10700_v8  ;;  %v16218_v35 = vld [vmem:[%s22949_s5 + $0x128] ss:$12 sps:$4 sm:$0xff]  }
 0x64a   : > { %v8898_v0 = vld [vmem:[#allocation3 + $0x38] sm:$0xff]  ;;  %v21310_v32 = vpack.c.bf16 %v8818_v39, %v8816_v31  ;;  %v21342_v54 = vor.u32 %v10758_v20, %v10757_v11  ;;  %v10767_v55 = vrot.slane %v10765_v21, 2 }
 0x64b   : > { %8860 = vst.msk [vmem:[#allocation3 + $0x58] sm:$0xff] %vm8849_vm7, %v8819_v45  ;;  %v8647_v16 = vpop.f32.mrb[252].mxu1  ;;  %v21313_v1 = vpack.c.bf16 %v8898_v0, %v8896_v44  ;;  %v9066_v45 = vor.u32 %v9064_v13, %v9050_v38  ;;  %v10750_v43 = vshrl.u32 %v10704_v29, 16  ;;  %v10753_v61 = vshll.u32 %v10704_v29, 16 }
 0x64c   : > { %v8780_v28 = vadd.f32 %v21279_v63, %v8647_v16  ;;  %v8649_v40 = vpop.f32.mrb[253].mxu1  ;;  %v9068_v41 = vshll.u32 %v21310_v32, 16  ;;  %v10768_v16 = vor.u32 %v10767_v55, %v10764_v47 }
 0x64d   : > { %v8781_v51 = vadd.f32 %v21283_v17, %v8649_v40  ;;  %v8651_v33 = vpop.f32.mrb[254].mxu1  ;;  %v9060_v22 = vshll.u32 %v21313_v1, 16  ;;  %v9072_v48 = vshrl.u32 %v21313_v1, 16  ;;  %v10755_v21 = vrot.slane %v10753_v61, 2 }
 0x64e   : > { %v8820_v24 = vmax.f32 %v8780_v28, 0.0  ;;  %v8782_v25 = vadd.f32 %v21279_v63, %v8651_v33  ;;  %v8653_v42 = vpop.f32.mrb[255].mxu1  ;;  %v9070_v30 = vrot.slane %v9068_v41, 1 }
 0x64f   : > { %v8821_v59 = vmax.f32 %v8781_v51, 0.0  ;;  %v8783_v34 = vadd.f32 %v21283_v17, %v8653_v42  ;;  %v9062_v4 = vrot.slane %v9060_v22, 1  ;;  %v10769_v52 = vrot.slane %v9072_v48, 1 }
 0x650   : > { %v8822_v62 = vmax.f32 %v8782_v25, 0.0  ;;  %v8900_v6 = vld [vmem:[#allocation3 + $0x48] sm:$0xff]  ;;  %v10770_v31 = vrot.slane %v9060_v22, 2  ;;  %v21372_v51 = vsel %vm6644_vm3, %v9066_v45, %v9070_v30 }
 0x651   : > { %8862 = vst.msk [vmem:[#allocation3 + $0x68] sm:$0xff] %vm8849_vm7, %v8821_v59  ;;  %v8823_v5 = vmax.f32 %v8783_v34, 0.0  ;;  %v21328_v9 = vsel %vm6644_vm3, %v9058_v12, %v9062_v4  ;;  %v9074_v0 = vor.u32 %v9072_v48, %v9062_v4  ;;  %v9080_v59 = vshrl.u32 %v21310_v32, 16  ;;  %v16221_v4 = vld [vmem:[%s22949_s5 + $0x140] ss:$12 sps:$4 sm:$0xff]  }
 0x652   : > { %13730 = vmatprep.mubr.msk.bf16.mxu0 %vm8849_vm7, %v21328_v9  ;;  %v8902_v7 = vld [vmem:[#allocation3 + $0x58] sm:$0xff]  ;;  %v21336_v14 = vpack.c.bf16 %v8822_v62, %v8820_v24  ;;  %v21362_v28 = vor.u32 %v10770_v31, %v10769_v52  ;;  %v10752_v48 = vrot.slane %v10750_v43, 1  ;;  %v16223_v31 = vld [vmem:[%s22949_s5 + $0x158] ss:$12 sps:$4 sm:$0xff]  }
 0x653   : > { %8864 = vst.msk [vmem:[#allocation3 + $0x78] sm:$0xff] %vm8849_vm7, %v8823_v5  ;;  %v8657_v15 = vpop.f32.mrb[0].mxu1  ;;  %9441 = vmatmul.mubr.bf16.vlgmr.msra.gmra.mrb[200].mxu0 %v21333_v53  ;;  %v21340_v3 = vpack.c.bf16 %v8902_v7, %v8900_v6  ;;  %v9082_v52 = vor.u32 %v9080_v59, %v9070_v30 }
 0x654   : > { %v8784_v60 = vadd.f32 %v21279_v63, %v8657_v15  ;;  %v8659_v58 = vpop.f32.mrb[1].mxu1  ;;  %9542 = vmatpush1.bf16.msra.mxu0 %v16212_v26  ;;  %v23068_v57 = vshll.u32 %v21336_v14, 16  ;;  %v21379_v24 = vsel %vm7880_vm4, %v10768_v16, %v21362_v28  ;;  %v10756_v29 = vor.u32 %v10755_v21, %v10752_v48  ;;  %v16224_v16 = vld [vmem:[%s22949_s5 + $0x170] ss:$12 sps:$4 sm:$0xff]  }
 0x655   : > { %v8785_v46 = vadd.f32 %v21283_v17, %v8659_v58  ;;  %v8661_v27 = vpop.f32.mrb[2].mxu1  ;;  %v9076_v49 = vshll.u32 %v21340_v3, 16  ;;  %9543 = vmatprep.subr.bf16.mxu0 %v23059_v36  ;;  %v9088_v38 = vshrl.u32 %v21340_v3, 16  ;;  %23574 = vst [vmem:[#allocation67_spill] sm:$0xff] %v21379_v24  ;;  %v10774_v21 = vrot.slane %v9068_v41, 2 }
 0x656   : > { %v8824_v2 = vmax.f32 %v8784_v60, 0.0  ;;  %v8786_v39 = vadd.f32 %v21279_v63, %v8661_v27  ;;  %v8663_v19 = vpop.f32.mrb[3].mxu1  ;;  %v9086_v34 = vrot.slane %v23068_v57, 1 }
 0x657   : > { %v8825_v23 = vmax.f32 %v8785_v46, 0.0  ;;  %v8787_v44 = vadd.f32 %v21283_v17, %v8663_v19  ;;  %v9078_v56 = vrot.slane %v9076_v49, 1  ;;  %v10777_v8 = vrot.slane %v9088_v38, 1 }
 0x658   : > { %v8826_v37 = vmax.f32 %v8786_v39, 0.0  ;;  %9544 = vmatpush1.bf16.msra.mxu0 %v16215_v50  ;;  %v8904_v33 = vld [vmem:[#allocation3 + $0x68] sm:$0xff]  ;;  %v10778_v15 = vrot.slane %v9076_v49, 2  ;;  %v21413_v39 = vsel %vm6644_vm3, %v9082_v52, %v9086_v34 }
 0x659   : > { %8866 = vst.msk [vmem:[#allocation3 + $0x88] sm:$0xff] %vm8849_vm7, %v8825_v23  ;;  %v8827_v13 = vmax.f32 %v8787_v44, 0.0  ;;  %v21366_v40 = vsel %vm6644_vm3, %v9074_v0, %v9078_v56  ;;  %9545 = vmatprep.subr.bf16.mxu0 %v23059_v36  ;;  %v9090_v58 = vor.u32 %v9088_v38, %v9078_v56  ;;  %v21423_v0 = vsel %vm7880_vm4, %v10756_v29, %v21342_v54 }
 0x65a   : > { %13731 = vmatprep.mubr.msk.bf16.mxu0 %vm8849_vm7, %v21366_v40  ;;  %v8906_v22 = vld [vmem:[#allocation3 + $0x78] sm:$0xff]  ;;  %v21375_v11 = vpack.c.bf16 %v8826_v37, %v8824_v2  ;;  %v21415_v30 = vor.u32 %v10778_v15, %v10777_v8  ;;  %23575 = vst [vmem:[#allocation65_spill] sm:$0xff] %v21423_v0 }
 0x65b   : > { %8868 = vst.msk [vmem:[#allocation3 + $0x98] sm:$0xff] %vm8849_vm7, %v8827_v13  ;;  %v8667_v25 = vpop.f32.mrb[4].mxu1  ;;  %9451 = vmatmul.mubr.bf16.gmra.mrb[204].mxu0 %v21372_v51  ;;  %v21383_v42 = vpack.c.bf16 %v8906_v22, %v8904_v33  ;;  %v9096_v33 = vshrl.u32 %v21336_v14, 16 }
 0x65c   : > { %23573 = vst [vmem:[#allocation64_spill] sm:$0xff] %v21375_v11  ;;  %v8788_v12 = vadd.f32 %v21279_v63, %v8667_v25  ;;  %v8669_v10 = vpop.f32.mrb[5].mxu1  ;;  %9546 = vmatpush1.bf16.msra.mxu0 %v16218_v35  ;;  %v23056_v49 = vshll.u32 %v21375_v11, 16 }
 0x65d   : > { %v8789_v20 = vadd.f32 %v21283_v17, %v8669_v10  ;;  %v8671_v62 = vpop.f32.mrb[6].mxu1  ;;  %v9092_v26 = vshll.u32 %v21383_v42, 16  ;;  %9547 = vmatprep.subr.bf16.mxu0 %v23059_v36  ;;  %v9104_v35 = vshrl.u32 %v21383_v42, 16 }
 0x65e   : > { %v8828_v5 = vmax.f32 %v8788_v12, 0.0  ;;  %v8790_v6 = vadd.f32 %v21279_v63, %v8671_v62  ;;  %v8673_v7 = vpop.f32.mrb[7].mxu1  ;;  %v9102_v22 = vrot.slane %v23056_v49, 1  ;;  %v21568_v49 = vld [vmem:[#allocation3 + $0x140] sm:$0xf] }
 0x65f   : > { %v8829_v47 = vmax.f32 %v8789_v20, 0.0  ;;  %v8791_v60 = vadd.f32 %v21283_v17, %v8673_v7  ;;  %v9094_v50 = vrot.slane %v9092_v26, 1  ;;  %v16225_v7 = vld [vmem:[%s22949_s5 + $0x188] ss:$12 sps:$4 sm:$0xff]   ;;  %v10785_v29 = vrot.slane %v9104_v35, 1 }
 0x660   : > { %v8830_v55 = vmax.f32 %v8790_v6, 0.0  ;;  %9548 = vmatpush1.bf16.msra.mxu0 %v16221_v4  ;;  %v8908_v19 = vld [vmem:[#allocation3 + $0x88] sm:$0xff]  ;;  %v10773_v4 = vrot.slane %v9080_v59, 1  ;;  %v9098_v6 = vor.u32 %v9096_v33, %v9086_v34 }
 0x661   : > { %8870 = vst.msk [vmem:[#allocation3 + $0xa8] sm:$0xff] %vm8849_vm7, %v8829_v47  ;;  %v8831_v46 = vmax.f32 %v8791_v60, 0.0  ;;  %v21404_v27 = vsel %vm6644_vm3, %v9090_v58, %v9094_v50  ;;  %9549 = vmatprep.subr.bf16.mxu0 %v23059_v36  ;;  %v9106_v10 = vor.u32 %v9104_v35, %v9094_v50  ;;  %v23052_v60 = vrot.slane %v21375_v11, 2 }
 0x662   : > { %v21408_v2 = vpack.c.bf16 %v8830_v55, %v8828_v5  ;;  %13732 = vmatprep.mubr.msk.bf16.mxu0 %vm8849_vm7, %v21404_v27  ;;  %v8910_v45 = vld [vmem:[#allocation3 + $0x98] sm:$0xff]  ;;  %v21456_v41 = vsel %vm6644_vm3, %v9098_v6, %v9102_v22  ;;  %v21464_v50 = vsel %vm7880_vm4, %v21362_v28, %v21415_v30 }
 0x663   : > { %8872 = vst.msk [vmem:[#allocation3 + $0xb8] sm:$0xff] %vm8849_vm7, %v8831_v46  ;;  %v8677_v23 = vpop.f32.mrb[8].mxu1  ;;  %9461 = vmatmul.mubr.bf16.gmra.mrb[208].mxu0 %v21413_v39  ;;  %v21419_v44 = vpack.c.bf16 %v8910_v45, %v8908_v19  ;;  %23577 = vst [vmem:[#allocation39_spill] sm:$0xff] %v21464_v50  ;;  %v21471_v46 = vor.u32 %v10774_v21, %v10773_v4 }
 0x664   : > { %v8792_v56 = vadd.f32 %v21279_v63, %v8677_v23  ;;  %v8679_v37 = vpop.f32.mrb[9].mxu1  ;;  %9550 = vmatpush1.bf16.msra.mxu0 %v16223_v31  ;;  %v23054_v15 = vshll.u32 %v21408_v2, 16  ;;  %v23057_v31 = vshrl.u32 %v21375_v11, 16  ;;  %v11432_v28 = vrot.slane %v21408_v2, 2 }
 0x665   : > { %v8793_v13 = vadd.f32 %v21283_v17, %v8679_v37  ;;  %v8681_v43 = vpop.f32.mrb[10].mxu1  ;;  %v23058_v61 = vshll.u32 %v21419_v44, 16  ;;  %9551 = vmatprep.subr.bf16.mxu0 %v23059_v36  ;;  %v23053_v23 = vrot.slane %v21419_v44, 2  ;;  %v16226_v37 = vld [vmem:[%s22949_s5 + $0x1a0] ss:$12 sps:$4 sm:$0xff]  }
 0x666   : > { %v8832_v38 = vmax.f32 %v8792_v56, 0.0  ;;  %v8794_v25 = vadd.f32 %v21279_v63, %v8681_v43  ;;  %v8683_v12 = vpop.f32.mrb[11].mxu1  ;;  %v23061_v56 = vshrl.u32 %v21419_v44, 16 }
 0x667   : > { %v8833_v20 = vmax.f32 %v8793_v13, 0.0  ;;  %v8795_v62 = vadd.f32 %v21283_v17, %v8683_v12  ;;  %v9110_v48 = vrot.slane %v23058_v61, 1 }
 0x668   : > { %v8834_v5 = vmax.f32 %v8794_v25, 0.0  ;;  %9552 = vmatpush1.bf16.msra.mxu0 %v16224_v16  ;;  %v8912_v34 = vld [vmem:[#allocation3 + $0xa8] sm:$0xff] }
 0x669   : > { %8874 = vst.msk [vmem:[#allocation3 + $0xc8] sm:$0xff] %vm8849_vm7, %v8833_v20  ;;  %v8835_v59 = vmax.f32 %v8795_v62, 0.0  ;;  %v21449_v8 = vsel %vm6644_vm3, %v9106_v10, %v9110_v48  ;;  %9553 = vmatprep.subr.bf16.mxu0 %v23059_v36  ;;  %v9122_v4 = vor.u32 %v23061_v56, %v9110_v48  ;;  %v10786_v20 = vrot.slane %v9092_v26, 2 }
 0x66a   : > { %13733 = vmatprep.mubr.msk.bf16.mxu0 %vm8849_vm7, %v21449_v8  ;;  %v8914_v47 = vld [vmem:[#allocation3 + $0xb8] sm:$0xff]  ;;  %v21459_v58 = vpack.c.bf16 %v8834_v5, %v8832_v38  ;;  %v21485_v38 = vrot.slane %v23054_v15, 1  ;;  %v21508_v26 = vsel %vm8369_vm6, %v23052_v60, %v11432_v28  ;;  %v9114_v48 = vor.u32 %v23057_v31, %v9102_v22 }
 0x66b   : > { %8876 = vst.msk [vmem:[#allocation3 + $0xd8] sm:$0xff] %vm8849_vm7, %v8835_v59  ;;  %v8687_v55 = vpop.f32.mrb[12].mxu1  ;;  %9471 = vmatmul.mubr.bf16.gmra.mrb[212].mxu0 %v21456_v41  ;;  %v21468_v52 = vpack.c.bf16 %v8914_v47, %v8912_v34  ;;  %23580 = vst [vmem:[#allocation18_spill] sm:$0xff] %v21508_v26  ;;  %v21512_v59 = vld [vmem:[#allocation3 + $0x148] sm:$0xf] }
 0x66c   : > { %23576 = vst [vmem:[#allocation38_spill] sm:$0xff] %v21459_v58  ;;  %v8796_v19 = vadd.f32 %v21279_v63, %v8687_v55  ;;  %v8689_v45 = vpop.f32.mrb[13].mxu1  ;;  %9554 = vmatpush1.bf16.msra.mxu0 %v16225_v7  ;;  %v16227_v34 = vld [vmem:[%s22949_s5 + $0x1b8] ss:$12 sps:$4 sm:$0xff]   ;;  %v21529_v22 = vsel %vm6644_vm3, %v9114_v48, %v21485_v38  ;;  %v23066_v48 = vrot.slane %v21459_v58, 2 }
 0x66d   : > { %23578 = vst [vmem:[#allocation70_spill] sm:$0xff] %v21468_v52  ;;  %v8797_v16 = vadd.f32 %v21283_v17, %v8689_v45  ;;  %v8691_v13 = vpop.f32.mrb[14].mxu1  ;;  %v11434_v43 = vrot.slane %v21468_v52, 2  ;;  %v23055_v35 = vshll.u32 %v21468_v52, 16  ;;  %9555 = vmatprep.subr.bf16.mxu0 %v23059_v36 }
 0x66e   : > { %v8836_v25 = vmax.f32 %v8796_v19, 0.0  ;;  %v8798_v12 = vadd.f32 %v21279_v63, %v8691_v13  ;;  %v8693_v10 = vpop.f32.mrb[15].mxu1  ;;  %v21523_v19 = vld [vmem:[#allocation3 + $0x148] sm:$0x1] }
 0x66f   : > { %v8837_v62 = vmax.f32 %v8797_v16, 0.0  ;;  %v8799_v21 = vadd.f32 %v21283_v17, %v8693_v10  ;;  %v21497_v5 = vsel %vm8369_vm6, %v23053_v23, %v11434_v43  ;;  %v9126_v6 = vrot.slane %v23055_v35, 1 }
 0x670   : > { %23579 = vst [vmem:[#allocation41_spill] sm:$0xff] %v21497_v5  ;;  %v8838_v7 = vmax.f32 %v8798_v12, 0.0  ;;  %14064 = vmatprep.mubr.msk.bf16.mxu1 %vm8849_vm7, %v21497_v5  ;;  %9556 = vmatpush1.bf16.msra.mxu0 %v16226_v37  ;;  %v8916_v45 = vld [vmem:[#allocation3 + $0xc8] sm:$0xff]  ;;  %v23062_v16 = vshll.u32 %v21459_v58, 16 }
 0x671   : > { %8878 = vst.msk [vmem:[#allocation3 + $0xe8] sm:$0xff] %vm8849_vm7, %v8837_v62  ;;  %v8839_v47 = vmax.f32 %v8799_v21, 0.0  ;;  %11854 = vmatmul.mubr.bf16.vlgmr.msra.gmra.mrb[24].mxu1 %v21508_v26  ;;  %v21520_v55 = vsel %vm6644_vm3, %v9122_v4, %v9126_v6  ;;  %9557 = vmatprep.subr.bf16.mxu0 %v23059_v36  ;;  %v21543_v62 = vsel %vm7880_vm4, %v21342_v54, %v21471_v46 }
 0x672   : > { %13734 = vmatprep.mubr.msk.bf16.mxu0 %vm8849_vm7, %v21520_v55  ;;  %v8918_v37 = vld [vmem:[#allocation3 + $0xd8] sm:$0xff]  ;;  %v21532_v13 = vpack.c.bf16 %v8838_v7, %v8836_v25  ;;  %23581 = vst [vmem:[#allocation69_spill] sm:$0xff] %v21543_v62  ;;  %v21545_v21 = vor.u32 %v10786_v20, %v10785_v29  ;;  %v9134_v35 = vrot.slane %v23062_v16, 1  ;;  %v23067_v16 = vshrl.u32 %v21459_v58, 16 }
 0x673   : > { %8880 = vst.msk [vmem:[#allocation3 + $0xf8] sm:$0xff] %vm8849_vm7, %v8839_v47  ;;  %v8697_v12 = vpop.f32.mrb[16].mxu1  ;;  %9481 = vmatmul.mubr.bf16.gmra.mrb[216].mxu0 %v21529_v22  ;;  %v21536_v10 = vpack.c.bf16 %v8918_v37, %v8916_v45  ;;  %v23065_v47 = vshrl.u32 %v21468_v52, 16  ;;  %v8998_v45 = vpack.c.bf16 %v21523_v19, %v21523_v19  ;;  %v16228_v37 = vld [vmem:[%s22949_s5 + $0x1d0] ss:$12 sps:$4 sm:$0xff]  }
 0x674   : > { %v8800_v25 = vadd.f32 %v21279_v63, %v8697_v12  ;;  %v8699_v7 = vpop.f32.mrb[17].mxu1  ;;  %9558 = vmatpush1.bf16.msra.mxu0 %v16227_v34  ;;  %v23064_v12 = vshrl.u32 %v21408_v2, 16  ;;  %v16231_v19 = vld [vmem:[%s22949_s5 + $0x4] ss:$12 sps:$4 sm:$0xff]   ;;  %v11440_v4 = vrot.slane %v21532_v13, 2 }
 0x675   : > { %v8801_v54 = vadd.f32 %v21283_v17, %v8699_v7  ;;  %v8701_v60 = vpop.f32.mrb[18].mxu1  ;;  %v11438_v29 = vrot.slane %v21536_v10, 2  ;;  %v23063_v20 = vshll.u32 %v21536_v10, 16  ;;  %9559 = vmatprep.subr.bf16.mxu0 %v23059_v36  ;;  %v9138_v7 = vor.u32 %v23065_v47, %v9126_v6  ;;  %v8993_v6 = vld [vmem:[#allocation3 + $0x140] sm:$0x1] }
 0x676   : > { %v8840_v34 = vmax.f32 %v8800_v25, 0.0  ;;  %v8802_v23 = vadd.f32 %v21279_v63, %v8701_v60  ;;  %v8703_v15 = vpop.f32.mrb[19].mxu1  ;;  %v21583_v60 = vsel %vm8369_vm6, %v11432_v28, %v23066_v48  ;;  %v11367_v28 = vpack.c.bf16 %v21568_v49, %v21568_v49 }
 0x677   : > { %v8841_v31 = vmax.f32 %v8801_v54, 0.0  ;;  %v8803_v61 = vadd.f32 %v21283_v17, %v8703_v15  ;;  %v21572_v36 = vsel %vm8369_vm6, %v11434_v43, %v11438_v29  ;;  %v9142_v25 = vrot.slane %v23063_v20, 1  ;;  %23583 = vst [vmem:[#allocation42_spill] sm:$0xff] %v21583_v60 }
 0x678   : > { %23582 = vst [vmem:[#allocation72_spill] sm:$0xff] %v21572_v36  ;;  %v8842_v56 = vmax.f32 %v8802_v23, 0.0  ;;  %14065 = vmatprep.mubr.msk.bf16.mxu1 %vm8849_vm7, %v21572_v36  ;;  %v9130_v15 = vor.u32 %v23064_v12, %v21485_v38  ;;  %v23070_v43 = vshll.u32 %v21532_v13, 16  ;;  %9560 = vmatpush1.bf16.msra.mxu0 %v16228_v37  ;;  %v8920_v37 = vld [vmem:[#allocation3 + $0xe8] sm:$0xff]  ;;  %v21616_v12 = vshll.u32 %v8998_v45, 16 }
 0x679   : > { %8882 = vst.msk [vmem:[#allocation3 + $0x108] sm:$0xff] %vm8849_vm7, %v8841_v31  ;;  %v8843_v23 = vmax.f32 %v8803_v61, 0.0  ;;  %11862 = vmatmul.mubr.bf16.gmra.mrb[28].mxu1 %v21583_v60  ;;  %v21592_v54 = vsel %vm6644_vm3, %v9138_v7, %v9142_v25  ;;  %9835 = vmatprep.subr.bf16.mxu0 %v16231_v19  ;;  %v23069_v61 = vshrl.u32 %v21536_v10, 16  ;;  %v21608_v7 = vsel %vm7880_vm4, %v21415_v30, %v21545_v21 }
 0x67a   : > { %13735 = vmatprep.mubr.msk.bf16.mxu0 %vm8849_vm7, %v21592_v54  ;;  %v21600_v38 = vsel %vm6644_vm3, %v9130_v15, %v9134_v35  ;;  %v8922_v31 = vld [vmem:[#allocation3 + $0xf8] sm:$0xff]  ;;  %v21603_v20 = vpack.c.bf16 %v8842_v56, %v8840_v34  ;;  %23584 = vst [vmem:[#allocation43_spill] sm:$0xff] %v21608_v7  ;;  %v9146_v15 = vor.u32 %v23067_v16, %v9134_v35  ;;  %v10781_v45 = vrot.slane %v9096_v33, 1 }
 0x67b   : > { %8884 = vst.msk [vmem:[#allocation3 + $0x118] sm:$0xff] %vm8849_vm7, %v8843_v23  ;;  %v8707_v49 = vpop.f32.mrb[20].mxu1  ;;  %9491 = vmatmul.mubr.bf16.gmra.mrb[220].mxu0 %v21600_v38  ;;  %v21612_v19 = vpack.c.bf16 %v8922_v31, %v8920_v37  ;;  %v8997_v47 = vpack.c.bf16 %v8993_v6, %v8993_v6  ;;  %v9154_v30 = vor.u32 %v23069_v61, %v9142_v25  ;;  %v9150_v23 = vrot.slane %v23070_v43, 1 }
 0x67c   : > { %v8804_v56 = vadd.f32 %v21279_v63, %v8707_v49  ;;  %v8709_v34 = vpop.f32.mrb[21].mxu1  ;;  %v23076_v57 = vshll.u32 %v21603_v20, 16  ;;  %v23585_v25 = vshll.u32 %v21336_v14, 16  ;;  %v23603_v7 = vshll.u32 %v21408_v2, 16 }
 0x67d   : > { %v8805_v37 = vadd.f32 %v21283_v17, %v8709_v34  ;;  %v8711_v31 = vpop.f32.mrb[22].mxu1  ;;  %v11442_v48 = vrot.slane %v21612_v19, 2  ;;  %v23074_v35 = vshll.u32 %v21612_v19, 16  ;;  %v23604_v50 = vshrl.u32 %v21536_v10, 16 }
 0x67e   : > { %v8844_v6 = vmax.f32 %v8804_v56, 0.0  ;;  %v8806_v49 = vadd.f32 %v21279_v63, %v8711_v31  ;;  %v8713_v16 = vpop.f32.mrb[23].mxu1  ;;  %v10782_v61 = vrot.slane %v23585_v25, 2  ;;  %v23587_v63 = vrot.slane %v21459_v58, 2 }
 0x67f   : > { %v8845_v43 = vmax.f32 %v8805_v37, 0.0  ;;  %v8807_v34 = vadd.f32 %v21283_v17, %v8713_v16  ;;  %v21635_v60 = vsel %vm8369_vm6, %v11438_v29, %v11442_v48  ;;  %v9158_v36 = vrot.slane %v23074_v35, 1 }
 0x680   : > { %23586 = vst [vmem:[#allocation45_spill] sm:$0xff] %v21635_v60  ;;  %v8846_v26 = vmax.f32 %v8806_v49, 0.0  ;;  %14066 = vmatprep.mubr.msk.bf16.mxu1 %vm8849_vm7, %v21635_v60  ;;  %v21644_v33 = vsel %vm8369_vm6, %v23587_v63, %v11440_v4  ;;  %v21646_v56 = vshll.u32 %v8997_v47, 16  ;;  %v21654_v29 = vsel %vm6644_vm3, %v9146_v15, %v9150_v23  ;;  %v8924_v31 = vld [vmem:[#allocation3 + $0x108] sm:$0xff] }
 0x681   : > { %23588 = vst [vmem:[#allocation44_spill] sm:$0xff] %v21644_v33  ;;  %8886 = vst.msk [vmem:[#allocation3 + $0x128] sm:$0xff] %vm8849_vm7, %v8845_v43  ;;  %v8847_v17 = vmax.f32 %v8807_v34, 0.0  ;;  %11870 = vmatmul.mubr.bf16.gmra.mrb[32].mxu1 %v21644_v33  ;;  %v21651_v16 = vsel %vm6644_vm3, %v9154_v30, %v9158_v36  ;;  %v11444_v47 = vrot.slane %v21603_v20, 2  ;;  %v9166_v43 = vrot.slane %v23076_v57, 1 }
 0x682   : > { %13736 = vmatprep.mubr.msk.bf16.mxu0 %vm8849_vm7, %v21651_v16  ;;  %v8926_v49 = vld [vmem:[#allocation3 + $0x118] sm:$0xff]  ;;  %v21662_v25 = vpack.c.bf16 %v8846_v26, %v8844_v6  ;;  %v10783_v34 = vor.u32 %v10782_v61, %v10781_v45  ;;  %v23589_v30 = vpack.c.bf16 %v21512_v59, %v21512_v59  ;;  %v21672_v37 = vrot.slane %v11367_v28, 2 }
 0x683   : > { %8888 = vst.msk [vmem:[#allocation3 + $0x138] sm:$0xff] %vm8849_vm7, %v8847_v17  ;;  %9501 = vmatmul.mubr.bf16.gmra.mrb[224].mxu0 %v21654_v29  ;;  %v21666_v15 = vpack.c.bf16 %v8926_v49, %v8924_v31  ;;  %v23590_v33 = vshrl.u32 %v21532_v13, 16  ;;  %v23079_v26 = vshrl.u32 %v21603_v20, 16  ;;  %v23591_v61 = vshrl.u32 %v21419_v44, 16 }
 0x684   : > { %v11454_v63 = vrot.slane %v23589_v30, 2  ;;  %v23592_v6 = vshll.u32 %v21419_v44, 16  ;;  %v9168_v59 = vshrl.u32 %v21612_v19, 16  ;;  %v21686_v30 = vsel %vm8369_vm6, %v11440_v4, %v11444_v47 }
 0x685   : > { %v9162_v57 = vor.u32 %v23590_v33, %v9150_v23  ;;  %v10793_v45 = vrot.slane %v23591_v61, 1  ;;  %v11446_v31 = vrot.slane %v21666_v15, 2  ;;  %v23080_v49 = vshll.u32 %v21666_v15, 16  ;;  %23593 = vst [vmem:[#allocation74_spill] sm:$0xff] %v21686_v30 }
 0x686   : > { %v10794_v17 = vrot.slane %v23592_v6, 2  ;;  %v9178_v33 = vor.u32 %v23079_v26, %v9166_v43  ;;  %v9170_v35 = vor.u32 %v9168_v59, %v9158_v36  ;;  %v23595_v28 = vshrl.u32 %v21375_v11, 16 }
 0x687   : > { %v21689_v23 = vsel %vm6644_vm3, %v9162_v57, %v9166_v43  ;;  %v21695_v6 = vsel %vm8369_vm6, %v11442_v48, %v11446_v31  ;;  %v9174_v60 = vrot.slane %v23080_v49, 1  ;;  %v21707_v43 = vsel %vm7880_vm4, %v21471_v46, %v10783_v34 }
 0x688   : > { %23594 = vst [vmem:[#allocation19_spill] sm:$0xff] %v21695_v6  ;;  %v10789_v5 = vrot.slane %v23595_v28, 1  ;;  %14067 = vmatprep.mubr.msk.bf16.mxu1 %vm8849_vm7, %v21695_v6  ;;  %23596 = vst [vmem:[#allocation75_spill] sm:$0xff] %v21707_v43  ;;  %v10795_v48 = vor.u32 %v10794_v17, %v10793_v45  ;;  %v23597_v61 = vshll.u32 %v21662_v25, 16  ;;  %v23598_v26 = vshll.u32 %v21375_v11, 16  ;;  %v8928_v46 = vld [vmem:[#allocation3 + $0x128] sm:$0xff] }
 0x689   : > { %11878 = vmatmul.mubr.bf16.gmra.mrb[36].mxu1 %v21686_v30  ;;  %v21711_v36 = vsel %vm6644_vm3, %v9170_v35, %v9174_v60  ;;  %v23599_v57 = vshrl.u32 %v21468_v52, 16  ;;  %v9184_v45 = vshrl.u32 %v21666_v15, 16  ;;  %v23601_v17 = vshll.u32 %v21468_v52, 16 }
 0x68a   : > { %v9182_v28 = vrot.slane %v23597_v61, 1  ;;  %v10790_v49 = vrot.slane %v23598_v26, 2  ;;  %13737 = vmatprep.mubr.msk.bf16.mxu0 %vm8849_vm7, %v21711_v36  ;;  %v8930_v4 = vld [vmem:[#allocation3 + $0x138] sm:$0xff]  ;;  %v21724_v35 = vsel %vm7880_vm4, %v21545_v21, %v10795_v48  ;;  %v23602_v30 = vshrl.u32 %v21408_v2, 16 }
 0x68b   : > { %v10801_v6 = vrot.slane %v23599_v57, 1  ;;  %23600 = vst [vmem:[#allocation20_spill] sm:$0xff] %v21724_v35  ;;  %v10802_v61 = vrot.slane %v23601_v17, 2  ;;  %9511 = vmatmul.mubr.bf16.gmra.mrb[228].mxu0 %v21689_v23  ;;  %v21731_v57 = vpack.c.bf16 %v8930_v4, %v8928_v46  ;;  %v10798_v62 = vrot.slane %v23603_v7, 2 }
 0x68c   : > { %v10797_v26 = vrot.slane %v23602_v30, 1  ;;  %v10791_v43 = vor.u32 %v10790_v49, %v10789_v5  ;;  %v10809_v0 = vrot.slane %v23604_v50, 1  ;;  %v23605_v21 = vshll.u32 %v21536_v10, 16 }
 0x68d   : > { %v10803_v24 = vor.u32 %v10802_v61, %v10801_v6  ;;  %v23606_v17 = vshrl.u32 %v21459_v58, 16  ;;  %v23607_v30 = vshll.u32 %v21459_v58, 16  ;;  %v11450_v4 = vrot.slane %v21731_v57, 2 }
 0x68e   : > { %v10810_v35 = vrot.slane %v23605_v21, 2  ;;  %v23608_v5 = vrot.slane %v21662_v25, 2  ;;  %v9188_v7 = vshll.u32 %v21731_v57, 16  ;;  %v21751_v50 = vsel %vm6644_vm3, %v9178_v33, %v9182_v28 }
 0x68f   : > { %v10805_v52 = vrot.slane %v23606_v17, 1  ;;  %v10806_v11 = vrot.slane %v23607_v30, 2  ;;  %v21754_v6 = vsel %vm7880_vm4, %v10783_v34, %v10791_v43  ;;  %v21757_v46 = vsel %vm7880_vm4, %v10795_v48, %v10803_v24 }
 0x690   : > { %v21747_v49 = vsel %vm8369_vm6, %v11444_v47, %v23608_v5  ;;  %v10799_v61 = vor.u32 %v10798_v62, %v10797_v26  ;;  %v10811_v21 = vor.u32 %v10810_v35, %v10809_v0  ;;  %v21760_v17 = vsel %vm8369_vm6, %v11446_v31, %v11450_v4 }
 0x691   : > { %23609 = vst [vmem:[#allocation77_spill] sm:$0xff] %v21747_v49  ;;  %23610 = vst [vmem:[#allocation46_spill] sm:$0xff] %v21760_v17  ;;  %v9186_v30 = vor.u32 %v9184_v45, %v9174_v60  ;;  %v9190_v58 = vrot.slane %v9188_v7, 1  ;;  %v9200_v47 = vshrl.u32 %v21731_v57, 16  ;;  %14068 = vmatprep.mubr.msk.bf16.mxu1 %vm8849_vm7, %v21760_v17  ;;  %v21766_v33 = vsel %vm8369_vm6, %v11450_v4, %v11454_v63 }
 0x692   : > { %23611 = vst [vmem:[#allocation47_spill] sm:$0xff] %v21766_v33  ;;  %v21769_v34 = vsel %vm7880_vm4, %v10791_v43, %v10799_v61  ;;  %v21772_v48 = vsel %vm7880_vm4, %v10803_v24, %v10811_v21  ;;  %v10807_v0 = vor.u32 %v10806_v11, %v10805_v52  ;;  %11886 = vmatmul.mubr.bf16.gmra.mrb[40].mxu1 %v21747_v49  ;;  %v10817_v31 = vrot.slane %v9168_v59, 1 }
 0x693   : > { %v21776_v62 = vsel %vm6644_vm3, %v9186_v30, %v9190_v58  ;;  %v9202_v60 = vor.u32 %v9200_v47, %v9190_v58  ;;  %v23612_v35 = vshll.u32 %v21612_v19, 16  ;;  %14069 = vmatprep.mubr.msk.bf16.mxu1 %vm8849_vm7, %v21766_v33  ;;  %v23614_v11 = vshrl.u32 %v21532_v13, 16 }
 0x694   : > { %13738 = vmatprep.mubr.msk.bf16.mxu0 %vm8849_vm7, %v21776_v62  ;;  %v21785_v24 = vsel %vm7880_vm4, %v10799_v61, %v10807_v0  ;;  %v23615_v63 = vshll.u32 %v21532_v13, 16  ;;  %v10825_v58 = vrot.slane %v9184_v45, 1  ;;  %v23616_v59 = vrot.slane %v21616_v12, 1 }
 0x695   : > { %v10818_v26 = vrot.slane %v23612_v35, 2  ;;  %23613 = vst [vmem:[#allocation48_spill] sm:$0xff] %v21785_v24  ;;  %v10813_v52 = vrot.slane %v23614_v11, 1  ;;  %9521 = vmatmul.mubr.bf16.gmra.mrb[232].mxu0 %v21751_v50  ;;  %v23617_v30 = vshll.u32 %v21666_v15, 16  ;;  %v23618_v61 = vshrl.u32 %v21603_v20, 16 }
 0x696   : > { %v10814_v43 = vrot.slane %v23615_v63, 2  ;;  %v21795_v4 = vsel %vm6644_vm3, %v9202_v60, %v23616_v59  ;;  %v23619_v45 = vshll.u32 %v21603_v20, 16  ;;  %v10833_v49 = vrot.slane %v9200_v47, 1 }
 0x697   : > { %v10819_v5 = vor.u32 %v10818_v26, %v10817_v31  ;;  %v10826_v35 = vrot.slane %v23617_v30, 2  ;;  %v10821_v33 = vrot.slane %v23618_v61, 1  ;;  %13739 = vmatprep.mubr.msk.bf16.mxu0 %vm8849_vm7, %v21795_v4  ;;  %v10834_v17 = vrot.slane %v9188_v7, 2 }
 0x698   : > { %v10815_v11 = vor.u32 %v10814_v43, %v10813_v52  ;;  %v10822_v63 = vrot.slane %v23619_v45, 2  ;;  %v23620_v31 = vshrl.u32 %v21662_v25, 16  ;;  %v23621_v59 = vshll.u32 %v21662_v25, 16 }
 0x699   : > { %v21806_v12 = vsel %vm7880_vm4, %v10811_v21, %v10819_v5  ;;  %v10827_v60 = vor.u32 %v10826_v35, %v10825_v58  ;;  %v21817_v45 = vor.u32 %v10834_v17, %v10833_v49  ;;  %v23623_v47 = vrot.slane %v21662_v25, 2 }
 0x69a   : > { %v10829_v26 = vrot.slane %v23620_v31, 1  ;;  %v10830_v30 = vrot.slane %v23621_v59, 2  ;;  %v23622_v61 = vmov %v23620_v31  ;;  %v21815_v52 = vsel %vm7880_vm4, %v10807_v0, %v10815_v11  ;;  %v16234_v0 = vld [vmem:[%s22949_s5 + $0x1c] ss:$12 sps:$4 sm:$0xff]   ;;  %v16255_v31 = vld [vmem:[%s22949_s5 + $0xc4] ss:$12 sps:$4 sm:$0xff]  }
 0x69b   : > { %v9194_v24 = vor.u32 %v23622_v61, %v9182_v28  ;;  %v10823_v43 = vor.u32 %v10822_v63, %v10821_v33  ;;  %v21820_v7 = vsel %vm7880_vm4, %v10819_v5, %v10827_v60  ;;  %v21828_v58 = vsel %vm8369_vm6, %v23623_v47, %v21672_v37  ;;  %v16229_v37 = vld [vmem:[%s22949_s5] ss:$12 sps:$4 sm:$0xff]   ;;  %v16243_v5 = vld [vmem:[%s22949_s5 + $0x64] ss:$12 sps:$4 sm:$0xff]  }
 0x69c   : > { %v21822_v21 = vor.u32 %v10830_v30, %v10829_v26  ;;  %v21835_v28 = vsel %vm7880_vm4, %v10827_v60, %v21817_v45  ;;  %11894 = vmatmul.mubr.bf16.gmra.mrb[44].mxu1 %v21828_v58  ;;  %v23624_v17 = vrot.slane %v21646_v56, 1  ;;  %v16232_v56 = vld [vmem:[%s22949_s5 + $0x18] ss:$12 sps:$4 sm:$0xff]   ;;  %v16249_v63 = vld [vmem:[%s22949_s5 + $0x94] ss:$12 sps:$4 sm:$0xff]   ;;  %v23625_v59 = vmov 0  }
 0x69d   : > { %v21831_v35 = vsel %vm7880_vm4, %v10815_v11, %v10823_v43  ;;  %v16241_v11 = vld [vmem:[%s22949_s5 + $0x60] ss:$12 sps:$4 sm:$0xff]   ;;  %v16247_v60 = vld [vmem:[%s22949_s5 + $0x90] ss:$12 sps:$4 sm:$0xff]   ;;  %v16263_v30 = vld [vmem:[%s22949_s5 + $0x68] ss:$12 sps:$4 sm:$0xff]  }
 0x69e   : > { %v21840_v49 = vsel %vm7880_vm4, %v10823_v43, %v21822_v21  ;;  %v21845_v33 = vsel %vm6644_vm3, %v9194_v24, %v23624_v17  ;;  %v16235_v24 = vld [vmem:[%s22949_s5 + $0x30] ss:$12 sps:$4 sm:$0xff]   ;;  %v16253_v26 = vld [vmem:[%s22949_s5 + $0xc0] ss:$12 sps:$4 sm:$0xff]   ;;  %v16265_v43 = vld [vmem:[%s22949_s5 + $0x98] ss:$12 sps:$4 sm:$0xff]  }
 0x69f   : > { %9531 = vmatmul.mubr.bf16.gmra.mrb[236].mxu0 %v21845_v33  ;;  %v16264_v61 = vld [vmem:[%s22949_s5 + $0x80] ss:$12 sps:$4 sm:$0xff]   ;;  %v16266_v47 = vld [vmem:[%s22949_s5 + $0xb0] ss:$12 sps:$4 sm:$0xff]   ;;  %v16267_v17 = vld [vmem:[%s22949_s5 + $0xc8] ss:$12 sps:$4 sm:$0xff]  }
 0x6a0   : > { %13740 = vmatprep.mubr.msk.bf16.mxu0 %vm8849_vm7, %v21328_v9  ;;  %v16237_v9 = vld [vmem:[%s22949_s5 + $0x34] ss:$12 sps:$4 sm:$0xff]  }
 0x6a7   : > { %9574 = vmatmul.mubr.bf16.vlgmr.msra.gmra.mrb[240].mxu0 %v21333_v53  ;;  %v16240_v53 = vld [vmem:[%s22949_s5 + $0x4c] ss:$12 sps:$4 sm:$0xff]  }
 0x6a8   : > { %13741 = vmatprep.mubr.msk.bf16.mxu0 %vm8849_vm7, %v21366_v40  ;;  %9836 = vmatpush1.bf16.msra.mxu0 %v16229_v37  ;;  %v16238_v40 = vld [vmem:[%s22949_s5 + $0x48] ss:$12 sps:$4 sm:$0xff]  }
 0x6a9   : > { %9837 = vmatprep.subr.bf16.mxu0 %v16234_v0  ;;  %v23627_v37 = vld [vmem:[#allocation70_spill] sm:$0xff]  ;;  %v16268_v0 = vld [vmem:[%s22949_s5 + $0xe0] ss:$12 sps:$4 sm:$0xff]  }
 0x6ac   : > { %9838 = vmatpush1.bf16.msra.mxu0 %v16232_v56  ;;  %v16271_v56 = vld [vmem:[%s22949_s5 + $0x1e4] ss:$12 sps:$4 sm:$0xff]  }
 0x6ad   : > { %9839 = vmatprep.subr.bf16.mxu0 %v16237_v9  ;;  %v23628_v9 = vld [vmem:[#allocation38_spill] sm:$0xff] }
 0x6af   : > { %9582 = vmatmul.mubr.bf16.gmra.mrb[244].mxu0 %v21372_v51  ;;  %v16246_v51 = vld [vmem:[%s22949_s5 + $0x7c] ss:$12 sps:$4 sm:$0xff]  }
 0x6b0   : > { %13742 = vmatprep.mubr.msk.bf16.mxu0 %vm8849_vm7, %v21404_v27  ;;  %9840 = vmatpush1.bf16.msra.mxu0 %v16235_v24  ;;  %v16244_v27 = vld [vmem:[%s22949_s5 + $0x78] ss:$12 sps:$4 sm:$0xff]   ;;  %v16269_v24 = vld [vmem:[%s22949_s5 + $0x1e0] ss:$12 sps:$4 sm:$0xff]  }
 0x6b1   : > { %9841 = vmatprep.subr.bf16.mxu0 %v16240_v53  ;;  %v16274_v53 = vld [vmem:[%s22949_s5 + $0x1fc] ss:$12 sps:$4 sm:$0xff]  }
 0x6b4   : > { %9842 = vmatpush1.bf16.msra.mxu0 %v16238_v40 }
 0x6b5   : > { %9843 = vmatprep.subr.bf16.mxu0 %v16243_v5  ;;  %v16272_v5 = vld [vmem:[%s22949_s5 + $0x1f8] ss:$12 sps:$4 sm:$0xff]  }
 0x6b7   : > { %9590 = vmatmul.mubr.bf16.gmra.mrb[248].mxu0 %v21413_v39  ;;  %v16252_v39 = vld [vmem:[%s22949_s5 + $0xac] ss:$12 sps:$4 sm:$0xff]  }
 0x6b8   : > { %13743 = vmatprep.mubr.msk.bf16.mxu0 %vm8849_vm7, %v21449_v8  ;;  %9844 = vmatpush1.bf16.msra.mxu0 %v16241_v11  ;;  %v16250_v8 = vld [vmem:[%s22949_s5 + $0xa8] ss:$12 sps:$4 sm:$0xff]  }
 0x6b9   : > { %9845 = vmatprep.subr.bf16.mxu0 %v16246_v51  ;;  %v16277_v51 = vld [vmem:[%s22949_s5 + $0x214] ss:$12 sps:$4 sm:$0xff]  }
 0x6bc   : > { %9846 = vmatpush1.bf16.msra.mxu0 %v16244_v27 }
 0x6bd   : > { %9847 = vmatprep.subr.bf16.mxu0 %v16249_v63 }
 0x6bf   : > { %9598 = vmatmul.mubr.bf16.gmra.mrb[252].mxu0 %v21456_v41  ;;  %v16258_v41 = vld [vmem:[%s22949_s5 + $0xdc] ss:$12 sps:$4 sm:$0xff]  }
 0x6c0   : > { %13744 = vmatprep.mubr.msk.bf16.mxu0 %vm8849_vm7, %v21520_v55  ;;  %9848 = vmatpush1.bf16.msra.mxu0 %v16247_v60  ;;  %v16256_v55 = vld [vmem:[%s22949_s5 + $0xd8] ss:$12 sps:$4 sm:$0xff]   ;;  %v16275_v60 = vld [vmem:[%s22949_s5 + $0x210] ss:$12 sps:$4 sm:$0xff]  }
 0x6c1   : > { %9849 = vmatprep.subr.bf16.mxu0 %v16252_v39  ;;  %v16280_v39 = vld [vmem:[%s22949_s5 + $0x22c] ss:$12 sps:$4 sm:$0xff]  }
 0x6c4   : > { %9850 = vmatpush1.bf16.msra.mxu0 %v16250_v8 }
 0x6c5   : > { %9851 = vmatprep.subr.bf16.mxu0 %v16255_v31  ;;  %v16278_v31 = vld [vmem:[%s22949_s5 + $0x228] ss:$12 sps:$4 sm:$0xff]  }
 0x6c7   : > { %9606 = vmatmul.mubr.bf16.gmra.mrb[0].mxu0 %v21529_v22  ;;  %v8892_v22 = vld [vmem:[#allocation3 + $0x8] sm:$0xff] }
 0x6c8   : > { %13745 = vmatprep.mubr.msk.bf16.mxu0 %vm8849_vm7, %v21592_v54  ;;  %9852 = vmatpush1.bf16.msra.mxu0 %v16253_v26  ;;  %v21935_v54 = vld [vmem:[#allocation3 + $0x18] sm:$0xff] }
 0x6c9   : > { %9853 = vmatprep.subr.bf16.mxu0 %v16258_v41  ;;  %v16283_v41 = vld [vmem:[%s22949_s5 + $0x244] ss:$12 sps:$4 sm:$0xff]  }
 0x6cc   : > { %9854 = vmatpush1.bf16.msra.mxu0 %v16256_v55 }
 0x6cd   : > { %9968 = vmatprep.subr.bf16.mxu0 %v23625_v59 }
 0x6cf   : > { %9614 = vmatmul.mubr.bf16.gmra.mrb[4].mxu0 %v21600_v38  ;;  %v8932_v38 = vpack.c.bf16 %v21935_v54, %v8892_v22 }
 0x6d0   : > { %13746 = vmatprep.mubr.msk.bf16.mxu0 %vm8849_vm7, %v21651_v16  ;;  %v8891_v16 = vld [vmem:[#allocation3] sm:$0xff] }
 0x6d7   : > { %9622 = vmatmul.mubr.bf16.gmra.mrb[8].mxu0 %v21654_v29  ;;  %v16259_v29 = vld [vmem:[%s22949_s5 + $0x8] ss:$12 sps:$4 sm:$0xff]  }
 0x6d8   : > { %13747 = vmatprep.mubr.msk.bf16.mxu0 %vm8849_vm7, %v21711_v36 }
 0x6df   : > { %9630 = vmatmul.mubr.bf16.gmra.mrb[12].mxu0 %v21689_v23  ;;  %v21943_v23 = vld [vmem:[#allocation3 + $0x10] sm:$0xff] }
 0x6e0   : > { %13748 = vmatprep.mubr.msk.bf16.mxu0 %vm8849_vm7, %v21776_v62  ;;  %v8931_v36 = vpack.c.bf16 %v21943_v23, %v8891_v16  ;;  %v16261_v62 = vld [vmem:[%s22949_s5 + $0x38] ss:$12 sps:$4 sm:$0xff]   ;;  %v16286_v16 = vld [vmem:[%s22949_s5 + $0x25c] ss:$12 sps:$4 sm:$0xff]  }
 0x6e7   : > { %9638 = vmatmul.mubr.bf16.gmra.mrb[16].mxu0 %v21751_v50  ;;  %v16260_v50 = vld [vmem:[%s22949_s5 + $0x20] ss:$12 sps:$4 sm:$0xff]  }
 0x6e8   : > { %13749 = vmatprep.mubr.msk.bf16.mxu0 %vm8849_vm7, %v21795_v4  ;;  %v16262_v4 = vld [vmem:[%s22949_s5 + $0x50] ss:$12 sps:$4 sm:$0xff]  }
 0x6ef   : > { %9646 = vmatmul.mubr.bf16.gmra.mrb[20].mxu0 %v21845_v33  ;;  %v23626_v33 = vld [vmem:[#allocation64_spill] sm:$0xff] }
 0x6f0   : > { %13780 = vmatprep.mubr.msk.bf16.mxu0 %vm8849_vm7, %v8932_v38 }
 0x6f7   : > { %9868 = vmatmul.mubr.bf16.vlgmr.msra.gmra.mrb[200].mxu0 %v8931_v36 }
 0x6f8   : > { %13781 = vmatprep.mubr.msk.bf16.mxu0 %vm8849_vm7, %v21313_v1  ;;  %9969 = vmatpush1.bf16.msra.mxu0 %v16259_v29 }
 0x6f9   : > { %9970 = vmatprep.subr.bf16.mxu0 %v23625_v59 }
 0x6fc   : > { %9971 = vmatpush1.bf16.msra.mxu0 %v16260_v50 }
 0x6fd   : > { %9972 = vmatprep.subr.bf16.mxu0 %v23625_v59 }
 0x6ff   : > { %9878 = vmatmul.mubr.bf16.gmra.mrb[204].mxu0 %v21300_v18 }
 0x700   : > { %13782 = vmatprep.mubr.msk.bf16.mxu0 %vm8849_vm7, %v21340_v3  ;;  %9973 = vmatpush1.bf16.msra.mxu0 %v16261_v62  ;;  %v16289_v62 = vld [vmem:[%s22949_s5 + $0x274] ss:$12 sps:$4 sm:$0xff]  }
 0x701   : > { %9974 = vmatprep.subr.bf16.mxu0 %v23625_v59 }
 0x704   : > { %9975 = vmatpush1.bf16.msra.mxu0 %v16262_v4 }
 0x705   : > { %9976 = vmatprep.subr.bf16.mxu0 %v23625_v59 }
 0x707   : > { %9888 = vmatmul.mubr.bf16.gmra.mrb[208].mxu0 %v21310_v32 }
 0x708   : > { %13783 = vmatprep.mubr.msk.bf16.mxu0 %vm8849_vm7, %v21383_v42  ;;  %9977 = vmatpush1.bf16.msra.mxu0 %v16263_v30 }
 0x709   : > { %9978 = vmatprep.subr.bf16.mxu0 %v23625_v59 }
 0x70c   : > { %9979 = vmatpush1.bf16.msra.mxu0 %v16264_v61  ;;  %v16287_v61 = vld [vmem:[%s22949_s5 + $0x270] ss:$12 sps:$4 sm:$0xff]  }
 0x70d   : > { %9980 = vmatprep.subr.bf16.mxu0 %v23625_v59 }
 0x70f   : > { %9898 = vmatmul.mubr.bf16.gmra.mrb[212].mxu0 %v21336_v14 }
 0x710   : > { %13784 = vmatprep.mubr.msk.bf16.mxu0 %vm8849_vm7, %v21419_v44  ;;  %9981 = vmatpush1.bf16.msra.mxu0 %v16265_v43  ;;  %v16292_v43 = vld [vmem:[%s22949_s5 + $0x28c] ss:$12 sps:$4 sm:$0xff]  }
 0x711   : > { %9982 = vmatprep.subr.bf16.mxu0 %v23625_v59 }
 0x714   : > { %9983 = vmatpush1.bf16.msra.mxu0 %v16266_v47 }
 0x715   : > { %9984 = vmatprep.subr.bf16.mxu0 %v23625_v59 }
 0x717   : > { %9908 = vmatmul.mubr.bf16.gmra.mrb[216].mxu0 %v23626_v33 }
 0x718   : > { %13785 = vmatprep.mubr.msk.bf16.mxu0 %vm8849_vm7, %v23627_v37  ;;  %9985 = vmatpush1.bf16.msra.mxu0 %v16267_v17  ;;  %v16290_v17 = vld [vmem:[%s22949_s5 + $0x288] ss:$12 sps:$4 sm:$0xff]  }
 0x719   : > { %9986 = vmatprep.subr.bf16.mxu0 %v23625_v59 }
 0x71c   : > { %9987 = vmatpush1.bf16.msra.mxu0 %v16268_v0 }
 0x71d   : > { %10394 = vmatprep.subr.bf16.mxu0 %v16271_v56  ;;  %v16295_v56 = vld [vmem:[%s22949_s5 + $0x2a4] ss:$12 sps:$4 sm:$0xff]  }
 0x71f   : > { %9918 = vmatmul.mubr.bf16.gmra.mrb[220].mxu0 %v21408_v2 }
 0x720   : > { %13786 = vmatprep.mubr.msk.bf16.mxu0 %vm8849_vm7, %v21536_v10 }
 0x727   : > { %9928 = vmatmul.mubr.bf16.gmra.mrb[224].mxu0 %v23628_v9 }
 0x728   : > { %13787 = vmatprep.mubr.msk.bf16.mxu0 %vm8849_vm7, %v21612_v19 }
 0x72f   : > { %9938 = vmatmul.mubr.bf16.gmra.mrb[228].mxu0 %v21532_v13 }
 0x730   : > { %13788 = vmatprep.mubr.msk.bf16.mxu0 %vm8849_vm7, %v21666_v15 }
 0x737   : > { %9948 = vmatmul.mubr.bf16.gmra.mrb[232].mxu0 %v21603_v20 }
 0x738   : > { %13789 = vmatprep.mubr.msk.bf16.mxu0 %vm8849_vm7, %v21731_v57 }
 0x73f   : > { %9958 = vmatmul.mubr.bf16.gmra.mrb[236].mxu0 %v21662_v25 }
 0x740   : > { %13790 = vmatprep.mubr.msk.bf16.mxu0 %vm8849_vm7, %v8932_v38  ;;  %v16281_v38 = vld [vmem:[%s22949_s5 + $0x240] ss:$12 sps:$4 sm:$0xff]  }
 0x744   : > { %v22021_v40 = vpop.f32.mrb[24].mxu1 }
 0x745   : > { %v11857_v11 = vpop.f32.mrb[25].mxu1 }
 0x746   : > { %v11858_v27 = vpop.f32.mrb[26].mxu1  ;;  %v16298_v11 = vld [vmem:[%s22949_s5 + $0x2bc] ss:$12 sps:$4 sm:$0xff]  }
 0x747   : > { %10001 = vmatmul.mubr.bf16.vlgmr.msra.gmra.mrb[240].mxu0 %v8931_v36  ;;  %v11860_v63 = vpop.f32.mrb[27].mxu1  ;;  %v16284_v36 = vld [vmem:[%s22949_s5 + $0x258] ss:$12 sps:$4 sm:$0xff]  }
 0x748   : > { %13791 = vmatprep.mubr.msk.bf16.mxu0 %vm8849_vm7, %v21313_v1  ;;  %10395 = vmatpush1.bf16.msra.mxu0 %v16269_v24  ;;  %v16296_v27 = vld [vmem:[%s22949_s5 + $0x2b8] ss:$12 sps:$4 sm:$0xff]  }
 0x749   : > { %10396 = vmatprep.subr.bf16.mxu0 %v16274_v53 }
 0x74c   : > { %10397 = vmatpush1.bf16.msra.mxu0 %v16272_v5  ;;  %v22038_v8 = vpop.f32.mrb[28].mxu1  ;;  %v16293_v5 = vld [vmem:[%s22949_s5 + $0x2a0] ss:$12 sps:$4 sm:$0xff]  }
 0x74d   : > { %10398 = vmatprep.subr.bf16.mxu0 %v16277_v51  ;;  %v11865_v26 = vpop.f32.mrb[29].mxu1 }
 0x74e   : > { %v22046_v55 = vpop.f32.mrb[30].mxu1 }
 0x74f   : > { %10009 = vmatmul.mubr.bf16.gmra.mrb[244].mxu0 %v21300_v18  ;;  %v11868_v22 = vpop.f32.mrb[31].mxu1 }
 0x750   : > { %13792 = vmatprep.mubr.msk.bf16.mxu0 %vm8849_vm7, %v21340_v3  ;;  %10399 = vmatpush1.bf16.msra.mxu0 %v16275_v60 }
 0x751   : > { %10400 = vmatprep.subr.bf16.mxu0 %v16280_v39 }
 0x754   : > { %10401 = vmatpush1.bf16.msra.mxu0 %v16278_v31  ;;  %v22057_v29 = vpop.f32.mrb[32].mxu1 }
 0x755   : > { %10402 = vmatprep.subr.bf16.mxu0 %v16283_v41  ;;  %v11873_v50 = vpop.f32.mrb[33].mxu1 }
 0x756   : > { %v22065_v4 = vpop.f32.mrb[34].mxu1 }
 0x757   : > { %10017 = vmatmul.mubr.bf16.gmra.mrb[248].mxu0 %v21310_v32  ;;  %v11876_v30 = vpop.f32.mrb[35].mxu1 }
 0x758   : > { %13793 = vmatprep.mubr.msk.bf16.mxu0 %vm8849_vm7, %v21383_v42  ;;  %10403 = vmatpush1.bf16.msra.mxu0 %v16281_v38  ;;  %v10082_v38 = vld [vmem:[#allocation3 + $0x8] sm:$0xfc] }
 0x759   : > { %10404 = vmatprep.subr.bf16.mxu0 %v16286_v16  ;;  %v10086_v16 = vpack.c.bf16 %v21935_v54, %v10082_v38  ;;  %v10168_v38 = vrot.slane %v21419_v44, 1 }
 0x75b   : > { %v10155_v50 = vrot.slane %v10086_v16, 1  ;;  %v16303_v16 = vld [vmem:[%s22949_s5 + $0x248] ss:$12 sps:$4 sm:$0xff]  }
 0x75c   : > { %10405 = vmatpush1.bf16.msra.mxu0 %v16284_v36  ;;  %v11879_v47 = vpop.f32.mrb[36].mxu1  ;;  %v10156_v36 = vrot.slane %v21313_v1, 1 }
 0x75d   : > { %10406 = vmatprep.subr.bf16.mxu0 %v16289_v62  ;;  %v11881_v0 = vpop.f32.mrb[37].mxu1  ;;  %v10081_v62 = vld [vmem:[#allocation3] sm:$0xfc]  ;;  %v10160_v47 = vrot.slane %v21340_v3, 1 }
 0x75e   : > { %v22082_v24 = vpop.f32.mrb[38].mxu1  ;;  %v22119_v30 = vsel %vm7459_vm5, %v10155_v50, %v10156_v36  ;;  %v16299_v0 = vld [vmem:[%s22949_s5 + $0x1e8] ss:$12 sps:$4 sm:$0xff]  }
 0x75f   : > { %10025 = vmatmul.mubr.bf16.gmra.mrb[252].mxu0 %v21336_v14  ;;  %v11884_v53 = vpop.f32.mrb[39].mxu1 }
 0x760   : > { %13794 = vmatprep.mubr.msk.bf16.mxu0 %vm8849_vm7, %v21419_v44  ;;  %10407 = vmatpush1.bf16.msra.mxu0 %v16287_v61  ;;  %v10085_v61 = vpack.c.bf16 %v21943_v23, %v10081_v62  ;;  %v22134_v53 = vsel %vm7459_vm5, %v10156_v36, %v10160_v47  ;;  %v16304_v62 = vld [vmem:[%s22949_s5 + $0x260] ss:$12 sps:$4 sm:$0xff]  }
 0x761   : > { %10408 = vmatprep.subr.bf16.mxu0 %v16292_v43  ;;  %v10153_v43 = vrot.slane %v21300_v18, 1 }
 0x764   : > { %10409 = vmatpush1.bf16.msra.mxu0 %v16290_v17  ;;  %v10152_v17 = vrot.slane %v10085_v61, 1  ;;  %v10166_v61 = vrot.slane %v23626_v33, 1 }
 0x765   : > { %10410 = vmatprep.subr.bf16.mxu0 %v16295_v56  ;;  %v22093_v51 = vpop.f32.mrb[40].mxu1 }
 0x766   : > { %v11889_v63 = vpop.f32.mrb[41].mxu1  ;;  %v22130_v56 = vsel %vm7459_vm5, %v10152_v17, %v10153_v43 }
 0x767   : > { %10033 = vmatmul.mubr.bf16.gmra.mrb[0].mxu0 %v23626_v33  ;;  %v22098_v60 = vpop.f32.mrb[42].mxu1  ;;  %v16301_v63 = vld [vmem:[%s22949_s5 + $0x218] ss:$12 sps:$4 sm:$0xff]  }
 0x768   : > { %13795 = vmatprep.mubr.msk.bf16.mxu0 %vm8849_vm7, %v23627_v37  ;;  %10411 = vmatpush1.bf16.msra.mxu0 %v16293_v5  ;;  %v11892_v39 = vpop.f32.mrb[43].mxu1  ;;  %v16300_v5 = vld [vmem:[%s22949_s5 + $0x200] ss:$12 sps:$4 sm:$0xff]  }
 0x769   : > { %10412 = vmatprep.subr.bf16.mxu0 %v16298_v11  ;;  %v10158_v11 = vrot.slane %v21310_v32, 1 }
 0x76b   : > { %v22149_v39 = vsel %vm7459_vm5, %v10153_v43, %v10158_v11  ;;  %v10172_v43 = vrot.slane %v23627_v37, 1  ;;  %v16306_v37 = vld [vmem:[%s22949_s5 + $0x290] ss:$12 sps:$4 sm:$0xff]  }
 0x76c   : > { %10413 = vmatpush1.bf16.msra.mxu0 %v16296_v27  ;;  %v10164_v27 = vrot.slane %v21383_v42, 1 }
 0x76d   : > { %10527 = vmatprep.subr.bf16.mxu0 %v23625_v59 }
 0x76e   : > { %v22172_v50 = vsel %vm7459_vm5, %v10164_v27, %v10168_v38 }
 0x76f   : > { %10041 = vmatmul.mubr.bf16.gmra.mrb[4].mxu0 %v21408_v2  ;;  %v22104_v31 = vpop.f32.mrb[44].mxu1 }
 0x770   : > { %13796 = vmatprep.mubr.msk.bf16.mxu0 %vm8849_vm7, %v21536_v10  ;;  %v11897_v26 = vpop.f32.mrb[45].mxu1 }
 0x771   : > { %v11898_v41 = vpop.f32.mrb[46].mxu1  ;;  %v22153_v26 = vsel %vm7459_vm5, %v10160_v47, %v10164_v27  ;;  %v16305_v47 = vld [vmem:[%s22949_s5 + $0x278] ss:$12 sps:$4 sm:$0xff]   ;;  %v16307_v27 = vld [vmem:[%s22949_s5 + $0x2a8] ss:$12 sps:$4 sm:$0xff]  }
 0x772   : > { %v11900_v22 = vpop.f32.mrb[47].mxu1  ;;  %v16302_v41 = vld [vmem:[%s22949_s5 + $0x230] ss:$12 sps:$4 sm:$0xff]  }
 0x773   : > { %v10162_v22 = vrot.slane %v21336_v14, 1 }
 0x775   : > { %v22168_v36 = vsel %vm7459_vm5, %v10158_v11, %v10162_v22  ;;  %v22187_v17 = vsel %vm7459_vm5, %v10162_v22, %v10166_v61  ;;  %v10176_v11 = vrot.slane %v21536_v10, 1  ;;  %v16311_v10 = vld [vmem:[%s22949_s5 + $0x2d4] ss:$12 sps:$4 sm:$0xff]   ;;  %v10174_v22 = vrot.slane %v23628_v9, 1 }
 0x777   : > { %10049 = vmatmul.mubr.bf16.gmra.mrb[8].mxu0 %v23628_v9 }
 0x778   : > { %13797 = vmatprep.mubr.msk.bf16.mxu0 %vm8849_vm7, %v21612_v19 }
 0x77f   : > { %10057 = vmatmul.mubr.bf16.gmra.mrb[12].mxu0 %v21532_v13 }
 0x780   : > { %13798 = vmatprep.mubr.msk.bf16.mxu0 %vm8849_vm7, %v21666_v15 }
 0x787   : > { %10065 = vmatmul.mubr.bf16.gmra.mrb[16].mxu0 %v21603_v20 }
 0x788   : > { %13799 = vmatprep.mubr.msk.bf16.mxu0 %vm8849_vm7, %v21731_v57 }
 0x78f   : > { %10073 = vmatmul.mubr.bf16.gmra.mrb[20].mxu0 %v21662_v25 }
 0x790   : > { %13870 = vmatprep.mubr.msk.bf16.mxu0 %vm8849_vm7, %v22119_v30 }
 0x797   : > { %10427 = vmatmul.mubr.bf16.vlgmr.msra.gmra.mrb[200].mxu0 %v22130_v56 }
 0x798   : > { %13871 = vmatprep.mubr.msk.bf16.mxu0 %vm8849_vm7, %v22134_v53  ;;  %10528 = vmatpush1.bf16.msra.mxu0 %v16299_v0  ;;  %v22191_v0 = vsel %vm7459_vm5, %v10168_v38, %v10172_v43  ;;  %v10180_v38 = vrot.slane %v21612_v19, 1 }
 0x799   : > { %10529 = vmatprep.subr.bf16.mxu0 %v23625_v59 }
 0x79c   : > { %10530 = vmatpush1.bf16.msra.mxu0 %v16300_v5  ;;  %v10170_v5 = vrot.slane %v21408_v2, 1  ;;  %v16308_v2 = vld [vmem:[%s22949_s5 + $0x2c0] ss:$12 sps:$4 sm:$0xff]  }
 0x79d   : > { %10531 = vmatprep.subr.bf16.mxu0 %v23625_v59 }
 0x79f   : > { %10437 = vmatmul.mubr.bf16.gmra.mrb[204].mxu0 %v22149_v39 }
 0x7a0   : > { %13872 = vmatprep.mubr.msk.bf16.mxu0 %vm8849_vm7, %v22153_v26  ;;  %10532 = vmatpush1.bf16.msra.mxu0 %v16301_v63  ;;  %v22206_v63 = vsel %vm7459_vm5, %v10166_v61, %v10170_v5  ;;  %v10178_v61 = vrot.slane %v21532_v13, 1 }
 0x7a1   : > { %10533 = vmatprep.subr.bf16.mxu0 %v23625_v59 }
 0x7a2   : > { %v22235_v9 = vsel %vm7459_vm5, %v10174_v22, %v10178_v61 }
 0x7a4   : > { %10534 = vmatpush1.bf16.msra.mxu0 %v16302_v41  ;;  %v22210_v41 = vsel %vm7459_vm5, %v10172_v43, %v10176_v11  ;;  %v10184_v43 = vrot.slane %v21666_v15, 1 }
 0x7a5   : > { %10535 = vmatprep.subr.bf16.mxu0 %v23625_v59 }
 0x7a6   : > { %v22239_v19 = vsel %vm7459_vm5, %v10180_v38, %v10184_v43 }
 0x7a7   : > { %10447 = vmatmul.mubr.bf16.gmra.mrb[208].mxu0 %v22168_v36 }
 0x7a8   : > { %13873 = vmatprep.mubr.msk.bf16.mxu0 %vm8849_vm7, %v22172_v50  ;;  %10536 = vmatpush1.bf16.msra.mxu0 %v16303_v16  ;;  %v22224_v16 = vsel %vm7459_vm5, %v10170_v5, %v10174_v22  ;;  %v10084_v5 = vld [vmem:[#allocation3 + $0x148] sm:$0x3] }
 0x7a9   : > { %10537 = vmatprep.subr.bf16.mxu0 %v23625_v59 }
 0x7ac   : > { %10538 = vmatpush1.bf16.msra.mxu0 %v16304_v62  ;;  %v22228_v62 = vsel %vm7459_vm5, %v10176_v11, %v10180_v38  ;;  %v10088_v11 = vpack.c.bf16 %v10084_v5, %v10084_v5  ;;  %v16323_v5 = vld [vmem:[%s22949_s5 + $0x334] ss:$12 sps:$4 sm:$0xff]  }
 0x7ad   : > { %10539 = vmatprep.subr.bf16.mxu0 %v23625_v59 }
 0x7af   : > { %10457 = vmatmul.mubr.bf16.gmra.mrb[212].mxu0 %v22187_v17 }
 0x7b0   : > { %13874 = vmatprep.mubr.msk.bf16.mxu0 %vm8849_vm7, %v22191_v0  ;;  %10540 = vmatpush1.bf16.msra.mxu0 %v16305_v47  ;;  %v10182_v47 = vrot.slane %v21603_v20, 1 }
 0x7b1   : > { %10541 = vmatprep.subr.bf16.mxu0 %v23625_v59 }
 0x7b2   : > { %v22246_v13 = vsel %vm7459_vm5, %v10178_v61, %v10182_v47 }
 0x7b4   : > { %10542 = vmatpush1.bf16.msra.mxu0 %v16306_v37  ;;  %v10188_v37 = vrot.slane %v21731_v57, 1 }
 0x7b5   : > { %10543 = vmatprep.subr.bf16.mxu0 %v23625_v59 }
 0x7b6   : > { %v22250_v15 = vsel %vm7459_vm5, %v10184_v43, %v10188_v37  ;;  %v16314_v43 = vld [vmem:[%s22949_s5 + $0x2ec] ss:$12 sps:$4 sm:$0xff]  }
 0x7b7   : > { %10467 = vmatmul.mubr.bf16.gmra.mrb[216].mxu0 %v22206_v63 }
 0x7b8   : > { %13875 = vmatprep.mubr.msk.bf16.mxu0 %vm8849_vm7, %v22210_v41  ;;  %10544 = vmatpush1.bf16.msra.mxu0 %v16307_v27  ;;  %v10186_v27 = vrot.slane %v21662_v25, 1  ;;  %v16309_v25 = vld [vmem:[%s22949_s5 + $0x2d0] ss:$12 sps:$4 sm:$0xff]  }
 0x7b9   : > { %10545 = vmatprep.subr.bf16.mxu0 %v23625_v59 }
 0x7ba   : > { %v22256_v20 = vsel %vm7459_vm5, %v10182_v47, %v10186_v27  ;;  %v16312_v47 = vld [vmem:[%s22949_s5 + $0x2e8] ss:$12 sps:$4 sm:$0xff]  }
 0x7bc   : > { %10546 = vmatpush1.bf16.msra.mxu0 %v16308_v2  ;;  %v10192_v2 = vrot.slane %v10088_v11, 1  ;;  %v16321_v11 = vld [vmem:[%s22949_s5 + $0x330] ss:$12 sps:$4 sm:$0xff]  }
 0x7bd   : > { %11055 = vmatprep.subr.bf16.mxu0 %v16311_v10  ;;  %v10083_v10 = vld [vmem:[#allocation3 + $0x140] sm:$0x3] }
 0x7be   : > { %v10087_v57 = vpack.c.bf16 %v10083_v10, %v10083_v10  ;;  %v10193_v22 = vsel %vm7459_vm5, %v10188_v37, %v10192_v2  ;;  %v16315_v37 = vld [vmem:[%s22949_s5 + $0x300] ss:$12 sps:$4 sm:$0xff]  }
 0x7bf   : > { %10477 = vmatmul.mubr.bf16.gmra.mrb[220].mxu0 %v22224_v16  ;;  %v16327_v2 = vld [vmem:[%s22949_s5 + $0x360] ss:$12 sps:$4 sm:$0xff]  }
 0x7c0   : > { %13876 = vmatprep.mubr.msk.bf16.mxu0 %vm8849_vm7, %v22228_v62  ;;  %v10190_v38 = vrot.slane %v10087_v57, 1  ;;  %v16335_v10 = vld [vmem:[%s22949_s5 + $0x394] ss:$12 sps:$4 sm:$0xff]   ;;  %v16333_v57 = vld [vmem:[%s22949_s5 + $0x390] ss:$12 sps:$4 sm:$0xff]  }
 0x7c2   : > { %v10191_v61 = vsel %vm7459_vm5, %v10186_v27, %v10190_v38  ;;  %v16329_v27 = vld [vmem:[%s22949_s5 + $0x364] ss:$12 sps:$4 sm:$0xff]   ;;  %v23634_v38 = vld [vmem:[#allocation75_spill] sm:$0xff] }
 0x7c7   : > { %10487 = vmatmul.mubr.bf16.gmra.mrb[224].mxu0 %v22235_v9 }
 0x7c8   : > { %13877 = vmatprep.mubr.msk.bf16.mxu0 %vm8849_vm7, %v22239_v19 }
 0x7cf   : > { %10497 = vmatmul.mubr.bf16.gmra.mrb[228].mxu0 %v22246_v13 }
 0x7d0   : > { %13878 = vmatprep.mubr.msk.bf16.mxu0 %vm8849_vm7, %v22250_v15 }
 0x7d7   : > { %10507 = vmatmul.mubr.bf16.gmra.mrb[232].mxu0 %v22256_v20 }
 0x7d8   : > { %13879 = vmatprep.mubr.msk.bf16.mxu0 %vm8849_vm7, %v10193_v22 }
 0x7df   : > { %10517 = vmatmul.mubr.bf16.gmra.mrb[236].mxu0 %v10191_v61 }
 0x7e0   : > { %13880 = vmatprep.mubr.msk.bf16.mxu0 %vm8849_vm7, %v22119_v30  ;;  %v16317_v30 = vld [vmem:[%s22949_s5 + $0x304] ss:$12 sps:$4 sm:$0xff]  }
 0x7e7   : > { %10560 = vmatmul.mubr.bf16.vlgmr.msra.gmra.mrb[240].mxu0 %v22130_v56  ;;  %v16320_v56 = vld [vmem:[%s22949_s5 + $0x31c] ss:$12 sps:$4 sm:$0xff]  }
 0x7e8   : > { %13881 = vmatprep.mubr.msk.bf16.mxu0 %vm8849_vm7, %v22134_v53  ;;  %11056 = vmatpush1.bf16.msra.mxu0 %v16309_v25  ;;  %v16318_v53 = vld [vmem:[%s22949_s5 + $0x318] ss:$12 sps:$4 sm:$0xff]   ;;  %v16344_v25 = vld [vmem:[%s22949_s5 + $0x350] ss:$12 sps:$4 sm:$0xff]  }
 0x7e9   : > { %11057 = vmatprep.subr.bf16.mxu0 %v16314_v43  ;;  %v16345_v43 = vld [vmem:[%s22949_s5 + $0x368] ss:$12 sps:$4 sm:$0xff]  }
 0x7ec   : > { %11058 = vmatpush1.bf16.msra.mxu0 %v16312_v47  ;;  %v16346_v47 = vld [vmem:[%s22949_s5 + $0x380] ss:$12 sps:$4 sm:$0xff]  }
 0x7ed   : > { %11059 = vmatprep.subr.bf16.mxu0 %v16317_v30  ;;  %v16347_v30 = vld [vmem:[%s22949_s5 + $0x398] ss:$12 sps:$4 sm:$0xff]  }
 0x7ef   : > { %10568 = vmatmul.mubr.bf16.gmra.mrb[244].mxu0 %v22149_v39  ;;  %v16326_v39 = vld [vmem:[%s22949_s5 + $0x34c] ss:$12 sps:$4 sm:$0xff]  }
 0x7f0   : > { %13882 = vmatprep.mubr.msk.bf16.mxu0 %vm8849_vm7, %v22153_v26  ;;  %11060 = vmatpush1.bf16.msra.mxu0 %v16315_v37  ;;  %v16324_v26 = vld [vmem:[%s22949_s5 + $0x348] ss:$12 sps:$4 sm:$0xff]   ;;  %v16348_v37 = vld [vmem:[%s22949_s5 + $0x3b0] ss:$12 sps:$4 sm:$0xff]  }
 0x7f1   : > { %11061 = vmatprep.subr.bf16.mxu0 %v16320_v56  ;;  %v16351_v56 = vld [vmem:[%s22949_s5 + $0x3c4] ss:$12 sps:$4 sm:$0xff]  }
 0x7f4   : > { %11062 = vmatpush1.bf16.msra.mxu0 %v16318_v53  ;;  %v23636_v53 = vld [vmem:[#allocation48_spill] sm:$0xff] }
 0x7f5   : > { %11063 = vmatprep.subr.bf16.mxu0 %v16323_v5  ;;  %v10703_v5 = vld [vmem:[#allocation3 + $0x148] sm:$0x7] }
 0x7f7   : > { %10576 = vmatmul.mubr.bf16.gmra.mrb[248].mxu0 %v22168_v36  ;;  %v16332_v36 = vld [vmem:[%s22949_s5 + $0x37c] ss:$12 sps:$4 sm:$0xff]  }
 0x7f8   : > { %13883 = vmatprep.mubr.msk.bf16.mxu0 %vm8849_vm7, %v22172_v50  ;;  %11064 = vmatpush1.bf16.msra.mxu0 %v16321_v11  ;;  %v16330_v50 = vld [vmem:[%s22949_s5 + $0x378] ss:$12 sps:$4 sm:$0xff]   ;;  %v10707_v11 = vpack.c.bf16 %v10703_v5, %v10703_v5  ;;  %v16373_v5 = vld [vmem:[%s22949_s5 + $0x480] ss:$12 sps:$4 sm:$0xff]  }
 0x7f9   : > { %11065 = vmatprep.subr.bf16.mxu0 %v16326_v39 }
 0x7fa   : > { %v10847_v39 = vshrl.u32 %v10707_v11, 16 }
 0x7fc   : > { %11066 = vmatpush1.bf16.msra.mxu0 %v16324_v26  ;;  %v10850_v26 = vshll.u32 %v10707_v11, 16  ;;  %v11361_v11 = vld [vmem:[#allocation3] sm:$0xf0] }
 0x7fd   : > { %11067 = vmatprep.subr.bf16.mxu0 %v16329_v27  ;;  %v10702_v27 = vld [vmem:[#allocation3 + $0x140] sm:$0x7] }
 0x7ff   : > { %10584 = vmatmul.mubr.bf16.gmra.mrb[252].mxu0 %v22187_v17  ;;  %v16338_v17 = vld [vmem:[%s22949_s5 + $0x3ac] ss:$12 sps:$4 sm:$0xff]  }
 0x800   : > { %13884 = vmatprep.mubr.msk.bf16.mxu0 %vm8849_vm7, %v22191_v0  ;;  %11068 = vmatpush1.bf16.msra.mxu0 %v16327_v2  ;;  %v16336_v0 = vld [vmem:[%s22949_s5 + $0x3a8] ss:$12 sps:$4 sm:$0xff]   ;;  %v10706_v2 = vpack.c.bf16 %v10702_v27, %v10702_v27 }
 0x801   : > { %11069 = vmatprep.subr.bf16.mxu0 %v16332_v36  ;;  %v10849_v36 = vrot.slane %v10847_v39, 1  ;;  %v16536_v39 = vld [vmem:[%s22949_s5 + $0x3c8] ss:$12 sps:$4 sm:$0xff]  }
 0x804   : > { %11070 = vmatpush1.bf16.msra.mxu0 %v16330_v50  ;;  %v10852_v50 = vrot.slane %v10850_v26, 2 }
 0x805   : > { %11071 = vmatprep.subr.bf16.mxu0 %v16335_v10  ;;  %v10838_v10 = vshrl.u32 %v10706_v2, 16 }
 0x807   : > { %10592 = vmatmul.mubr.bf16.gmra.mrb[0].mxu0 %v22206_v63  ;;  %v23629_v63 = vld [vmem:[#allocation67_spill] sm:$0xff] }
 0x808   : > { %13885 = vmatprep.mubr.msk.bf16.mxu0 %vm8849_vm7, %v22210_v41  ;;  %11072 = vmatpush1.bf16.msra.mxu0 %v16333_v57  ;;  %v16339_v41 = vld [vmem:[%s22949_s5 + $0x2d8] ss:$12 sps:$4 sm:$0xff]   ;;  %v10841_v57 = vshll.u32 %v10706_v2, 16  ;;  %v16539_v2 = vld [vmem:[%s22949_s5 + $0x410] ss:$12 sps:$4 sm:$0xff]  }
 0x809   : > { %11073 = vmatprep.subr.bf16.mxu0 %v16338_v17  ;;  %v10853_v17 = vor.u32 %v10852_v50, %v10849_v36  ;;  %v23637_v50 = vrot.slane %v21419_v44, 2  ;;  %v23638_v44 = vrot.slane %v23626_v33, 2  ;;  %v23640_v33 = vld [vmem:[#allocation18_spill] sm:$0xff] }
 0x80c   : > { %11074 = vmatpush1.bf16.msra.mxu0 %v16336_v0  ;;  %v10840_v0 = vrot.slane %v10838_v10, 1 }
 0x80d   : > { %11188 = vmatprep.subr.bf16.mxu0 %v23625_v59 }
 0x80f   : > { %10600 = vmatmul.mubr.bf16.gmra.mrb[4].mxu0 %v22224_v16  ;;  %v23630_v16 = vld [vmem:[#allocation65_spill] sm:$0xff] }
 0x810   : > { %13886 = vmatprep.mubr.msk.bf16.mxu0 %vm8849_vm7, %v22228_v62  ;;  %v23631_v62 = vld [vmem:[#allocation39_spill] sm:$0xff] }
 0x817   : > { %10608 = vmatmul.mubr.bf16.gmra.mrb[8].mxu0 %v22235_v9  ;;  %v16340_v9 = vld [vmem:[%s22949_s5 + $0x2f0] ss:$12 sps:$4 sm:$0xff]  }
 0x818   : > { %13887 = vmatprep.mubr.msk.bf16.mxu0 %vm8849_vm7, %v22239_v19  ;;  %v16341_v19 = vld [vmem:[%s22949_s5 + $0x308] ss:$12 sps:$4 sm:$0xff]  }
 0x81f   : > { %10616 = vmatmul.mubr.bf16.gmra.mrb[12].mxu0 %v22246_v13  ;;  %v23632_v13 = vld [vmem:[#allocation69_spill] sm:$0xff] }
 0x820   : > { %13888 = vmatprep.mubr.msk.bf16.mxu0 %vm8849_vm7, %v22250_v15  ;;  %v23633_v15 = vld [vmem:[#allocation43_spill] sm:$0xff] }
 0x827   : > { %10624 = vmatmul.mubr.bf16.gmra.mrb[16].mxu0 %v22256_v20  ;;  %v16342_v20 = vld [vmem:[%s22949_s5 + $0x320] ss:$12 sps:$4 sm:$0xff]  }
 0x828   : > { %13889 = vmatprep.mubr.msk.bf16.mxu0 %vm8849_vm7, %v10193_v22  ;;  %v16343_v22 = vld [vmem:[%s22949_s5 + $0x338] ss:$12 sps:$4 sm:$0xff]  }
 0x82f   : > { %10632 = vmatmul.mubr.bf16.gmra.mrb[20].mxu0 %v10191_v61  ;;  %v23635_v61 = vld [vmem:[#allocation20_spill] sm:$0xff] }
 0x830   : > { %13960 = vmatprep.mubr.msk.bf16.mxu0 %vm8849_vm7, %v23629_v63 }
 0x837   : > { %11088 = vmatmul.mubr.bf16.vlgmr.msra.gmra.mrb[200].mxu0 %v23630_v16 }
 0x838   : > { %13961 = vmatprep.mubr.msk.bf16.mxu0 %vm8849_vm7, %v23631_v62  ;;  %11189 = vmatpush1.bf16.msra.mxu0 %v16339_v41  ;;  %v10843_v41 = vrot.slane %v10841_v57, 2  ;;  %v16541_v57 = vld [vmem:[%s22949_s5 + $0x440] ss:$12 sps:$4 sm:$0xff]  }
 0x839   : > { %11190 = vmatprep.subr.bf16.mxu0 %v23625_v59 }
 0x83c   : > { %11191 = vmatpush1.bf16.msra.mxu0 %v16340_v9  ;;  %v10854_v9 = vsel %vm7880_vm4, %v21817_v45, %v10853_v17  ;;  %v16354_v45 = vld [vmem:[%s22949_s5 + $0x3dc] ss:$12 sps:$4 sm:$0xff]  }
 0x83d   : > { %11192 = vmatprep.subr.bf16.mxu0 %v23625_v59 }
 0x83f   : > { %11098 = vmatmul.mubr.bf16.gmra.mrb[204].mxu0 %v23632_v13 }
 0x840   : > { %13962 = vmatprep.mubr.msk.bf16.mxu0 %vm8849_vm7, %v23633_v15  ;;  %11193 = vmatpush1.bf16.msra.mxu0 %v16341_v19  ;;  %v10844_v19 = vor.u32 %v10843_v41, %v10840_v0  ;;  %v23639_v0 = vld [vmem:[#allocation41_spill] sm:$0xff]  ;;  %v16542_v41 = vld [vmem:[%s22949_s5 + $0x458] ss:$12 sps:$4 sm:$0xff]  }
 0x841   : > { %11194 = vmatprep.subr.bf16.mxu0 %v23625_v59 }
 0x844   : > { %11195 = vmatpush1.bf16.msra.mxu0 %v16342_v20  ;;  %v22422_v20 = vsel %vm7880_vm4, %v21822_v21, %v10844_v19  ;;  %v16352_v21 = vld [vmem:[%s22949_s5 + $0x3d8] ss:$12 sps:$4 sm:$0xff]  }
 0x845   : > { %11196 = vmatprep.subr.bf16.mxu0 %v23625_v59  ;;  %v23641_v19 = vld [vmem:[#allocation72_spill] sm:$0xff] }
 0x847   : > { %11108 = vmatmul.mubr.bf16.gmra.mrb[208].mxu0 %v23634_v38 }
 0x848   : > { %13963 = vmatprep.mubr.msk.bf16.mxu0 %vm8849_vm7, %v23635_v61  ;;  %11197 = vmatpush1.bf16.msra.mxu0 %v16343_v22  ;;  %v16349_v22 = vld [vmem:[%s22949_s5 + $0x3c0] ss:$12 sps:$4 sm:$0xff]  }
 0x849   : > { %11198 = vmatprep.subr.bf16.mxu0 %v23625_v59 }
 0x84c   : > { %11199 = vmatpush1.bf16.msra.mxu0 %v16344_v25  ;;  %v16355_v25 = vld [vmem:[%s22949_s5 + $0x3f0] ss:$12 sps:$4 sm:$0xff]  }
 0x84d   : > { %11200 = vmatprep.subr.bf16.mxu0 %v23625_v59 }
 0x84f   : > { %11118 = vmatmul.mubr.bf16.gmra.mrb[212].mxu0 %v21754_v6 }
 0x850   : > { %13964 = vmatprep.mubr.msk.bf16.mxu0 %vm8849_vm7, %v21757_v46  ;;  %11201 = vmatpush1.bf16.msra.mxu0 %v16345_v43  ;;  %v16363_v43 = vld [vmem:[%s22949_s5 + $0x424] ss:$12 sps:$4 sm:$0xff]  }
 0x851   : > { %11202 = vmatprep.subr.bf16.mxu0 %v23625_v59 }
 0x854   : > { %11203 = vmatpush1.bf16.msra.mxu0 %v16346_v47  ;;  %v16361_v47 = vld [vmem:[%s22949_s5 + $0x420] ss:$12 sps:$4 sm:$0xff]  }
 0x855   : > { %11204 = vmatprep.subr.bf16.mxu0 %v23625_v59 }
 0x857   : > { %11128 = vmatmul.mubr.bf16.gmra.mrb[216].mxu0 %v21769_v34 }
 0x858   : > { %13965 = vmatprep.mubr.msk.bf16.mxu0 %vm8849_vm7, %v21772_v48  ;;  %11205 = vmatpush1.bf16.msra.mxu0 %v16347_v30  ;;  %v16369_v30 = vld [vmem:[%s22949_s5 + $0x454] ss:$12 sps:$4 sm:$0xff]  }
 0x859   : > { %11206 = vmatprep.subr.bf16.mxu0 %v23625_v59 }
 0x85c   : > { %11207 = vmatpush1.bf16.msra.mxu0 %v16348_v37  ;;  %v16367_v37 = vld [vmem:[%s22949_s5 + $0x450] ss:$12 sps:$4 sm:$0xff]  }
 0x85d   : > { %11656 = vmatprep.subr.bf16.mxu0 %v16351_v56  ;;  %v16375_v56 = vld [vmem:[%s22949_s5 + $0x484] ss:$12 sps:$4 sm:$0xff]  }
 0x85f   : > { %11138 = vmatmul.mubr.bf16.gmra.mrb[220].mxu0 %v23636_v53 }
 0x860   : > { %13966 = vmatprep.mubr.msk.bf16.mxu0 %vm8849_vm7, %v21806_v12 }
 0x867   : > { %11148 = vmatmul.mubr.bf16.gmra.mrb[224].mxu0 %v21815_v52 }
 0x868   : > { %13967 = vmatprep.mubr.msk.bf16.mxu0 %vm8849_vm7, %v21820_v7 }
 0x86f   : > { %11158 = vmatmul.mubr.bf16.gmra.mrb[228].mxu0 %v21831_v35 }
 0x870   : > { %13968 = vmatprep.mubr.msk.bf16.mxu0 %vm8849_vm7, %v21835_v28 }
 0x877   : > { %11168 = vmatmul.mubr.bf16.gmra.mrb[232].mxu0 %v21840_v49 }
 0x878   : > { %13969 = vmatprep.mubr.msk.bf16.mxu0 %vm8849_vm7, %v10854_v9 }
 0x87f   : > { %11178 = vmatmul.mubr.bf16.gmra.mrb[236].mxu0 %v22422_v20 }
 0x880   : > { %13970 = vmatprep.mubr.msk.bf16.mxu0 %vm8849_vm7, %v23629_v63  ;;  %v16357_v63 = vld [vmem:[%s22949_s5 + $0x3f4] ss:$12 sps:$4 sm:$0xff]  }
 0x887   : > { %11221 = vmatmul.mubr.bf16.vlgmr.msra.gmra.mrb[240].mxu0 %v23630_v16  ;;  %v16360_v16 = vld [vmem:[%s22949_s5 + $0x40c] ss:$12 sps:$4 sm:$0xff]  }
 0x888   : > { %13971 = vmatprep.mubr.msk.bf16.mxu0 %vm8849_vm7, %v23631_v62  ;;  %11657 = vmatpush1.bf16.msra.mxu0 %v16349_v22  ;;  %v16358_v62 = vld [vmem:[%s22949_s5 + $0x408] ss:$12 sps:$4 sm:$0xff]   ;;  %v16545_v22 = vld [vmem:[%s22949_s5 + $0x4a0] ss:$12 sps:$4 sm:$0xff]  }
 0x889   : > { %11658 = vmatprep.subr.bf16.mxu0 %v16354_v45  ;;  %v23642_v45 = vld [vmem:[#allocation42_spill] sm:$0xff] }
 0x88c   : > { %11659 = vmatpush1.bf16.msra.mxu0 %v16352_v21  ;;  %v23643_v21 = vld [vmem:[#allocation45_spill] sm:$0xff] }
 0x88d   : > { %11660 = vmatprep.subr.bf16.mxu0 %v16357_v63  ;;  %v23644_v63 = vld [vmem:[#allocation44_spill] sm:$0xff] }
 0x88f   : > { %11229 = vmatmul.mubr.bf16.gmra.mrb[244].mxu0 %v23632_v13  ;;  %v16366_v13 = vld [vmem:[%s22949_s5 + $0x43c] ss:$12 sps:$4 sm:$0xff]  }
 0x890   : > { %13972 = vmatprep.mubr.msk.bf16.mxu0 %vm8849_vm7, %v23633_v15  ;;  %11661 = vmatpush1.bf16.msra.mxu0 %v16355_v25  ;;  %v16364_v15 = vld [vmem:[%s22949_s5 + $0x438] ss:$12 sps:$4 sm:$0xff]  }
 0x891   : > { %11662 = vmatprep.subr.bf16.mxu0 %v16360_v16  ;;  %v23645_v25 = vld [vmem:[#allocation19_spill] sm:$0xff]  ;;  %v23646_v16 = vld [vmem:[#allocation74_spill] sm:$0xff] }
 0x894   : > { %11663 = vmatpush1.bf16.msra.mxu0 %v16358_v62  ;;  %v23647_v62 = vld [vmem:[#allocation46_spill] sm:$0xff] }
 0x895   : > { %11664 = vmatprep.subr.bf16.mxu0 %v16363_v43  ;;  %v23649_v43 = vld [vmem:[#allocation47_spill] sm:$0xff] }
 0x897   : > { %11237 = vmatmul.mubr.bf16.gmra.mrb[248].mxu0 %v23634_v38  ;;  %v16372_v38 = vld [vmem:[%s22949_s5 + $0x46c] ss:$12 sps:$4 sm:$0xff]  }
 0x898   : > { %13973 = vmatprep.mubr.msk.bf16.mxu0 %vm8849_vm7, %v23635_v61  ;;  %11665 = vmatpush1.bf16.msra.mxu0 %v16361_v47  ;;  %v16370_v61 = vld [vmem:[%s22949_s5 + $0x468] ss:$12 sps:$4 sm:$0xff]  }
 0x899   : > { %11666 = vmatprep.subr.bf16.mxu0 %v16366_v13 }
 0x89c   : > { %11667 = vmatpush1.bf16.msra.mxu0 %v16364_v15 }
 0x89d   : > { %11668 = vmatprep.subr.bf16.mxu0 %v16369_v30 }
 0x89f   : > { %11245 = vmatmul.mubr.bf16.gmra.mrb[252].mxu0 %v21754_v6  ;;  %v16378_v6 = vld [vmem:[%s22949_s5 + $0x49c] ss:$12 sps:$4 sm:$0xff]  }
 0x8a0   : > { %13974 = vmatprep.mubr.msk.bf16.mxu0 %vm8849_vm7, %v21757_v46  ;;  %11669 = vmatpush1.bf16.msra.mxu0 %v16367_v37  ;;  %v16376_v46 = vld [vmem:[%s22949_s5 + $0x498] ss:$12 sps:$4 sm:$0xff]   ;;  %v16379_v37 = vld [vmem:[%s22951_s7 + $0x28] sm:$0xff]  }
 0x8a1   : > { %11670 = vmatprep.subr.bf16.mxu0 %v16372_v38  ;;  %14195 = vmatpush3.bf16.msra.mxu1 %v16379_v37 }
 0x8a4   : > { %11671 = vmatpush1.bf16.msra.mxu0 %v16370_v61 }
 0x8a5   : > { %11672 = vmatprep.subr.bf16.mxu0 %v16375_v56 }
 0x8a7   : > { %11253 = vmatmul.mubr.bf16.gmra.mrb[0].mxu0 %v21769_v34  ;;  %v11362_v34 = vld [vmem:[#allocation3 + $0x8] sm:$0xf0] }
 0x8a8   : > { %13975 = vmatprep.mubr.msk.bf16.mxu0 %vm8849_vm7, %v21772_v48  ;;  %11673 = vmatpush1.bf16.msra.mxu0 %v16373_v5  ;;  %v11366_v48 = vpack.c.bf16 %v21935_v54, %v11362_v34 }
 0x8a9   : > { %11674 = vmatprep.subr.bf16.mxu0 %v16378_v6  ;;  %v22610_v6 = vld [vmem:[#allocation2 + $0x140] sm:$0xff] }
 0x8aa   : > { %14196 = vmatprep.subr.bf16.mxu1 %v22610_v6  ;;  %14204 = vmatprep.mubr.msk.bf16.mxu1 %vm16614_vm9, %v22610_v6 }
 0x8ac   : > { %11675 = vmatpush1.bf16.msra.mxu0 %v16376_v46 }
 0x8ad   : > { %11789 = vmatprep.subr.bf16.mxu0 %v23625_v59 }
 0x8af   : > { %11261 = vmatmul.mubr.bf16.gmra.mrb[4].mxu0 %v23636_v53  ;;  %v11418_v53 = vrot.slane %v21313_v1, 2 }
 0x8b0   : > { %13976 = vmatprep.mubr.msk.bf16.mxu0 %vm8849_vm7, %v21806_v12  ;;  %v11417_v12 = vrot.slane %v11366_v48, 2 }
 0x8b7   : > { %11269 = vmatmul.mubr.bf16.gmra.mrb[8].mxu0 %v21815_v52  ;;  %v22515_v52 = vsel %vm8369_vm6, %v11417_v12, %v11418_v53 }
 0x8b8   : > { %13977 = vmatprep.mubr.msk.bf16.mxu0 %vm8849_vm7, %v21820_v7  ;;  %v11365_v7 = vpack.c.bf16 %v21943_v23, %v11361_v11  ;;  %v11420_v23 = vrot.slane %v21310_v32, 2  ;;  %v16538_v32 = vld [vmem:[%s22949_s5 + $0x3f8] ss:$12 sps:$4 sm:$0xff]  }
 0x8bf   : > { %11277 = vmatmul.mubr.bf16.gmra.mrb[12].mxu0 %v21831_v35  ;;  %v11415_v35 = vrot.slane %v21300_v18, 2  ;;  %v11426_v18 = vrot.slane %v21383_v42, 2  ;;  %v11424_v42 = vrot.slane %v21336_v14, 2  ;;  %v16540_v14 = vld [vmem:[%s22949_s5 + $0x428] ss:$12 sps:$4 sm:$0xff]  }
 0x8c0   : > { %13978 = vmatprep.mubr.msk.bf16.mxu0 %vm8849_vm7, %v21835_v28  ;;  %v11422_v28 = vrot.slane %v21340_v3, 2  ;;  %v16537_v3 = vld [vmem:[%s22949_s5 + $0x3e0] ss:$12 sps:$4 sm:$0xff]  }
 0x8c1   : > { %v11421_v26 = vsel %vm8369_vm6, %v11415_v35, %v11420_v23  ;;  %v11425_v36 = vsel %vm8369_vm6, %v11420_v23, %v11424_v42  ;;  %v11431_v10 = vsel %vm8369_vm6, %v11426_v18, %v23637_v50  ;;  %v11429_v17 = vsel %vm8369_vm6, %v11424_v42, %v23638_v44 }
 0x8c2   : > { %v11423_v1 = vsel %vm8369_vm6, %v11418_v53, %v11422_v28  ;;  %v11427_v27 = vsel %vm8369_vm6, %v11422_v28, %v11426_v18  ;;  %v16381_v18 = vld [vmem:[%s22951_s7 + $0x38] sm:$0xff]   ;;  %v16613_v42 = vmov 65535  }
 0x8c7   : > { %11285 = vmatmul.mubr.bf16.gmra.mrb[16].mxu0 %v21840_v49  ;;  %v11414_v49 = vrot.slane %v11365_v7, 2 }
 0x8c8   : > { %13979 = vmatprep.mubr.msk.bf16.mxu0 %vm8849_vm7, %v10854_v9  ;;  %v16543_v9 = vld [vmem:[%s22949_s5 + $0x470] ss:$12 sps:$4 sm:$0xff]  }
 0x8c9   : > { %v11416_v54 = vsel %vm8369_vm6, %v11414_v49, %v11415_v35 }
 0x8cf   : > { %11293 = vmatmul.mubr.bf16.gmra.mrb[20].mxu0 %v22422_v20  ;;  %v16544_v20 = vld [vmem:[%s22949_s5 + $0x488] ss:$12 sps:$4 sm:$0xff]  }
 0x8d0   : > { %14050 = vmatprep.mubr.msk.bf16.mxu0 %vm8849_vm7, %v22515_v52 }
 0x8d7   : > { %11689 = vmatmul.mubr.bf16.vlgmr.msra.gmra.mrb[200].mxu0 %v11416_v54 }
 0x8d8   : > { %14051 = vmatprep.mubr.msk.bf16.mxu0 %vm8849_vm7, %v11423_v1  ;;  %11790 = vmatpush1.bf16.msra.mxu0 %v16536_v39 }
 0x8d9   : > { %11791 = vmatprep.subr.bf16.mxu0 %v23625_v59 }
 0x8dc   : > { %11792 = vmatpush1.bf16.msra.mxu0 %v16537_v3 }
 0x8dd   : > { %11793 = vmatprep.subr.bf16.mxu0 %v23625_v59 }
 0x8df   : > { %11699 = vmatmul.mubr.bf16.gmra.mrb[204].mxu0 %v11421_v26 }
 0x8e0   : > { %14052 = vmatprep.mubr.msk.bf16.mxu0 %vm8849_vm7, %v11427_v27  ;;  %11794 = vmatpush1.bf16.msra.mxu0 %v16538_v32  ;;  %v16383_v32 = vld [vmem:[%s22951_s7 + $0x48] sm:$0x3f]  }
 0x8e1   : > { %11795 = vmatprep.subr.bf16.mxu0 %v23625_v59 }
 0x8e4   : > { %11796 = vmatpush1.bf16.msra.mxu0 %v16539_v2  ;;  %v12140_v2 = vsel %vm12138_vm8, 4294967295, %v16613_v42 }
 0x8e5   : > { %11797 = vmatprep.subr.bf16.mxu0 %v23625_v59 }
 0x8e7   : > { %11709 = vmatmul.mubr.bf16.gmra.mrb[208].mxu0 %v11425_v36 }
 0x8e8   : > { %14053 = vmatprep.mubr.msk.bf16.mxu0 %vm8849_vm7, %v11431_v10  ;;  %11798 = vmatpush1.bf16.msra.mxu0 %v16540_v14 }
 0x8e9   : > { %11799 = vmatprep.subr.bf16.mxu0 %v23625_v59 }
 0x8ec   : > { %11800 = vmatpush1.bf16.msra.mxu0 %v16541_v57 }
 0x8ed   : > { %11801 = vmatprep.subr.bf16.mxu0 %v23625_v59 }
 0x8ef   : > { %11719 = vmatmul.mubr.bf16.gmra.mrb[212].mxu0 %v11429_v17 }
 0x8f0   : > { %14054 = vmatprep.mubr.msk.bf16.mxu0 %vm8849_vm7, %v23639_v0  ;;  %11802 = vmatpush1.bf16.msra.mxu0 %v16542_v41 }
 0x8f1   : > { %11803 = vmatprep.subr.bf16.mxu0 %v23625_v59 }
 0x8f4   : > { %11804 = vmatpush1.bf16.msra.mxu0 %v16543_v9 }
 0x8f5   : > { %11805 = vmatprep.subr.bf16.mxu0 %v23625_v59 }
 0x8f7   : > { %11729 = vmatmul.mubr.bf16.gmra.mrb[216].mxu0 %v23640_v33 }
 0x8f8   : > { %14055 = vmatprep.mubr.msk.bf16.mxu0 %vm8849_vm7, %v23641_v19  ;;  %11806 = vmatpush1.bf16.msra.mxu0 %v16544_v20 }
 0x8f9   : > { %11807 = vmatprep.subr.bf16.mxu0 %v23625_v59  ;;  %v23648_v59 = vld [vmem:[#allocation77_spill] sm:$0xff] }
 0x8fc   : > { %11808 = vmatpush1.bf16.msra.mxu0 %v16545_v22 }
 0x8ff   : > { %11739 = vmatmul.mubr.bf16.gmra.mrb[220].mxu0 %v23642_v45 }
 0x900   : > { %14056 = vmatprep.mubr.msk.bf16.mxu0 %vm8849_vm7, %v23643_v21 }
 0x907   : > { %11749 = vmatmul.mubr.bf16.gmra.mrb[224].mxu0 %v23644_v63 }
 0x908   : > { %14057 = vmatprep.mubr.msk.bf16.mxu0 %vm8849_vm7, %v23645_v25 }
 0x90f   : > { %11759 = vmatmul.mubr.bf16.gmra.mrb[228].mxu0 %v23646_v16 }
 0x910   : > { %14058 = vmatprep.mubr.msk.bf16.mxu0 %vm8849_vm7, %v23647_v62 }
 0x917   : > { %11769 = vmatmul.mubr.bf16.gmra.mrb[232].mxu0 %v23648_v59 }
 0x918   : > { %14059 = vmatprep.mubr.msk.bf16.mxu0 %vm8849_vm7, %v23649_v43 }
 0x91f   : > { %11779 = vmatmul.mubr.bf16.gmra.mrb[236].mxu0 %v21828_v58 }
 0x920   : > { %14060 = vmatprep.mubr.msk.bf16.mxu0 %vm8849_vm7, %v22515_v52 }
 0x927   : > { %11822 = vmatmul.mubr.bf16.vlgmr.msra.gmra.mrb[240].mxu0 %v11416_v54 }
 0x928   : > { %14061 = vmatprep.mubr.msk.bf16.mxu0 %vm8849_vm7, %v11423_v1 }
 0x92f   : > { %11830 = vmatmul.mubr.bf16.gmra.mrb[244].mxu0 %v11421_v26 }
 0x930   : > { %14062 = vmatprep.mubr.msk.bf16.mxu0 %vm8849_vm7, %v11427_v27 }
 0x937   : > { %11838 = vmatmul.mubr.bf16.gmra.mrb[248].mxu0 %v11425_v36  ;;  %v22653_v36 = vsel %vm8369_vm6, %v12140_v2, 0 }
 0x938   : > { %14063 = vmatprep.mubr.msk.bf16.mxu0 %vm8849_vm7, %v11431_v10  ;;  %v12143_v10 = vand.u32 %v16383_v32, %v22653_v36 }
 0x93f   : > { %11846 = vmatmul.mubr.bf16.gmra.mrb[252].mxu0 %v11429_v17 }
 0x97a   : > { %v11254_v47 = vpop.f32.mrb[0].mxu0 }
 0x97b   : > { %v22602_v13 = vadd.f32 %v22021_v40, %v11254_v47  ;;  %v11256_v15 = vpop.f32.mrb[1].mxu0 }
 0x97c   : > { %v11257_v30 = vpop.f32.mrb[2].mxu0 }
 0x97d   : > { %v11259_v58 = vpop.f32.mrb[3].mxu0 }
 0x982   : > { %v11262_v38 = vpop.f32.mrb[4].mxu0 }
 0x983   : > { %v22608_v61 = vadd.f32 %v22038_v8, %v11262_v38  ;;  %v11264_v56 = vpop.f32.mrb[5].mxu0  ;;  %v16380_v8 = vld [vmem:[%s22951_s7 + $0x30] sm:$0xff]  }
 0x984   : > { %v11265_v5 = vpop.f32.mrb[6].mxu0  ;;  %14197 = vmatpush3.bf16.msra.mxu1 %v16380_v8  ;;  %v22701_v56 = vld [vmem:[%s22950_s6] ss:$0 sm:$0xff] }
 0x985   : > { %v22614_v40 = vadd.f32 %v22046_v55, %v11265_v5  ;;  %v11267_v46 = vpop.f32.mrb[7].mxu0  ;;  %14198 = vmatprep.subr.bf16.mxu1 %v22610_v6 }
 0x988   : > { %14199 = vmatpush3.bf16.msra.mxu1 %v16381_v18 }
 0x989   : > { %14200 = vmatprep.subr.bf16.mxu1 %v22610_v6 }
 0x98a   : > { %v11270_v34 = vpop.f32.mrb[8].mxu0 }
 0x98b   : > { %v22617_v48 = vadd.f32 %v22057_v29, %v11270_v34  ;;  %v11272_v53 = vpop.f32.mrb[9].mxu0 }
 0x98c   : > { %v11273_v12 = vpop.f32.mrb[10].mxu0 }
 0x98d   : > { %v22623_v11 = vadd.f32 %v22065_v4, %v11273_v12  ;;  %v11275_v52 = vpop.f32.mrb[11].mxu0 }
 0x992   : > { %v11278_v55 = vpop.f32.mrb[12].mxu0 }
 0x993   : > { %v11280_v7 = vpop.f32.mrb[13].mxu0 }
 0x994   : > { %v11281_v35 = vpop.f32.mrb[14].mxu0 }
 0x995   : > { %v22627_v28 = vadd.f32 %v22082_v24, %v11281_v35  ;;  %v11283_v29 = vpop.f32.mrb[15].mxu0 }
 0x99a   : > { %v11286_v49 = vpop.f32.mrb[16].mxu0 }
 0x99b   : > { %v22630_v54 = vadd.f32 %v22093_v51, %v11286_v49  ;;  %v11288_v1 = vpop.f32.mrb[17].mxu0 }
 0x99c   : > { %v11289_v39 = vpop.f32.mrb[18].mxu0 }
 0x99d   : > { %v22633_v4 = vadd.f32 %v22098_v60, %v11289_v39  ;;  %v11291_v23 = vpop.f32.mrb[19].mxu0  ;;  %v16382_v60 = vld [vmem:[%s22951_s7 + $0x40] sm:$0xff]  }
 0x99e   : > { %14201 = vmatpush3.bf16.msra.mxu1 %v16382_v60 }
 0x99f   : > { %14202 = vmatprep.subr.bf16.mxu1 %v22610_v6 }
 0x9a2   : > { %v11294_v3 = vpop.f32.mrb[20].mxu0  ;;  %14203 = vmatpush3.bf16.msra.mxu1 %v12143_v10 }
 0x9a3   : > { %v22640_v24 = vadd.f32 %v22104_v31, %v11294_v3  ;;  %v11296_v26 = vpop.f32.mrb[21].mxu0  ;;  %14208 = vmatprep.subr.bf16.mxu1 %v22610_v6 }
 0x9a4   : > { %v11297_v51 = vpop.f32.mrb[22].mxu0 }
 0x9a5   : > { %v11299_v27 = vpop.f32.mrb[23].mxu0 }
 0x9aa   : > { %v22650_v31 = vpop.f32.mrb[200].mxu0 }
 0x9ab   : > { %v22655_v50 = vpop.f32.mrb[201].mxu0 }
 0x9ac   : > { %v11962_v14 = vmax.f32 %v22650_v31, %v22655_v50  ;;  %v22661_v57 = vpop.f32.mrb[202].mxu0 }
 0x9ad   : > { %v22663_v44 = vpop.f32.mrb[203].mxu0 }
 0x9ae   : > { %v11963_v17 = vmax.f32 %v22661_v57, %v22663_v44 }
 0x9b2   : > { %v22668_v0 = vpop.f32.mrb[204].mxu0 }
 0x9b3   : > { %v22670_v41 = vpop.f32.mrb[205].mxu0 }
 0x9b4   : > { %v11964_v9 = vmax.f32 %v22668_v0, %v22670_v41  ;;  %v22674_v33 = vpop.f32.mrb[206].mxu0 }
 0x9b5   : > { %v22676_v19 = vpop.f32.mrb[207].mxu0 }
 0x9b6   : > { %v11965_v20 = vmax.f32 %v22674_v33, %v22676_v19 }
 0x9ba   : > { %v11710_v22 = vpop.f32.mrb[208].mxu0 }
 0x9bb   : > { %v11712_v45 = vpop.f32.mrb[209].mxu0 }
 0x9bc   : > { %v22680_v21 = vpop.f32.mrb[210].mxu0 }
 0x9bd   : > { %v22682_v63 = vpop.f32.mrb[211].mxu0 }
 0x9be   : > { %v11967_v25 = vmax.f32 %v22680_v21, %v22682_v63 }
 0x9c2   : > { %v22686_v16 = vpop.f32.mrb[212].mxu0 }
 0x9c3   : > { %v22688_v62 = vpop.f32.mrb[213].mxu0 }
 0x9c4   : > { %v11968_v59 = vmax.f32 %v22686_v16, %v22688_v62  ;;  %v22692_v43 = vpop.f32.mrb[214].mxu0 }
 0x9c5   : > { %v22694_v47 = vpop.f32.mrb[215].mxu0 }
 0x9c6   : > { %v11969_v15 = vmax.f32 %v22692_v43, %v22694_v47  ;;  %v16385_v47 = vld [vmem:[%s22951_s7 + $0x8] sm:$0xff]  }
 0x9ca   : > { %v11730_v30 = vpop.f32.mrb[216].mxu0 }
 0x9cb   : > { %v11732_v58 = vpop.f32.mrb[217].mxu0 }
 0x9cc   : > { %v11970_v37 = vmax.f32 %v11730_v30, %v11732_v58  ;;  %v11734_v38 = vpop.f32.mrb[218].mxu0 }
 0x9cd   : > { %v11736_v5 = vpop.f32.mrb[219].mxu0 }
 0x9ce   : > { %v11990_v46 = vmax.f32 %v11970_v37, %v22602_v13 }
 0x9d0   : > { %v12017_v34 = vadd.f32 %v22701_v56, %v11990_v46 }
 0x9d2   : > { %v12037_v53 = vmax.f32 %v12017_v34, 0.0  ;;  %v11740_v8 = vpop.f32.mrb[220].mxu0 }
 0x9d3   : > { %v11742_v12 = vpop.f32.mrb[221].mxu0 }
 0x9d4   : > { %12058 = vst.msk [vmem:[#allocation4 + $0x40] sm:$0xff] %vm12049_vm10, %v12037_v53  ;;  %v11972_v52 = vmax.f32 %v11740_v8, %v11742_v12  ;;  %v11744_v55 = vpop.f32.mrb[222].mxu0 }
 0x9d5   : > { %v11746_v7 = vpop.f32.mrb[223].mxu0 }
 0x9d6   : > { %v11992_v35 = vmax.f32 %v11972_v52, %v22608_v61  ;;  %v11973_v29 = vmax.f32 %v11744_v55, %v11746_v7 }
 0x9d8   : > { %v12019_v49 = vadd.f32 %v22701_v56, %v11992_v35  ;;  %v11993_v1 = vmax.f32 %v11973_v29, %v22614_v40 }
 0x9da   : > { %v12039_v39 = vmax.f32 %v12019_v49, 0.0  ;;  %v12020_v13 = vadd.f32 %v22701_v56, %v11993_v1  ;;  %v11750_v23 = vpop.f32.mrb[224].mxu0 }
 0x9db   : > { %v11752_v18 = vpop.f32.mrb[225].mxu0 }
 0x9dc   : > { %12060 = vst.msk [vmem:[#allocation4 + $0x50] sm:$0xff] %vm12049_vm10, %v12039_v39  ;;  %v12040_v3 = vmax.f32 %v12020_v13, 0.0  ;;  %v11974_v26 = vmax.f32 %v11750_v23, %v11752_v18  ;;  %v11754_v51 = vpop.f32.mrb[226].mxu0 }
 0x9dd   : > { %v11756_v27 = vpop.f32.mrb[227].mxu0 }
 0x9de   : > { %12061 = vst.msk [vmem:[#allocation4 + $0x58] sm:$0xff] %vm12049_vm10, %v12040_v3  ;;  %v11994_v61 = vmax.f32 %v11974_v26, %v22617_v48  ;;  %v11975_v60 = vmax.f32 %v11754_v51, %v11756_v27 }
 0x9e0   : > { %v12021_v32 = vadd.f32 %v22701_v56, %v11994_v61  ;;  %v11995_v40 = vmax.f32 %v11975_v60, %v22623_v11 }
 0x9e2   : > { %v12041_v42 = vmax.f32 %v12021_v32, 0.0  ;;  %v12022_v2 = vadd.f32 %v22701_v56, %v11995_v40  ;;  %v11760_v10 = vpop.f32.mrb[228].mxu0 }
 0x9e3   : > { %v11762_v22 = vpop.f32.mrb[229].mxu0 }
 0x9e4   : > { %12062 = vst.msk [vmem:[#allocation4 + $0x60] sm:$0xff] %vm12049_vm10, %v12041_v42  ;;  %v12042_v45 = vmax.f32 %v12022_v2, 0.0  ;;  %v11764_v30 = vpop.f32.mrb[230].mxu0 }
 0x9e5   : > { %v11766_v58 = vpop.f32.mrb[231].mxu0 }
 0x9e6   : > { %12063 = vst.msk [vmem:[#allocation4 + $0x68] sm:$0xff] %vm12049_vm10, %v12042_v45  ;;  %v11977_v37 = vmax.f32 %v11764_v30, %v11766_v58 }
 0x9e8   : > { %v11997_v48 = vmax.f32 %v11977_v37, %v22627_v28 }
 0x9ea   : > { %v12024_v38 = vadd.f32 %v22701_v56, %v11997_v48  ;;  %v11770_v5 = vpop.f32.mrb[232].mxu0 }
 0x9eb   : > { %v11772_v46 = vpop.f32.mrb[233].mxu0 }
 0x9ec   : > { %v12044_v11 = vmax.f32 %v12024_v38, 0.0  ;;  %v11978_v34 = vmax.f32 %v11770_v5, %v11772_v46  ;;  %v11774_v53 = vpop.f32.mrb[234].mxu0 }
 0x9ed   : > { %v11776_v8 = vpop.f32.mrb[235].mxu0 }
 0x9ee   : > { %12065 = vst.msk [vmem:[#allocation4 + $0x78] sm:$0xff] %vm12049_vm10, %v12044_v11  ;;  %v11998_v12 = vmax.f32 %v11978_v34, %v22630_v54  ;;  %v11979_v52 = vmax.f32 %v11774_v53, %v11776_v8  ;;  %v16384_v8 = vld [vmem:[%s22951_s7] sm:$0xff]  }
 0x9f0   : > { %v12025_v55 = vadd.f32 %v22701_v56, %v11998_v12  ;;  %v11999_v7 = vmax.f32 %v11979_v52, %v22633_v4  ;;  %v16387_v52 = vld [vmem:[%s22951_s7 + $0x18] sm:$0xff]  }
 0x9f2   : > { %v12045_v35 = vmax.f32 %v12025_v55, 0.0  ;;  %v12026_v28 = vadd.f32 %v22701_v56, %v11999_v7  ;;  %v11780_v29 = vpop.f32.mrb[236].mxu0  ;;  %v16388_v55 = vld [vmem:[%s22951_s7 + $0x20] sm:$0x3f]  }
 0x9f3   : > { %v11782_v49 = vpop.f32.mrb[237].mxu0 }
 0x9f4   : > { %12066 = vst.msk [vmem:[#allocation4 + $0x80] sm:$0xff] %vm12049_vm10, %v12045_v35  ;;  %v12046_v1 = vmax.f32 %v12026_v28, 0.0  ;;  %v11980_v39 = vmax.f32 %v11780_v29, %v11782_v49  ;;  %v11784_v13 = vpop.f32.mrb[238].mxu0  ;;  %v12218_v35 = vand.u32 %v16388_v55, %v22653_v36  ;;  %v16389_v29 = vld [vmem:[%s22951_s7 + $0x50] sm:$0xff]  }
 0x9f5   : > { %v11786_v23 = vpop.f32.mrb[239].mxu0 }
 0x9f6   : > { %12067 = vst.msk [vmem:[#allocation4 + $0x88] sm:$0xff] %vm12049_vm10, %v12046_v1  ;;  %v12000_v54 = vmax.f32 %v11980_v39, %v22640_v24  ;;  %v16390_v1 = vld [vmem:[%s22951_s7 + $0x58] sm:$0xff]   ;;  %v16391_v39 = vld [vmem:[%s22951_s7 + $0x60] sm:$0xff]   ;;  %v16392_v23 = vld [vmem:[%s22951_s7 + $0x68] sm:$0xff]  }
 0x9f8   : > { %v12027_v18 = vadd.f32 %v22701_v56, %v12000_v54  ;;  %v16393_v54 = vld [vmem:[%s22951_s7 + $0x70] sm:$0x3f]  }
 0x9fa   : > { %v12047_v3 = vmax.f32 %v12027_v18, 0.0  ;;  %v11823_v26 = vpop.f32.mrb[240].mxu0 }
 0x9fb   : > { %v11982_v4 = vmax.f32 %v11962_v14, %v11823_v26  ;;  %v11825_v51 = vpop.f32.mrb[241].mxu0  ;;  %v12311_v26 = vand.u32 %v16393_v54, %v22653_v36  ;;  %v14142_v54 = vld [vmem:[%s22954_s10] ss:$0 sm:$0xff] }
 0x9fc   : > { %12068 = vst.msk [vmem:[#allocation4 + $0x90] sm:$0xff] %vm12049_vm10, %v12047_v3  ;;  %v11826_v27 = vpop.f32.mrb[242].mxu0  ;;  %v16394_v51 = vld [vmem:[%s22951_s7 + $0x78] sm:$0xff]  }
 0x9fd   : > { %v12009_v61 = vadd.f32 %v22701_v56, %v11982_v4  ;;  %v11983_v60 = vmax.f32 %v11963_v17, %v11826_v27  ;;  %v11828_v32 = vpop.f32.mrb[243].mxu0 }
 0x9ff   : > { %v12029_v24 = vmax.f32 %v12009_v61, 0.0  ;;  %v12010_v40 = vadd.f32 %v22701_v56, %v11983_v60  ;;  %v16395_v61 = vld [vmem:[%s22951_s7 + $0x80] sm:$0xff]   ;;  %v16396_v60 = vld [vmem:[%s22951_s7 + $0x88] sm:$0xff]  }
 0xa01   : > { %12050 = vst.msk [vmem:[#allocation4] sm:$0xff] %vm12049_vm10, %v12029_v24  ;;  %v12030_v42 = vmax.f32 %v12010_v40, 0.0  ;;  %v16397_v24 = vld [vmem:[%s22951_s7 + $0x90] sm:$0xff]   ;;  %v16398_v40 = vld [vmem:[%s22951_s7 + $0x98] sm:$0x3f]  }
 0xa02   : > { %v11831_v2 = vpop.f32.mrb[244].mxu0 }
 0xa03   : > { %12051 = vst.msk [vmem:[#allocation4 + $0x8] sm:$0xff] %vm12049_vm10, %v12030_v42  ;;  %v11984_v31 = vmax.f32 %v11964_v9, %v11831_v2  ;;  %v11833_v50 = vpop.f32.mrb[245].mxu0 }
 0xa04   : > { %v11834_v14 = vpop.f32.mrb[246].mxu0 }
 0xa05   : > { %v12011_v10 = vadd.f32 %v22701_v56, %v11984_v31  ;;  %v11985_v57 = vmax.f32 %v11965_v20, %v11834_v14  ;;  %v11836_v44 = vpop.f32.mrb[247].mxu0  ;;  %v12405_v31 = vand.u32 %v16398_v40, %v22653_v36  ;;  %v16399_v14 = vld [vmem:[%s22951_s7 + $0xa0] sm:$0xff]  }
 0xa06   : > { %v16401_v44 = vld [vmem:[%s22951_s7 + $0xb0] sm:$0xff]  }
 0xa07   : > { %v12031_v17 = vmax.f32 %v12011_v10, 0.0  ;;  %v12012_v22 = vadd.f32 %v22701_v56, %v11985_v57  ;;  %v16400_v57 = vld [vmem:[%s22951_s7 + $0xa8] sm:$0xff]  }
 0xa09   : > { %12052 = vst.msk [vmem:[#allocation4 + $0x10] sm:$0xff] %vm12049_vm10, %v12031_v17  ;;  %v12032_v45 = vmax.f32 %v12012_v22, 0.0  ;;  %v16402_v22 = vld [vmem:[%s22951_s7 + $0xb8] sm:$0xff]  }
 0xa0a   : > { %v11839_v30 = vpop.f32.mrb[248].mxu0 }
 0xa0b   : > { %12053 = vst.msk [vmem:[#allocation4 + $0x18] sm:$0xff] %vm12049_vm10, %v12032_v45  ;;  %v11841_v0 = vpop.f32.mrb[249].mxu0  ;;  %v16403_v45 = vld [vmem:[%s22951_s7 + $0xc0] sm:$0x3f]  }
 0xa0c   : > { %v11842_v41 = vpop.f32.mrb[250].mxu0 }
 0xa0d   : > { %v11987_v9 = vmax.f32 %v11967_v25, %v11842_v41  ;;  %v11844_v58 = vpop.f32.mrb[251].mxu0  ;;  %v12499_v41 = vand.u32 %v16403_v45, %v22653_v36  ;;  %v16405_v36 = vld [vmem:[%s22953_s9 + $0x8] sm:$0xff]  }
 0xa0f   : > { %v12014_v33 = vadd.f32 %v22701_v56, %v11987_v9 }
 0xa11   : > { %v12034_v19 = vmax.f32 %v12014_v33, 0.0  ;;  %v16404_v33 = vld [vmem:[%s22953_s9] sm:$0xff]  }
 0xa12   : > { %v11847_v20 = vpop.f32.mrb[252].mxu0 }
 0xa13   : > { %12055 = vst.msk [vmem:[#allocation4 + $0x28] sm:$0xff] %vm12049_vm10, %v12034_v19  ;;  %v11988_v37 = vmax.f32 %v11968_v59, %v11847_v20  ;;  %v11849_v48 = vpop.f32.mrb[253].mxu0  ;;  %v16406_v19 = vld [vmem:[%s22953_s9 + $0x10] sm:$0xff]   ;;  %v16407_v20 = vld [vmem:[%s22953_s9 + $0x18] sm:$0xff]  }
 0xa14   : > { %v11850_v38 = vpop.f32.mrb[254].mxu0  ;;  %v16409_v48 = vld [vmem:[%s22953_s9 + $0x28] sm:$0xff]  }
 0xa15   : > { %v12015_v5 = vadd.f32 %v22701_v56, %v11988_v37  ;;  %v11989_v21 = vmax.f32 %v11969_v15, %v11850_v38  ;;  %v11852_v63 = vpop.f32.mrb[255].mxu0  ;;  %v16386_v15 = vld [vmem:[%s22951_s7 + $0x10] sm:$0xff]   ;;  %v16408_v37 = vld [vmem:[%s22953_s9 + $0x20] sm:$0xff]  }
 0xa16   : > { %v16410_v38 = vld [vmem:[%s22953_s9 + $0x30] ss:$0 sps:$4 sm:$0x33]  }
 0xa17   : > { %v12035_v25 = vmax.f32 %v12015_v5, 0.0  ;;  %v12016_v46 = vadd.f32 %v22701_v56, %v11989_v21  ;;  %v12617_v5 = vsel %vm12615_vm11, %v16410_v38, 0 }
 0xa19   : > { %12056 = vst.msk [vmem:[#allocation4 + $0x30] sm:$0xff] %vm12049_vm10, %v12035_v25  ;;  %v12036_v11 = vmax.f32 %v12016_v46, 0.0 }
 0xa1a   : > { %v12092_v59 = vld [vmem:[#allocation4 + $0x4] ss:$20 sm:$0xff]  ;;  %v12261_v13 = vld [vmem:[#allocation4 + $0x5] ss:$20 sm:$0xff]  ;;  %v12264_v3 = vld [vmem:[#allocation4 + $0x6] ss:$20 sm:$0xff] }
 0xa1b   : > { %12057 = vst.msk [vmem:[#allocation4 + $0x38] sm:$0xff] %vm12049_vm10, %v12036_v11  ;;  %v12262_v18 = vmax.f32 %v12092_v59, %v12261_v13  ;;  %v12355_v32 = vld [vmem:[#allocation4 + $0x7] ss:$20 sm:$0xff] }
 0xa1c   : > { %v12356_v2 = vmax.f32 %v12264_v3, %v12355_v32 }
 0xa1d   : > { %v12265_v4 = vmax.f32 %v12262_v18, %v12264_v3 }
 0xa1f   : > { %v12266_v27 = vpack.c.bf16 %v12265_v4, %v12265_v4 }
 0xa20   : > { %v12358_v42 = vld [vmem:[#allocation4 + $0x8] ss:$20 sm:$0xff]  ;;  %v12449_v17 = vld [vmem:[#allocation4 + $0x9] ss:$20 sm:$0xff]  ;;  %v12452_v0 = vld [vmem:[#allocation4 + $0xa] ss:$20 sm:$0xff] }
 0xa21   : > { %v12359_v50 = vmax.f32 %v12356_v2, %v12358_v42  ;;  %v12450_v30 = vmax.f32 %v12358_v42, %v12449_v17 }
 0xa22   : > { %v12075_v34 = vld [vmem:[#allocation4 + $0x2] ss:$20 sm:$0xff]  ;;  %v12089_v16 = vld [vmem:[#allocation4 + $0x3] ss:$20 sm:$0xff]  ;;  %v12070_v56 = vld [vmem:[#allocation4] ss:$20 sm:$0xff] }
 0xa23   : > { %v12090_v62 = vmax.f32 %v12075_v34, %v12089_v16  ;;  %v12072_v12 = vld [vmem:[#allocation4 + $0x1] ss:$20 sm:$0xff]  ;;  %v12360_v10 = vpack.c.bf16 %v12359_v50, %v12359_v50  ;;  %v12453_v9 = vmax.f32 %v12450_v30, %v12452_v0 }
 0xa24   : > { %v12073_v7 = vmax.f32 %v12070_v56, %v12072_v12 }
 0xa25   : > { %v12093_v53 = vmax.f32 %v12090_v62, %v12092_v59  ;;  %v12454_v58 = vpack.c.bf16 %v12453_v9, %v12453_v9 }
 0xa26   : > { %v12076_v28 = vmax.f32 %v12073_v7, %v12075_v34 }
 0xa27   : > { %v12094_v43 = vpack.c.bf16 %v12093_v53, %v12093_v53 }
 0xa28   : > { %v12077_v49 = vpack.c.bf16 %v12076_v28, %v12076_v28 }
 0xa29   : > { %14205 = vmatmul.mubr.msk.bf16.vlgmr.msra.gmra.mrb[48].mxu1 %vm12049_vm10, %v12094_v43 }
 0xa2a   : > { %14209 = vmatpush3.bf16.msra.mxu1 %v16384_v8  ;;  %14218 = vmatprep.mubr.msk.bf16.mxu1 %vm16614_vm9, %v22610_v6 }
 0xa2b   : > { %14210 = vmatprep.subr.bf16.mxu1 %v22610_v6 }
 0xa2e   : > { %14211 = vmatpush3.bf16.msra.mxu1 %v16385_v47 }
 0xa2f   : > { %14212 = vmatprep.subr.bf16.mxu1 %v22610_v6 }
 0xa32   : > { %14213 = vmatpush3.bf16.msra.mxu1 %v16386_v15 }
 0xa33   : > { %14214 = vmatprep.subr.bf16.mxu1 %v22610_v6 }
 0xa36   : > { %14215 = vmatpush3.bf16.msra.mxu1 %v16387_v52 }
 0xa37   : > { %14216 = vmatprep.subr.bf16.mxu1 %v22610_v6 }
 0xa3a   : > { %14217 = vmatpush3.bf16.msra.mxu1 %v12218_v35  ;;  %v14141_v35 = vld [vmem:[%s22952_s8] ss:$0 sm:$0xff] }
 0xa3b   : > { %14222 = vmatprep.subr.bf16.mxu1 %v22610_v6 }
 0xa3d   : > { %14219 = vmatmul.mubr.msk.bf16.vlgmr.msra.gmra.mrb[52].mxu1 %vm12049_vm10, %v12077_v49 }
 0xa3e   : > { %14223 = vmatpush3.bf16.msra.mxu1 %v16389_v29  ;;  %14232 = vmatprep.mubr.msk.bf16.mxu1 %vm16614_vm9, %v22610_v6 }
 0xa3f   : > { %14224 = vmatprep.subr.bf16.mxu1 %v22610_v6 }
 0xa42   : > { %14225 = vmatpush3.bf16.msra.mxu1 %v16390_v1 }
 0xa43   : > { %14226 = vmatprep.subr.bf16.mxu1 %v22610_v6 }
 0xa46   : > { %14227 = vmatpush3.bf16.msra.mxu1 %v16391_v39 }
 0xa47   : > { %14228 = vmatprep.subr.bf16.mxu1 %v22610_v6 }
 0xa4a   : > { %14229 = vmatpush3.bf16.msra.mxu1 %v16392_v23 }
 0xa4b   : > { %14230 = vmatprep.subr.bf16.mxu1 %v22610_v6 }
 0xa4e   : > { %14231 = vmatpush3.bf16.msra.mxu1 %v12311_v26 }
 0xa4f   : > { %14236 = vmatprep.subr.bf16.mxu1 %v22610_v6 }
 0xa51   : > { %14233 = vmatmul.mubr.msk.bf16.vlgmr.msra.gmra.mrb[56].mxu1 %vm12049_vm10, %v12266_v27 }
 0xa52   : > { %14237 = vmatpush3.bf16.msra.mxu1 %v16394_v51  ;;  %14246 = vmatprep.mubr.msk.bf16.mxu1 %vm16614_vm9, %v22610_v6 }
 0xa53   : > { %14238 = vmatprep.subr.bf16.mxu1 %v22610_v6 }
 0xa56   : > { %14239 = vmatpush3.bf16.msra.mxu1 %v16395_v61 }
 0xa57   : > { %14240 = vmatprep.subr.bf16.mxu1 %v22610_v6 }
 0xa5a   : > { %14241 = vmatpush3.bf16.msra.mxu1 %v16396_v60 }
 0xa5b   : > { %14242 = vmatprep.subr.bf16.mxu1 %v22610_v6 }
 0xa5e   : > { %14243 = vmatpush3.bf16.msra.mxu1 %v16397_v24 }
 0xa5f   : > { %14244 = vmatprep.subr.bf16.mxu1 %v22610_v6 }
 0xa62   : > { %14245 = vmatpush3.bf16.msra.mxu1 %v12405_v31 }
 0xa63   : > { %14250 = vmatprep.subr.bf16.mxu1 %v22610_v6 }
 0xa65   : > { %14247 = vmatmul.mubr.msk.bf16.vlgmr.msra.gmra.mrb[60].mxu1 %vm12049_vm10, %v12360_v10 }
 0xa66   : > { %14251 = vmatpush3.bf16.msra.mxu1 %v16399_v14  ;;  %14260 = vmatprep.mubr.msk.bf16.mxu1 %vm16614_vm9, %v22610_v6 }
 0xa67   : > { %14252 = vmatprep.subr.bf16.mxu1 %v22610_v6 }
 0xa6a   : > { %14253 = vmatpush3.bf16.msra.mxu1 %v16400_v57 }
 0xa6b   : > { %14254 = vmatprep.subr.bf16.mxu1 %v22610_v6 }
 0xa6e   : > { %14255 = vmatpush3.bf16.msra.mxu1 %v16401_v44 }
 0xa6f   : > { %14256 = vmatprep.subr.bf16.mxu1 %v22610_v6 }
 0xa72   : > { %14257 = vmatpush3.bf16.msra.mxu1 %v16402_v22 }
 0xa73   : > { %14258 = vmatprep.subr.bf16.mxu1 %v22610_v6 }
 0xa76   : > { %14259 = vmatpush3.bf16.msra.mxu1 %v12499_v41 }
 0xa77   : > { %14264 = vmatprep.subr.bf16.mxu1 %v22610_v6 }
 0xa79   : > { %14261 = vmatmul.mubr.msk.bf16.vlgmr.msra.gmra.mrb[64].mxu1 %vm12049_vm10, %v12454_v58 }
 0xa7a   : > { %14278 = vmatprep.mubr.msk.bf16.mxu1 %vm16614_vm9, %v22610_v6  ;;  %14265 = vmatpush3.bf16.msra.mxu1 %v16404_v33 }
 0xa7b   : > { %14266 = vmatprep.subr.bf16.mxu1 %v22610_v6 }
 0xa7e   : > { %14267 = vmatpush3.bf16.msra.mxu1 %v16405_v36 }
 0xa7f   : > { %14268 = vmatprep.subr.bf16.mxu1 %v22610_v6 }
 0xa82   : > { %14269 = vmatpush3.bf16.msra.mxu1 %v16406_v19 }
 0xa83   : > { %14270 = vmatprep.subr.bf16.mxu1 %v22610_v6 }
 0xa86   : > { %14271 = vmatpush3.bf16.msra.mxu1 %v16407_v20 }
 0xa87   : > { %14272 = vmatprep.subr.bf16.mxu1 %v22610_v6 }
 0xa8a   : > { %14273 = vmatpush3.bf16.msra.mxu1 %v16408_v37 }
 0xa8b   : > { %14274 = vmatprep.subr.bf16.mxu1 %v22610_v6 }
 0xa8e   : > { %14275 = vmatpush3.bf16.msra.mxu1 %v16409_v48 }
 0xa8f   : > { %14276 = vmatprep.subr.bf16.mxu1 %v22610_v6 }
 0xa92   : > { %14277 = vmatpush3.bf16.msra.mxu1 %v12617_v5 }
 0xafc   : > { %v12179_v21 = vpop.f32.mrb[48].mxu1 }
 0xafd   : > { %v14206_v63 = vpop.f32.mrb[49].mxu1 }
 0xafe   : > { %v12182_v25 = vpop.f32.mrb[50].mxu1 }
 0xaff   : > { %v14207_v46 = vpop.f32.mrb[51].mxu1 }
 0xb10   : > { %v12254_v11 = vpop.f32.mrb[52].mxu1 }
 0xb11   : > { %v12255_v34 = vadd.f32 %v12254_v11, %v12179_v21  ;;  %v14220_v16 = vpop.f32.mrb[53].mxu1 }
 0xb12   : > { %v12257_v62 = vpop.f32.mrb[54].mxu1 }
 0xb13   : > { %v14221_v59 = vpop.f32.mrb[55].mxu1 }
 0xb24   : > { %v12347_v53 = vpop.f32.mrb[56].mxu1 }
 0xb25   : > { %v12353_v8 = vadd.f32 %v12347_v53, %v12255_v34  ;;  %v14234_v43 = vpop.f32.mrb[57].mxu1 }
 0xb26   : > { %v12350_v47 = vpop.f32.mrb[58].mxu1 }
 0xb27   : > { %v14235_v15 = vpop.f32.mrb[59].mxu1 }
 0xb38   : > { %v12441_v56 = vpop.f32.mrb[60].mxu1 }
 0xb39   : > { %v12447_v12 = vadd.f32 %v12441_v56, %v12353_v8  ;;  %v14248_v6 = vpop.f32.mrb[61].mxu1 }
 0xb3a   : > { %v12444_v52 = vpop.f32.mrb[62].mxu1 }
 0xb3b   : > { %v14249_v55 = vpop.f32.mrb[63].mxu1 }
 0xb4c   : > { %v12535_v7 = vpop.f32.mrb[64].mxu1 }
 0xb4d   : > { %v12541_v28 = vadd.f32 %v12535_v7, %v12447_v12  ;;  %v14262_v29 = vpop.f32.mrb[65].mxu1 }
 0xb4e   : > { %v12538_v49 = vpop.f32.mrb[66].mxu1 }
 0xb4f   : > { %v12549_v1 = vadd.f32 %v14141_v35, %v12541_v28  ;;  %v14263_v39 = vpop.f32.mrb[67].mxu1 }
 0xb51   : > { %v12550_v13 = vmax.f32 %v12549_v1, 0.0 }
 0xb53   : > { %v12551_v23 = vpack.c.bf16 %v12550_v13, %v12550_v13 }
 0xb55   : > { %14279 = vmatmul.mubr.msk.bf16.vlgmr.msra.gmra.mrb[68].mxu1 %vm12611_vm12, %v12551_v23 }
 0xc28   : > { %v12653_v18 = vpop.f32.mrb[68].mxu1 }
 0xc29   : > { %v12654_v3 = vadd.f32 %v14142_v54, %v12653_v18  ;;  %v14280_v26 = vpop.f32.mrb[69].mxu1 }
 0xc2a   : > { %v12656_v4 = vpop.f32.mrb[70].mxu1 }
 0xc2b   : > { %v14281_v51 = vpop.f32.mrb[71].mxu1  ;;  %12660 = vst.msk [vmem:[%s382_s19] sm:$0xff] %vm12659_vm13, %v12654_v3 }
 0xc2c   : > { %16560 = shalt.err (!%p16557_p3)
}
 0xc2d   : > { %s16561_s25 = scalar_lea.hbm %s22902_s26, 128  ;;  %s16565_s19 = scalar_lea.hbm %s22955_s11, 256 }
 0xc2e   : > { %p16562_p4 = scmp.ne.s32.totalorder %s22902_s26, %s16561_s25  ;;  %p16566_p9 = scmp.lt.u32.totalorder %s22902_s26, %s22955_s11 }
 0xc2f   : > { %p16567_p10 = scmp.lt.u32.totalorder %s16565_s19, %s16561_s25  ;;  %p16569_p12 = scmp.lt.u32.totalorder %s16561_s25, %s22902_s26 }
 0xc30   : > { %p16563_p7 = pnand %p16562_p4, %p16714_p5 }
 0xc31   : > { %p16568_p11 = por %p16567_p10, %p16566_p9 }
 0xc32   : > { %p16564_p8 = pneg %p16563_p7 }
 0xc33   : > { %p16570_p13 = por %p16569_p12, %p16568_p11 }
 0xc35   : > { %p16571_p0 = pnand %p16570_p13, %p16564_p8 }
 0xc37   : > { %16574 = shalt.err (!%p16571_p0)
}
 0xc38   : > { %15130 = dma.vmem_to_hbm [thread:$0]  (%p16714_p5), %s22904_s14, 128, %s22902_s26, %s12662_s21  }
 0xc39 PF: > { %p15136_p1 = scmp.ge.s32.totalorder %s16609_s20, 2  ;;  %s12687_s22 = sand.u32 1, %s16597_s17  }
 0xc3a   : > { %s12688_s30 = scalar_lea.sflag [#allocation6], %s12687_s22 }
 0xc3b   : > { %p15133_p2 = pnand %p15136_p1, %p16718_p6 }
 0xc3d   : > { %16592 = dma.done.wait (!%p15133_p2), %s12688_s30, 128  }
 0xc3e   : > { %16594 = vsyncadd (!%p15133_p2), %s12688_s30, 4294967168  ;;  %s23650_s12 = sld [smem:[#allocation8_spill]]  ;;  %s23651_s19 = sld [smem:[#allocation9_spill]] }
 0xc3f   : > { %p21_p3 = scmp.ge.s32.totalorder %s16701_s23, 4   ;;  %s23652_s17 = smov %s16601_s18 }
 0xc40   : > { %s23654_s20 = smov %s16701_s23 }
 0xc41   :  { %23 = sbr.rel (!%p21_p3) target bundleno = 3 (0x3), region = 121 }
 0xc44   : > { %s23653_s18 = smov %s23650_s12 }
 0xc48   :  { %12693 = vsyncpa [#allocation6], 1 }
 0xc49   :  { %12695 = vsyncpa [#allocation6 + $0x1], 1 }

</bundles_post_ra>
